<compile_context>
chip_gen: v6e
topology: v6e:2x2x1
jax: 0.10.0
libtpu: 0.0.40
codegen_flags: <defaults>
</compile_context>

<pallas_src>
import jax
import jax.numpy as jnp
from jax.experimental import pallas as pl
from jax.experimental.pallas import tpu as pltpu


KP_FC1 = 3328          # fc1 K (3136) padded so the 2 K-tiles are 128-lane aligned
TK_FC1 = 1664          # fc1 K tile (2 grid steps, 13*128 lanes)
N_FC3_PAD = 128        # fc3 N (10) padded to a lane-dense 128


# ----------------------------------------------------------------------------
# Pallas kernels
# ----------------------------------------------------------------------------
def _conv_relu_pool_kernel(x_ref, w_ref, b_ref, o_ref):
    """Fused conv (as im2col matmul) + 2x2 max-pool + bias + ReLU.

    x_ref : (4, Mo, 9*Cin) bf16 im2col planes (one per pool position),
            Mo = B*Ho*Wo.
    w_ref : (9*Cin, Cout) bf16,  b_ref : (1, Cout) f32.
    o_ref : (Mo, Cout) bf16 pooled output.

    Bias is shared and ReLU is monotone, so max(relu(y_i + b)) ==
    relu(max(y_i) + b): take the 4-way max first, then bias + ReLU once.
    """
    w = w_ref[...]
    m = jnp.dot(x_ref[0], w, preferred_element_type=jnp.float32)
    for p in range(1, 4):
        m = jnp.maximum(
            m, jnp.dot(x_ref[p], w, preferred_element_type=jnp.float32))
    # TODO(synk): conv1 (Cin=1, K=9) leaves most of the MXU contraction dim
    # idle and Cout=32/64 gives masked (non-lane-dense) stores; both are
    # negligible at MNIST sizes so the simple im2col matmul is kept.
    o_ref[...] = jnp.maximum(m + b_ref[...], 0.0).astype(o_ref.dtype)


def _fc_stack_kernel(x_ref, w1_ref, b1_ref, w2_ref, b2_ref, w3_ref, b3_ref,
                     o_ref, acc_ref):
    """Fused fc1 (K-tiled, ReLU) + fc2 (ReLU) + fc3 (lane-padded N).

    fc1 accumulates into acc_ref over the K grid axis; fc2 and fc3 run in the
    epilogue of the last K step with their weights resident in VMEM.
    """
    k = pl.program_id(0)

    @pl.when(k == 0)
    def _():
        acc_ref[...] = jnp.zeros_like(acc_ref)

    acc_ref[...] += jnp.dot(x_ref[...], w1_ref[...],
                            preferred_element_type=jnp.float32)

    @pl.when(k == pl.num_programs(0) - 1)
    def _():
        h1 = jnp.maximum(acc_ref[...] + b1_ref[...], 0.0)
        h2 = jnp.maximum(
            jnp.dot(h1.astype(jnp.bfloat16), w2_ref[...],
                    preferred_element_type=jnp.float32) + b2_ref[...], 0.0)
        o_ref[...] = (jnp.dot(h2.astype(jnp.bfloat16), w3_ref[...],
                              preferred_element_type=jnp.float32)
                      + b3_ref[...])


# ----------------------------------------------------------------------------
# pallas_call wrappers
# ----------------------------------------------------------------------------
def conv_relu_pool(planes, w_col, b_row):
    """planes: (4, Mo, 9*Cin) bf16 stacked im2col planes (one per pool pos)."""
    P, Mo, K = planes.shape
    Kw, N = w_col.shape
    assert P == 4 and K == Kw
    return pl.pallas_call(
        _conv_relu_pool_kernel,
        out_shape=jax.ShapeDtypeStruct((Mo, N), jnp.bfloat16),
        grid=(1,),
        in_specs=[
            pl.BlockSpec((P, Mo, K), lambda i: (0, 0, 0)),
            pl.BlockSpec((K, N), lambda i: (0, 0)),
            pl.BlockSpec((1, N), lambda i: (0, 0)),
        ],
        out_specs=pl.BlockSpec((Mo, N), lambda i: (0, 0)),
        compiler_params=pltpu.CompilerParams(
            dimension_semantics=("arbitrary",)),
    )(planes, w_col, b_row)


def fc_stack(x, w1, b1, w2, b2, w3, b3, *, tk):
    """out = (relu(relu(x@w1+b1) @ w2 + b2)) @ w3 + b3, fused in one call.

    x (M,K) bf16, w1 (K,N1) bf16 K-tiled by tk, w2 (N1,N2) / w3 (N2,N3) bf16
    resident; biases f32 rows.  Output f32 (M,N3) with N3 lane-padded.
    """
    M, K = x.shape
    _, N1 = w1.shape
    _, N2 = w2.shape
    _, N3 = w3.shape
    assert K % tk == 0 and tk % 128 == 0
    return pl.pallas_call(
        _fc_stack_kernel,
        out_shape=jax.ShapeDtypeStruct((M, N3), jnp.float32),
        grid_spec=pltpu.PrefetchScalarGridSpec(
            num_scalar_prefetch=0,
            grid=(K // tk,),
            in_specs=[
                pl.BlockSpec((M, tk), lambda k: (0, k)),
                pl.BlockSpec((tk, N1), lambda k: (k, 0)),
                pl.BlockSpec((1, N1), lambda k: (0, 0)),
                pl.BlockSpec((N1, N2), lambda k: (0, 0)),
                pl.BlockSpec((1, N2), lambda k: (0, 0)),
                pl.BlockSpec((N2, N3), lambda k: (0, 0)),
                pl.BlockSpec((1, N3), lambda k: (0, 0)),
            ],
            out_specs=pl.BlockSpec((M, N3), lambda k: (0, 0)),
            scratch_shapes=[pltpu.VMEM((M, N1), jnp.float32)],
        ),
        compiler_params=pltpu.CompilerParams(
            dimension_semantics=("arbitrary",)),
    )(x, w1, b1, w2, b2, w3, b3)


# ----------------------------------------------------------------------------
# im2col glue (pure data movement, runs as XLA ops feeding the kernels)
# ----------------------------------------------------------------------------
def im2col_pool_planes_stacked(x_nhwc):
    """3x3/stride-1/pad-1 im2col, split into the 4 pool positions of the
    following 2x2 max-pool, stacked into ONE array.

    Returns (4, B*Ho*Wo, 9*C): plane index = ph*2+pw, rows in (b, ho, wo)
    order, patch channel order (kh, kw, cin).  Built from 9 full-resolution
    tap slices + one reshape/transpose (far fewer XLA ops than per-plane
    strided slicing)."""
    B, H, W, C = x_nhwc.shape
    Ho, Wo = H // 2, W // 2
    xp = jnp.pad(x_nhwc, ((0, 0), (1, 1), (1, 1), (0, 0)))
    taps = [xp[:, kh:kh + H, kw:kw + W, :]
            for kh in range(3) for kw in range(3)]
    cols = jnp.concatenate(taps, axis=-1)                 # (B, H, W, 9C)
    cols = cols.reshape(B, Ho, 2, Wo, 2, 9 * C)
    cols = jnp.transpose(cols, (2, 4, 0, 1, 3, 5))        # (ph, pw, B, Ho, Wo, 9C)
    return cols.reshape(4, B * Ho * Wo, 9 * C)


def conv_weight_to_col(w_oihw):
    """PyTorch (Cout,Cin,3,3) -> (9*Cin, Cout) matching im2col ordering."""
    Cout, Cin, _, _ = w_oihw.shape
    return jnp.transpose(w_oihw, (2, 3, 1, 0)).reshape(9 * Cin, Cout)


# ----------------------------------------------------------------------------
# Parameter preparation (one-time, offline w.r.t. the forward pass)
# ----------------------------------------------------------------------------
def prepare_params(p):
    # fc1 rows permuted from PyTorch NCHW flatten order (c,h,w) to the NHWC
    # flatten order (h,w,c) our conv path produces, then K-padded to 3328 so
    # the two K tiles of 1664 are 128-lane aligned.
    fc1_w = p["fc1_w"].reshape(64, 7, 7, 1024).transpose(1, 2, 0, 3)
    fc1_w = fc1_w.reshape(3136, 1024)
    fc1_w = jnp.pad(fc1_w, ((0, KP_FC1 - 3136), (0, 0)))
    # fc3 padded to a lane-dense N=128 (extra columns / bias entries are zero).
    fc3_w = jnp.pad(p["fc3_w"], ((0, 0), (0, N_FC3_PAD - 10)))
    fc3_b = jnp.pad(p["fc3_b"], ((0, N_FC3_PAD - 10),))
    return {
        "conv1_w": conv_weight_to_col(p["conv1_w"]).astype(jnp.bfloat16),
        "conv1_b": p["conv1_b"].reshape(1, -1).astype(jnp.float32),
        "conv2_w": conv_weight_to_col(p["conv2_w"]).astype(jnp.bfloat16),
        "conv2_b": p["conv2_b"].reshape(1, -1).astype(jnp.float32),
        "fc1_w": fc1_w.astype(jnp.bfloat16),
        "fc1_b": p["fc1_b"].reshape(1, -1).astype(jnp.float32),
        "fc2_w": p["fc2_w"].astype(jnp.bfloat16),
        "fc2_b": p["fc2_b"].reshape(1, -1).astype(jnp.float32),
        "fc3_w": fc3_w.astype(jnp.bfloat16),
        "fc3_b": fc3_b.reshape(1, -1).astype(jnp.float32),
    }


# ----------------------------------------------------------------------------
# Full model forward (Pallas path)
# ----------------------------------------------------------------------------
def minist_forward(x_nchw, kp):
    B = x_nchw.shape[0]
    x = jnp.transpose(x_nchw, (0, 2, 3, 1)).astype(jnp.bfloat16)  # NHWC bf16

    # conv1 + ReLU + pool (fused): (B,28,28,1) -> (B*14*14, 32)
    planes = im2col_pool_planes_stacked(x)
    y = conv_relu_pool(planes, kp["conv1_w"], kp["conv1_b"])
    y = y.reshape(B, 14, 14, 32)

    # conv2 + ReLU + pool (fused): (B,14,14,32) -> (B*7*7, 64)
    planes = im2col_pool_planes_stacked(y)
    y = conv_relu_pool(planes, kp["conv2_w"], kp["conv2_b"])

    # flatten in NHWC order (fc1 weight rows were pre-permuted to match);
    # K padded 3136 -> 3328 so each K tile of 1664 is lane-aligned.
    feat = y.reshape(B, 7 * 7 * 64)
    featp = jnp.pad(feat, ((0, 0), (0, KP_FC1 - 3136)))

    # fc1 + fc2 + fc3 fused into one kernel (fc2/fc3 run in fc1's last K step).
    out = fc_stack(featp, kp["fc1_w"], kp["fc1_b"],
                   kp["fc2_w"], kp["fc2_b"],
                   kp["fc3_w"], kp["fc3_b"], tk=TK_FC1)
    return out[:, :10]


# ----------------------------------------------------------------------------
# Pure-JAX f32 reference (for correctness check against the Pallas path)
# ----------------------------------------------------------------------------
def minist_reference(x_nchw, p):
    def conv(x, w, b):
        y = jax.lax.conv_general_dilated(
            x, w, window_strides=(1, 1), padding=((1, 1), (1, 1)),
            dimension_numbers=("NCHW", "OIHW", "NCHW"))
        return y + b[None, :, None, None]

    def pool(x):
        return jax.lax.reduce_window(x, -jnp.inf, jax.lax.max,
                                     (1, 1, 2, 2), (1, 1, 2, 2), "VALID")

    B = x_nchw.shape[0]
    y = pool(jax.nn.relu(conv(x_nchw, p["conv1_w"], p["conv1_b"])))
    y = pool(jax.nn.relu(conv(y, p["conv2_w"], p["conv2_b"])))
    feat = y.reshape(B, 64 * 7 * 7)
    h = jax.nn.relu(feat @ p["fc1_w"] + p["fc1_b"])
    h = jax.nn.relu(h @ p["fc2_w"] + p["fc2_b"])
    return h @ p["fc3_w"] + p["fc3_b"]


# ----------------------------------------------------------------------------
def init_params(key):
    ks = jax.random.split(key, 10)

    def w(k, shape, fan_in):
        return jax.random.normal(k, shape, jnp.float32) / jnp.sqrt(fan_in)

    return {
        # PyTorch conv weight layout (Cout, Cin, kh, kw)
        "conv1_w": w(ks[0], (32, 1, 3, 3), 9.0),
        "conv1_b": w(ks[1], (32,), 9.0),
        "conv2_w": w(ks[2], (64, 32, 3, 3), 288.0),
        "conv2_b": w(ks[3], (64,), 288.0),
        # Linear stored as (in, out) == PyTorch weight.T
        "fc1_w": w(ks[4], (3136, 1024), 3136.0),
        "fc1_b": w(ks[5], (1024,), 3136.0),
        "fc2_w": w(ks[6], (1024, 512), 1024.0),
        "fc2_b": w(ks[7], (512,), 1024.0),
        "fc3_w": w(ks[8], (512, 10), 512.0),
        "fc3_b": w(ks[9], (10,), 512.0),
    }


if __name__ == "__main__":
    key = jax.random.PRNGKey(0)
    kx, kparam = jax.random.split(key)
    params = init_params(kparam)
    kparams = prepare_params(params)          # one-time kernel-ready params

    # Module geometry requires 28x28 inputs (fc1 expects 64*7*7); batch=2.
    x = jax.random.normal(kx, (2, 1, 28, 28), jnp.float32)

    forward = jax.jit(minist_forward)
    out = jax.block_until_ready(forward(x, kparams))
    ref = jax.block_until_ready(minist_reference(x, params))

    assert out.shape == (2, 10), out.shape
    # bf16 MXU operands -> slightly looser tolerance vs the f32 reference.
    assert jnp.allclose(out, ref, rtol=5e-2, atol=5e-2), (
        f"max abs diff {jnp.max(jnp.abs(out - ref))}")
    print("KERNEL_OK")
</pallas_src>

<mosaic_0001>
module attributes {stable_mosaic.version = 11 : i64} {
  func.func @_conv_relu_pool_kernel(%arg0: i32, %arg1: memref<4x392x9xbf16, #tpu.memory_space<vmem>>, %arg2: memref<9x32xbf16, #tpu.memory_space<vmem>>, %arg3: memref<1x32xf32, #tpu.memory_space<vmem>>, %arg4: memref<392x32xbf16, #tpu.memory_space<vmem>>) attributes {dimension_semantics = [#tpu.dimension_semantics<arbitrary>], iteration_bounds = array<i64: 1>, scalar_prefetch = 0 : i64, scratch_operands = 0 : i64, tpu.core_type = #tpu.core_type<tc>, window_params = [{pipeline_mode = #tpu.pipeline_mode<synchronous>, transform_indices = @transform_0, window_bounds = array<i64: 4, 392, 9>}, {pipeline_mode = #tpu.pipeline_mode<synchronous>, transform_indices = @transform_1, window_bounds = array<i64: 9, 32>}, {pipeline_mode = #tpu.pipeline_mode<synchronous>, transform_indices = @transform_2, window_bounds = array<i64: 1, 32>}, {pipeline_mode = #tpu.pipeline_mode<synchronous>, transform_indices = @transform_3, window_bounds = array<i64: 392, 32>}]} {
    %c0 = arith.constant 0 : index
    %c0_0 = arith.constant 0 : index
    %0 = vector.load %arg2[%c0, %c0_0] : memref<9x32xbf16, #tpu.memory_space<vmem>>, vector<9x32xbf16>
    %c0_1 = arith.constant 0 : index
    %c0_2 = arith.constant 0 : index
    %c0_3 = arith.constant 0 : index
    %1 = vector.load %arg1[%c0_1, %c0_2, %c0_3] : memref<4x392x9xbf16, #tpu.memory_space<vmem>>, vector<1x392x9xbf16>
    %2 = vector.shape_cast %1 : vector<1x392x9xbf16> to vector<392x9xbf16>
    %cst = arith.constant dense<0.000000e+00> : vector<392x32xf32>
    %3 = tpu.matmul %2, %0, %cst {dimension_numbers = #tpu.dot_dimension_numbers<[1], [0], [0], [1], [0, 0, 1, 1], [], []>} : vector<392x9xbf16>, vector<9x32xbf16>, vector<392x32xf32> -> vector<392x32xf32>
    %c1 = arith.constant 1 : index
    %c0_4 = arith.constant 0 : index
    %c0_5 = arith.constant 0 : index
    %4 = vector.load %arg1[%c1, %c0_4, %c0_5] : memref<4x392x9xbf16, #tpu.memory_space<vmem>>, vector<1x392x9xbf16>
    %5 = vector.shape_cast %4 : vector<1x392x9xbf16> to vector<392x9xbf16>
    %cst_6 = arith.constant dense<0.000000e+00> : vector<392x32xf32>
    %6 = tpu.matmul %5, %0, %cst_6 {dimension_numbers = #tpu.dot_dimension_numbers<[1], [0], [0], [1], [0, 0, 1, 1], [], []>} : vector<392x9xbf16>, vector<9x32xbf16>, vector<392x32xf32> -> vector<392x32xf32>
    %7 = arith.maximumf %3, %6 : vector<392x32xf32>
    %c2 = arith.constant 2 : index
    %c0_7 = arith.constant 0 : index
    %c0_8 = arith.constant 0 : index
    %8 = vector.load %arg1[%c2, %c0_7, %c0_8] : memref<4x392x9xbf16, #tpu.memory_space<vmem>>, vector<1x392x9xbf16>
    %9 = vector.shape_cast %8 : vector<1x392x9xbf16> to vector<392x9xbf16>
    %cst_9 = arith.constant dense<0.000000e+00> : vector<392x32xf32>
    %10 = tpu.matmul %9, %0, %cst_9 {dimension_numbers = #tpu.dot_dimension_numbers<[1], [0], [0], [1], [0, 0, 1, 1], [], []>} : vector<392x9xbf16>, vector<9x32xbf16>, vector<392x32xf32> -> vector<392x32xf32>
    %11 = arith.maximumf %7, %10 : vector<392x32xf32>
    %c3 = arith.constant 3 : index
    %c0_10 = arith.constant 0 : index
    %c0_11 = arith.constant 0 : index
    %12 = vector.load %arg1[%c3, %c0_10, %c0_11] : memref<4x392x9xbf16, #tpu.memory_space<vmem>>, vector<1x392x9xbf16>
    %13 = vector.shape_cast %12 : vector<1x392x9xbf16> to vector<392x9xbf16>
    %cst_12 = arith.constant dense<0.000000e+00> : vector<392x32xf32>
    %14 = tpu.matmul %13, %0, %cst_12 {dimension_numbers = #tpu.dot_dimension_numbers<[1], [0], [0], [1], [0, 0, 1, 1], [], []>} : vector<392x9xbf16>, vector<9x32xbf16>, vector<392x32xf32> -> vector<392x32xf32>
    %15 = arith.maximumf %11, %14 : vector<392x32xf32>
    %c0_13 = arith.constant 0 : index
    %c0_14 = arith.constant 0 : index
    %16 = vector.load %arg3[%c0_13, %c0_14] : memref<1x32xf32, #tpu.memory_space<vmem>>, vector<1x32xf32>
    %17 = vector.broadcast %16 : vector<1x32xf32> to vector<392x32xf32>
    %18 = arith.addf %15, %17 : vector<392x32xf32>
    %cst_15 = arith.constant 0.000000e+00 : f32
    %19 = vector.broadcast %cst_15 : f32 to vector<392x32xf32>
    %20 = arith.maximumf %18, %19 : vector<392x32xf32>
    %21 = arith.truncf %20 : vector<392x32xf32> to vector<392x32xbf16>
    %c0_16 = arith.constant 0 : index
    %c0_17 = arith.constant 0 : index
    %22 = vector.load %arg4[%c0_16, %c0_17] : memref<392x32xbf16, #tpu.memory_space<vmem>>, vector<392x32xbf16>
    tpu.vector_store %arg4[%c0_16, %c0_17], %21 {strides = array<i32>} : memref<392x32xbf16, #tpu.memory_space<vmem>>, vector<392x32xbf16>,
    return
  }
  func.func @transform_0(%arg0: i32) -> (i32, i32, i32) {
    %c0_i32 = arith.constant 0 : i32
    %c0_i32_0 = arith.constant 0 : i32
    %c0_i32_1 = arith.constant 0 : i32
    %c0_i32_2 = arith.constant 0 : i32
    return %c0_i32, %c0_i32_0, %c0_i32_1 : i32, i32, i32
  }
  func.func @transform_1(%arg0: i32) -> (i32, i32) {
    %c0_i32 = arith.constant 0 : i32
    %c0_i32_0 = arith.constant 0 : i32
    %c0_i32_1 = arith.constant 0 : i32
    return %c0_i32, %c0_i32_0 : i32, i32
  }
  func.func @transform_2(%arg0: i32) -> (i32, i32) {
    %c0_i32 = arith.constant 0 : i32
    %c0_i32_0 = arith.constant 0 : i32
    %c0_i32_1 = arith.constant 0 : i32
    return %c0_i32, %c0_i32_0 : i32, i32
  }
  func.func @transform_3(%arg0: i32) -> (i32, i32) {
    %c0_i32 = arith.constant 0 : i32
    %c0_i32_0 = arith.constant 0 : i32
    %c0_i32_1 = arith.constant 0 : i32
    return %c0_i32, %c0_i32_0 : i32, i32
  }
}

module attributes {stable_mosaic.version = 11 : i64} {
  func.func @_conv_relu_pool_kernel(%arg0: i32, %arg1: memref<4x98x288xbf16, #tpu.memory_space<vmem>>, %arg2: memref<288x64xbf16, #tpu.memory_space<vmem>>, %arg3: memref<1x64xf32, #tpu.memory_space<vmem>>, %arg4: memref<98x64xbf16, #tpu.memory_space<vmem>>) attributes {dimension_semantics = [#tpu.dimension_semantics<arbitrary>], iteration_bounds = array<i64: 1>, scalar_prefetch = 0 : i64, scratch_operands = 0 : i64, tpu.core_type = #tpu.core_type<tc>, window_params = [{pipeline_mode = #tpu.pipeline_mode<synchronous>, transform_indices = @transform_0, window_bounds = array<i64: 4, 98, 288>}, {pipeline_mode = #tpu.pipeline_mode<synchronous>, transform_indices = @transform_1, window_bounds = array<i64: 288, 64>}, {pipeline_mode = #tpu.pipeline_mode<synchronous>, transform_indices = @transform_2, window_bounds = array<i64: 1, 64>}, {pipeline_mode = #tpu.pipeline_mode<synchronous>, transform_indices = @transform_3, window_bounds = array<i64: 98, 64>}]} {
    %c0 = arith.constant 0 : index
    %c0_0 = arith.constant 0 : index
    %0 = vector.load %arg2[%c0, %c0_0] : memref<288x64xbf16, #tpu.memory_space<vmem>>, vector<288x64xbf16>
    %c0_1 = arith.constant 0 : index
    %c0_2 = arith.constant 0 : index
    %c0_3 = arith.constant 0 : index
    %1 = vector.load %arg1[%c0_1, %c0_2, %c0_3] : memref<4x98x288xbf16, #tpu.memory_space<vmem>>, vector<1x98x288xbf16>
    %2 = vector.shape_cast %1 : vector<1x98x288xbf16> to vector<98x288xbf16>
    %cst = arith.constant dense<0.000000e+00> : vector<98x64xf32>
    %3 = tpu.matmul %2, %0, %cst {dimension_numbers = #tpu.dot_dimension_numbers<[1], [0], [0], [1], [0, 0, 1, 1], [], []>} : vector<98x288xbf16>, vector<288x64xbf16>, vector<98x64xf32> -> vector<98x64xf32>
    %c1 = arith.constant 1 : index
    %c0_4 = arith.constant 0 : index
    %c0_5 = arith.constant 0 : index
    %4 = vector.load %arg1[%c1, %c0_4, %c0_5] : memref<4x98x288xbf16, #tpu.memory_space<vmem>>, vector<1x98x288xbf16>
    %5 = vector.shape_cast %4 : vector<1x98x288xbf16> to vector<98x288xbf16>
    %cst_6 = arith.constant dense<0.000000e+00> : vector<98x64xf32>
    %6 = tpu.matmul %5, %0, %cst_6 {dimension_numbers = #tpu.dot_dimension_numbers<[1], [0], [0], [1], [0, 0, 1, 1], [], []>} : vector<98x288xbf16>, vector<288x64xbf16>, vector<98x64xf32> -> vector<98x64xf32>
    %7 = arith.maximumf %3, %6 : vector<98x64xf32>
    %c2 = arith.constant 2 : index
    %c0_7 = arith.constant 0 : index
    %c0_8 = arith.constant 0 : index
    %8 = vector.load %arg1[%c2, %c0_7, %c0_8] : memref<4x98x288xbf16, #tpu.memory_space<vmem>>, vector<1x98x288xbf16>
    %9 = vector.shape_cast %8 : vector<1x98x288xbf16> to vector<98x288xbf16>
    %cst_9 = arith.constant dense<0.000000e+00> : vector<98x64xf32>
    %10 = tpu.matmul %9, %0, %cst_9 {dimension_numbers = #tpu.dot_dimension_numbers<[1], [0], [0], [1], [0, 0, 1, 1], [], []>} : vector<98x288xbf16>, vector<288x64xbf16>, vector<98x64xf32> -> vector<98x64xf32>
    %11 = arith.maximumf %7, %10 : vector<98x64xf32>
    %c3 = arith.constant 3 : index
    %c0_10 = arith.constant 0 : index
    %c0_11 = arith.constant 0 : index
    %12 = vector.load %arg1[%c3, %c0_10, %c0_11] : memref<4x98x288xbf16, #tpu.memory_space<vmem>>, vector<1x98x288xbf16>
    %13 = vector.shape_cast %12 : vector<1x98x288xbf16> to vector<98x288xbf16>
    %cst_12 = arith.constant dense<0.000000e+00> : vector<98x64xf32>
    %14 = tpu.matmul %13, %0, %cst_12 {dimension_numbers = #tpu.dot_dimension_numbers<[1], [0], [0], [1], [0, 0, 1, 1], [], []>} : vector<98x288xbf16>, vector<288x64xbf16>, vector<98x64xf32> -> vector<98x64xf32>
    %15 = arith.maximumf %11, %14 : vector<98x64xf32>
    %c0_13 = arith.constant 0 : index
    %c0_14 = arith.constant 0 : index
    %16 = vector.load %arg3[%c0_13, %c0_14] : memref<1x64xf32, #tpu.memory_space<vmem>>, vector<1x64xf32>
    %17 = vector.broadcast %16 : vector<1x64xf32> to vector<98x64xf32>
    %18 = arith.addf %15, %17 : vector<98x64xf32>
    %cst_15 = arith.constant 0.000000e+00 : f32
    %19 = vector.broadcast %cst_15 : f32 to vector<98x64xf32>
    %20 = arith.maximumf %18, %19 : vector<98x64xf32>
    %21 = arith.truncf %20 : vector<98x64xf32> to vector<98x64xbf16>
    %c0_16 = arith.constant 0 : index
    %c0_17 = arith.constant 0 : index
    %22 = vector.load %arg4[%c0_16, %c0_17] : memref<98x64xbf16, #tpu.memory_space<vmem>>, vector<98x64xbf16>
    tpu.vector_store %arg4[%c0_16, %c0_17], %21 {strides = array<i32>} : memref<98x64xbf16, #tpu.memory_space<vmem>>, vector<98x64xbf16>,
    return
  }
  func.func @transform_0(%arg0: i32) -> (i32, i32, i32) {
    %c0_i32 = arith.constant 0 : i32
    %c0_i32_0 = arith.constant 0 : i32
    %c0_i32_1 = arith.constant 0 : i32
    %c0_i32_2 = arith.constant 0 : i32
    return %c0_i32, %c0_i32_0, %c0_i32_1 : i32, i32, i32
  }
  func.func @transform_1(%arg0: i32) -> (i32, i32) {
    %c0_i32 = arith.constant 0 : i32
    %c0_i32_0 = arith.constant 0 : i32
    %c0_i32_1 = arith.constant 0 : i32
    return %c0_i32, %c0_i32_0 : i32, i32
  }
  func.func @transform_2(%arg0: i32) -> (i32, i32) {
    %c0_i32 = arith.constant 0 : i32
    %c0_i32_0 = arith.constant 0 : i32
    %c0_i32_1 = arith.constant 0 : i32
    return %c0_i32, %c0_i32_0 : i32, i32
  }
  func.func @transform_3(%arg0: i32) -> (i32, i32) {
    %c0_i32 = arith.constant 0 : i32
    %c0_i32_0 = arith.constant 0 : i32
    %c0_i32_1 = arith.constant 0 : i32
    return %c0_i32, %c0_i32_0 : i32, i32
  }
}

module attributes {stable_mosaic.version = 11 : i64} {
  func.func @_fc_stack_kernel(%arg0: i32, %arg1: memref<2x1664xbf16, #tpu.memory_space<vmem>>, %arg2: memref<1664x1024xbf16, #tpu.memory_space<vmem>>, %arg3: memref<1x1024xf32, #tpu.memory_space<vmem>>, %arg4: memref<1024x512xbf16, #tpu.memory_space<vmem>>, %arg5: memref<1x512xf32, #tpu.memory_space<vmem>>, %arg6: memref<512x128xbf16, #tpu.memory_space<vmem>>, %arg7: memref<1x128xf32, #tpu.memory_space<vmem>>, %arg8: memref<2x128xf32, #tpu.memory_space<vmem>>, %arg9: memref<2x1024xf32, #tpu.memory_space<vmem>>) attributes {dimension_semantics = [#tpu.dimension_semantics<arbitrary>], iteration_bounds = array<i64: 2>, scalar_prefetch = 0 : i64, scratch_operands = 1 : i64, tpu.core_type = #tpu.core_type<tc>, window_params = [{transform_indices = @transform_0, window_bounds = array<i64: 2, 1664>}, {transform_indices = @transform_1, window_bounds = array<i64: 1664, 1024>}, {pipeline_mode = #tpu.pipeline_mode<synchronous>, transform_indices = @transform_2, window_bounds = array<i64: 1, 1024>}, {pipeline_mode = #tpu.pipeline_mode<synchronous>, transform_indices = @transform_3, window_bounds = array<i64: 1024, 512>}, {pipeline_mode = #tpu.pipeline_mode<synchronous>, transform_indices = @transform_4, window_bounds = array<i64: 1, 512>}, {pipeline_mode = #tpu.pipeline_mode<synchronous>, transform_indices = @transform_5, window_bounds = array<i64: 512, 128>}, {pipeline_mode = #tpu.pipeline_mode<synchronous>, transform_indices = @transform_6, window_bounds = array<i64: 1, 128>}, {pipeline_mode = #tpu.pipeline_mode<synchronous>, transform_indices = @transform_7, window_bounds = array<i64: 2, 128>}]} {
    %c0_i32 = arith.constant 0 : i32
    %0 = arith.cmpi eq, %arg0, %c0_i32 : i32
    %1 = arith.extui %0 : i1 to i32
    %c0_i32_0 = arith.constant 0 : i32
    %2 = arith.cmpi ne, %1, %c0_i32_0 : i32
    scf.if %2 {
      %cst_9 = arith.constant 0.000000e+00 : f32
      %12 = vector.broadcast %cst_9 : f32 to vector<2x1024xf32>
      %c0_10 = arith.constant 0 : index
      %c0_11 = arith.constant 0 : index
      %13 = vector.load %arg9[%c0_10, %c0_11] : memref<2x1024xf32, #tpu.memory_space<vmem>>, vector<2x1024xf32>
      tpu.vector_store %arg9[%c0_10, %c0_11], %12 {strides = array<i32>} : memref<2x1024xf32, #tpu.memory_space<vmem>>, vector<2x1024xf32>,
    } else {
    }
    %c0 = arith.constant 0 : index
    %c0_1 = arith.constant 0 : index
    %3 = vector.load %arg9[%c0, %c0_1] : memref<2x1024xf32, #tpu.memory_space<vmem>>, vector<2x1024xf32>
    %c0_2 = arith.constant 0 : index
    %c0_3 = arith.constant 0 : index
    %4 = vector.load %arg1[%c0_2, %c0_3] : memref<2x1664xbf16, #tpu.memory_space<vmem>>, vector<2x1664xbf16>
    %c0_4 = arith.constant 0 : index
    %c0_5 = arith.constant 0 : index
    %5 = vector.load %arg2[%c0_4, %c0_5] : memref<1664x1024xbf16, #tpu.memory_space<vmem>>, vector<1664x1024xbf16>
    %cst = arith.constant dense<0.000000e+00> : vector<2x1024xf32>
    %6 = tpu.matmul %4, %5, %cst {dimension_numbers = #tpu.dot_dimension_numbers<[1], [0], [0], [1], [0, 0, 1, 1], [], []>} : vector<2x1664xbf16>, vector<1664x1024xbf16>, vector<2x1024xf32> -> vector<2x1024xf32>
    %7 = arith.addf %3, %6 : vector<2x1024xf32>
    %c0_6 = arith.constant 0 : index
    %c0_7 = arith.constant 0 : index
    %8 = vector.load %arg9[%c0_6, %c0_7] : memref<2x1024xf32, #tpu.memory_space<vmem>>, vector<2x1024xf32>
    tpu.vector_store %arg9[%c0_6, %c0_7], %7 {strides = array<i32>} : memref<2x1024xf32, #tpu.memory_space<vmem>>, vector<2x1024xf32>,
    %c1_i32 = arith.constant 1 : i32
    %9 = arith.cmpi eq, %arg0, %c1_i32 : i32
    %10 = arith.extui %9 : i1 to i32
    %c0_i32_8 = arith.constant 0 : i32
    %11 = arith.cmpi ne, %10, %c0_i32_8 : i32
    scf.if %11 {
      %c0_9 = arith.constant 0 : index
      %c0_10 = arith.constant 0 : index
      %12 = vector.load %arg9[%c0_9, %c0_10] : memref<2x1024xf32, #tpu.memory_space<vmem>>, vector<2x1024xf32>
      %c0_11 = arith.constant 0 : index
      %c0_12 = arith.constant 0 : index
      %13 = vector.load %arg3[%c0_11, %c0_12] : memref<1x1024xf32, #tpu.memory_space<vmem>>, vector<1x1024xf32>
      %14 = vector.broadcast %13 : vector<1x1024xf32> to vector<2x1024xf32>
      %15 = arith.addf %12, %14 : vector<2x1024xf32>
      %cst_13 = arith.constant 0.000000e+00 : f32
      %16 = vector.broadcast %cst_13 : f32 to vector<2x1024xf32>
      %17 = arith.maximumf %15, %16 : vector<2x1024xf32>
      %18 = arith.truncf %17 : vector<2x1024xf32> to vector<2x1024xbf16>
      %c0_14 = arith.constant 0 : index
      %c0_15 = arith.constant 0 : index
      %19 = vector.load %arg4[%c0_14, %c0_15] : memref<1024x512xbf16, #tpu.memory_space<vmem>>, vector<1024x512xbf16>
      %cst_16 = arith.constant dense<0.000000e+00> : vector<2x512xf32>
      %20 = tpu.matmul %18, %19, %cst_16 {dimension_numbers = #tpu.dot_dimension_numbers<[1], [0], [0], [1], [0, 0, 1, 1], [], []>} : vector<2x1024xbf16>, vector<1024x512xbf16>, vector<2x512xf32> -> vector<2x512xf32>
      %c0_17 = arith.constant 0 : index
      %c0_18 = arith.constant 0 : index
      %21 = vector.load %arg5[%c0_17, %c0_18] : memref<1x512xf32, #tpu.memory_space<vmem>>, vector<1x512xf32>
      %22 = vector.broadcast %21 : vector<1x512xf32> to vector<2x512xf32>
      %23 = arith.addf %20, %22 : vector<2x512xf32>
      %cst_19 = arith.constant 0.000000e+00 : f32
      %24 = vector.broadcast %cst_19 : f32 to vector<2x512xf32>
      %25 = arith.maximumf %23, %24 : vector<2x512xf32>
      %26 = arith.truncf %25 : vector<2x512xf32> to vector<2x512xbf16>
      %c0_20 = arith.constant 0 : index
      %c0_21 = arith.constant 0 : index
      %27 = vector.load %arg6[%c0_20, %c0_21] : memref<512x128xbf16, #tpu.memory_space<vmem>>, vector<512x128xbf16>
      %cst_22 = arith.constant dense<0.000000e+00> : vector<2x128xf32>
      %28 = tpu.matmul %26, %27, %cst_22 {dimension_numbers = #tpu.dot_dimension_numbers<[1], [0], [0], [1], [0, 0, 1, 1], [], []>} : vector<2x512xbf16>, vector<512x128xbf16>, vector<2x128xf32> -> vector<2x128xf32>
      %c0_23 = arith.constant 0 : index
      %c0_24 = arith.constant 0 : index
      %29 = vector.load %arg7[%c0_23, %c0_24] : memref<1x128xf32, #tpu.memory_space<vmem>>, vector<1x128xf32>
      %30 = vector.broadcast %29 : vector<1x128xf32> to vector<2x128xf32>
      %31 = arith.addf %28, %30 : vector<2x128xf32>
      %c0_25 = arith.constant 0 : index
      %c0_26 = arith.constant 0 : index
      %32 = vector.load %arg8[%c0_25, %c0_26] : memref<2x128xf32, #tpu.memory_space<vmem>>, vector<2x128xf32>
      tpu.vector_store %arg8[%c0_25, %c0_26], %31 {strides = array<i32>} : memref<2x128xf32, #tpu.memory_space<vmem>>, vector<2x128xf32>,
    } else {
    }
    return
  }
  func.func @transform_0(%arg0: i32) -> (i32, i32) {
    %c0_i32 = arith.constant 0 : i32
    %c0_i32_0 = arith.constant 0 : i32
    return %c0_i32, %arg0 : i32, i32
  }
  func.func @transform_1(%arg0: i32) -> (i32, i32) {
    %c0_i32 = arith.constant 0 : i32
    %c0_i32_0 = arith.constant 0 : i32
    return %arg0, %c0_i32 : i32, i32
  }
  func.func @transform_2(%arg0: i32) -> (i32, i32) {
    %c0_i32 = arith.constant 0 : i32
    %c0_i32_0 = arith.constant 0 : i32
    %c0_i32_1 = arith.constant 0 : i32
    return %c0_i32, %c0_i32_0 : i32, i32
  }
  func.func @transform_3(%arg0: i32) -> (i32, i32) {
    %c0_i32 = arith.constant 0 : i32
    %c0_i32_0 = arith.constant 0 : i32
    %c0_i32_1 = arith.constant 0 : i32
    return %c0_i32, %c0_i32_0 : i32, i32
  }
  func.func @transform_4(%arg0: i32) -> (i32, i32) {
    %c0_i32 = arith.constant 0 : i32
    %c0_i32_0 = arith.constant 0 : i32
    %c0_i32_1 = arith.constant 0 : i32
    return %c0_i32, %c0_i32_0 : i32, i32
  }
  func.func @transform_5(%arg0: i32) -> (i32, i32) {
    %c0_i32 = arith.constant 0 : i32
    %c0_i32_0 = arith.constant 0 : i32
    %c0_i32_1 = arith.constant 0 : i32
    return %c0_i32, %c0_i32_0 : i32, i32
  }
  func.func @transform_6(%arg0: i32) -> (i32, i32) {
    %c0_i32 = arith.constant 0 : i32
    %c0_i32_0 = arith.constant 0 : i32
    %c0_i32_1 = arith.constant 0 : i32
    return %c0_i32, %c0_i32_0 : i32, i32
  }
  func.func @transform_7(%arg0: i32) -> (i32, i32) {
    %c0_i32 = arith.constant 0 : i32
    %c0_i32_0 = arith.constant 0 : i32
    %c0_i32_1 = arith.constant 0 : i32
    return %c0_i32, %c0_i32_0 : i32, i32
  }
}

</mosaic_0001>

<bundles_post_ra>
// kernel: minist_forward.3
= control target key start
LH: loop header
LB: loop body
LE: loop exit
PB: predicated region body
PF: predicated region fallthrough
CT: control target
= control target key end

     0   :  { %8 = vsyncpa [#allocation3], 0  ;;  %s4916_s0 = inlined_call_operand.vmem [shape: bf16[4,392,9], index: 0, kind: input, shape index: {}]   ;;  %s4917_s1 = inlined_call_operand.hbm [shape: bf16[9,32], index: 1, kind: input, shape index: {}]   ;;  %s4918_s2 = inlined_call_operand.hbm [shape: f32[1,32], index: 2, kind: input, shape index: {}]   ;;  %s4919_s3 = inlined_call_operand.vmem [shape: bf16[392,32], index: 3, kind: output, shape index: {}]  }
   0x1   :  { %9 = vsyncpa [#allocation5], 0  ;;  %s3591_s12 = smov [#allocation2]  }
   0x2   :  { %s17_s13 = sshll.u32 %s3591_s12, 4  ;;  %s18_s13 = int_to_ptr.vmem [resolvable:$true] %s17_s13 }
   0x3   :  { %s3555_s14 = scalar_lea.vmem %s18_s13, 128  ;;  %p3560_p1 = scmp.lt.s32.totalorder %s18_s13, %s18_s13 }
   0x4   :  { %p3556_p0 = scmp.ne.s32.totalorder %s18_s13, %s3555_s14  ;;  %p3561_p2 = scmp.lt.s32.totalorder %s3555_s14, %s3555_s14 }
   0x6   :  { %p3562_p3 = por %p3561_p2, %p3560_p1 }
   0x8   :  { %p3563_p4 = pnand %p3562_p3, %p3556_p0 }
   0xa   :  { %3566 = shalt.err (!%p3563_p4)
}
   0xb   :  { %s3592_s15 = smov 64   ;;  %s3593_s16 = smov 4  }
   0xc   :  { %23 = dma.hbm_to_vmem [thread:$0]  %s4917_s1, 128, %s18_s13, [#allocation3], %s3592_s15, %s3592_s15, %s3593_s16  }
   0xd   :  { %s3594_s19 = smov [#allocation4]  }
   0xe   :  { %s30_s20 = sshll.u32 %s3594_s19, 4  ;;  %s31_s20 = int_to_ptr.vmem [resolvable:$true] %s30_s20 }
   0xf   :  { %s3575_s21 = scalar_lea.vmem %s31_s20, 16  ;;  %s3579_s22 = scalar_lea.vmem %s31_s20, 32 }
  0x10   :  { %p3576_p5 = scmp.ne.s32.totalorder %s31_s20, %s3575_s21  ;;  %p3580_p6 = scmp.lt.s32.totalorder %s31_s20, %s31_s20 }
  0x11   :  { %p3581_p7 = scmp.lt.s32.totalorder %s3579_s22, %s3575_s21 }
  0x13   :  { %p3582_p8 = por %p3581_p7, %p3580_p6 }
  0x15   :  { %p3583_p9 = pnand %p3582_p8, %p3576_p5 }
  0x17   :  { %3586 = shalt.err (!%p3583_p9)
}
  0x18   :  { %33 = dma.hbm_to_vmem [thread:$0]  %s4918_s2, 16, %s31_s20, [#allocation5]  }
  0x19   :  { %3587 = dma.done.wait [#allocation3], 128  }
  0x1a   :  { %3588 = vsyncadd [#allocation3], 4294967168 }
  0x1b   :  { %3589 = dma.done.wait [#allocation5], 16  }
  0x1c   :  { %3590 = vsyncadd [#allocation5], 4294967280  ;;  %vm296_vm0 = vcmask 1043456   ;;  %v4920_v0 = vmov 0.0   ;;  %vm3596_vm1 = vmmov 0   ;;  %vm297_vm2 = vcmask 1044480  }
  0x1d   :  { %3031 = vmatprep.subr.bf16.mxu0 %v4920_v0  ;;  %3133 = vmatprep.subr.bf16.mxu1 %v4920_v0  ;;  %v3597_v1 = vmov 65535   ;;  %v3446_v4 = vld [vmem:[#allocation2] sm:$0x1f]   ;;  %vm220_vm3 = vcmask 72704   ;;  %v3449_v8 = vld [vmem:[%s4916_s0 + $0x8] sm:$0xff]   ;;  %v3451_v10 = vld [vmem:[%s4916_s0 + $0x10] sm:$0xff]  }
  0x1e   :  { %3033 = vmatprep.mubr.msk.bf16.mxu0 %vm3596_vm1, %v4920_v0  ;;  %3135 = vmatprep.mubr.msk.bf16.mxu1 %vm3596_vm1, %v4920_v0  ;;  %v298_v2 = vsel %vm296_vm0, 4294967295, %v3597_v1  ;;  %v3447_v6 = vld [vmem:[%s4916_s0] sm:$0xff]   ;;  %v3450_v9 = vld [vmem:[%s4916_s0 + $0xcc] sm:$0xff]   ;;  %v3452_v11 = vld [vmem:[%s4916_s0 + $0xd4] sm:$0xff]   ;;  %vm2424_vm4 = vcmask 257024  }
  0x1f   :  { %v299_v3 = vsel %vm297_vm2, %v298_v2, 0  ;;  %v3448_v7 = vld [vmem:[%s4916_s0 + $0xc4] sm:$0xff]   ;;  %v3453_v12 = vld [vmem:[%s4916_s0 + $0x18] sm:$0xff]   ;;  %v3458_v17 = vld [vmem:[%s4916_s0 + $0xec] sm:$0xff]  }
  0x20   :  { %v301_v5 = vand.u32 %v3446_v4, %v299_v3  ;;  %v3454_v13 = vld [vmem:[%s4916_s0 + $0xdc] sm:$0xff]   ;;  %v3456_v15 = vld [vmem:[%s4916_s0 + $0xe4] sm:$0xff]   ;;  %v3459_v18 = vld [vmem:[%s4916_s0 + $0x30] sm:$0xff]  }
  0x21   :  { %v3455_v14 = vld [vmem:[%s4916_s0 + $0x20] sm:$0xff]   ;;  %v3457_v16 = vld [vmem:[%s4916_s0 + $0x28] sm:$0xff]   ;;  %v3460_v19 = vld [vmem:[%s4916_s0 + $0xf4] sm:$0xff]  }
  0x22   :  { %3032 = vmatpush3.bf16.msra.mxu0 %v301_v5  ;;  %3134 = vmatpush3.bf16.msra.mxu1 %v301_v5  ;;  %v3461_v20 = vld [vmem:[%s4916_s0 + $0x38] sm:$0xff]   ;;  %v3463_v22 = vld [vmem:[%s4916_s0 + $0x40] sm:$0xff]   ;;  %v3465_v24 = vld [vmem:[%s4916_s0 + $0x48] sm:$0xff]  }
  0x23   :  { %3235 = vmatprep.subr.bf16.mxu0 %v4920_v0  ;;  %3337 = vmatprep.subr.bf16.mxu1 %v4920_v0  ;;  %v3462_v21 = vld [vmem:[%s4916_s0 + $0xfc] sm:$0xff]   ;;  %v3464_v23 = vld [vmem:[%s4916_s0 + $0x104] sm:$0xff]   ;;  %v3466_v25 = vld [vmem:[%s4916_s0 + $0x10c] sm:$0xff]  }
  0x24   :  { %v3467_v26 = vld [vmem:[%s4916_s0 + $0x50] sm:$0xff]   ;;  %v3469_v28 = vld [vmem:[%s4916_s0 + $0x58] sm:$0xff]   ;;  %v3471_v30 = vld [vmem:[%s4916_s0 + $0x60] sm:$0xff]  }
  0x25   :  { %3034 = vmatmul.mubr.msk.bf16.vlgmr.msra.gmra.mxu0 %vm220_vm3, %v3447_v6  ;;  %3136 = vmatmul.mubr.msk.bf16.vlgmr.msra.gmra.mxu1 %vm220_vm3, %v3448_v7  ;;  %v3468_v27 = vld [vmem:[%s4916_s0 + $0x114] sm:$0xff]   ;;  %v3470_v29 = vld [vmem:[%s4916_s0 + $0x11c] sm:$0xff]   ;;  %v3472_v31 = vld [vmem:[%s4916_s0 + $0x124] sm:$0xff]  }
  0x26   :  { %3236 = vmatpush3.bf16.msra.mxu0 %v301_v5  ;;  %3338 = vmatpush3.bf16.msra.mxu1 %v301_v5  ;;  %v3473_v32 = vld [vmem:[%s4916_s0 + $0x68] sm:$0xff]   ;;  %v3475_v34 = vld [vmem:[%s4916_s0 + $0x70] sm:$0xff]   ;;  %v3477_v36 = vld [vmem:[%s4916_s0 + $0x78] sm:$0xff]  }
  0x27   :  { %3037 = vmatprep.mubr.msk.bf16.mxu0 %vm3596_vm1, %v4920_v0  ;;  %3139 = vmatprep.mubr.msk.bf16.mxu1 %vm3596_vm1, %v4920_v0  ;;  %v3474_v33 = vld [vmem:[%s4916_s0 + $0x12c] sm:$0xff]   ;;  %v3476_v35 = vld [vmem:[%s4916_s0 + $0x134] sm:$0xff]   ;;  %v3478_v37 = vld [vmem:[%s4916_s0 + $0x13c] sm:$0xff]  }
  0x28   :  { %v3479_v38 = vld [vmem:[%s4916_s0 + $0x80] sm:$0xff]   ;;  %v3481_v40 = vld [vmem:[%s4916_s0 + $0x88] sm:$0xff]   ;;  %v3483_v42 = vld [vmem:[%s4916_s0 + $0x90] sm:$0xff]  }
  0x29   :  { %v3480_v39 = vld [vmem:[%s4916_s0 + $0x144] sm:$0xff]   ;;  %v3482_v41 = vld [vmem:[%s4916_s0 + $0x14c] sm:$0xff]   ;;  %v3484_v43 = vld [vmem:[%s4916_s0 + $0x154] sm:$0xff]  }
  0x2a   :  { %v3485_v44 = vld [vmem:[%s4916_s0 + $0x98] sm:$0xff]   ;;  %v3487_v46 = vld [vmem:[%s4916_s0 + $0xa0] sm:$0xff]   ;;  %v3489_v48 = vld [vmem:[%s4916_s0 + $0xa8] sm:$0xff]  }
  0x2b   :  { %v3486_v45 = vld [vmem:[%s4916_s0 + $0x15c] sm:$0xff]   ;;  %v3488_v47 = vld [vmem:[%s4916_s0 + $0x164] sm:$0xff]   ;;  %v3490_v49 = vld [vmem:[%s4916_s0 + $0x16c] sm:$0xff]  }
  0x2c   :  { %v3491_v50 = vld [vmem:[%s4916_s0 + $0xb0] sm:$0xff]   ;;  %v3493_v52 = vld [vmem:[%s4916_s0 + $0xb8] sm:$0xff]   ;;  %v3495_v54 = vld [vmem:[%s4916_s0 + $0xc0] ss:$0 sps:$4 sm:$0xff]  }
  0x2d   :  { %3038 = vmatmul.mubr.msk.bf16.gmra.mxu0 %vm220_vm3, %v3449_v8  ;;  %3140 = vmatmul.mubr.msk.bf16.gmra.mxu1 %vm220_vm3, %v3450_v9  ;;  %v3492_v51 = vld [vmem:[%s4916_s0 + $0x174] sm:$0xff]   ;;  %v3494_v53 = vld [vmem:[%s4916_s0 + $0x17c] sm:$0xff]   ;;  %v3496_v55 = vld [vmem:[%s4916_s0 + $0x184] ss:$0 sps:$4 sm:$0xff]  }
  0x2e   :  { %3041 = vmatprep.mubr.msk.bf16.mxu0 %vm3596_vm1, %v4920_v0  ;;  %3143 = vmatprep.mubr.msk.bf16.mxu1 %vm3596_vm1, %v4920_v0  ;;  %v3497_v63 = vld [vmem:[%s4916_s0 + $0x188] sm:$0xff]  }
  0x2f   :  { %v3498_v1 = vld [vmem:[%s4916_s0 + $0x24c] sm:$0xff]  }
  0x35   :  { %3042 = vmatmul.mubr.msk.bf16.gmra.mxu0 %vm220_vm3, %v3451_v10  ;;  %3144 = vmatmul.mubr.msk.bf16.gmra.mxu1 %vm220_vm3, %v3452_v11 }
  0x36   :  { %3045 = vmatprep.mubr.msk.bf16.mxu0 %vm3596_vm1, %v4920_v0  ;;  %3147 = vmatprep.mubr.msk.bf16.mxu1 %vm3596_vm1, %v4920_v0 }
  0x3d   :  { %3046 = vmatmul.mubr.msk.bf16.gmra.mxu0 %vm220_vm3, %v3453_v12  ;;  %3148 = vmatmul.mubr.msk.bf16.gmra.mxu1 %vm220_vm3, %v3454_v13  ;;  %v3499_v12 = vld [vmem:[%s4916_s0 + $0x190] sm:$0xff]  }
  0x3e   :  { %3049 = vmatprep.mubr.msk.bf16.mxu0 %vm3596_vm1, %v4920_v0  ;;  %3151 = vmatprep.mubr.msk.bf16.mxu1 %vm3596_vm1, %v4920_v0  ;;  %v3500_v13 = vld [vmem:[%s4916_s0 + $0x254] sm:$0xff]  }
  0x45   :  { %3050 = vmatmul.mubr.msk.bf16.gmra.mxu0 %vm220_vm3, %v3455_v14  ;;  %3152 = vmatmul.mubr.msk.bf16.gmra.mxu1 %vm220_vm3, %v3456_v15 }
  0x46   :  { %3053 = vmatprep.mubr.msk.bf16.mxu0 %vm3596_vm1, %v4920_v0  ;;  %3155 = vmatprep.mubr.msk.bf16.mxu1 %vm3596_vm1, %v4920_v0 }
  0x4d   :  { %3054 = vmatmul.mubr.msk.bf16.gmra.mxu0 %vm220_vm3, %v3457_v16  ;;  %3156 = vmatmul.mubr.msk.bf16.gmra.mxu1 %vm220_vm3, %v3458_v17 }
  0x4e   :  { %3057 = vmatprep.mubr.msk.bf16.mxu0 %vm3596_vm1, %v4920_v0  ;;  %3159 = vmatprep.mubr.msk.bf16.mxu1 %vm3596_vm1, %v4920_v0 }
  0x55   :  { %3058 = vmatmul.mubr.msk.bf16.gmra.mxu0 %vm220_vm3, %v3459_v18  ;;  %3160 = vmatmul.mubr.msk.bf16.gmra.mxu1 %vm220_vm3, %v3460_v19 }
  0x56   :  { %3061 = vmatprep.mubr.msk.bf16.mxu0 %vm3596_vm1, %v4920_v0  ;;  %3163 = vmatprep.mubr.msk.bf16.mxu1 %vm3596_vm1, %v4920_v0 }
  0x5d   :  { %3062 = vmatmul.mubr.msk.bf16.gmra.mxu0 %vm220_vm3, %v3461_v20  ;;  %3164 = vmatmul.mubr.msk.bf16.gmra.mxu1 %vm220_vm3, %v3462_v21 }
  0x5e   :  { %3065 = vmatprep.mubr.msk.bf16.mxu0 %vm3596_vm1, %v4920_v0  ;;  %3167 = vmatprep.mubr.msk.bf16.mxu1 %vm3596_vm1, %v4920_v0 }
  0x65   :  { %3066 = vmatmul.mubr.msk.bf16.gmra.mxu0 %vm220_vm3, %v3463_v22  ;;  %3168 = vmatmul.mubr.msk.bf16.gmra.mxu1 %vm220_vm3, %v3464_v23 }
  0x66   :  { %3069 = vmatprep.mubr.msk.bf16.mxu0 %vm3596_vm1, %v4920_v0  ;;  %3171 = vmatprep.mubr.msk.bf16.mxu1 %vm3596_vm1, %v4920_v0 }
  0x6d   :  { %3070 = vmatmul.mubr.msk.bf16.gmra.mxu0 %vm220_vm3, %v3465_v24  ;;  %3172 = vmatmul.mubr.msk.bf16.gmra.mxu1 %vm220_vm3, %v3466_v25  ;;  %v3501_v24 = vld [vmem:[%s4916_s0 + $0x198] sm:$0xff]  }
  0x6e   :  { %3073 = vmatprep.mubr.msk.bf16.mxu0 %vm3596_vm1, %v4920_v0  ;;  %3175 = vmatprep.mubr.msk.bf16.mxu1 %vm3596_vm1, %v4920_v0  ;;  %v3502_v25 = vld [vmem:[%s4916_s0 + $0x25c] sm:$0xff]  }
  0x75   :  { %3074 = vmatmul.mubr.msk.bf16.gmra.mxu0 %vm220_vm3, %v3467_v26  ;;  %3176 = vmatmul.mubr.msk.bf16.gmra.mxu1 %vm220_vm3, %v3468_v27 }
  0x76   :  { %3077 = vmatprep.mubr.msk.bf16.mxu0 %vm3596_vm1, %v4920_v0  ;;  %3179 = vmatprep.mubr.msk.bf16.mxu1 %vm3596_vm1, %v4920_v0 }
  0x7d   :  { %3078 = vmatmul.mubr.msk.bf16.gmra.mxu0 %vm220_vm3, %v3469_v28  ;;  %3180 = vmatmul.mubr.msk.bf16.gmra.mxu1 %vm220_vm3, %v3470_v29 }
  0x7e   :  { %3081 = vmatprep.mubr.msk.bf16.mxu0 %vm3596_vm1, %v4920_v0  ;;  %3183 = vmatprep.mubr.msk.bf16.mxu1 %vm3596_vm1, %v4920_v0 }
  0x85   :  { %3082 = vmatmul.mubr.msk.bf16.gmra.mxu0 %vm220_vm3, %v3471_v30  ;;  %3184 = vmatmul.mubr.msk.bf16.gmra.mxu1 %vm220_vm3, %v3472_v31 }
  0x86   :  { %3085 = vmatprep.mubr.msk.bf16.mxu0 %vm3596_vm1, %v4920_v0  ;;  %3187 = vmatprep.mubr.msk.bf16.mxu1 %vm3596_vm1, %v4920_v0 }
  0x8d   :  { %3086 = vmatmul.mubr.msk.bf16.gmra.mxu0 %vm220_vm3, %v3473_v32  ;;  %3188 = vmatmul.mubr.msk.bf16.gmra.mxu1 %vm220_vm3, %v3474_v33 }
  0x8e   :  { %3089 = vmatprep.mubr.msk.bf16.mxu0 %vm3596_vm1, %v4920_v0  ;;  %3191 = vmatprep.mubr.msk.bf16.mxu1 %vm3596_vm1, %v4920_v0 }
  0x95   :  { %3090 = vmatmul.mubr.msk.bf16.gmra.mxu0 %vm220_vm3, %v3475_v34  ;;  %3192 = vmatmul.mubr.msk.bf16.gmra.mxu1 %vm220_vm3, %v3476_v35 }
  0x96   :  { %3093 = vmatprep.mubr.msk.bf16.mxu0 %vm3596_vm1, %v4920_v0  ;;  %3195 = vmatprep.mubr.msk.bf16.mxu1 %vm3596_vm1, %v4920_v0 }
  0x9d   :  { %3094 = vmatmul.mubr.msk.bf16.gmra.mxu0 %vm220_vm3, %v3477_v36  ;;  %3196 = vmatmul.mubr.msk.bf16.gmra.mxu1 %vm220_vm3, %v3478_v37  ;;  %v3503_v36 = vld [vmem:[%s4916_s0 + $0x1a0] sm:$0xff]  }
  0x9e   :  { %3097 = vmatprep.mubr.msk.bf16.mxu0 %vm3596_vm1, %v4920_v0  ;;  %3199 = vmatprep.mubr.msk.bf16.mxu1 %vm3596_vm1, %v4920_v0  ;;  %v3504_v37 = vld [vmem:[%s4916_s0 + $0x264] sm:$0xff]  }
  0xa5   :  { %3098 = vmatmul.mubr.msk.bf16.gmra.mxu0 %vm220_vm3, %v3479_v38  ;;  %3200 = vmatmul.mubr.msk.bf16.gmra.mxu1 %vm220_vm3, %v3480_v39 }
  0xa6   :  { %3101 = vmatprep.mubr.msk.bf16.mxu0 %vm3596_vm1, %v4920_v0  ;;  %3203 = vmatprep.mubr.msk.bf16.mxu1 %vm3596_vm1, %v4920_v0 }
  0xad   :  { %3102 = vmatmul.mubr.msk.bf16.gmra.mxu0 %vm220_vm3, %v3481_v40  ;;  %3204 = vmatmul.mubr.msk.bf16.gmra.mxu1 %vm220_vm3, %v3482_v41 }
  0xae   :  { %3105 = vmatprep.mubr.msk.bf16.mxu0 %vm3596_vm1, %v4920_v0  ;;  %3207 = vmatprep.mubr.msk.bf16.mxu1 %vm3596_vm1, %v4920_v0 }
  0xb5   :  { %3106 = vmatmul.mubr.msk.bf16.gmra.mxu0 %vm220_vm3, %v3483_v42  ;;  %3208 = vmatmul.mubr.msk.bf16.gmra.mxu1 %vm220_vm3, %v3484_v43 }
  0xb6   :  { %3109 = vmatprep.mubr.msk.bf16.mxu0 %vm3596_vm1, %v4920_v0  ;;  %3211 = vmatprep.mubr.msk.bf16.mxu1 %vm3596_vm1, %v4920_v0 }
  0xbd   :  { %3110 = vmatmul.mubr.msk.bf16.gmra.mxu0 %vm220_vm3, %v3485_v44  ;;  %3212 = vmatmul.mubr.msk.bf16.gmra.mxu1 %vm220_vm3, %v3486_v45 }
  0xbe   :  { %3113 = vmatprep.mubr.msk.bf16.mxu0 %vm3596_vm1, %v4920_v0  ;;  %3215 = vmatprep.mubr.msk.bf16.mxu1 %vm3596_vm1, %v4920_v0 }
  0xc5   :  { %3114 = vmatmul.mubr.msk.bf16.gmra.mxu0 %vm220_vm3, %v3487_v46  ;;  %3216 = vmatmul.mubr.msk.bf16.gmra.mxu1 %vm220_vm3, %v3488_v47 }
  0xc6   :  { %3117 = vmatprep.mubr.msk.bf16.mxu0 %vm3596_vm1, %v4920_v0  ;;  %3219 = vmatprep.mubr.msk.bf16.mxu1 %vm3596_vm1, %v4920_v0 }
  0xcd   :  { %3118 = vmatmul.mubr.msk.bf16.gmra.mxu0 %vm220_vm3, %v3489_v48  ;;  %3220 = vmatmul.mubr.msk.bf16.gmra.mxu1 %vm220_vm3, %v3490_v49  ;;  %v3505_v48 = vld [vmem:[%s4916_s0 + $0x1a8] sm:$0xff]  }
  0xce   :  { %3121 = vmatprep.mubr.msk.bf16.mxu0 %vm3596_vm1, %v4920_v0  ;;  %3223 = vmatprep.mubr.msk.bf16.mxu1 %vm3596_vm1, %v4920_v0  ;;  %v3506_v49 = vld [vmem:[%s4916_s0 + $0x26c] sm:$0xff]  }
  0xd5   :  { %3122 = vmatmul.mubr.msk.bf16.gmra.mxu0 %vm220_vm3, %v3491_v50  ;;  %3224 = vmatmul.mubr.msk.bf16.gmra.mxu1 %vm220_vm3, %v3492_v51 }
  0xd6   :  { %3125 = vmatprep.mubr.msk.bf16.mxu0 %vm3596_vm1, %v4920_v0  ;;  %3227 = vmatprep.mubr.msk.bf16.mxu1 %vm3596_vm1, %v4920_v0 }
  0xdd   :  { %3126 = vmatmul.mubr.msk.bf16.gmra.mxu0 %vm220_vm3, %v3493_v52  ;;  %3228 = vmatmul.mubr.msk.bf16.gmra.mxu1 %vm220_vm3, %v3494_v53 }
  0xde   :  { %3129 = vmatprep.mubr.msk.bf16.mxu0 %vm3596_vm1, %v4920_v0  ;;  %3231 = vmatprep.mubr.msk.bf16.mxu1 %vm3596_vm1, %v4920_v0 }
  0xe5   :  { %v3926_v56 = vpop.f32.mrf.mxu0  ;;  %3130 = vmatmul.mubr.msk.bf16.gmra.mxu0 %vm220_vm3, %v3495_v54  ;;  %v3929_v57 = vpop.f32.mrf.mxu1  ;;  %3232 = vmatmul.mubr.msk.bf16.gmra.mxu1 %vm220_vm3, %v3496_v55 }
  0xe6   :  { %3237 = vmatprep.mubr.msk.bf16.mxu0 %vm3596_vm1, %v4920_v0  ;;  %3339 = vmatprep.mubr.msk.bf16.mxu1 %vm3596_vm1, %v4920_v0 }
  0xe7   :  { %v3035_v59 = vpop.f32.mrf.mxu0  ;;  %v3137_v60 = vpop.f32.mrf.mxu1 }
  0xe9   :  { %v3938_v61 = vpop.f32.mrf.mxu0  ;;  %v3940_v62 = vpop.f32.mrf.mxu1 }
  0xeb   :  { %v3036_v3 = vpop.f32.mrf.mxu0  ;;  %v3138_v4 = vpop.f32.mrf.mxu1 }
  0xec   :  { %v3507_v3 = vld [vmem:[%s4916_s0 + $0x1b0] sm:$0xff]  }
  0xed   :  { %v3950_v5 = vpop.f32.mrf.mxu0  ;;  %v3952_v6 = vpop.f32.mrf.mxu1  ;;  %3238 = vmatmul.mubr.msk.bf16.vlgmr.msra.gmra.mxu0 %vm220_vm3, %v3497_v63  ;;  %3340 = vmatmul.mubr.msk.bf16.vlgmr.msra.gmra.mxu1 %vm220_vm3, %v3498_v1  ;;  %v3508_v4 = vld [vmem:[%s4916_s0 + $0x274] sm:$0xff]  }
  0xee   :  { %3241 = vmatprep.mubr.msk.bf16.mxu0 %vm3596_vm1, %v4920_v0  ;;  %3343 = vmatprep.mubr.msk.bf16.mxu1 %vm3596_vm1, %v4920_v0 }
  0xef   :  { %v3039_v8 = vpop.f32.mrf.mxu0  ;;  %v3141_v9 = vpop.f32.mrf.mxu1 }
  0xf1   :  { %v3962_v10 = vpop.f32.mrf.mxu0  ;;  %v3964_v11 = vpop.f32.mrf.mxu1 }
  0xf3   :  { %v3040_v15 = vpop.f32.mrf.mxu0  ;;  %v3142_v16 = vpop.f32.mrf.mxu1 }
  0xf5   :  { %v3974_v17 = vpop.f32.mrf.mxu0  ;;  %v3976_v18 = vpop.f32.mrf.mxu1  ;;  %3242 = vmatmul.mubr.msk.bf16.gmra.mxu0 %vm220_vm3, %v3499_v12  ;;  %3344 = vmatmul.mubr.msk.bf16.gmra.mxu1 %vm220_vm3, %v3500_v13 }
  0xf6   :  { %3245 = vmatprep.mubr.msk.bf16.mxu0 %vm3596_vm1, %v4920_v0  ;;  %3347 = vmatprep.mubr.msk.bf16.mxu1 %vm3596_vm1, %v4920_v0 }
  0xf7   :  { %v3043_v20 = vpop.f32.mrf.mxu0  ;;  %v3145_v21 = vpop.f32.mrf.mxu1 }
  0xf9   :  { %v3986_v22 = vpop.f32.mrf.mxu0  ;;  %v3988_v23 = vpop.f32.mrf.mxu1 }
  0xfb   :  { %v3044_v27 = vpop.f32.mrf.mxu0  ;;  %v3146_v28 = vpop.f32.mrf.mxu1 }
  0xfc   :  { %v3509_v27 = vld [vmem:[%s4916_s0 + $0x1b8] sm:$0xff]  }
  0xfd   :  { %v3998_v29 = vpop.f32.mrf.mxu0  ;;  %v4000_v30 = vpop.f32.mrf.mxu1  ;;  %3246 = vmatmul.mubr.msk.bf16.gmra.mxu0 %vm220_vm3, %v3501_v24  ;;  %3348 = vmatmul.mubr.msk.bf16.gmra.mxu1 %vm220_vm3, %v3502_v25  ;;  %v3510_v28 = vld [vmem:[%s4916_s0 + $0x27c] sm:$0xff]  }
  0xfe   :  { %3249 = vmatprep.mubr.msk.bf16.mxu0 %vm3596_vm1, %v4920_v0  ;;  %3351 = vmatprep.mubr.msk.bf16.mxu1 %vm3596_vm1, %v4920_v0 }
  0xff   :  { %v3047_v32 = vpop.f32.mrf.mxu0  ;;  %v3149_v33 = vpop.f32.mrf.mxu1 }
 0x101   :  { %v4010_v34 = vpop.f32.mrf.mxu0  ;;  %v4012_v35 = vpop.f32.mrf.mxu1 }
 0x103   :  { %v3048_v39 = vpop.f32.mrf.mxu0  ;;  %v3150_v40 = vpop.f32.mrf.mxu1 }
 0x105   :  { %v4022_v41 = vpop.f32.mrf.mxu0  ;;  %v4024_v42 = vpop.f32.mrf.mxu1  ;;  %3250 = vmatmul.mubr.msk.bf16.gmra.mxu0 %vm220_vm3, %v3503_v36  ;;  %3352 = vmatmul.mubr.msk.bf16.gmra.mxu1 %vm220_vm3, %v3504_v37 }
 0x106   :  { %3253 = vmatprep.mubr.msk.bf16.mxu0 %vm3596_vm1, %v4920_v0  ;;  %3355 = vmatprep.mubr.msk.bf16.mxu1 %vm3596_vm1, %v4920_v0 }
 0x107   :  { %v3051_v44 = vpop.f32.mrf.mxu0  ;;  %v3153_v45 = vpop.f32.mrf.mxu1 }
 0x109   :  { %v4034_v46 = vpop.f32.mrf.mxu0  ;;  %v4036_v47 = vpop.f32.mrf.mxu1 }
 0x10b   :  { %v3052_v51 = vpop.f32.mrf.mxu0  ;;  %v3154_v52 = vpop.f32.mrf.mxu1 }
 0x10c   :  { %v3511_v51 = vld [vmem:[%s4916_s0 + $0x1c0] sm:$0xff]  }
 0x10d   :  { %v4046_v53 = vpop.f32.mrf.mxu0  ;;  %v4048_v54 = vpop.f32.mrf.mxu1  ;;  %3254 = vmatmul.mubr.msk.bf16.gmra.mxu0 %vm220_vm3, %v3505_v48  ;;  %3356 = vmatmul.mubr.msk.bf16.gmra.mxu1 %vm220_vm3, %v3506_v49  ;;  %v3512_v52 = vld [vmem:[%s4916_s0 + $0x284] sm:$0xff]  }
 0x10e   :  { %3257 = vmatprep.mubr.msk.bf16.mxu0 %vm3596_vm1, %v4920_v0  ;;  %3359 = vmatprep.mubr.msk.bf16.mxu1 %vm3596_vm1, %v4920_v0 }
 0x10f   :  { %v3055_v59 = vpop.f32.mrf.mxu0  ;;  %v3157_v60 = vpop.f32.mrf.mxu1 }
 0x111   :  { %v4058_v63 = vpop.f32.mrf.mxu0  ;;  %v4060_v1 = vpop.f32.mrf.mxu1 }
 0x113   :  { %v3056_v9 = vpop.f32.mrf.mxu0  ;;  %v3158_v12 = vpop.f32.mrf.mxu1 }
 0x115   :  { %v4070_v13 = vpop.f32.mrf.mxu0  ;;  %v4072_v15 = vpop.f32.mrf.mxu1  ;;  %3258 = vmatmul.mubr.msk.bf16.gmra.mxu0 %vm220_vm3, %v3507_v3  ;;  %3360 = vmatmul.mubr.msk.bf16.gmra.mxu1 %vm220_vm3, %v3508_v4 }
 0x116   :  { %3261 = vmatprep.mubr.msk.bf16.mxu0 %vm3596_vm1, %v4920_v0  ;;  %3363 = vmatprep.mubr.msk.bf16.mxu1 %vm3596_vm1, %v4920_v0 }
 0x117   :  { %v3059_v20 = vpop.f32.mrf.mxu0  ;;  %v3161_v21 = vpop.f32.mrf.mxu1 }
 0x119   :  { %v4082_v24 = vpop.f32.mrf.mxu0  ;;  %v4084_v25 = vpop.f32.mrf.mxu1 }
 0x11b   :  { %v3060_v33 = vpop.f32.mrf.mxu0  ;;  %v3162_v36 = vpop.f32.mrf.mxu1 }
 0x11c   :  { %v3513_v33 = vld [vmem:[%s4916_s0 + $0x1c8] sm:$0xff]  }
 0x11d   :  { %v4094_v37 = vpop.f32.mrf.mxu0  ;;  %v4096_v39 = vpop.f32.mrf.mxu1  ;;  %3262 = vmatmul.mubr.msk.bf16.gmra.mxu0 %vm220_vm3, %v3509_v27  ;;  %3364 = vmatmul.mubr.msk.bf16.gmra.mxu1 %vm220_vm3, %v3510_v28  ;;  %v3514_v36 = vld [vmem:[%s4916_s0 + $0x28c] sm:$0xff]  }
 0x11e   :  { %3265 = vmatprep.mubr.msk.bf16.mxu0 %vm3596_vm1, %v4920_v0  ;;  %3367 = vmatprep.mubr.msk.bf16.mxu1 %vm3596_vm1, %v4920_v0 }
 0x11f   :  { %v3063_v44 = vpop.f32.mrf.mxu0  ;;  %v3165_v45 = vpop.f32.mrf.mxu1 }
 0x121   :  { %v4106_v48 = vpop.f32.mrf.mxu0  ;;  %v4108_v49 = vpop.f32.mrf.mxu1 }
 0x123   :  { %v3064_v60 = vpop.f32.mrf.mxu0  ;;  %v3166_v3 = vpop.f32.mrf.mxu1 }
 0x125   :  { %v4118_v4 = vpop.f32.mrf.mxu0  ;;  %v4120_v9 = vpop.f32.mrf.mxu1  ;;  %3266 = vmatmul.mubr.msk.bf16.gmra.mxu0 %vm220_vm3, %v3511_v51  ;;  %3368 = vmatmul.mubr.msk.bf16.gmra.mxu1 %vm220_vm3, %v3512_v52 }
 0x126   :  { %3269 = vmatprep.mubr.msk.bf16.mxu0 %vm3596_vm1, %v4920_v0  ;;  %3371 = vmatprep.mubr.msk.bf16.mxu1 %vm3596_vm1, %v4920_v0 }
 0x127   :  { %v3067_v20 = vpop.f32.mrf.mxu0  ;;  %v3169_v21 = vpop.f32.mrf.mxu1 }
 0x129   :  { %v4130_v27 = vpop.f32.mrf.mxu0  ;;  %v4132_v28 = vpop.f32.mrf.mxu1 }
 0x12b   :  { %v3068_v45 = vpop.f32.mrf.mxu0  ;;  %v3170_v51 = vpop.f32.mrf.mxu1 }
 0x12d   :  { %v4142_v52 = vpop.f32.mrf.mxu0  ;;  %v4144_v60 = vpop.f32.mrf.mxu1  ;;  %3270 = vmatmul.mubr.msk.bf16.gmra.mxu0 %vm220_vm3, %v3513_v33  ;;  %3372 = vmatmul.mubr.msk.bf16.gmra.mxu1 %vm220_vm3, %v3514_v36  ;;  %v3515_v33 = vld [vmem:[%s4916_s0 + $0x1d0] sm:$0xff]  }
 0x12e   :  { %3273 = vmatprep.mubr.msk.bf16.mxu0 %vm3596_vm1, %v4920_v0  ;;  %3375 = vmatprep.mubr.msk.bf16.mxu1 %vm3596_vm1, %v4920_v0  ;;  %v3516_v36 = vld [vmem:[%s4916_s0 + $0x294] sm:$0xff]  }
 0x12f   :  { %v3071_v20 = vpop.f32.mrf.mxu0  ;;  %v3173_v21 = vpop.f32.mrf.mxu1 }
 0x131   :  { %v4154_v45 = vpop.f32.mrf.mxu0  ;;  %v4156_v51 = vpop.f32.mrf.mxu1 }
 0x133   :  { %v3072_v44 = vpop.f32.mrf.mxu0  ;;  %v3174_v12 = vpop.f32.mrf.mxu1 }
 0x135   :  { %v4166_v59 = vpop.f32.mrf.mxu0  ;;  %v4168_v20 = vpop.f32.mrf.mxu1  ;;  %3274 = vmatmul.mubr.msk.bf16.gmra.mxu0 %vm220_vm3, %v3515_v33  ;;  %3376 = vmatmul.mubr.msk.bf16.gmra.mxu1 %vm220_vm3, %v3516_v36  ;;  %v3517_v33 = vld [vmem:[%s4916_s0 + $0x1d8] sm:$0xff]  }
 0x136   :  { %3277 = vmatprep.mubr.msk.bf16.mxu0 %vm3596_vm1, %v4920_v0  ;;  %3379 = vmatprep.mubr.msk.bf16.mxu1 %vm3596_vm1, %v4920_v0  ;;  %v3518_v36 = vld [vmem:[%s4916_s0 + $0x29c] sm:$0xff]  }
 0x137   :  { %v3075_v3 = vpop.f32.mrf.mxu0  ;;  %v3177_v44 = vpop.f32.mrf.mxu1 }
 0x139   :  { %v4178_v12 = vpop.f32.mrf.mxu0  ;;  %v4180_v40 = vpop.f32.mrf.mxu1 }
 0x13b   :  { %v3076_v32 = vpop.f32.mrf.mxu0  ;;  %v3178_v16 = vpop.f32.mrf.mxu1 }
 0x13d   :  { %v4190_v8 = vpop.f32.mrf.mxu0  ;;  %v4192_v3 = vpop.f32.mrf.mxu1  ;;  %3278 = vmatmul.mubr.msk.bf16.gmra.mxu0 %vm220_vm3, %v3517_v33  ;;  %3380 = vmatmul.mubr.msk.bf16.gmra.mxu1 %vm220_vm3, %v3518_v36  ;;  %v3519_v33 = vld [vmem:[%s4916_s0 + $0x1e0] sm:$0xff]  }
 0x13e   :  { %3281 = vmatprep.mubr.msk.bf16.mxu0 %vm3596_vm1, %v4920_v0  ;;  %3383 = vmatprep.mubr.msk.bf16.mxu1 %vm3596_vm1, %v4920_v0  ;;  %v3520_v36 = vld [vmem:[%s4916_s0 + $0x2a4] sm:$0xff]  }
 0x13f   :  { %v3079_v21 = vpop.f32.mrf.mxu0  ;;  %v3181_v32 = vpop.f32.mrf.mxu1 }
 0x141   :  { %v4202_v16 = vpop.f32.mrf.mxu0  ;;  %v4204_v55 = vpop.f32.mrf.mxu1 }
 0x142   :  { %4973 = vst [vmem:[#allocation8_spill] sm:$0xff] %v4204_v55 }
 0x143   :  { %v3080_v50 = vpop.f32.mrf.mxu0  ;;  %v3182_v43 = vpop.f32.mrf.mxu1 }
 0x145   :  { %v4214_v38 = vpop.f32.mrf.mxu0  ;;  %v4216_v21 = vpop.f32.mrf.mxu1  ;;  %3282 = vmatmul.mubr.msk.bf16.gmra.mxu0 %vm220_vm3, %v3519_v33  ;;  %3384 = vmatmul.mubr.msk.bf16.gmra.mxu1 %vm220_vm3, %v3520_v36  ;;  %v3521_v33 = vld [vmem:[%s4916_s0 + $0x1e8] sm:$0xff]  }
 0x146   :  { %4974 = vst [vmem:[#allocation9_spill] sm:$0xff] %v4214_v38  ;;  %4975 = vst [vmem:[#allocation10_spill] sm:$0xff] %v4216_v21  ;;  %3285 = vmatprep.mubr.msk.bf16.mxu0 %vm3596_vm1, %v4920_v0  ;;  %3387 = vmatprep.mubr.msk.bf16.mxu1 %vm3596_vm1, %v4920_v0  ;;  %v3522_v36 = vld [vmem:[%s4916_s0 + $0x2ac] sm:$0xff]  }
 0x147   :  { %v3083_v44 = vpop.f32.mrf.mxu0  ;;  %v3185_v50 = vpop.f32.mrf.mxu1 }
 0x149   :  { %v4226_v43 = vpop.f32.mrf.mxu0  ;;  %v4228_v31 = vpop.f32.mrf.mxu1 }
 0x14a   :  { %4976 = vst [vmem:[#allocation11_spill] sm:$0xff] %v4226_v43  ;;  %4977 = vst [vmem:[#allocation12_spill] sm:$0xff] %v4228_v31 }
 0x14b   :  { %v3084_v26 = vpop.f32.mrf.mxu0  ;;  %v3186_v19 = vpop.f32.mrf.mxu1 }
 0x14d   :  { %v4238_v14 = vpop.f32.mrf.mxu0  ;;  %v4240_v44 = vpop.f32.mrf.mxu1  ;;  %3286 = vmatmul.mubr.msk.bf16.gmra.mxu0 %vm220_vm3, %v3521_v33  ;;  %3388 = vmatmul.mubr.msk.bf16.gmra.mxu1 %vm220_vm3, %v3522_v36  ;;  %v3523_v33 = vld [vmem:[%s4916_s0 + $0x1f0] sm:$0xff]  }
 0x14e   :  { %4978 = vst [vmem:[#allocation13_spill] sm:$0xff] %v4238_v14  ;;  %4979 = vst [vmem:[#allocation14_spill] sm:$0xff] %v4240_v44  ;;  %3289 = vmatprep.mubr.msk.bf16.mxu0 %vm3596_vm1, %v4920_v0  ;;  %3391 = vmatprep.mubr.msk.bf16.mxu1 %vm3596_vm1, %v4920_v0  ;;  %v3524_v36 = vld [vmem:[%s4916_s0 + $0x2b4] sm:$0xff]   ;;  %v4984_v44 = vmov 0.0  }
 0x14f   :  { %v3087_v32 = vpop.f32.mrf.mxu0  ;;  %v3189_v26 = vpop.f32.mrf.mxu1 }
 0x151   :  { %v4250_v19 = vpop.f32.mrf.mxu0  ;;  %v4252_v7 = vpop.f32.mrf.mxu1 }
 0x152   :  { %4980 = vst [vmem:[#allocation15_spill] sm:$0xff] %v4250_v19  ;;  %4981 = vst [vmem:[#allocation16_spill] sm:$0xff] %v4252_v7 }
 0x153   :  { %v3088_v2 = vpop.f32.mrf.mxu0  ;;  %v3190_v58 = vpop.f32.mrf.mxu1 }
 0x155   :  { %v4262_v0 = vpop.f32.mrf.mxu0  ;;  %v4264_v32 = vpop.f32.mrf.mxu1  ;;  %3290 = vmatmul.mubr.msk.bf16.gmra.mxu0 %vm220_vm3, %v3523_v33  ;;  %3392 = vmatmul.mubr.msk.bf16.gmra.mxu1 %vm220_vm3, %v3524_v36  ;;  %v3525_v33 = vld [vmem:[%s4916_s0 + $0x1f8] sm:$0xff]  }
 0x156   :  { %4982 = vst [vmem:[#allocation17_spill] sm:$0xff] %v4262_v0  ;;  %4983 = vst [vmem:[#allocation18_spill] sm:$0xff] %v4264_v32  ;;  %3293 = vmatprep.mubr.msk.bf16.mxu0 %vm3596_vm1, %v4984_v44  ;;  %3395 = vmatprep.mubr.msk.bf16.mxu1 %vm3596_vm1, %v4984_v44  ;;  %v3526_v36 = vld [vmem:[%s4916_s0 + $0x2bc] sm:$0xff]  }
 0x157   :  { %v3091_v50 = vpop.f32.mrf.mxu0  ;;  %v3193_v2 = vpop.f32.mrf.mxu1 }
 0x159   :  { %v4274_v58 = vpop.f32.mrf.mxu0  ;;  %v4276_v7 = vpop.f32.mrf.mxu1 }
 0x15a   :  { %4985 = vst [vmem:[#allocation19_spill] sm:$0xff] %v4274_v58  ;;  %4986 = vst [vmem:[#allocation20_spill] sm:$0xff] %v4276_v7 }
 0x15b   :  { %v3092_v32 = vpop.f32.mrf.mxu0  ;;  %v3194_v0 = vpop.f32.mrf.mxu1 }
 0x15d   :  { %v4286_v19 = vpop.f32.mrf.mxu0  ;;  %v4288_v50 = vpop.f32.mrf.mxu1  ;;  %3294 = vmatmul.mubr.msk.bf16.gmra.mxu0 %vm220_vm3, %v3525_v33  ;;  %3396 = vmatmul.mubr.msk.bf16.gmra.mxu1 %vm220_vm3, %v3526_v36  ;;  %v3527_v33 = vld [vmem:[%s4916_s0 + $0x200] sm:$0xff]  }
 0x15e   :  { %4987 = vst [vmem:[#allocation21_spill] sm:$0xff] %v4286_v19  ;;  %4988 = vst [vmem:[#allocation22_spill] sm:$0xff] %v4288_v50  ;;  %3297 = vmatprep.mubr.msk.bf16.mxu0 %vm3596_vm1, %v4984_v44  ;;  %3399 = vmatprep.mubr.msk.bf16.mxu1 %vm3596_vm1, %v4984_v44  ;;  %v3528_v36 = vld [vmem:[%s4916_s0 + $0x2c4] sm:$0xff]  }
 0x15f   :  { %v3095_v26 = vpop.f32.mrf.mxu0  ;;  %v3197_v32 = vpop.f32.mrf.mxu1 }
 0x161   :  { %v4298_v0 = vpop.f32.mrf.mxu0  ;;  %v4300_v7 = vpop.f32.mrf.mxu1 }
 0x162   :  { %4989 = vst [vmem:[#allocation23_spill] sm:$0xff] %v4298_v0  ;;  %4990 = vst [vmem:[#allocation24_spill] sm:$0xff] %v4300_v7 }
 0x163   :  { %v3096_v50 = vpop.f32.mrf.mxu0  ;;  %v3198_v19 = vpop.f32.mrf.mxu1 }
 0x165   :  { %v4310_v58 = vpop.f32.mrf.mxu0  ;;  %v4312_v26 = vpop.f32.mrf.mxu1  ;;  %3298 = vmatmul.mubr.msk.bf16.gmra.mxu0 %vm220_vm3, %v3527_v33  ;;  %3400 = vmatmul.mubr.msk.bf16.gmra.mxu1 %vm220_vm3, %v3528_v36  ;;  %v3529_v33 = vld [vmem:[%s4916_s0 + $0x208] sm:$0xff]  }
 0x166   :  { %4991 = vst [vmem:[#allocation25_spill] sm:$0xff] %v4310_v58  ;;  %4992 = vst [vmem:[#allocation26_spill] sm:$0xff] %v4312_v26  ;;  %3301 = vmatprep.mubr.msk.bf16.mxu0 %vm3596_vm1, %v4984_v44  ;;  %3403 = vmatprep.mubr.msk.bf16.mxu1 %vm3596_vm1, %v4984_v44  ;;  %v3530_v36 = vld [vmem:[%s4916_s0 + $0x2cc] sm:$0xff]  }
 0x167   :  { %v3099_v2 = vpop.f32.mrf.mxu0  ;;  %v3201_v50 = vpop.f32.mrf.mxu1 }
 0x169   :  { %v4322_v19 = vpop.f32.mrf.mxu0  ;;  %v4324_v7 = vpop.f32.mrf.mxu1 }
 0x16a   :  { %4993 = vst [vmem:[#allocation27_spill] sm:$0xff] %v4322_v19  ;;  %4994 = vst [vmem:[#allocation28_spill] sm:$0xff] %v4324_v7 }
 0x16b   :  { %v3100_v26 = vpop.f32.mrf.mxu0  ;;  %v3202_v58 = vpop.f32.mrf.mxu1 }
 0x16d   :  { %v4334_v0 = vpop.f32.mrf.mxu0  ;;  %v4336_v2 = vpop.f32.mrf.mxu1  ;;  %3302 = vmatmul.mubr.msk.bf16.gmra.mxu0 %vm220_vm3, %v3529_v33  ;;  %3404 = vmatmul.mubr.msk.bf16.gmra.mxu1 %vm220_vm3, %v3530_v36  ;;  %v3531_v33 = vld [vmem:[%s4916_s0 + $0x210] sm:$0xff]  }
 0x16e   :  { %4995 = vst [vmem:[#allocation29_spill] sm:$0xff] %v4334_v0  ;;  %4996 = vst [vmem:[#allocation30_spill] sm:$0xff] %v4336_v2  ;;  %3305 = vmatprep.mubr.msk.bf16.mxu0 %vm3596_vm1, %v4984_v44  ;;  %3407 = vmatprep.mubr.msk.bf16.mxu1 %vm3596_vm1, %v4984_v44  ;;  %v3532_v36 = vld [vmem:[%s4916_s0 + $0x2d4] sm:$0xff]  }
 0x16f   :  { %v3103_v32 = vpop.f32.mrf.mxu0  ;;  %v3205_v26 = vpop.f32.mrf.mxu1 }
 0x171   :  { %v4346_v58 = vpop.f32.mrf.mxu0  ;;  %v4348_v7 = vpop.f32.mrf.mxu1 }
 0x172   :  { %4997 = vst [vmem:[#allocation31_spill] sm:$0xff] %v4346_v58  ;;  %4998 = vst [vmem:[#allocation32_spill] sm:$0xff] %v4348_v7 }
 0x173   :  { %v3104_v2 = vpop.f32.mrf.mxu0  ;;  %v3206_v0 = vpop.f32.mrf.mxu1 }
 0x175   :  { %v4358_v19 = vpop.f32.mrf.mxu0  ;;  %v4360_v32 = vpop.f32.mrf.mxu1  ;;  %3306 = vmatmul.mubr.msk.bf16.gmra.mxu0 %vm220_vm3, %v3531_v33  ;;  %3408 = vmatmul.mubr.msk.bf16.gmra.mxu1 %vm220_vm3, %v3532_v36  ;;  %v3533_v33 = vld [vmem:[%s4916_s0 + $0x218] sm:$0xff]  }
 0x176   :  { %4999 = vst [vmem:[#allocation33_spill] sm:$0xff] %v4358_v19  ;;  %5000 = vst [vmem:[#allocation34_spill] sm:$0xff] %v4360_v32  ;;  %3309 = vmatprep.mubr.msk.bf16.mxu0 %vm3596_vm1, %v4984_v44  ;;  %3411 = vmatprep.mubr.msk.bf16.mxu1 %vm3596_vm1, %v4984_v44  ;;  %v3534_v36 = vld [vmem:[%s4916_s0 + $0x2dc] sm:$0xff]  }
 0x177   :  { %v3107_v50 = vpop.f32.mrf.mxu0  ;;  %v3209_v2 = vpop.f32.mrf.mxu1 }
 0x179   :  { %v4370_v0 = vpop.f32.mrf.mxu0  ;;  %v4372_v7 = vpop.f32.mrf.mxu1 }
 0x17a   :  { %5001 = vst [vmem:[#allocation35_spill] sm:$0xff] %v4370_v0  ;;  %5002 = vst [vmem:[#allocation36_spill] sm:$0xff] %v4372_v7 }
 0x17b   :  { %v3108_v32 = vpop.f32.mrf.mxu0  ;;  %v3210_v19 = vpop.f32.mrf.mxu1 }
 0x17d   :  { %v4382_v58 = vpop.f32.mrf.mxu0  ;;  %v4384_v50 = vpop.f32.mrf.mxu1  ;;  %3310 = vmatmul.mubr.msk.bf16.gmra.mxu0 %vm220_vm3, %v3533_v33  ;;  %3412 = vmatmul.mubr.msk.bf16.gmra.mxu1 %vm220_vm3, %v3534_v36  ;;  %v3535_v33 = vld [vmem:[%s4916_s0 + $0x220] sm:$0xff]  }
 0x17e   :  { %5003 = vst [vmem:[#allocation37_spill] sm:$0xff] %v4382_v58  ;;  %5004 = vst [vmem:[#allocation38_spill] sm:$0xff] %v4384_v50  ;;  %3313 = vmatprep.mubr.msk.bf16.mxu0 %vm3596_vm1, %v4984_v44  ;;  %3415 = vmatprep.mubr.msk.bf16.mxu1 %vm3596_vm1, %v4984_v44  ;;  %v3536_v36 = vld [vmem:[%s4916_s0 + $0x2e4] sm:$0xff]  }
 0x17f   :  { %v3111_v26 = vpop.f32.mrf.mxu0  ;;  %v3213_v32 = vpop.f32.mrf.mxu1 }
 0x181   :  { %v4394_v19 = vpop.f32.mrf.mxu0  ;;  %v4396_v7 = vpop.f32.mrf.mxu1 }
 0x182   :  { %5005 = vst [vmem:[#allocation39_spill] sm:$0xff] %v4394_v19  ;;  %5006 = vst [vmem:[#allocation40_spill] sm:$0xff] %v4396_v7 }
 0x183   :  { %v3112_v50 = vpop.f32.mrf.mxu0  ;;  %v3214_v58 = vpop.f32.mrf.mxu1 }
 0x185   :  { %v4406_v0 = vpop.f32.mrf.mxu0  ;;  %v4408_v26 = vpop.f32.mrf.mxu1  ;;  %3314 = vmatmul.mubr.msk.bf16.gmra.mxu0 %vm220_vm3, %v3535_v33  ;;  %3416 = vmatmul.mubr.msk.bf16.gmra.mxu1 %vm220_vm3, %v3536_v36  ;;  %v3537_v33 = vld [vmem:[%s4916_s0 + $0x228] sm:$0xff]  }
 0x186   :  { %5007 = vst [vmem:[#allocation41_spill] sm:$0xff] %v4406_v0  ;;  %5008 = vst [vmem:[#allocation42_spill] sm:$0xff] %v4408_v26  ;;  %3317 = vmatprep.mubr.msk.bf16.mxu0 %vm3596_vm1, %v4984_v44  ;;  %3419 = vmatprep.mubr.msk.bf16.mxu1 %vm3596_vm1, %v4984_v44  ;;  %v3538_v36 = vld [vmem:[%s4916_s0 + $0x2ec] sm:$0xff]  }
 0x187   :  { %v3115_v2 = vpop.f32.mrf.mxu0  ;;  %v3217_v50 = vpop.f32.mrf.mxu1 }
 0x189   :  { %v4418_v58 = vpop.f32.mrf.mxu0  ;;  %v4420_v7 = vpop.f32.mrf.mxu1 }
 0x18a   :  { %5009 = vst [vmem:[#allocation43_spill] sm:$0xff] %v4418_v58  ;;  %5010 = vst [vmem:[#allocation44_spill] sm:$0xff] %v4420_v7 }
 0x18b   :  { %v3116_v26 = vpop.f32.mrf.mxu0  ;;  %v3218_v0 = vpop.f32.mrf.mxu1 }
 0x18d   :  { %v4430_v19 = vpop.f32.mrf.mxu0  ;;  %v4432_v2 = vpop.f32.mrf.mxu1  ;;  %3318 = vmatmul.mubr.msk.bf16.gmra.mxu0 %vm220_vm3, %v3537_v33  ;;  %3420 = vmatmul.mubr.msk.bf16.gmra.mxu1 %vm220_vm3, %v3538_v36  ;;  %v3539_v33 = vld [vmem:[%s4916_s0 + $0x230] sm:$0xff]  }
 0x18e   :  { %5011 = vst [vmem:[#allocation45_spill] sm:$0xff] %v4430_v19  ;;  %5012 = vst [vmem:[#allocation46_spill] sm:$0xff] %v4432_v2  ;;  %3321 = vmatprep.mubr.msk.bf16.mxu0 %vm3596_vm1, %v4984_v44  ;;  %3423 = vmatprep.mubr.msk.bf16.mxu1 %vm3596_vm1, %v4984_v44  ;;  %v3540_v36 = vld [vmem:[%s4916_s0 + $0x2f4] sm:$0xff]  }
 0x18f   :  { %v3119_v32 = vpop.f32.mrf.mxu0  ;;  %v3221_v26 = vpop.f32.mrf.mxu1 }
 0x191   :  { %v4442_v0 = vpop.f32.mrf.mxu0  ;;  %v4444_v7 = vpop.f32.mrf.mxu1 }
 0x192   :  { %5013 = vst [vmem:[#allocation47_spill] sm:$0xff] %v4442_v0  ;;  %5014 = vst [vmem:[#allocation48_spill] sm:$0xff] %v4444_v7 }
 0x193   :  { %v3120_v2 = vpop.f32.mrf.mxu0  ;;  %v3222_v19 = vpop.f32.mrf.mxu1 }
 0x195   :  { %v4454_v58 = vpop.f32.mrf.mxu0  ;;  %v4456_v32 = vpop.f32.mrf.mxu1  ;;  %3322 = vmatmul.mubr.msk.bf16.gmra.mxu0 %vm220_vm3, %v3539_v33  ;;  %3424 = vmatmul.mubr.msk.bf16.gmra.mxu1 %vm220_vm3, %v3540_v36  ;;  %v3541_v33 = vld [vmem:[%s4916_s0 + $0x238] sm:$0xff]  }
 0x196   :  { %5015 = vst [vmem:[#allocation49_spill] sm:$0xff] %v4454_v58  ;;  %5016 = vst [vmem:[#allocation50_spill] sm:$0xff] %v4456_v32  ;;  %3325 = vmatprep.mubr.msk.bf16.mxu0 %vm3596_vm1, %v4984_v44  ;;  %3427 = vmatprep.mubr.msk.bf16.mxu1 %vm3596_vm1, %v4984_v44  ;;  %v3542_v36 = vld [vmem:[%s4916_s0 + $0x2fc] sm:$0xff]  }
 0x197   :  { %v3123_v50 = vpop.f32.mrf.mxu0  ;;  %v3225_v2 = vpop.f32.mrf.mxu1 }
 0x199   :  { %v4466_v19 = vpop.f32.mrf.mxu0  ;;  %v4468_v7 = vpop.f32.mrf.mxu1 }
 0x19a   :  { %5017 = vst [vmem:[#allocation51_spill] sm:$0xff] %v4466_v19  ;;  %5018 = vst [vmem:[#allocation52_spill] sm:$0xff] %v4468_v7 }
 0x19b   :  { %v3124_v32 = vpop.f32.mrf.mxu0  ;;  %v3226_v58 = vpop.f32.mrf.mxu1 }
 0x19d   :  { %v4478_v0 = vpop.f32.mrf.mxu0  ;;  %v4480_v50 = vpop.f32.mrf.mxu1  ;;  %3326 = vmatmul.mubr.msk.bf16.gmra.mxu0 %vm220_vm3, %v3541_v33  ;;  %3428 = vmatmul.mubr.msk.bf16.gmra.mxu1 %vm220_vm3, %v3542_v36  ;;  %v3543_v33 = vld [vmem:[%s4916_s0 + $0x240] sm:$0xff]  }
 0x19e   :  { %5019 = vst [vmem:[#allocation53_spill] sm:$0xff] %v4478_v0  ;;  %5020 = vst [vmem:[#allocation54_spill] sm:$0xff] %v4480_v50  ;;  %3329 = vmatprep.mubr.msk.bf16.mxu0 %vm3596_vm1, %v4984_v44  ;;  %3431 = vmatprep.mubr.msk.bf16.mxu1 %vm3596_vm1, %v4984_v44  ;;  %v3544_v36 = vld [vmem:[%s4916_s0 + $0x304] sm:$0xff]  }
 0x19f   :  { %v3127_v26 = vpop.f32.mrf.mxu0  ;;  %v3229_v32 = vpop.f32.mrf.mxu1 }
 0x1a1   :  { %v4490_v58 = vpop.f32.mrf.mxu0  ;;  %v4492_v7 = vpop.f32.mrf.mxu1 }
 0x1a2   :  { %5021 = vst [vmem:[#allocation55_spill] sm:$0xff] %v4490_v58  ;;  %5022 = vst [vmem:[#allocation56_spill] sm:$0xff] %v4492_v7  ;;  %v3545_v58 = vld [vmem:[%s4916_s0 + $0x248] ss:$0 sps:$4 sm:$0xff]  }
 0x1a3   :  { %v3128_v50 = vpop.f32.mrf.mxu0  ;;  %v3230_v0 = vpop.f32.mrf.mxu1 }
 0x1a5   :  { %v4502_v19 = vpop.f32.mrf.mxu0  ;;  %v4504_v26 = vpop.f32.mrf.mxu1  ;;  %3330 = vmatmul.mubr.msk.bf16.gmra.mxu0 %vm220_vm3, %v3543_v33  ;;  %3432 = vmatmul.mubr.msk.bf16.gmra.mxu1 %vm220_vm3, %v3544_v36  ;;  %v3546_v33 = vld [vmem:[%s4916_s0 + $0x30c] ss:$0 sps:$4 sm:$0xff]  }
 0x1a6   :  { %5023 = vst [vmem:[#allocation57_spill] sm:$0xff] %v4502_v19  ;;  %5024 = vst [vmem:[#allocation58_spill] sm:$0xff] %v4504_v26  ;;  %3333 = vmatprep.mubr.msk.bf16.mxu0 %vm3596_vm1, %v4984_v44  ;;  %3435 = vmatprep.mubr.msk.bf16.mxu1 %vm3596_vm1, %v4984_v44  ;;  %v5025_v44 = vmax.f32 %v3926_v56, %v3929_v57 }
 0x1a7   :  { %v3131_v2 = vpop.f32.mrf.mxu0  ;;  %v3233_v50 = vpop.f32.mrf.mxu1 }
 0x1a8   :  { %v4525_v2 = vld [vmem:[#allocation4] ss:$0 sm:$0xff] }
 0x1a9   :  { %v532_v0 = vpop.f32.mrf.mxu0  ;;  %v1012_v7 = vpop.f32.mrf.mxu1 }
 0x1ab   :  { %v3132_v36 = vpop.f32.mrf.mxu0  ;;  %v3234_v32 = vpop.f32.mrf.mxu1 }
 0x1ac   :  { %v5026_v32 = vmax.f32 %v3938_v61, %v3940_v62 }
 0x1ad   :  { %v1346_v26 = vpop.f32.mrf.mxu0  ;;  %3334 = vmatmul.mubr.msk.bf16.gmra.mxu0 %vm220_vm3, %v3545_v58  ;;  %v1875_v19 = vpop.f32.mrf.mxu1  ;;  %3436 = vmatmul.mubr.msk.bf16.gmra.mxu1 %vm220_vm3, %v3546_v33 }
 0x1ae   :  { %v1544_v7 = vmax.f32 %v5025_v44, %v1346_v26 }
 0x1af   :  { %v3239_v50 = vpop.f32.mrf.mxu0  ;;  %v3341_v0 = vpop.f32.mrf.mxu1 }
 0x1b0   :  { %v2073_v14 = vmax.f32 %v1544_v7, %v1875_v19  ;;  %v5027_v19 = vmax.f32 %v3950_v5, %v3952_v6 }
 0x1b1   :  { %v1349_v31 = vpop.f32.mrf.mxu0  ;;  %v1878_v43 = vpop.f32.mrf.mxu1 }
 0x1b2   :  { %v2129_v36 = vadd.f32 %v4525_v2, %v2073_v14  ;;  %v1545_v58 = vmax.f32 %v5026_v32, %v1349_v31 }
 0x1b3   :  { %v3240_v21 = vpop.f32.mrf.mxu0  ;;  %v3342_v38 = vpop.f32.mrf.mxu1 }
 0x1b4   :  { %v2178_v33 = vmax.f32 %v2129_v36, 0.0  ;;  %v2074_v55 = vmax.f32 %v1545_v58, %v1878_v43 }
 0x1b5   :  { %v1354_v56 = vpop.f32.mrf.mxu0  ;;  %v1883_v57 = vpop.f32.mrf.mxu1 }
 0x1b6   :  { %v2878_v26 = vpack.c.bf16 %v2178_v33, %v2178_v33  ;;  %v2130_v44 = vadd.f32 %v4525_v2, %v2074_v55  ;;  %v1546_v7 = vmax.f32 %v5027_v19, %v1354_v56  ;;  %v5028_v55 = vmax.f32 %v3962_v10, %v3964_v11 }
 0x1b7   :  { %v3243_v50 = vpop.f32.mrf.mxu0  ;;  %v3345_v14 = vpop.f32.mrf.mxu1 }
 0x1b8   :  { %2425 = vst.msk [vmem:[%s4919_s3] sm:$0xf] %vm2424_vm4, %v2878_v26  ;;  %v2179_v61 = vmax.f32 %v2130_v44, 0.0  ;;  %v2075_v62 = vmax.f32 %v1546_v7, %v1883_v57  ;;  %v5029_v26 = vmax.f32 %v3974_v17, %v3976_v18 }
 0x1b9   :  { %v1357_v31 = vpop.f32.mrf.mxu0  ;;  %v1886_v38 = vpop.f32.mrf.mxu1 }
 0x1ba   :  { %v2879_v21 = vpack.c.bf16 %v2179_v61, %v2179_v61  ;;  %v2131_v43 = vadd.f32 %v4525_v2, %v2075_v62  ;;  %v1547_v0 = vmax.f32 %v5028_v55, %v1357_v31  ;;  %v5030_v31 = vmax.f32 %v3986_v22, %v3988_v23 }
 0x1bb   :  { %v3244_v5 = vpop.f32.mrf.mxu0  ;;  %v3346_v6 = vpop.f32.mrf.mxu1 }
 0x1bc   :  { %2426 = vst.msk [vmem:[%s4919_s3 + $0x4] sm:$0xf] %vm2424_vm4, %v2879_v21  ;;  %v2180_v36 = vmax.f32 %v2131_v43, 0.0  ;;  %v2076_v32 = vmax.f32 %v1547_v0, %v1886_v38 }
 0x1bd   :  { %v1362_v58 = vpop.f32.mrf.mxu0  ;;  %v1891_v33 = vpop.f32.mrf.mxu1 }
 0x1be   :  { %v2880_v56 = vpack.c.bf16 %v2180_v36, %v2180_v36  ;;  %v2132_v57 = vadd.f32 %v4525_v2, %v2076_v32  ;;  %v1548_v44 = vmax.f32 %v5029_v26, %v1362_v58  ;;  %v5031_v36 = vmax.f32 %v3998_v29, %v4000_v30 }
 0x1bf   :  { %v3247_v10 = vpop.f32.mrf.mxu0  ;;  %v3349_v11 = vpop.f32.mrf.mxu1 }
 0x1c0   :  { %2427 = vst.msk [vmem:[%s4919_s3 + $0x8] sm:$0xf] %vm2424_vm4, %v2880_v56  ;;  %v2181_v19 = vmax.f32 %v2132_v57, 0.0  ;;  %v2077_v7 = vmax.f32 %v1548_v44, %v1891_v33  ;;  %v5032_v10 = vmax.f32 %v4010_v34, %v4012_v35 }
 0x1c1   :  { %v1365_v50 = vpop.f32.mrf.mxu0  ;;  %v1894_v14 = vpop.f32.mrf.mxu1 }
 0x1c2   :  { %v2881_v61 = vpack.c.bf16 %v2181_v19, %v2181_v19  ;;  %v2133_v62 = vadd.f32 %v4525_v2, %v2077_v7  ;;  %v1549_v38 = vmax.f32 %v5030_v31, %v1365_v50  ;;  %v5033_v31 = vmax.f32 %v4022_v41, %v4024_v42 }
 0x1c3   :  { %v3248_v17 = vpop.f32.mrf.mxu0  ;;  %v3350_v18 = vpop.f32.mrf.mxu1 }
 0x1c4   :  { %2428 = vst.msk [vmem:[%s4919_s3 + $0xc] sm:$0xf] %vm2424_vm4, %v2881_v61  ;;  %v2182_v21 = vmax.f32 %v2133_v62, 0.0  ;;  %v2078_v43 = vmax.f32 %v1549_v38, %v1894_v14 }
 0x1c5   :  { %v1370_v55 = vpop.f32.mrf.mxu0  ;;  %v1899_v0 = vpop.f32.mrf.mxu1 }
 0x1c6   :  { %v2882_v5 = vpack.c.bf16 %v2182_v21, %v2182_v21  ;;  %v2134_v6 = vadd.f32 %v4525_v2, %v2078_v43  ;;  %v1550_v32 = vmax.f32 %v5031_v36, %v1370_v55 }
 0x1c7   :  { %v3251_v22 = vpop.f32.mrf.mxu0  ;;  %v3353_v23 = vpop.f32.mrf.mxu1 }
 0x1c8   :  { %2429 = vst.msk [vmem:[%s4919_s3 + $0x10] sm:$0xf] %vm2424_vm4, %v2882_v5  ;;  %v2183_v58 = vmax.f32 %v2134_v6, 0.0  ;;  %v2079_v33 = vmax.f32 %v1550_v32, %v1899_v0  ;;  %v5034_v5 = vmax.f32 %v4034_v46, %v4036_v47 }
 0x1c9   :  { %v1373_v56 = vpop.f32.mrf.mxu0  ;;  %v1902_v57 = vpop.f32.mrf.mxu1 }
 0x1ca   :  { %v2883_v26 = vpack.c.bf16 %v2183_v58, %v2183_v58  ;;  %v2135_v44 = vadd.f32 %v4525_v2, %v2079_v33  ;;  %v1551_v11 = vmax.f32 %v5032_v10, %v1373_v56  ;;  %v5035_v56 = vmax.f32 %v4046_v53, %v4048_v54 }
 0x1cb   :  { %v3252_v29 = vpop.f32.mrf.mxu0  ;;  %v3354_v30 = vpop.f32.mrf.mxu1 }
 0x1cc   :  { %2430 = vst.msk [vmem:[%s4919_s3 + $0x14] sm:$0xf] %vm2424_vm4, %v2883_v26  ;;  %v2184_v19 = vmax.f32 %v2135_v44, 0.0  ;;  %v2080_v7 = vmax.f32 %v1551_v11, %v1902_v57 }
 0x1cd   :  { %v1378_v50 = vpop.f32.mrf.mxu0  ;;  %v1907_v14 = vpop.f32.mrf.mxu1 }
 0x1ce   :  { %v2884_v61 = vpack.c.bf16 %v2184_v19, %v2184_v19  ;;  %v2136_v62 = vadd.f32 %v4525_v2, %v2080_v7  ;;  %v1552_v38 = vmax.f32 %v5033_v31, %v1378_v50  ;;  %v5036_v19 = vmax.f32 %v4058_v63, %v4060_v1 }
 0x1cf   :  { %v3255_v34 = vpop.f32.mrf.mxu0  ;;  %v3357_v35 = vpop.f32.mrf.mxu1 }
 0x1d0   :  { %2431 = vst.msk [vmem:[%s4919_s3 + $0x18] sm:$0xf] %vm2424_vm4, %v2884_v61  ;;  %v2185_v17 = vmax.f32 %v2136_v62, 0.0  ;;  %v2081_v18 = vmax.f32 %v1552_v38, %v1907_v14  ;;  %v5037_v34 = vmax.f32 %v4070_v13, %v4072_v15 }
 0x1d1   :  { %v1381_v21 = vpop.f32.mrf.mxu0  ;;  %v1910_v43 = vpop.f32.mrf.mxu1 }
 0x1d2   :  { %v2885_v55 = vpack.c.bf16 %v2185_v17, %v2185_v17  ;;  %v2137_v0 = vadd.f32 %v4525_v2, %v2081_v18  ;;  %v1553_v6 = vmax.f32 %v5034_v5, %v1381_v21  ;;  %v5038_v5 = vmax.f32 %v4082_v24, %v4084_v25 }
 0x1d3   :  { %v3256_v41 = vpop.f32.mrf.mxu0  ;;  %v3358_v42 = vpop.f32.mrf.mxu1 }
 0x1d4   :  { %2432 = vst.msk [vmem:[%s4919_s3 + $0x1c] sm:$0xf] %vm2424_vm4, %v2885_v55  ;;  %v2186_v36 = vmax.f32 %v2137_v0, 0.0  ;;  %v2082_v32 = vmax.f32 %v1553_v6, %v1910_v43 }
 0x1d5   :  { %v1386_v22 = vpop.f32.mrf.mxu0  ;;  %v1915_v23 = vpop.f32.mrf.mxu1 }
 0x1d6   :  { %v2886_v58 = vpack.c.bf16 %v2186_v36, %v2186_v36  ;;  %v2138_v33 = vadd.f32 %v4525_v2, %v2082_v32  ;;  %v1554_v57 = vmax.f32 %v5035_v56, %v1386_v22 }
 0x1d7   :  { %v3259_v46 = vpop.f32.mrf.mxu0  ;;  %v3361_v47 = vpop.f32.mrf.mxu1 }
 0x1d8   :  { %2433 = vst.msk [vmem:[%s4919_s3 + $0x20] sm:$0xf] %vm2424_vm4, %v2886_v58  ;;  %v2187_v26 = vmax.f32 %v2138_v33, 0.0  ;;  %v2083_v44 = vmax.f32 %v1554_v57, %v1915_v23  ;;  %v5039_v58 = vmax.f32 %v4094_v37, %v4096_v39 }
 0x1d9   :  { %v1389_v10 = vpop.f32.mrf.mxu0  ;;  %v1918_v11 = vpop.f32.mrf.mxu1 }
 0x1da   :  { %v2887_v29 = vpack.c.bf16 %v2187_v26, %v2187_v26  ;;  %v2139_v30 = vadd.f32 %v4525_v2, %v2083_v44  ;;  %v1555_v7 = vmax.f32 %v5036_v19, %v1389_v10  ;;  %v5040_v10 = vmax.f32 %v4106_v48, %v4108_v49 }
 0x1db   :  { %v3260_v53 = vpop.f32.mrf.mxu0  ;;  %v3362_v54 = vpop.f32.mrf.mxu1 }
 0x1dc   :  { %2434 = vst.msk [vmem:[%s4919_s3 + $0x24] sm:$0xf] %vm2424_vm4, %v2887_v29  ;;  %v2188_v50 = vmax.f32 %v2139_v30, 0.0  ;;  %v2084_v14 = vmax.f32 %v1555_v7, %v1918_v11 }
 0x1dd   :  { %v1394_v61 = vpop.f32.mrf.mxu0  ;;  %v1923_v62 = vpop.f32.mrf.mxu1 }
 0x1de   :  { %v2888_v31 = vpack.c.bf16 %v2188_v50, %v2188_v50  ;;  %v2140_v38 = vadd.f32 %v4525_v2, %v2084_v14  ;;  %v1556_v35 = vmax.f32 %v5037_v34, %v1394_v61  ;;  %v5041_v50 = vmax.f32 %v4118_v4, %v4120_v9 }
 0x1df   :  { %v3263_v63 = vpop.f32.mrf.mxu0  ;;  %v3365_v1 = vpop.f32.mrf.mxu1 }
 0x1e0   :  { %2435 = vst.msk [vmem:[%s4919_s3 + $0x28] sm:$0xf] %vm2424_vm4, %v2888_v31  ;;  %v2189_v17 = vmax.f32 %v2140_v38, 0.0  ;;  %v2085_v18 = vmax.f32 %v1556_v35, %v1923_v62  ;;  %v5042_v63 = vmax.f32 %v4130_v27, %v4132_v28 }
 0x1e1   :  { %v1397_v21 = vpop.f32.mrf.mxu0  ;;  %v1926_v43 = vpop.f32.mrf.mxu1 }
 0x1e2   :  { %v2889_v55 = vpack.c.bf16 %v2189_v17, %v2189_v17  ;;  %v2141_v0 = vadd.f32 %v4525_v2, %v2085_v18  ;;  %v1557_v6 = vmax.f32 %v5038_v5, %v1397_v21  ;;  %v5043_v5 = vmax.f32 %v4142_v52, %v4144_v60 }
 0x1e3   :  { %v3264_v13 = vpop.f32.mrf.mxu0  ;;  %v3366_v15 = vpop.f32.mrf.mxu1 }
 0x1e4   :  { %2436 = vst.msk [vmem:[%s4919_s3 + $0x2c] sm:$0xf] %vm2424_vm4, %v2889_v55  ;;  %v2190_v41 = vmax.f32 %v2141_v0, 0.0  ;;  %v2086_v42 = vmax.f32 %v1557_v6, %v1926_v43 }
 0x1e5   :  { %v1402_v36 = vpop.f32.mrf.mxu0  ;;  %v1931_v32 = vpop.f32.mrf.mxu1 }
 0x1e6   :  { %v2890_v22 = vpack.c.bf16 %v2190_v41, %v2190_v41  ;;  %v2142_v23 = vadd.f32 %v4525_v2, %v2086_v42  ;;  %v1558_v33 = vmax.f32 %v5039_v58, %v1402_v36 }
 0x1e7   :  { %v3267_v24 = vpop.f32.mrf.mxu0  ;;  %v3369_v25 = vpop.f32.mrf.mxu1 }
 0x1e8   :  { %2437 = vst.msk [vmem:[%s4919_s3 + $0x30] sm:$0xf] %vm2424_vm4, %v2890_v22  ;;  %v2191_v56 = vmax.f32 %v2142_v23, 0.0  ;;  %v2087_v57 = vmax.f32 %v1558_v33, %v1931_v32  ;;  %v5044_v22 = vmax.f32 %v4154_v45, %v4156_v51 }
 0x1e9   :  { %v1405_v46 = vpop.f32.mrf.mxu0  ;;  %v1934_v47 = vpop.f32.mrf.mxu1 }
 0x1ea   :  { %v2891_v26 = vpack.c.bf16 %v2191_v56, %v2191_v56  ;;  %v2143_v44 = vadd.f32 %v4525_v2, %v2087_v57  ;;  %v1559_v11 = vmax.f32 %v5040_v10, %v1405_v46  ;;  %v5045_v46 = vmax.f32 %v4166_v59, %v4168_v20 }
 0x1eb   :  { %v3268_v37 = vpop.f32.mrf.mxu0  ;;  %v3370_v39 = vpop.f32.mrf.mxu1 }
 0x1ec   :  { %2438 = vst.msk [vmem:[%s4919_s3 + $0x34] sm:$0xf] %vm2424_vm4, %v2891_v26  ;;  %v2192_v29 = vmax.f32 %v2143_v44, 0.0  ;;  %v2088_v30 = vmax.f32 %v1559_v11, %v1934_v47 }
 0x1ed   :  { %v1410_v19 = vpop.f32.mrf.mxu0  ;;  %v1939_v7 = vpop.f32.mrf.mxu1 }
 0x1ee   :  { %v2892_v53 = vpack.c.bf16 %v2192_v29, %v2192_v29  ;;  %v2144_v54 = vadd.f32 %v4525_v2, %v2088_v30  ;;  %v1560_v14 = vmax.f32 %v5041_v50, %v1410_v19  ;;  %v5046_v29 = vmax.f32 %v4178_v12, %v4180_v40 }
 0x1ef   :  { %v3271_v48 = vpop.f32.mrf.mxu0  ;;  %v3373_v49 = vpop.f32.mrf.mxu1 }
 0x1f0   :  { %2439 = vst.msk [vmem:[%s4919_s3 + $0x38] sm:$0xf] %vm2424_vm4, %v2892_v53  ;;  %v2193_v61 = vmax.f32 %v2144_v54, 0.0  ;;  %v2089_v62 = vmax.f32 %v1560_v14, %v1939_v7  ;;  %v5047_v48 = vmax.f32 %v4190_v8, %v4192_v3 }
 0x1f1   :  { %v1413_v31 = vpop.f32.mrf.mxu0  ;;  %v1942_v38 = vpop.f32.mrf.mxu1 }
 0x1f2   :  { %v2893_v34 = vpack.c.bf16 %v2193_v61, %v2193_v61  ;;  %v2145_v35 = vadd.f32 %v4525_v2, %v2089_v62  ;;  %v1561_v1 = vmax.f32 %v5042_v63, %v1413_v31  ;;  %v5048_v63 = vld [vmem:[#allocation8_spill] sm:$0xff] }
 0x1f3   :  { %v3272_v4 = vpop.f32.mrf.mxu0  ;;  %v3374_v9 = vpop.f32.mrf.mxu1 }
 0x1f4   :  { %2440 = vst.msk [vmem:[%s4919_s3 + $0x3c] sm:$0xf] %vm2424_vm4, %v2893_v34  ;;  %v2194_v17 = vmax.f32 %v2145_v35, 0.0  ;;  %v2090_v18 = vmax.f32 %v1561_v1, %v1942_v38  ;;  %v5049_v1 = vmax.f32 %v4202_v16, %v5048_v63 }
 0x1f5   :  { %v1418_v21 = vpop.f32.mrf.mxu0  ;;  %v1947_v43 = vpop.f32.mrf.mxu1 }
 0x1f6   :  { %v2894_v55 = vpack.c.bf16 %v2194_v17, %v2194_v17  ;;  %v2146_v0 = vadd.f32 %v4525_v2, %v2090_v18  ;;  %v1562_v6 = vmax.f32 %v5043_v5, %v1418_v21  ;;  %v5051_v5 = vld [vmem:[#allocation10_spill] sm:$0xff] }
 0x1f7   :  { %v3275_v27 = vpop.f32.mrf.mxu0  ;;  %v3377_v28 = vpop.f32.mrf.mxu1 }
 0x1f8   :  { %2441 = vst.msk [vmem:[%s4919_s3 + $0x40] sm:$0xf] %vm2424_vm4, %v2894_v55  ;;  %v2195_v13 = vmax.f32 %v2146_v0, 0.0  ;;  %v2091_v15 = vmax.f32 %v1562_v6, %v1947_v43  ;;  %v5050_v0 = vld [vmem:[#allocation9_spill] sm:$0xff] }
 0x1f9   :  { %v1421_v41 = vpop.f32.mrf.mxu0  ;;  %v1950_v42 = vpop.f32.mrf.mxu1  ;;  %v5052_v6 = vmax.f32 %v5050_v0, %v5051_v5 }
 0x1fa   :  { %v2895_v36 = vpack.c.bf16 %v2195_v13, %v2195_v13  ;;  %v2147_v32 = vadd.f32 %v4525_v2, %v2091_v15  ;;  %v1563_v23 = vmax.f32 %v5044_v22, %v1421_v41  ;;  %v5053_v22 = vld [vmem:[#allocation11_spill] sm:$0xff] }
 0x1fb   :  { %v3276_v52 = vpop.f32.mrf.mxu0  ;;  %v3378_v60 = vpop.f32.mrf.mxu1 }
 0x1fc   :  { %2442 = vst.msk [vmem:[%s4919_s3 + $0x44] sm:$0xf] %vm2424_vm4, %v2895_v36  ;;  %v2196_v58 = vmax.f32 %v2147_v32, 0.0  ;;  %v2092_v33 = vmax.f32 %v1563_v23, %v1950_v42  ;;  %v5054_v23 = vld [vmem:[#allocation12_spill] sm:$0xff] }
 0x1fd   :  { %v1426_v24 = vpop.f32.mrf.mxu0  ;;  %v1955_v25 = vpop.f32.mrf.mxu1  ;;  %v5055_v52 = vmax.f32 %v5053_v22, %v5054_v23 }
 0x1fe   :  { %v2896_v56 = vpack.c.bf16 %v2196_v58, %v2196_v58  ;;  %v2148_v57 = vadd.f32 %v4525_v2, %v2092_v33  ;;  %v1564_v47 = vmax.f32 %v5045_v46, %v1426_v24 }
 0x1ff   :  { %v3279_v45 = vpop.f32.mrf.mxu0  ;;  %v3381_v51 = vpop.f32.mrf.mxu1 }
 0x200   :  { %2443 = vst.msk [vmem:[%s4919_s3 + $0x48] sm:$0xf] %vm2424_vm4, %v2896_v56  ;;  %v2197_v26 = vmax.f32 %v2148_v57, 0.0  ;;  %v2093_v44 = vmax.f32 %v1564_v47, %v1955_v25  ;;  %v5056_v45 = vld [vmem:[#allocation13_spill] sm:$0xff]  ;;  %v5057_v51 = vld [vmem:[#allocation14_spill] sm:$0xff] }
 0x201   :  { %v1429_v10 = vpop.f32.mrf.mxu0  ;;  %v1958_v11 = vpop.f32.mrf.mxu1 }
 0x202   :  { %v2897_v37 = vpack.c.bf16 %v2197_v26, %v2197_v26  ;;  %v2149_v39 = vadd.f32 %v4525_v2, %v2093_v44  ;;  %v1565_v30 = vmax.f32 %v5046_v29, %v1429_v10  ;;  %v5058_v26 = vmax.f32 %v5056_v45, %v5057_v51 }
 0x203   :  { %v3280_v59 = vpop.f32.mrf.mxu0  ;;  %v3382_v20 = vpop.f32.mrf.mxu1 }
 0x204   :  { %2444 = vst.msk [vmem:[%s4919_s3 + $0x4c] sm:$0xf] %vm2424_vm4, %v2897_v37  ;;  %v2198_v19 = vmax.f32 %v2149_v39, 0.0  ;;  %v2094_v7 = vmax.f32 %v1565_v30, %v1958_v11 }
 0x205   :  { %v1434_v53 = vpop.f32.mrf.mxu0  ;;  %v1963_v54 = vpop.f32.mrf.mxu1 }
 0x206   :  { %v2898_v50 = vpack.c.bf16 %v2198_v19, %v2198_v19  ;;  %v2150_v14 = vadd.f32 %v4525_v2, %v2094_v7  ;;  %v1566_v49 = vmax.f32 %v5047_v48, %v1434_v53  ;;  %v5059_v19 = vld [vmem:[#allocation15_spill] sm:$0xff]  ;;  %v5060_v7 = vld [vmem:[#allocation16_spill] sm:$0xff] }
 0x207   :  { %v3283_v40 = vpop.f32.mrf.mxu0  ;;  %v3385_v12 = vpop.f32.mrf.mxu1  ;;  %v5061_v53 = vmax.f32 %v5059_v19, %v5060_v7 }
 0x208   :  { %2445 = vst.msk [vmem:[%s4919_s3 + $0x50] sm:$0xf] %vm2424_vm4, %v2898_v50  ;;  %v2199_v61 = vmax.f32 %v2150_v14, 0.0  ;;  %v2095_v62 = vmax.f32 %v1566_v49, %v1963_v54 }
 0x209   :  { %v1437_v31 = vpop.f32.mrf.mxu0  ;;  %v1966_v38 = vpop.f32.mrf.mxu1 }
 0x20a   :  { %v2899_v34 = vpack.c.bf16 %v2199_v61, %v2199_v61  ;;  %v2151_v35 = vadd.f32 %v4525_v2, %v2095_v62  ;;  %v1567_v4 = vmax.f32 %v5049_v1, %v1437_v31  ;;  %v5062_v31 = vld [vmem:[#allocation17_spill] sm:$0xff] }
 0x20b   :  { %v3284_v8 = vpop.f32.mrf.mxu0  ;;  %v3386_v3 = vpop.f32.mrf.mxu1 }
 0x20c   :  { %2446 = vst.msk [vmem:[%s4919_s3 + $0x54] sm:$0xf] %vm2424_vm4, %v2899_v34  ;;  %v2200_v9 = vmax.f32 %v2151_v35, 0.0  ;;  %v2096_v17 = vmax.f32 %v1567_v4, %v1966_v38  ;;  %v5063_v38 = vld [vmem:[#allocation18_spill] sm:$0xff] }
 0x20d   :  { %v1442_v18 = vpop.f32.mrf.mxu0  ;;  %v1971_v21 = vpop.f32.mrf.mxu1  ;;  %v5064_v34 = vmax.f32 %v5062_v31, %v5063_v38 }
 0x20e   :  { %v2900_v43 = vpack.c.bf16 %v2200_v9, %v2200_v9  ;;  %v2152_v55 = vadd.f32 %v4525_v2, %v2096_v17  ;;  %v1568_v27 = vmax.f32 %v5052_v6, %v1442_v18 }
 0x20f   :  { %v3287_v16 = vpop.f32.mrf.mxu0  ;;  %v3389_v28 = vpop.f32.mrf.mxu1 }
 0x210   :  { %2447 = vst.msk [vmem:[%s4919_s3 + $0x58] sm:$0xf] %vm2424_vm4, %v2900_v43  ;;  %v2201_v13 = vmax.f32 %v2152_v55, 0.0  ;;  %v2097_v15 = vmax.f32 %v1568_v27, %v1971_v21  ;;  %v5065_v21 = vld [vmem:[#allocation19_spill] sm:$0xff]  ;;  %v5066_v43 = vld [vmem:[#allocation20_spill] sm:$0xff] }
 0x211   :  { %v1445_v41 = vpop.f32.mrf.mxu0  ;;  %v1974_v42 = vpop.f32.mrf.mxu1  ;;  %v5067_v55 = vmax.f32 %v5065_v21, %v5066_v43 }
 0x212   :  { %v2901_v36 = vpack.c.bf16 %v2201_v13, %v2201_v13  ;;  %v2153_v32 = vadd.f32 %v4525_v2, %v2097_v15  ;;  %v1569_v60 = vmax.f32 %v5055_v52, %v1445_v41 }
 0x213   :  { %v3288_v58 = vpop.f32.mrf.mxu0  ;;  %v3390_v33 = vpop.f32.mrf.mxu1 }
 0x214   :  { %2448 = vst.msk [vmem:[%s4919_s3 + $0x5c] sm:$0xf] %vm2424_vm4, %v2901_v36  ;;  %v2202_v24 = vmax.f32 %v2153_v32, 0.0  ;;  %v2098_v25 = vmax.f32 %v1569_v60, %v1974_v42  ;;  %v5068_v42 = vld [vmem:[#allocation21_spill] sm:$0xff]  ;;  %v5069_v36 = vld [vmem:[#allocation22_spill] sm:$0xff] }
 0x215   :  { %v1450_v56 = vpop.f32.mrf.mxu0  ;;  %v1979_v57 = vpop.f32.mrf.mxu1  ;;  %v5070_v32 = vmax.f32 %v5068_v42, %v5069_v36 }
 0x216   :  { %v2902_v46 = vpack.c.bf16 %v2202_v24, %v2202_v24  ;;  %v2154_v47 = vadd.f32 %v4525_v2, %v2098_v25  ;;  %v1570_v44 = vmax.f32 %v5058_v26, %v1450_v56 }
 0x217   :  { %v3291_v10 = vpop.f32.mrf.mxu0  ;;  %v3393_v11 = vpop.f32.mrf.mxu1 }
 0x218   :  { %2449 = vst.msk [vmem:[%s4919_s3 + $0x60] sm:$0xf] %vm2424_vm4, %v2902_v46  ;;  %v2203_v37 = vmax.f32 %v2154_v47, 0.0  ;;  %v2099_v39 = vmax.f32 %v1570_v44, %v1979_v57  ;;  %v5071_v57 = vld [vmem:[#allocation23_spill] sm:$0xff]  ;;  %v5072_v46 = vld [vmem:[#allocation24_spill] sm:$0xff] }
 0x219   :  { %v1453_v29 = vpop.f32.mrf.mxu0  ;;  %v1982_v30 = vpop.f32.mrf.mxu1  ;;  %v5073_v47 = vmax.f32 %v5071_v57, %v5072_v46 }
 0x21a   :  { %v2903_v59 = vpack.c.bf16 %v2203_v37, %v2203_v37  ;;  %v2155_v20 = vadd.f32 %v4525_v2, %v2099_v39  ;;  %v1571_v54 = vmax.f32 %v5061_v53, %v1453_v29 }
 0x21b   :  { %v3292_v50 = vpop.f32.mrf.mxu0  ;;  %v3394_v14 = vpop.f32.mrf.mxu1 }
 0x21c   :  { %2450 = vst.msk [vmem:[%s4919_s3 + $0x64] sm:$0xf] %vm2424_vm4, %v2903_v59  ;;  %v2204_v48 = vmax.f32 %v2155_v20, 0.0  ;;  %v2100_v49 = vmax.f32 %v1571_v54, %v1982_v30  ;;  %v5074_v30 = vld [vmem:[#allocation25_spill] sm:$0xff]  ;;  %v5075_v59 = vld [vmem:[#allocation26_spill] sm:$0xff] }
 0x21d   :  { %v1458_v40 = vpop.f32.mrf.mxu0  ;;  %v1987_v12 = vpop.f32.mrf.mxu1  ;;  %v5076_v20 = vmax.f32 %v5074_v30, %v5075_v59 }
 0x21e   :  { %v2904_v61 = vpack.c.bf16 %v2204_v48, %v2204_v48  ;;  %v2156_v62 = vadd.f32 %v4525_v2, %v2100_v49  ;;  %v1572_v35 = vmax.f32 %v5064_v34, %v1458_v40 }
 0x21f   :  { %v3295_v63 = vpop.f32.mrf.mxu0  ;;  %v3397_v1 = vpop.f32.mrf.mxu1 }
 0x220   :  { %2451 = vst.msk [vmem:[%s4919_s3 + $0x68] sm:$0xf] %vm2424_vm4, %v2904_v61  ;;  %v2205_v4 = vmax.f32 %v2156_v62, 0.0  ;;  %v2101_v8 = vmax.f32 %v1572_v35, %v1987_v12  ;;  %v5077_v12 = vld [vmem:[#allocation27_spill] sm:$0xff]  ;;  %v5078_v61 = vld [vmem:[#allocation28_spill] sm:$0xff] }
 0x221   :  { %v1461_v3 = vpop.f32.mrf.mxu0  ;;  %v1990_v9 = vpop.f32.mrf.mxu1  ;;  %v5079_v62 = vmax.f32 %v5077_v12, %v5078_v61 }
 0x222   :  { %v2905_v17 = vpack.c.bf16 %v2205_v4, %v2205_v4  ;;  %v2157_v18 = vadd.f32 %v4525_v2, %v2101_v8  ;;  %v1573_v0 = vmax.f32 %v5067_v55, %v1461_v3 }
 0x223   :  { %v3296_v5 = vpop.f32.mrf.mxu0  ;;  %v3398_v6 = vpop.f32.mrf.mxu1 }
 0x224   :  { %2452 = vst.msk [vmem:[%s4919_s3 + $0x6c] sm:$0xf] %vm2424_vm4, %v2905_v17  ;;  %v2206_v27 = vmax.f32 %v2157_v18, 0.0  ;;  %v2102_v16 = vmax.f32 %v1573_v0, %v1990_v9  ;;  %v5080_v9 = vld [vmem:[#allocation29_spill] sm:$0xff]  ;;  %v5081_v17 = vld [vmem:[#allocation30_spill] sm:$0xff] }
 0x225   :  { %v1466_v28 = vpop.f32.mrf.mxu0  ;;  %v1995_v13 = vpop.f32.mrf.mxu1  ;;  %v5082_v18 = vmax.f32 %v5080_v9, %v5081_v17 }
 0x226   :  { %v2906_v15 = vpack.c.bf16 %v2206_v27, %v2206_v27  ;;  %v2158_v41 = vadd.f32 %v4525_v2, %v2102_v16  ;;  %v1574_v22 = vmax.f32 %v5070_v32, %v1466_v28 }
 0x227   :  { %v3299_v23 = vpop.f32.mrf.mxu0  ;;  %v3401_v52 = vpop.f32.mrf.mxu1 }
 0x228   :  { %2453 = vst.msk [vmem:[%s4919_s3 + $0x70] sm:$0xf] %vm2424_vm4, %v2906_v15  ;;  %v2207_v60 = vmax.f32 %v2158_v41, 0.0  ;;  %v2103_v58 = vmax.f32 %v1574_v22, %v1995_v13  ;;  %v5083_v13 = vld [vmem:[#allocation31_spill] sm:$0xff]  ;;  %v5084_v15 = vld [vmem:[#allocation32_spill] sm:$0xff] }
 0x229   :  { %v1469_v33 = vpop.f32.mrf.mxu0  ;;  %v1998_v24 = vpop.f32.mrf.mxu1  ;;  %v5085_v41 = vmax.f32 %v5083_v13, %v5084_v15 }
 0x22a   :  { %v2907_v25 = vpack.c.bf16 %v2207_v60, %v2207_v60  ;;  %v2159_v56 = vadd.f32 %v4525_v2, %v2103_v58  ;;  %v1575_v45 = vmax.f32 %v5073_v47, %v1469_v33 }
 0x22b   :  { %v3300_v51 = vpop.f32.mrf.mxu0  ;;  %v3402_v26 = vpop.f32.mrf.mxu1 }
 0x22c   :  { %2454 = vst.msk [vmem:[%s4919_s3 + $0x74] sm:$0xf] %vm2424_vm4, %v2907_v25  ;;  %v2208_v44 = vmax.f32 %v2159_v56, 0.0  ;;  %v2104_v10 = vmax.f32 %v1575_v45, %v1998_v24  ;;  %v5086_v24 = vld [vmem:[#allocation33_spill] sm:$0xff]  ;;  %v5087_v25 = vld [vmem:[#allocation34_spill] sm:$0xff] }
 0x22d   :  { %v1474_v11 = vpop.f32.mrf.mxu0  ;;  %v2003_v37 = vpop.f32.mrf.mxu1  ;;  %v5088_v56 = vmax.f32 %v5086_v24, %v5087_v25 }
 0x22e   :  { %v2908_v39 = vpack.c.bf16 %v2208_v44, %v2208_v44  ;;  %v2160_v29 = vadd.f32 %v4525_v2, %v2104_v10  ;;  %v1576_v19 = vmax.f32 %v5076_v20, %v1474_v11 }
 0x22f   :  { %v3303_v7 = vpop.f32.mrf.mxu0  ;;  %v3405_v53 = vpop.f32.mrf.mxu1 }
 0x230   :  { %2455 = vst.msk [vmem:[%s4919_s3 + $0x78] sm:$0xf] %vm2424_vm4, %v2908_v39  ;;  %v2209_v54 = vmax.f32 %v2160_v29, 0.0  ;;  %v2105_v50 = vmax.f32 %v1576_v19, %v2003_v37  ;;  %v5089_v37 = vld [vmem:[#allocation35_spill] sm:$0xff]  ;;  %v5090_v39 = vld [vmem:[#allocation36_spill] sm:$0xff] }
 0x231   :  { %v1477_v14 = vpop.f32.mrf.mxu0  ;;  %v2006_v48 = vpop.f32.mrf.mxu1  ;;  %v5091_v29 = vmax.f32 %v5089_v37, %v5090_v39 }
 0x232   :  { %v2909_v49 = vpack.c.bf16 %v2209_v54, %v2209_v54  ;;  %v2161_v40 = vadd.f32 %v4525_v2, %v2105_v50  ;;  %v1577_v31 = vmax.f32 %v5079_v62, %v1477_v14 }
 0x233   :  { %v3304_v38 = vpop.f32.mrf.mxu0  ;;  %v3406_v34 = vpop.f32.mrf.mxu1 }
 0x234   :  { %2456 = vst.msk [vmem:[%s4919_s3 + $0x7c] sm:$0xf] %vm2424_vm4, %v2909_v49  ;;  %v2210_v35 = vmax.f32 %v2161_v40, 0.0  ;;  %v2106_v63 = vmax.f32 %v1577_v31, %v2006_v48  ;;  %v5092_v48 = vld [vmem:[#allocation37_spill] sm:$0xff]  ;;  %v5093_v49 = vld [vmem:[#allocation38_spill] sm:$0xff] }
 0x235   :  { %v1482_v1 = vpop.f32.mrf.mxu0  ;;  %v2011_v4 = vpop.f32.mrf.mxu1  ;;  %v5094_v40 = vmax.f32 %v5092_v48, %v5093_v49 }
 0x236   :  { %v2910_v8 = vpack.c.bf16 %v2210_v35, %v2210_v35  ;;  %v2162_v3 = vadd.f32 %v4525_v2, %v2106_v63  ;;  %v1578_v21 = vmax.f32 %v5082_v18, %v1482_v1 }
 0x237   :  { %v3307_v43 = vpop.f32.mrf.mxu0  ;;  %v3409_v55 = vpop.f32.mrf.mxu1 }
 0x238   :  { %2457 = vst.msk [vmem:[%s4919_s3 + $0x80] sm:$0xf] %vm2424_vm4, %v2910_v8  ;;  %v2211_v0 = vmax.f32 %v2162_v3, 0.0  ;;  %v2107_v5 = vmax.f32 %v1578_v21, %v2011_v4  ;;  %v5095_v4 = vld [vmem:[#allocation39_spill] sm:$0xff]  ;;  %v5096_v8 = vld [vmem:[#allocation40_spill] sm:$0xff] }
 0x239   :  { %v1485_v6 = vpop.f32.mrf.mxu0  ;;  %v2014_v27 = vpop.f32.mrf.mxu1  ;;  %v5097_v3 = vmax.f32 %v5095_v4, %v5096_v8 }
 0x23a   :  { %v2911_v16 = vpack.c.bf16 %v2211_v0, %v2211_v0  ;;  %v2163_v28 = vadd.f32 %v4525_v2, %v2107_v5  ;;  %v1579_v42 = vmax.f32 %v5085_v41, %v1485_v6 }
 0x23b   :  { %v3308_v36 = vpop.f32.mrf.mxu0  ;;  %v3410_v32 = vpop.f32.mrf.mxu1 }
 0x23c   :  { %2458 = vst.msk [vmem:[%s4919_s3 + $0x84] sm:$0xf] %vm2424_vm4, %v2911_v16  ;;  %v2212_v22 = vmax.f32 %v2163_v28, 0.0  ;;  %v2108_v23 = vmax.f32 %v1579_v42, %v2014_v27  ;;  %v5098_v27 = vld [vmem:[#allocation41_spill] sm:$0xff]  ;;  %v5099_v16 = vld [vmem:[#allocation42_spill] sm:$0xff] }
 0x23d   :  { %v1490_v52 = vpop.f32.mrf.mxu0  ;;  %v2019_v60 = vpop.f32.mrf.mxu1  ;;  %v5100_v28 = vmax.f32 %v5098_v27, %v5099_v16 }
 0x23e   :  { %v2912_v58 = vpack.c.bf16 %v2212_v22, %v2212_v22  ;;  %v2164_v33 = vadd.f32 %v4525_v2, %v2108_v23  ;;  %v1580_v57 = vmax.f32 %v5088_v56, %v1490_v52 }
 0x23f   :  { %v3311_v46 = vpop.f32.mrf.mxu0  ;;  %v3413_v47 = vpop.f32.mrf.mxu1 }
 0x240   :  { %2459 = vst.msk [vmem:[%s4919_s3 + $0x88] sm:$0xf] %vm2424_vm4, %v2912_v58  ;;  %v2213_v45 = vmax.f32 %v2164_v33, 0.0  ;;  %v2109_v51 = vmax.f32 %v1580_v57, %v2019_v60  ;;  %v5101_v60 = vld [vmem:[#allocation43_spill] sm:$0xff]  ;;  %v5102_v58 = vld [vmem:[#allocation44_spill] sm:$0xff] }
 0x241   :  { %v1493_v26 = vpop.f32.mrf.mxu0  ;;  %v2022_v44 = vpop.f32.mrf.mxu1  ;;  %v5103_v33 = vmax.f32 %v5101_v60, %v5102_v58 }
 0x242   :  { %v2913_v10 = vpack.c.bf16 %v2213_v45, %v2213_v45  ;;  %v2165_v11 = vadd.f32 %v4525_v2, %v2109_v51  ;;  %v1581_v30 = vmax.f32 %v5091_v29, %v1493_v26 }
 0x243   :  { %v3312_v59 = vpop.f32.mrf.mxu0  ;;  %v3414_v20 = vpop.f32.mrf.mxu1 }
 0x244   :  { %2460 = vst.msk [vmem:[%s4919_s3 + $0x8c] sm:$0xf] %vm2424_vm4, %v2913_v10  ;;  %v2214_v19 = vmax.f32 %v2165_v11, 0.0  ;;  %v2110_v7 = vmax.f32 %v1581_v30, %v2022_v44  ;;  %v5104_v44 = vld [vmem:[#allocation45_spill] sm:$0xff]  ;;  %v5105_v10 = vld [vmem:[#allocation46_spill] sm:$0xff] }
 0x245   :  { %v1498_v53 = vpop.f32.mrf.mxu0  ;;  %v2027_v54 = vpop.f32.mrf.mxu1  ;;  %v5106_v11 = vmax.f32 %v5104_v44, %v5105_v10 }
 0x246   :  { %v2914_v50 = vpack.c.bf16 %v2214_v19, %v2214_v19  ;;  %v2166_v14 = vadd.f32 %v4525_v2, %v2110_v7  ;;  %v1582_v12 = vmax.f32 %v5094_v40, %v1498_v53 }
 0x247   :  { %v3315_v61 = vpop.f32.mrf.mxu0  ;;  %v3417_v62 = vpop.f32.mrf.mxu1 }
 0x248   :  { %2461 = vst.msk [vmem:[%s4919_s3 + $0x90] sm:$0xf] %vm2424_vm4, %v2914_v50  ;;  %v2215_v31 = vmax.f32 %v2166_v14, 0.0  ;;  %v2111_v38 = vmax.f32 %v1582_v12, %v2027_v54  ;;  %v5107_v54 = vld [vmem:[#allocation47_spill] sm:$0xff]  ;;  %v5108_v50 = vld [vmem:[#allocation48_spill] sm:$0xff] }
 0x249   :  { %v1501_v34 = vpop.f32.mrf.mxu0  ;;  %v2030_v35 = vpop.f32.mrf.mxu1  ;;  %v5109_v14 = vmax.f32 %v5107_v54, %v5108_v50 }
 0x24a   :  { %v2915_v63 = vpack.c.bf16 %v2215_v31, %v2215_v31  ;;  %v2167_v1 = vadd.f32 %v4525_v2, %v2111_v38  ;;  %v1583_v9 = vmax.f32 %v5097_v3, %v1501_v34 }
 0x24b   :  { %v3316_v17 = vpop.f32.mrf.mxu0  ;;  %v3418_v18 = vpop.f32.mrf.mxu1 }
 0x24c   :  { %2462 = vst.msk [vmem:[%s4919_s3 + $0x94] sm:$0xf] %vm2424_vm4, %v2915_v63  ;;  %v2216_v21 = vmax.f32 %v2167_v1, 0.0  ;;  %v2112_v43 = vmax.f32 %v1583_v9, %v2030_v35  ;;  %v5110_v35 = vld [vmem:[#allocation49_spill] sm:$0xff]  ;;  %v5111_v63 = vld [vmem:[#allocation50_spill] sm:$0xff] }
 0x24d   :  { %v1506_v55 = vpop.f32.mrf.mxu0  ;;  %v2035_v0 = vpop.f32.mrf.mxu1  ;;  %v5112_v1 = vmax.f32 %v5110_v35, %v5111_v63 }
 0x24e   :  { %v2916_v5 = vpack.c.bf16 %v2216_v21, %v2216_v21  ;;  %v2168_v6 = vadd.f32 %v4525_v2, %v2112_v43  ;;  %v1584_v13 = vmax.f32 %v5100_v28, %v1506_v55 }
 0x24f   :  { %v3319_v15 = vpop.f32.mrf.mxu0  ;;  %v3421_v41 = vpop.f32.mrf.mxu1 }
 0x250   :  { %2463 = vst.msk [vmem:[%s4919_s3 + $0x98] sm:$0xf] %vm2424_vm4, %v2916_v5  ;;  %v2217_v42 = vmax.f32 %v2168_v6, 0.0  ;;  %v2113_v36 = vmax.f32 %v1584_v13, %v2035_v0  ;;  %v5113_v0 = vld [vmem:[#allocation51_spill] sm:$0xff]  ;;  %v5114_v5 = vld [vmem:[#allocation52_spill] sm:$0xff] }
 0x251   :  { %v1509_v32 = vpop.f32.mrf.mxu0  ;;  %v2038_v22 = vpop.f32.mrf.mxu1  ;;  %v5115_v6 = vmax.f32 %v5113_v0, %v5114_v5 }
 0x252   :  { %v2917_v23 = vpack.c.bf16 %v2217_v42, %v2217_v42  ;;  %v2169_v52 = vadd.f32 %v4525_v2, %v2113_v36  ;;  %v1585_v24 = vmax.f32 %v5103_v33, %v1509_v32 }
 0x253   :  { %v3320_v25 = vpop.f32.mrf.mxu0  ;;  %v3422_v56 = vpop.f32.mrf.mxu1 }
 0x254   :  { %2464 = vst.msk [vmem:[%s4919_s3 + $0x9c] sm:$0xf] %vm2424_vm4, %v2917_v23  ;;  %v2218_v57 = vmax.f32 %v2169_v52, 0.0  ;;  %v2114_v46 = vmax.f32 %v1585_v24, %v2038_v22  ;;  %v5116_v22 = vld [vmem:[#allocation53_spill] sm:$0xff]  ;;  %v5117_v23 = vld [vmem:[#allocation54_spill] sm:$0xff] }
 0x255   :  { %v1514_v47 = vpop.f32.mrf.mxu0  ;;  %v2043_v45 = vpop.f32.mrf.mxu1  ;;  %v5118_v52 = vmax.f32 %v5116_v22, %v5117_v23 }
 0x256   :  { %v2918_v51 = vpack.c.bf16 %v2218_v57, %v2218_v57  ;;  %v2170_v26 = vadd.f32 %v4525_v2, %v2114_v46  ;;  %v1586_v37 = vmax.f32 %v5106_v11, %v1514_v47 }
 0x257   :  { %v3323_v39 = vpop.f32.mrf.mxu0  ;;  %v3425_v29 = vpop.f32.mrf.mxu1 }
 0x258   :  { %2465 = vst.msk [vmem:[%s4919_s3 + $0xa0] sm:$0xf] %vm2424_vm4, %v2918_v51  ;;  %v2219_v30 = vmax.f32 %v2170_v26, 0.0  ;;  %v2115_v59 = vmax.f32 %v1586_v37, %v2043_v45  ;;  %v5119_v45 = vld [vmem:[#allocation55_spill] sm:$0xff]  ;;  %v5120_v51 = vld [vmem:[#allocation56_spill] sm:$0xff] }
 0x259   :  { %v1517_v20 = vpop.f32.mrf.mxu0  ;;  %v2046_v19 = vpop.f32.mrf.mxu1  ;;  %v5121_v26 = vmax.f32 %v5119_v45, %v5120_v51 }
 0x25a   :  { %v2919_v7 = vpack.c.bf16 %v2219_v30, %v2219_v30  ;;  %v2171_v53 = vadd.f32 %v4525_v2, %v2115_v59  ;;  %v1587_v48 = vmax.f32 %v5109_v14, %v1517_v20 }
 0x25b   :  { %v3324_v49 = vpop.f32.mrf.mxu0  ;;  %v3426_v40 = vpop.f32.mrf.mxu1 }
 0x25c   :  { %2466 = vst.msk [vmem:[%s4919_s3 + $0xa4] sm:$0xf] %vm2424_vm4, %v2919_v7  ;;  %v2220_v12 = vmax.f32 %v2171_v53, 0.0  ;;  %v2116_v61 = vmax.f32 %v1587_v48, %v2046_v19  ;;  %v5122_v19 = vld [vmem:[#allocation57_spill] sm:$0xff]  ;;  %v5123_v7 = vld [vmem:[#allocation58_spill] sm:$0xff] }
 0x25d   :  { %v1522_v62 = vpop.f32.mrf.mxu0  ;;  %v2051_v31 = vpop.f32.mrf.mxu1  ;;  %v5124_v53 = vmax.f32 %v5122_v19, %v5123_v7 }
 0x25e   :  { %v2920_v38 = vpack.c.bf16 %v2220_v12, %v2220_v12  ;;  %v2172_v34 = vadd.f32 %v4525_v2, %v2116_v61  ;;  %v1588_v4 = vmax.f32 %v5112_v1, %v1522_v62 }
 0x25f   :  { %v3327_v8 = vpop.f32.mrf.mxu0  ;;  %v3429_v3 = vpop.f32.mrf.mxu1 }
 0x260   :  { %2467 = vst.msk [vmem:[%s4919_s3 + $0xa8] sm:$0xf] %vm2424_vm4, %v2920_v38  ;;  %v2221_v9 = vmax.f32 %v2172_v34, 0.0  ;;  %v2117_v17 = vmax.f32 %v1588_v4, %v2051_v31 }
 0x261   :  { %v1525_v18 = vpop.f32.mrf.mxu0  ;;  %v2054_v21 = vpop.f32.mrf.mxu1 }
 0x262   :  { %v2921_v43 = vpack.c.bf16 %v2221_v9, %v2221_v9  ;;  %v2173_v55 = vadd.f32 %v4525_v2, %v2117_v17  ;;  %v1589_v27 = vmax.f32 %v5115_v6, %v1525_v18 }
 0x263   :  { %v3328_v16 = vpop.f32.mrf.mxu0  ;;  %v3430_v28 = vpop.f32.mrf.mxu1 }
 0x264   :  { %2468 = vst.msk [vmem:[%s4919_s3 + $0xac] sm:$0xf] %vm2424_vm4, %v2921_v43  ;;  %v2222_v13 = vmax.f32 %v2173_v55, 0.0  ;;  %v2118_v15 = vmax.f32 %v1589_v27, %v2054_v21 }
 0x265   :  { %v1530_v41 = vpop.f32.mrf.mxu0  ;;  %v2059_v42 = vpop.f32.mrf.mxu1 }
 0x266   :  { %v2922_v36 = vpack.c.bf16 %v2222_v13, %v2222_v13  ;;  %v2174_v32 = vadd.f32 %v4525_v2, %v2118_v15  ;;  %v1590_v60 = vmax.f32 %v5118_v52, %v1530_v41 }
 0x267   :  { %v3331_v58 = vpop.f32.mrf.mxu0  ;;  %v3433_v33 = vpop.f32.mrf.mxu1 }
 0x268   :  { %2469 = vst.msk [vmem:[%s4919_s3 + $0xb0] sm:$0xf] %vm2424_vm4, %v2922_v36  ;;  %v2223_v24 = vmax.f32 %v2174_v32, 0.0  ;;  %v2119_v25 = vmax.f32 %v1590_v60, %v2059_v42 }
 0x269   :  { %v1533_v56 = vpop.f32.mrf.mxu0  ;;  %v2062_v57 = vpop.f32.mrf.mxu1 }
 0x26a   :  { %v2923_v46 = vpack.c.bf16 %v2223_v24, %v2223_v24  ;;  %v2175_v47 = vadd.f32 %v4525_v2, %v2119_v25  ;;  %v1591_v44 = vmax.f32 %v5121_v26, %v1533_v56 }
 0x26b   :  { %v3332_v10 = vpop.f32.mrf.mxu0  ;;  %v3434_v11 = vpop.f32.mrf.mxu1 }
 0x26c   :  { %2470 = vst.msk [vmem:[%s4919_s3 + $0xb4] sm:$0xf] %vm2424_vm4, %v2923_v46  ;;  %v2224_v37 = vmax.f32 %v2175_v47, 0.0  ;;  %v2120_v39 = vmax.f32 %v1591_v44, %v2062_v57 }
 0x26d   :  { %v1538_v29 = vpop.f32.mrf.mxu0  ;;  %v2067_v30 = vpop.f32.mrf.mxu1 }
 0x26e   :  { %v2924_v59 = vpack.c.bf16 %v2224_v37, %v2224_v37  ;;  %v2176_v20 = vadd.f32 %v4525_v2, %v2120_v39  ;;  %v1592_v54 = vmax.f32 %v5124_v53, %v1538_v29 }
 0x26f   :  { %v3335_v50 = vpop.f32.mrf.mxu0  ;;  %v3437_v14 = vpop.f32.mrf.mxu1 }
 0x270   :  { %2471 = vst.msk [vmem:[%s4919_s3 + $0xb8] sm:$0xf] %vm2424_vm4, %v2924_v59  ;;  %v2225_v48 = vmax.f32 %v2176_v20, 0.0  ;;  %v2121_v49 = vmax.f32 %v1592_v54, %v2067_v30 }
 0x271   :  { %v1541_v40 = vpop.f32.mrf.mxu0  ;;  %v2070_v12 = vpop.f32.mrf.mxu1 }
 0x272   :  { %v2925_v61 = vpack.c.bf16 %v2225_v48, %v2225_v48  ;;  %v2177_v62 = vadd.f32 %v4525_v2, %v2121_v49 }
 0x273   :  { %v3336_v31 = vpop.f32.mrf.mxu0  ;;  %v3438_v38 = vpop.f32.mrf.mxu1 }
 0x274   :  { %2472 = vst.msk [vmem:[%s4919_s3 + $0xbc] sm:$0xf] %vm2424_vm4, %v2925_v61  ;;  %v2226_v34 = vmax.f32 %v2177_v62, 0.0 }
 0x276   :  { %v2926_v35 = vpack.c.bf16 %v2226_v34, %v2226_v34 }
 0x278   :  { %2473 = vst.msk [vmem:[%s4919_s3 + $0xc0] sm:$0xf] %vm2424_vm4, %v2926_v35 }
 0x279   :  { %2478 = vsyncpa [#allocation3], 1 }
 0x27a   :  { %2479 = vsyncpa [#allocation5], 1 }

// kernel: minist_forward.4
= control target key start
LH: loop header
LB: loop body
LE: loop exit
PB: predicated region body
PF: predicated region fallthrough
CT: control target
= control target key end

     0   :  { %v2362_v0 = vmov 0.0   ;;  %vm2363_vm0 = vmmov 0   ;;  %vm285_vm1 = vcmask 261120   ;;  %vm1580_vm2 = vcmask 519168   ;;  %s3137_s1 = inlined_call_operand.vmem [shape: bf16[288,64], index: 1, kind: input, shape index: {}]   ;;  %s3138_s0 = inlined_call_operand.vmem [shape: bf16[4,98,288], index: 0, kind: input, shape index: {}]   ;;  %s3139_s2 = inlined_call_operand.vmem [shape: f32[1,64], index: 2, kind: input, shape index: {}]   ;;  %s3140_s3 = inlined_call_operand.vmem [shape: bf16[98,64], index: 3, kind: output, shape index: {}]  }
   0x1   :  { %2102 = vmatprep.subr.bf16.mxu1 %v2362_v0  ;;  %v2388_v1 = vld [vmem:[%s3137_s1 + $0x78] sm:$0xff]   ;;  %2106 = vmatprep.mubr.msk.bf16.mxu1 %vm2363_vm0, %v2362_v0  ;;  %v2395_v2 = vld [vmem:[%s3137_s1 + $0x88] sm:$0xff]   ;;  %v2407_v4 = vld [vmem:[%s3137_s1 + $0x70] sm:$0xff]   ;;  %vm1593_vm3 = vcmask 516096  }
   0x2   :  { %1834 = vmatprep.subr.bf16.mxu0 %v2388_v1  ;;  %v2401_v3 = vld [vmem:[%s3137_s1 + $0x38] sm:$0xff]   ;;  %2103 = vmatpush3.bf16.msra.mxu1 %v2395_v2  ;;  %v2414_v5 = vld [vmem:[%s3137_s1 + $0x80] sm:$0xff]   ;;  %v2420_v6 = vld [vmem:[%s3137_s1 + $0x30] sm:$0xff]  }
   0x3   :  { %1835 = vmatpush3.bf16.msra.mxu0 %v2401_v3  ;;  %2104 = vmatprep.subr.bf16.mxu1 %v2362_v0  ;;  %v2242_v7 = vld [vmem:[%s3138_s0 + $0x8] ss:$12 sps:$4 sm:$0xff]   ;;  %v2442_v10 = vld [vmem:[%s3137_s1 + $0x60] sm:$0xff]   ;;  %v2459_v12 = vld [vmem:[%s3137_s1 + $0x58] sm:$0xff]  }
   0x4   :  { %1836 = vmatprep.subr.bf16.mxu0 %v2407_v4  ;;  %v2429_v8 = vld [vmem:[%s3137_s1 + $0x68] sm:$0xff]   ;;  %v2452_v11 = vld [vmem:[%s3137_s1 + $0x20] sm:$0xff]   ;;  %v2469_v14 = vld [vmem:[%s3137_s1 + $0x18] sm:$0xff]  }
   0x5   :  { %v2435_v9 = vld [vmem:[%s3137_s1 + $0x28] sm:$0xff]   ;;  %v2476_v15 = vld [vmem:[%s3137_s1 + $0x50] sm:$0xff]   ;;  %v2252_v17 = vld [vmem:[%s3138_s0 + $0x38] ss:$12 sps:$4 sm:$0xff]  }
   0x6   :  { %2105 = vmatpush3.bf16.msra.mxu1 %v2414_v5  ;;  %v2247_v13 = vld [vmem:[%s3138_s0 + $0x20] ss:$12 sps:$4 sm:$0xff]   ;;  %v2482_v16 = vld [vmem:[%s3137_s1 + $0x10] sm:$0xff]   ;;  %v2261_v25 = vld [vmem:[%s3138_s0 + $0x1c] ss:$12 sps:$4 sm:$0xff]  }
   0x7   :  { %1837 = vmatpush3.bf16.msra.mxu0 %v2420_v6  ;;  %1901 = vmatprep.subr.bf16.mxu1 %v2388_v1  ;;  %v2496_v18 = vld [vmem:[%s3137_s1 + $0x48] sm:$0xff]   ;;  %v2259_v19 = vld [vmem:[%s3138_s0 + $0x4] ss:$12 sps:$4 sm:$0xff]   ;;  %v2265_v28 = vld [vmem:[%s3138_s0 + $0x34] ss:$12 sps:$4 sm:$0xff]  }
   0x8   :  { %1838 = vmatprep.subr.bf16.mxu0 %v2429_v8  ;;  %v2506_v20 = vld [vmem:[%s3137_s1 + $0x8] sm:$0xff]   ;;  %339 = vmatprep.mubr.bf16.mxu0 %v2259_v19  ;;  %v2512_v21 = vld [vmem:[%s3137_s1 + $0x40] sm:$0xff]   ;;  %v2260_v23 = vld [vmem:[%s3138_s0 + $0x50] ss:$12 sps:$4 sm:$0xff]  }
   0x9   :  { %2107 = vmatmul.mubr.msk.bf16.vlgmr.msra.gmra.mxu1 %vm285_vm1, %v2242_v7  ;;  %v2523_v22 = vld [vmem:[%s3137_s1] sm:$0xff]   ;;  %v2263_v26 = vld [vmem:[%s3138_s0 + $0x68] ss:$12 sps:$4 sm:$0xff]   ;;  %v2268_v30 = vld [vmem:[%s3138_s0 + $0x30] ss:$12 sps:$4 sm:$0xff]  }
   0xa   :  { %2110 = vmatprep.mubr.msk.bf16.mxu1 %vm2363_vm0, %v2362_v0  ;;  %1902 = vmatpush3.bf16.msra.mxu1 %v2401_v3  ;;  %v2257_v24 = vld [vmem:[%s3138_s0] ss:$12 sps:$4 sm:$0xff]   ;;  %v2264_v27 = vld [vmem:[%s3138_s0 + $0x18] ss:$12 sps:$4 sm:$0xff]   ;;  %v2272_v33 = vld [vmem:[%s3138_s0 + $0x48] ss:$12 sps:$4 sm:$0xff]  }
   0xb   :  { %1839 = vmatpush3.bf16.msra.mxu0 %v2435_v9  ;;  %1903 = vmatprep.subr.bf16.mxu1 %v2407_v4  ;;  %v2267_v29 = vld [vmem:[%s3138_s0 + $0x80] ss:$12 sps:$4 sm:$0xff]   ;;  %v2271_v32 = vld [vmem:[%s3138_s0 + $0x98] ss:$0 sps:$4 sm:$0x11]  }
   0xc   :  { %1840 = vmatprep.subr.bf16.mxu0 %v2442_v10  ;;  %v2269_v31 = vld [vmem:[%s3138_s0 + $0x4c] ss:$12 sps:$4 sm:$0xff]   ;;  %v2276_v35 = vld [vmem:[%s3138_s0 + $0x64] ss:$12 sps:$4 sm:$0xff]   ;;  %v2273_v36 = vld [vmem:[%s3138_s0 + $0x9c] ss:$12 sps:$4 sm:$0xff]  }
   0xd   :  { %v2275_v34 = vld [vmem:[%s3138_s0 + $0xa0] ss:$12 sps:$4 sm:$0xff]   ;;  %v2279_v38 = vld [vmem:[%s3138_s0 + $0xb8] ss:$12 sps:$4 sm:$0xff]   ;;  %v2281_v39 = vld [vmem:[%s3138_s0 + $0x7c] ss:$12 sps:$4 sm:$0xff]  }
   0xe   :  { %1904 = vmatpush3.bf16.msra.mxu1 %v2420_v6  ;;  %v2278_v37 = vld [vmem:[%s3138_s0 + $0x60] ss:$12 sps:$4 sm:$0xff]   ;;  %v75_v40 = vld [vmem:[%s3138_s0 + $0x90] sm:$0x11]  ;;  %v2284_v42 = vld [vmem:[%s3138_s0 + $0x78] ss:$12 sps:$4 sm:$0xff]  }
   0xf   :  { %1841 = vmatpush3.bf16.msra.mxu0 %v2452_v11  ;;  %1905 = vmatprep.subr.bf16.mxu1 %v2429_v8  ;;  %v2283_v41 = vld [vmem:[%s3138_s0 + $0xb4] ss:$12 sps:$4 sm:$0xff]   ;;  %v2285_v43 = vld [vmem:[%s3138_s0 + $0xd0] ss:$12 sps:$4 sm:$0xff]   ;;  %v1618_v44 = vcombine.high %v75_v40, %v75_v40  ;;  %v2288_v45 = vld [vmem:[%s3138_s0 + $0xcc] ss:$12 sps:$4 sm:$0xff]   ;;  %v1617_v46 = vcombine.low %v75_v40, %v75_v40 }
  0x10   :  { %1842 = vmatprep.subr.bf16.mxu0 %v2459_v12  ;;  %v2290_v47 = vld [vmem:[%s3138_s0 + $0xe8] ss:$12 sps:$4 sm:$0xff]   ;;  %v2292_v48 = vld [vmem:[%s3138_s0 + $0xe4] ss:$12 sps:$4 sm:$0xff]   ;;  %v2294_v50 = vld [vmem:[%s3138_s0 + $0x100] ss:$12 sps:$4 sm:$0xff]  }
  0x11   :  { %2111 = vmatmul.mubr.msk.bf16.gmra.mxu1 %vm285_vm1, %v2247_v13  ;;  %v2293_v49 = vld [vmem:[%s3138_s0 + $0xa4] ss:$12 sps:$4 sm:$0xff]   ;;  %v2296_v51 = vld [vmem:[%s3138_s0 + $0xfc] ss:$12 sps:$4 sm:$0xff]   ;;  %v2300_v55 = vld [vmem:[%s3138_s0 + $0x114] ss:$12 sps:$4 sm:$0xff]  }
  0x12   :  { %2114 = vmatprep.mubr.msk.bf16.mxu1 %vm2363_vm0, %v2362_v0  ;;  %1906 = vmatpush3.bf16.msra.mxu1 %v2435_v9  ;;  %v2297_v52 = vld [vmem:[%s3138_s0 + $0xbc] ss:$12 sps:$4 sm:$0xff]   ;;  %v2298_v53 = vld [vmem:[%s3138_s0 + $0x118] ss:$12 sps:$4 sm:$0xff]   ;;  %v1669_v54 = vld [vmem:[%s3138_s0 + $0x12c] sm:$0x11] }
  0x13   :  { %1843 = vmatpush3.bf16.msra.mxu0 %v2469_v14  ;;  %1907 = vmatprep.subr.bf16.mxu1 %v2442_v10  ;;  %v2301_v56 = vld [vmem:[%s3138_s0 + $0xd4] ss:$12 sps:$4 sm:$0xff]   ;;  %v1690_v57 = vcombine.high %v1669_v54, %v1669_v54  ;;  %v1689_v58 = vcombine.low %v1669_v54, %v1669_v54  ;;  %v2304_v59 = vld [vmem:[%s3138_s0 + $0xec] ss:$12 sps:$4 sm:$0xff]   ;;  %v2307_v60 = vld [vmem:[%s3138_s0 + $0x13c] ss:$12 sps:$4 sm:$0xff]  }
  0x14   :  { %1844 = vmatprep.subr.bf16.mxu0 %v2476_v15  ;;  %v2305_v61 = vld [vmem:[%s3138_s0 + $0x138] ss:$12 sps:$4 sm:$0xff]   ;;  %v2309_v63 = vld [vmem:[%s3138_s0 + $0x154] ss:$12 sps:$4 sm:$0xff]   ;;  %v2312_v7 = vld [vmem:[%s3138_s0 + $0x11c] ss:$12 sps:$4 sm:$0xff]  }
  0x15   :  { %v2308_v62 = vld [vmem:[%s3138_s0 + $0x104] ss:$12 sps:$4 sm:$0xff]   ;;  %v2313_v13 = vld [vmem:[%s3138_s0 + $0x16c] ss:$12 sps:$4 sm:$0xff]  }
  0x16   :  { %1908 = vmatpush3.bf16.msra.mxu1 %v2452_v11 }
  0x17   :  { %1845 = vmatpush3.bf16.msra.mxu0 %v2482_v16  ;;  %1909 = vmatprep.subr.bf16.mxu1 %v2459_v12 }
  0x18   :  { %1846 = vmatprep.subr.bf16.mxu0 %v2496_v18 }
  0x19   :  { %2115 = vmatmul.mubr.msk.bf16.gmra.mxu1 %vm285_vm1, %v2252_v17  ;;  %v2328_v17 = vld [vmem:[%s3138_s0 + $0x170] ss:$12 sps:$4 sm:$0xff]  }
  0x1a   :  { %2118 = vmatprep.mubr.msk.bf16.mxu1 %vm2363_vm0, %v2362_v0  ;;  %1910 = vmatpush3.bf16.msra.mxu1 %v2469_v14 }
  0x1b   :  { %1847 = vmatpush3.bf16.msra.mxu0 %v2506_v20  ;;  %1911 = vmatprep.subr.bf16.mxu1 %v2476_v15 }
  0x1c   :  { %1848 = vmatprep.subr.bf16.mxu0 %v2512_v21 }
  0x1e   :  { %1912 = vmatpush3.bf16.msra.mxu1 %v2482_v16 }
  0x1f   :  { %1849 = vmatpush3.bf16.msra.mxu0 %v2523_v22  ;;  %1913 = vmatprep.subr.bf16.mxu1 %v2496_v18 }
  0x20   :  { %2134 = vmatprep.subr.bf16.mxu0 %v2362_v0 }
  0x21   :  { %2119 = vmatmul.mubr.msk.bf16.gmra.mxu1 %vm285_vm1, %v2260_v23  ;;  %v2335_v23 = vld [vmem:[%s3138_s0 + $0x1a0] ss:$12 sps:$4 sm:$0xff]  }
  0x22   :  { %340 = vmatmul.mubr.bf16.vlgmr.msra.gmra.mxu0 %v2257_v24  ;;  %2122 = vmatprep.mubr.msk.bf16.mxu1 %vm2363_vm0, %v2362_v0  ;;  %v2336_v24 = vld [vmem:[%s3138_s0 + $0x1f0] ss:$12 sps:$4 sm:$0xff]  }
  0x23   :  { %2135 = vmatpush3.bf16.msra.mxu0 %v2395_v2  ;;  %347 = vmatprep.mubr.bf16.mxu0 %v2261_v25  ;;  %v2338_v25 = vld [vmem:[%s3138_s0 + $0x1ec] ss:$12 sps:$4 sm:$0xff]  }
  0x24   :  { %1914 = vmatpush3.bf16.msra.mxu1 %v2506_v20  ;;  %2136 = vmatprep.subr.bf16.mxu0 %v2362_v0 }
  0x25   :  { %1915 = vmatprep.subr.bf16.mxu1 %v2512_v21 }
  0x27   :  { %2137 = vmatpush3.bf16.msra.mxu0 %v2414_v5 }
  0x28   :  { %1916 = vmatpush3.bf16.msra.mxu1 %v2523_v22  ;;  %2166 = vmatprep.subr.bf16.mxu0 %v2362_v0 }
  0x29   :  { %2123 = vmatmul.mubr.msk.bf16.gmra.mxu1 %vm285_vm1, %v2263_v26  ;;  %1968 = vmatprep.subr.bf16.mxu1 %v2388_v1  ;;  %v2339_v26 = vld [vmem:[%s3138_s0 + $0x1b8] ss:$12 sps:$4 sm:$0xff]  }
  0x2a   :  { %348 = vmatmul.mubr.bf16.gmra.mxu0 %v2264_v27  ;;  %2126 = vmatprep.mubr.msk.bf16.mxu1 %vm2363_vm0, %v2362_v0  ;;  %v2340_v27 = vld [vmem:[%s3138_s0 + $0x208] ss:$12 sps:$4 sm:$0xff]  }
  0x2b   :  { %355 = vmatprep.mubr.bf16.mxu0 %v2265_v28  ;;  %v2343_v28 = vld [vmem:[%s3138_s0 + $0x1d0] ss:$0 sps:$4 sm:$0x11]  }
  0x31   :  { %2127 = vmatmul.mubr.msk.bf16.gmra.mxu1 %vm285_vm1, %v2267_v29  ;;  %v2344_v29 = vld [vmem:[%s3138_s0 + $0x220] ss:$12 sps:$4 sm:$0xff]  }
  0x32   :  { %356 = vmatmul.mubr.bf16.gmra.mxu0 %v2268_v30  ;;  %2130 = vmatprep.mubr.msk.bf16.mxu1 %vm2363_vm0, %v2362_v0  ;;  %v2347_v30 = vld [vmem:[%s3138_s0 + $0x1dc] ss:$12 sps:$4 sm:$0xff]  }
  0x33   :  { %363 = vmatprep.mubr.bf16.mxu0 %v2269_v31  ;;  %v2348_v31 = vld [vmem:[%s3138_s0 + $0x238] ss:$12 sps:$4 sm:$0xff]  }
  0x39   :  { %2131 = vmatmul.mubr.msk.bf16.gmra.mxu1 %vm285_vm1, %v2271_v32 }
  0x3a   :  { %364 = vmatmul.mubr.bf16.gmra.mxu0 %v2272_v33  ;;  %663 = vmatprep.mubr.bf16.mxu1 %v2275_v34 }
  0x3b   :  { %371 = vmatprep.mubr.bf16.mxu0 %v2276_v35  ;;  %v2350_v35 = vld [vmem:[%s3138_s0 + $0x234] ss:$12 sps:$4 sm:$0xff]  }
  0x41   :  { %664 = vmatmul.mubr.bf16.vlgmr.msra.gmra.mxu1 %v2273_v36  ;;  %v2351_v36 = vld [vmem:[%s3138_s0 + $0x1f4] ss:$12 sps:$4 sm:$0xff]  }
  0x42   :  { %372 = vmatmul.mubr.bf16.gmra.mxu0 %v2278_v37  ;;  %671 = vmatprep.mubr.bf16.mxu1 %v2279_v38  ;;  %v2352_v37 = vld [vmem:[%s3138_s0 + $0x250] ss:$12 sps:$4 sm:$0xff]  }
  0x43   :  { %379 = vmatprep.mubr.bf16.mxu0 %v2281_v39  ;;  %1969 = vmatpush3.bf16.msra.mxu1 %v2401_v3 }
  0x44   :  { %1970 = vmatprep.subr.bf16.mxu1 %v2407_v4 }
  0x47   :  { %1971 = vmatpush3.bf16.msra.mxu1 %v2420_v6 }
  0x48   :  { %1972 = vmatprep.subr.bf16.mxu1 %v2429_v8 }
  0x49   :  { %672 = vmatmul.mubr.bf16.gmra.mxu1 %v2283_v41  ;;  %v1777_v41 = vld [vmem:[%s3138_s0 + $0x264] sm:$0x11] }
  0x4a   :  { %380 = vmatmul.mubr.bf16.gmra.mxu0 %v2284_v42  ;;  %679 = vmatprep.mubr.bf16.mxu1 %v2285_v43  ;;  %v2354_v43 = vld [vmem:[%s3138_s0 + $0x24c] ss:$12 sps:$4 sm:$0xff]  }
  0x4b   :  { %387 = vmatprep.mubr.bf16.mxu0 %v1618_v44  ;;  %1973 = vmatpush3.bf16.msra.mxu1 %v2435_v9  ;;  %v2355_v44 = vld [vmem:[%s3138_s0 + $0x20c] ss:$12 sps:$4 sm:$0xff]  }
  0x4c   :  { %1974 = vmatprep.subr.bf16.mxu1 %v2442_v10 }
  0x4f   :  { %1975 = vmatpush3.bf16.msra.mxu1 %v2452_v11 }
  0x50   :  { %1976 = vmatprep.subr.bf16.mxu1 %v2459_v12 }
  0x51   :  { %680 = vmatmul.mubr.bf16.gmra.mxu1 %v2288_v45  ;;  %v1798_v45 = vcombine.high %v1777_v41, %v1777_v41 }
  0x52   :  { %388 = vmatmul.mubr.bf16.gmra.mxu0 %v1617_v46  ;;  %687 = vmatprep.mubr.bf16.mxu1 %v2290_v47 }
  0x53   :  { %2138 = vmatprep.mubr.msk.bf16.mxu0 %vm2363_vm0, %v2362_v0  ;;  %1977 = vmatpush3.bf16.msra.mxu1 %v2469_v14 }
  0x54   :  { %1978 = vmatprep.subr.bf16.mxu1 %v2476_v15 }
  0x57   :  { %1979 = vmatpush3.bf16.msra.mxu1 %v2482_v16 }
  0x58   :  { %1980 = vmatprep.subr.bf16.mxu1 %v2496_v18 }
  0x59   :  { %688 = vmatmul.mubr.bf16.gmra.mxu1 %v2292_v48 }
  0x5a   :  { %2139 = vmatmul.mubr.msk.bf16.vlgmr.msra.gmra.mxu0 %vm285_vm1, %v2293_v49  ;;  %695 = vmatprep.mubr.bf16.mxu1 %v2294_v50  ;;  %v1797_v50 = vcombine.low %v1777_v41, %v1777_v41 }
  0x5b   :  { %2167 = vmatpush3.bf16.msra.mxu0 %v2395_v2  ;;  %2142 = vmatprep.mubr.msk.bf16.mxu0 %vm2363_vm0, %v2362_v0 }
  0x5c   :  { %1981 = vmatpush3.bf16.msra.mxu1 %v2506_v20  ;;  %2168 = vmatprep.subr.bf16.mxu0 %v2362_v0 }
  0x5d   :  { %1982 = vmatprep.subr.bf16.mxu1 %v2512_v21 }
  0x5f   :  { %2169 = vmatpush3.bf16.msra.mxu0 %v2414_v5 }
  0x60   :  { %1983 = vmatpush3.bf16.msra.mxu1 %v2523_v22  ;;  %2198 = vmatprep.subr.bf16.mxu0 %v2362_v0 }
  0x61   :  { %696 = vmatmul.mubr.bf16.gmra.mxu1 %v2296_v51  ;;  %2035 = vmatprep.subr.bf16.mxu1 %v2388_v1  ;;  %v2311_v1 = vld [vmem:[%s3138_s0 + $0x150] ss:$12 sps:$4 sm:$0xff]  }
  0x62   :  { %2143 = vmatmul.mubr.msk.bf16.gmra.mxu0 %vm285_vm1, %v2297_v52  ;;  %703 = vmatprep.mubr.bf16.mxu1 %v2298_v53  ;;  %v2358_v51 = vld [vmem:[%s3138_s0 + $0x224] ss:$12 sps:$4 sm:$0xff]  }
  0x63   :  { %2146 = vmatprep.mubr.msk.bf16.mxu0 %vm2363_vm0, %v2362_v0 }
  0x69   :  { %704 = vmatmul.mubr.bf16.gmra.mxu1 %v2300_v55 }
  0x6a   :  { %2147 = vmatmul.mubr.msk.bf16.gmra.mxu0 %vm285_vm1, %v2301_v56  ;;  %711 = vmatprep.mubr.bf16.mxu1 %v1690_v57 }
  0x6b   :  { %2150 = vmatprep.mubr.msk.bf16.mxu0 %vm2363_vm0, %v2362_v0 }
  0x71   :  { %712 = vmatmul.mubr.bf16.gmra.mxu1 %v1689_v58 }
  0x72   :  { %2151 = vmatmul.mubr.msk.bf16.gmra.mxu0 %vm285_vm1, %v2304_v59  ;;  %1000 = vmatprep.mubr.bf16.mxu1 %v2307_v60  ;;  %v2359_v59 = vld [vmem:[%s3138_s0 + $0x26c] ss:$0 sps:$4 sm:$0x11]  }
  0x73   :  { %2154 = vmatprep.mubr.msk.bf16.mxu0 %vm2363_vm0, %v2362_v0 }
  0x79   :  { %1001 = vmatmul.mubr.bf16.vlgmr.msra.gmra.mxu1 %v2305_v61  ;;  %v2360_v61 = vld [vmem:[%s3138_s0 + $0x23c] ss:$12 sps:$4 sm:$0xff]  }
  0x7a   :  { %2155 = vmatmul.mubr.msk.bf16.gmra.mxu0 %vm285_vm1, %v2308_v62  ;;  %1008 = vmatprep.mubr.bf16.mxu1 %v2309_v63 }
  0x7b   :  { %2158 = vmatprep.mubr.msk.bf16.mxu0 %vm2363_vm0, %v2362_v0  ;;  %2036 = vmatpush3.bf16.msra.mxu1 %v2401_v3  ;;  %v2315_v3 = vld [vmem:[%s3138_s0 + $0x168] ss:$12 sps:$4 sm:$0xff]  }
  0x7c   :  { %2037 = vmatprep.subr.bf16.mxu1 %v2407_v4  ;;  %v2316_v4 = vld [vmem:[%s3138_s0 + $0x134] ss:$0 sps:$4 sm:$0x11]  }
  0x7f   :  { %2038 = vmatpush3.bf16.msra.mxu1 %v2420_v6  ;;  %v2317_v6 = vld [vmem:[%s3138_s0 + $0x184] ss:$12 sps:$4 sm:$0xff]  }
  0x80   :  { %2039 = vmatprep.subr.bf16.mxu1 %v2429_v8  ;;  %v2319_v8 = vld [vmem:[%s3138_s0 + $0x180] ss:$12 sps:$4 sm:$0xff]  }
  0x81   :  { %1009 = vmatmul.mubr.bf16.gmra.mxu1 %v2311_v1 }
  0x82   :  { %2159 = vmatmul.mubr.msk.bf16.gmra.mxu0 %vm285_vm1, %v2312_v7  ;;  %1016 = vmatprep.mubr.bf16.mxu1 %v2313_v13 }
  0x83   :  { %2162 = vmatprep.mubr.msk.bf16.mxu0 %vm2363_vm0, %v2362_v0  ;;  %2040 = vmatpush3.bf16.msra.mxu1 %v2435_v9  ;;  %v2320_v9 = vld [vmem:[%s3138_s0 + $0x140] ss:$12 sps:$4 sm:$0xff]  }
  0x84   :  { %2041 = vmatprep.subr.bf16.mxu1 %v2442_v10  ;;  %v2321_v10 = vld [vmem:[%s3138_s0 + $0x19c] ss:$12 sps:$4 sm:$0xff]  }
  0x87   :  { %2042 = vmatpush3.bf16.msra.mxu1 %v2452_v11  ;;  %v2323_v11 = vld [vmem:[%s3138_s0 + $0x198] ss:$12 sps:$4 sm:$0xff]  }
  0x88   :  { %2043 = vmatprep.subr.bf16.mxu1 %v2459_v12  ;;  %v2324_v12 = vld [vmem:[%s3138_s0 + $0x158] ss:$12 sps:$4 sm:$0xff]  }
  0x89   :  { %1017 = vmatmul.mubr.bf16.gmra.mxu1 %v2315_v3 }
  0x8a   :  { %2163 = vmatmul.mubr.msk.bf16.gmra.mxu0 %vm285_vm1, %v2316_v4  ;;  %1024 = vmatprep.mubr.bf16.mxu1 %v2317_v6 }
  0x8b   :  { %2170 = vmatprep.mubr.msk.bf16.mxu0 %vm2363_vm0, %v2362_v0  ;;  %2044 = vmatpush3.bf16.msra.mxu1 %v2469_v14  ;;  %v2325_v14 = vld [vmem:[%s3138_s0 + $0x1b4] ss:$12 sps:$4 sm:$0xff]  }
  0x8c   :  { %2045 = vmatprep.subr.bf16.mxu1 %v2476_v15  ;;  %v1723_v15 = vld [vmem:[%s3138_s0 + $0x1c8] sm:$0x11] }
  0x8d   :  { %v1743_v19 = vcombine.low %v1723_v15, %v1723_v15 }
  0x8f   :  { %2046 = vmatpush3.bf16.msra.mxu1 %v2482_v16  ;;  %v2327_v16 = vld [vmem:[%s3138_s0 + $0x1b0] ss:$12 sps:$4 sm:$0xff]  }
  0x90   :  { %2047 = vmatprep.subr.bf16.mxu1 %v2496_v18  ;;  %v1744_v18 = vcombine.high %v1723_v15, %v1723_v15 }
  0x91   :  { %1025 = vmatmul.mubr.bf16.gmra.mxu1 %v2319_v8 }
  0x92   :  { %2171 = vmatmul.mubr.msk.bf16.vlgmr.msra.gmra.mxu0 %vm285_vm1, %v2320_v9  ;;  %1032 = vmatprep.mubr.bf16.mxu1 %v2321_v10 }
  0x93   :  { %2199 = vmatpush3.bf16.msra.mxu0 %v2395_v2  ;;  %2174 = vmatprep.mubr.msk.bf16.mxu0 %vm2363_vm0, %v2362_v0 }
  0x94   :  { %2048 = vmatpush3.bf16.msra.mxu1 %v2506_v20  ;;  %2200 = vmatprep.subr.bf16.mxu0 %v2362_v0  ;;  %v2331_v20 = vld [vmem:[%s3138_s0 + $0x188] ss:$12 sps:$4 sm:$0xff]  }
  0x95   :  { %2049 = vmatprep.subr.bf16.mxu1 %v2512_v21  ;;  %v2334_v21 = vld [vmem:[%s3138_s0 + $0x1d8] ss:$12 sps:$4 sm:$0xff]  }
  0x97   :  { %2201 = vmatpush3.bf16.msra.mxu0 %v2414_v5 }
  0x98   :  { %2050 = vmatpush3.bf16.msra.mxu1 %v2523_v22  ;;  %v2332_v22 = vld [vmem:[%s3138_s0 + $0x1d4] ss:$12 sps:$4 sm:$0xff]  }
  0x99   :  { %1033 = vmatmul.mubr.bf16.gmra.mxu1 %v2323_v11  ;;  %2230 = vmatprep.subr.bf16.mxu1 %v2362_v0 }
  0x9a   :  { %2175 = vmatmul.mubr.msk.bf16.gmra.mxu0 %vm285_vm1, %v2324_v12  ;;  %1040 = vmatprep.mubr.bf16.mxu1 %v2325_v14  ;;  %v2361_v12 = vld [vmem:[%s3138_s0 + $0x254] ss:$12 sps:$4 sm:$0xff]  }
  0x9b   :  { %2178 = vmatprep.mubr.msk.bf16.mxu0 %vm2363_vm0, %v2362_v0 }
  0xa1   :  { %1041 = vmatmul.mubr.bf16.gmra.mxu1 %v2327_v16 }
  0xa2   :  { %2179 = vmatmul.mubr.msk.bf16.gmra.mxu0 %vm285_vm1, %v2328_v17  ;;  %1048 = vmatprep.mubr.bf16.mxu1 %v1744_v18 }
  0xa3   :  { %2182 = vmatprep.mubr.msk.bf16.mxu0 %vm2363_vm0, %v2362_v0 }
  0xa9   :  { %1049 = vmatmul.mubr.bf16.gmra.mxu1 %v1743_v19 }
  0xaa   :  { %2183 = vmatmul.mubr.msk.bf16.gmra.mxu0 %vm285_vm1, %v2331_v20  ;;  %1337 = vmatprep.mubr.bf16.mxu1 %v2334_v21 }
  0xab   :  { %2186 = vmatprep.mubr.msk.bf16.mxu0 %vm2363_vm0, %v2362_v0 }
  0xb1   :  { %1338 = vmatmul.mubr.bf16.vlgmr.msra.gmra.mxu1 %v2332_v22 }
  0xb2   :  { %2187 = vmatmul.mubr.msk.bf16.gmra.mxu0 %vm285_vm1, %v2335_v23  ;;  %1345 = vmatprep.mubr.bf16.mxu1 %v2336_v24 }
  0xb3   :  { %2190 = vmatprep.mubr.msk.bf16.mxu0 %vm2363_vm0, %v2362_v0  ;;  %2232 = vmatpush3.bf16.msra.mxu1 %v2395_v2  ;;  %v2342_v2 = vld [vmem:[%s3138_s0 + $0x204] ss:$12 sps:$4 sm:$0xff]  }
  0xb4   :  { %2231 = vmatprep.subr.bf16.mxu1 %v2362_v0 }
  0xb7   :  { %2233 = vmatpush3.bf16.msra.mxu1 %v2414_v5  ;;  %v2346_v5 = vld [vmem:[%s3138_s0 + $0x21c] ss:$12 sps:$4 sm:$0xff]  }
  0xb9   :  { %1346 = vmatmul.mubr.bf16.gmra.mxu1 %v2338_v25 }
  0xba   :  { %2191 = vmatmul.mubr.msk.bf16.gmra.mxu0 %vm285_vm1, %v2339_v26  ;;  %1353 = vmatprep.mubr.bf16.mxu1 %v2340_v27 }
  0xbb   :  { %2194 = vmatprep.mubr.msk.bf16.mxu0 %vm2363_vm0, %v2362_v0 }
  0xc1   :  { %1354 = vmatmul.mubr.bf16.gmra.mxu1 %v2342_v2 }
  0xc2   :  { %2195 = vmatmul.mubr.msk.bf16.gmra.mxu0 %vm285_vm1, %v2343_v28  ;;  %1361 = vmatprep.mubr.bf16.mxu1 %v2344_v29 }
  0xc3   :  { %2202 = vmatprep.mubr.msk.bf16.mxu0 %vm2363_vm0, %v2362_v0 }
  0xc9   :  { %v429_v32 = vpop.f32.mrf.mxu1  ;;  %1362 = vmatmul.mubr.bf16.gmra.mxu1 %v2346_v5 }
  0xca   :  { %2203 = vmatmul.mubr.msk.bf16.vlgmr.msra.gmra.mxu0 %vm285_vm1, %v2347_v30  ;;  %1369 = vmatprep.mubr.bf16.mxu1 %v2348_v31 }
  0xcb   :  { %v2108_v33 = vpop.f32.mrf.mxu1  ;;  %2206 = vmatprep.mubr.msk.bf16.mxu0 %vm2363_vm0, %v2362_v0 }
  0xcd   :  { %v432_v34 = vpop.f32.mrf.mxu1 }
  0xcf   :  { %v2109_v38 = vpop.f32.mrf.mxu1 }
  0xd1   :  { %v437_v39 = vpop.f32.mrf.mxu1  ;;  %1370 = vmatmul.mubr.bf16.gmra.mxu1 %v2350_v35 }
  0xd2   :  { %2207 = vmatmul.mubr.msk.bf16.gmra.mxu0 %vm285_vm1, %v2351_v36  ;;  %1377 = vmatprep.mubr.bf16.mxu1 %v2352_v37 }
  0xd3   :  { %v2112_v40 = vpop.f32.mrf.mxu1  ;;  %2210 = vmatprep.mubr.msk.bf16.mxu0 %vm2363_vm0, %v2362_v0 }
  0xd5   :  { %v440_v42 = vpop.f32.mrf.mxu1 }
  0xd7   :  { %v2113_v46 = vpop.f32.mrf.mxu1 }
  0xd9   :  { %v445_v47 = vpop.f32.mrf.mxu1  ;;  %1378 = vmatmul.mubr.bf16.gmra.mxu1 %v2354_v43 }
  0xda   :  { %2211 = vmatmul.mubr.msk.bf16.gmra.mxu0 %vm285_vm1, %v2355_v44  ;;  %1385 = vmatprep.mubr.bf16.mxu1 %v1798_v45 }
  0xdb   :  { %v2116_v48 = vpop.f32.mrf.mxu1  ;;  %2214 = vmatprep.mubr.msk.bf16.mxu0 %vm2363_vm0, %v2362_v0 }
  0xdd   :  { %v448_v49 = vpop.f32.mrf.mxu1 }
  0xdf   :  { %v2117_v52 = vpop.f32.mrf.mxu1 }
  0xe1   :  { %v453_v53 = vpop.f32.mrf.mxu1  ;;  %1386 = vmatmul.mubr.bf16.gmra.mxu1 %v1797_v50 }
  0xe2   :  { %v1850_v54 = vpop.f32.mrf.mxu0  ;;  %2215 = vmatmul.mubr.msk.bf16.gmra.mxu0 %vm285_vm1, %v2358_v51  ;;  %2226 = vmatprep.mubr.msk.bf16.mxu1 %vm2363_vm0, %v2362_v0 }
  0xe3   :  { %v2120_v55 = vpop.f32.mrf.mxu1  ;;  %2218 = vmatprep.mubr.msk.bf16.mxu0 %vm2363_vm0, %v2362_v0 }
  0xe4   :  { %v1851_v56 = vpop.f32.mrf.mxu0 }
  0xe5   :  { %v1852_v57 = vadd.f32 %v1851_v56, %v1850_v54  ;;  %v456_v58 = vpop.f32.mrf.mxu1 }
  0xe6   :  { %v1853_v60 = vpop.f32.mrf.mxu0 }
  0xe7   :  { %v2874_v62 = vadd.f32 %v1852_v57, %v429_v32  ;;  %v2121_v63 = vpop.f32.mrf.mxu1 }
  0xe8   :  { %v1854_v1 = vpop.f32.mrf.mxu0 }
  0xe9   :  { %v1855_v7 = vadd.f32 %v1854_v1, %v1853_v60  ;;  %v461_v13 = vpop.f32.mrf.mxu1  ;;  %2227 = vmatmul.mubr.msk.bf16.vlgmr.msra.gmra.mxu1 %vm285_vm1, %v2359_v59 }
  0xea   :  { %v1856_v3 = vpop.f32.mrf.mxu0  ;;  %2219 = vmatmul.mubr.msk.bf16.gmra.mxu0 %vm285_vm1, %v2360_v61 }
  0xeb   :  { %v2878_v4 = vadd.f32 %v1855_v7, %v432_v34  ;;  %v2124_v6 = vpop.f32.mrf.mxu1  ;;  %2222 = vmatprep.mubr.msk.bf16.mxu0 %vm2363_vm0, %v2362_v0 }
  0xec   :  { %v1857_v8 = vpop.f32.mrf.mxu0 }
  0xed   :  { %v1858_v9 = vadd.f32 %v1857_v8, %v1856_v3  ;;  %v464_v10 = vpop.f32.mrf.mxu1 }
  0xee   :  { %v1859_v11 = vpop.f32.mrf.mxu0 }
  0xef   :  { %v2885_v14 = vadd.f32 %v1858_v9, %v437_v39  ;;  %v2125_v15 = vpop.f32.mrf.mxu1 }
  0xf0   :  { %v1860_v16 = vpop.f32.mrf.mxu0 }
  0xf1   :  { %v1861_v17 = vadd.f32 %v1860_v16, %v1859_v11  ;;  %v469_v18 = vpop.f32.mrf.mxu1 }
  0xf2   :  { %v1862_v19 = vpop.f32.mrf.mxu0  ;;  %2223 = vmatmul.mubr.msk.bf16.gmra.mxu0 %vm285_vm1, %v2361_v12 }
  0xf3   :  { %v2888_v20 = vadd.f32 %v1861_v17, %v440_v42  ;;  %v2128_v0 = vpop.f32.mrf.mxu1 }
  0xf4   :  { %v1863_v21 = vpop.f32.mrf.mxu0 }
  0xf5   :  { %v1864_v22 = vadd.f32 %v1863_v21, %v1862_v19  ;;  %v472_v23 = vpop.f32.mrf.mxu1 }
  0xf6   :  { %v1865_v24 = vpop.f32.mrf.mxu0 }
  0xf7   :  { %v2890_v25 = vadd.f32 %v1864_v22, %v445_v47  ;;  %v2129_v26 = vpop.f32.mrf.mxu1 }
  0xf8   :  { %v1866_v27 = vpop.f32.mrf.mxu0 }
  0xf9   :  { %v1867_v2 = vadd.f32 %v1866_v27, %v1865_v24  ;;  %v477_v28 = vpop.f32.mrf.mxu1 }
  0xfa   :  { %v1868_v29 = vpop.f32.mrf.mxu0 }
  0xfb   :  { %v2892_v5 = vadd.f32 %v1867_v2, %v448_v49  ;;  %v2132_v30 = vpop.f32.mrf.mxu1 }
  0xfc   :  { %v1869_v31 = vpop.f32.mrf.mxu0 }
  0xfd   :  { %v1870_v32 = vadd.f32 %v1869_v31, %v1868_v29  ;;  %v480_v33 = vpop.f32.mrf.mxu1 }
  0xfe   :  { %v1871_v34 = vpop.f32.mrf.mxu0 }
  0xff   :  { %v2894_v35 = vadd.f32 %v1870_v32, %v453_v53  ;;  %v2133_v36 = vpop.f32.mrf.mxu1 }
 0x100   :  { %v1872_v37 = vpop.f32.mrf.mxu0 }
 0x101   :  { %v1873_v38 = vadd.f32 %v1872_v37, %v1871_v34  ;;  %v1917_v39 = vpop.f32.mrf.mxu1 }
 0x102   :  { %v1874_v40 = vpop.f32.mrf.mxu0 }
 0x103   :  { %v2896_v41 = vadd.f32 %v1873_v38, %v456_v58  ;;  %v1918_v42 = vpop.f32.mrf.mxu1 }
 0x104   :  { %v1919_v43 = vadd.f32 %v1918_v42, %v1917_v39  ;;  %v1875_v44 = vpop.f32.mrf.mxu0 }
 0x105   :  { %v1876_v45 = vadd.f32 %v1875_v44, %v1874_v40  ;;  %v1920_v46 = vpop.f32.mrf.mxu1 }
 0x106   :  { %v1877_v47 = vpop.f32.mrf.mxu0 }
 0x107   :  { %v2898_v48 = vadd.f32 %v1876_v45, %v461_v13  ;;  %v1921_v49 = vpop.f32.mrf.mxu1 }
 0x108   :  { %v1922_v50 = vadd.f32 %v1921_v49, %v1920_v46  ;;  %v1878_v51 = vpop.f32.mrf.mxu0 }
 0x109   :  { %v1879_v52 = vadd.f32 %v1878_v51, %v1877_v47  ;;  %v1923_v53 = vpop.f32.mrf.mxu1 }
 0x10a   :  { %v1880_v54 = vpop.f32.mrf.mxu0 }
 0x10b   :  { %v2900_v55 = vadd.f32 %v1879_v52, %v464_v10  ;;  %v1924_v56 = vpop.f32.mrf.mxu1 }
 0x10c   :  { %v1925_v57 = vadd.f32 %v1924_v56, %v1923_v53  ;;  %v1881_v58 = vpop.f32.mrf.mxu0 }
 0x10d   :  { %v1882_v59 = vadd.f32 %v1881_v58, %v1880_v54  ;;  %v1926_v60 = vpop.f32.mrf.mxu1 }
 0x10e   :  { %v1883_v61 = vpop.f32.mrf.mxu0 }
 0x10f   :  { %v2902_v63 = vadd.f32 %v1882_v59, %v469_v18  ;;  %v1927_v1 = vpop.f32.mrf.mxu1 }
 0x110   :  { %v1928_v7 = vadd.f32 %v1927_v1, %v1926_v60  ;;  %v1884_v13 = vpop.f32.mrf.mxu0 }
 0x111   :  { %v1885_v3 = vadd.f32 %v1884_v13, %v1883_v61  ;;  %v1929_v6 = vpop.f32.mrf.mxu1 }
 0x112   :  { %v1886_v8 = vpop.f32.mrf.mxu0 }
 0x113   :  { %v2904_v9 = vadd.f32 %v1885_v3, %v472_v23  ;;  %v1930_v11 = vpop.f32.mrf.mxu1 }
 0x114   :  { %v1931_v12 = vadd.f32 %v1930_v11, %v1929_v6  ;;  %v1887_v10 = vpop.f32.mrf.mxu0 }
 0x115   :  { %v1888_v15 = vadd.f32 %v1887_v10, %v1886_v8  ;;  %v1932_v16 = vpop.f32.mrf.mxu1 }
 0x116   :  { %v1889_v17 = vpop.f32.mrf.mxu0 }
 0x117   :  { %v2906_v19 = vadd.f32 %v1888_v15, %v477_v28  ;;  %v1933_v0 = vpop.f32.mrf.mxu1 }
 0x118   :  { %v1934_v21 = vadd.f32 %v1933_v0, %v1932_v16  ;;  %v1890_v18 = vpop.f32.mrf.mxu0 }
 0x119   :  { %v1935_v22 = vpop.f32.mrf.mxu1 }
 0x11a   :  { %v753_v24 = vpop.f32.mrf.mxu0 }
 0x11b   :  { %v2908_v26 = vadd.f32 %v1919_v43, %v753_v24  ;;  %v1936_v27 = vpop.f32.mrf.mxu1 }
 0x11c   :  { %v1937_v2 = vadd.f32 %v1936_v27, %v1935_v22  ;;  %v2140_v29 = vpop.f32.mrf.mxu0 }
 0x11d   :  { %v807_v23 = vmax.f32 %v2874_v62, %v2908_v26  ;;  %v1938_v30 = vpop.f32.mrf.mxu1 }
 0x11e   :  { %v756_v31 = vpop.f32.mrf.mxu0 }
 0x11f   :  { %v2912_v32 = vadd.f32 %v1922_v50, %v756_v31  ;;  %v1939_v33 = vpop.f32.mrf.mxu1 }
 0x120   :  { %v1940_v28 = vadd.f32 %v1939_v33, %v1938_v30  ;;  %v2141_v34 = vpop.f32.mrf.mxu0 }
 0x121   :  { %v808_v36 = vmax.f32 %v2878_v4, %v2912_v32  ;;  %v1941_v37 = vpop.f32.mrf.mxu1 }
 0x122   :  { %v761_v38 = vpop.f32.mrf.mxu0 }
 0x123   :  { %v2916_v39 = vadd.f32 %v1925_v57, %v761_v38  ;;  %v1942_v40 = vpop.f32.mrf.mxu1 }
 0x124   :  { %v1943_v42 = vadd.f32 %v1942_v40, %v1941_v37  ;;  %v2144_v43 = vpop.f32.mrf.mxu0 }
 0x125   :  { %v809_v44 = vmax.f32 %v2885_v14, %v2916_v39  ;;  %v1944_v45 = vpop.f32.mrf.mxu1 }
 0x126   :  { %v764_v46 = vpop.f32.mrf.mxu0 }
 0x127   :  { %v2920_v47 = vadd.f32 %v1928_v7, %v764_v46  ;;  %v1945_v49 = vpop.f32.mrf.mxu1 }
 0x128   :  { %v1946_v50 = vadd.f32 %v1945_v49, %v1944_v45  ;;  %v2145_v51 = vpop.f32.mrf.mxu0 }
 0x129   :  { %v810_v52 = vmax.f32 %v2888_v20, %v2920_v47  ;;  %v1947_v53 = vpop.f32.mrf.mxu1 }
 0x12a   :  { %v769_v54 = vpop.f32.mrf.mxu0 }
 0x12b   :  { %v2924_v56 = vadd.f32 %v1931_v12, %v769_v54  ;;  %v1948_v57 = vpop.f32.mrf.mxu1 }
 0x12c   :  { %v1949_v58 = vadd.f32 %v1948_v57, %v1947_v53  ;;  %v2148_v59 = vpop.f32.mrf.mxu0 }
 0x12d   :  { %v811_v60 = vmax.f32 %v2890_v25, %v2924_v56  ;;  %v1950_v61 = vpop.f32.mrf.mxu1 }
 0x12e   :  { %v772_v1 = vpop.f32.mrf.mxu0 }
 0x12f   :  { %v2928_v7 = vadd.f32 %v1934_v21, %v772_v1  ;;  %v1951_v13 = vpop.f32.mrf.mxu1 }
 0x130   :  { %v1952_v3 = vadd.f32 %v1951_v13, %v1950_v61  ;;  %v2149_v6 = vpop.f32.mrf.mxu0 }
 0x131   :  { %v812_v8 = vmax.f32 %v2892_v5, %v2928_v7  ;;  %v1953_v11 = vpop.f32.mrf.mxu1 }
 0x132   :  { %v777_v10 = vpop.f32.mrf.mxu0 }
 0x133   :  { %v2932_v12 = vadd.f32 %v1937_v2, %v777_v10  ;;  %v1954_v15 = vpop.f32.mrf.mxu1 }
 0x134   :  { %v1955_v16 = vadd.f32 %v1954_v15, %v1953_v11  ;;  %v2152_v17 = vpop.f32.mrf.mxu0 }
 0x135   :  { %v813_v0 = vmax.f32 %v2894_v35, %v2932_v12  ;;  %v1956_v18 = vpop.f32.mrf.mxu1 }
 0x136   :  { %v780_v22 = vpop.f32.mrf.mxu0 }
 0x137   :  { %v2936_v21 = vadd.f32 %v1940_v28, %v780_v22  ;;  %v1957_v24 = vpop.f32.mrf.mxu1 }
 0x138   :  { %v2153_v27 = vpop.f32.mrf.mxu0 }
 0x139   :  { %v814_v29 = vmax.f32 %v2896_v41, %v2936_v21  ;;  %v1984_v30 = vpop.f32.mrf.mxu1 }
 0x13a   :  { %v785_v31 = vpop.f32.mrf.mxu0 }
 0x13b   :  { %v2940_v33 = vadd.f32 %v1943_v42, %v785_v31  ;;  %v1985_v2 = vpop.f32.mrf.mxu1 }
 0x13c   :  { %v1986_v34 = vadd.f32 %v1985_v2, %v1984_v30  ;;  %v2156_v37 = vpop.f32.mrf.mxu0 }
 0x13d   :  { %v815_v38 = vmax.f32 %v2898_v48, %v2940_v33  ;;  %v1987_v40 = vpop.f32.mrf.mxu1 }
 0x13e   :  { %v788_v43 = vpop.f32.mrf.mxu0 }
 0x13f   :  { %v2944_v45 = vadd.f32 %v1946_v50, %v788_v43  ;;  %v1988_v28 = vpop.f32.mrf.mxu1 }
 0x140   :  { %v1989_v46 = vadd.f32 %v1988_v28, %v1987_v40  ;;  %v2157_v49 = vpop.f32.mrf.mxu0 }
 0x141   :  { %v816_v51 = vmax.f32 %v2900_v55, %v2944_v45  ;;  %v1990_v53 = vpop.f32.mrf.mxu1 }
 0x142   :  { %v793_v54 = vpop.f32.mrf.mxu0 }
 0x143   :  { %v2948_v42 = vadd.f32 %v1949_v58, %v793_v54  ;;  %v1991_v57 = vpop.f32.mrf.mxu1 }
 0x144   :  { %v1992_v59 = vadd.f32 %v1991_v57, %v1990_v53  ;;  %v2160_v61 = vpop.f32.mrf.mxu0 }
 0x145   :  { %v817_v1 = vmax.f32 %v2902_v63, %v2948_v42  ;;  %v1993_v13 = vpop.f32.mrf.mxu1 }
 0x146   :  { %v796_v6 = vpop.f32.mrf.mxu0 }
 0x147   :  { %v2952_v50 = vadd.f32 %v1952_v3, %v796_v6  ;;  %v1994_v11 = vpop.f32.mrf.mxu1 }
 0x148   :  { %v1995_v10 = vadd.f32 %v1994_v11, %v1993_v13  ;;  %v2161_v15 = vpop.f32.mrf.mxu0 }
 0x149   :  { %v818_v17 = vmax.f32 %v2904_v9, %v2952_v50  ;;  %v1996_v18 = vpop.f32.mrf.mxu1  ;;  %v3029_v9 = vld [vmem:[%s3139_s2] ss:$0 sm:$0xff] }
 0x14a   :  { %v801_v22 = vpop.f32.mrf.mxu0 }
 0x14b   :  { %v2956_v58 = vadd.f32 %v1955_v16, %v801_v22  ;;  %v1997_v24 = vpop.f32.mrf.mxu1 }
 0x14c   :  { %v1998_v27 = vadd.f32 %v1997_v24, %v1996_v18  ;;  %v2164_v30 = vpop.f32.mrf.mxu0 }
 0x14d   :  { %v819_v31 = vmax.f32 %v2906_v19, %v2956_v58  ;;  %v1999_v2 = vpop.f32.mrf.mxu1 }
 0x14e   :  { %v804_v37 = vpop.f32.mrf.mxu0 }
 0x14f   :  { %v2000_v3 = vpop.f32.mrf.mxu1 }
 0x150   :  { %v2001_v40 = vadd.f32 %v2000_v3, %v1999_v2  ;;  %v2165_v43 = vpop.f32.mrf.mxu0 }
 0x151   :  { %v2002_v28 = vpop.f32.mrf.mxu1 }
 0x152   :  { %v1090_v49 = vpop.f32.mrf.mxu0 }
 0x153   :  { %v1091_v53 = vadd.f32 %v1986_v34, %v1090_v49  ;;  %v2003_v54 = vpop.f32.mrf.mxu1 }
 0x154   :  { %v2004_v57 = vadd.f32 %v2003_v54, %v2002_v28  ;;  %v2172_v61 = vpop.f32.mrf.mxu0 }
 0x155   :  { %v2963_v16 = vmax.f32 %v807_v23, %v1091_v53  ;;  %v2005_v13 = vpop.f32.mrf.mxu1 }
 0x156   :  { %v1093_v6 = vpop.f32.mrf.mxu0 }
 0x157   :  { %v1094_v11 = vadd.f32 %v1989_v46, %v1093_v6  ;;  %v2006_v15 = vpop.f32.mrf.mxu1 }
 0x158   :  { %v2007_v18 = vadd.f32 %v2006_v15, %v2005_v13  ;;  %v2173_v22 = vpop.f32.mrf.mxu0 }
 0x159   :  { %v2968_v24 = vmax.f32 %v808_v36, %v1094_v11  ;;  %v2008_v34 = vpop.f32.mrf.mxu1 }
 0x15a   :  { %v1098_v30 = vpop.f32.mrf.mxu0 }
 0x15b   :  { %v1099_v2 = vadd.f32 %v1992_v59, %v1098_v30  ;;  %v2009_v37 = vpop.f32.mrf.mxu1 }
 0x15c   :  { %v2010_v3 = vadd.f32 %v2009_v37, %v2008_v34  ;;  %v2176_v43 = vpop.f32.mrf.mxu0 }
 0x15d   :  { %v2973_v62 = vmax.f32 %v809_v44, %v1099_v2  ;;  %v2011_v26 = vpop.f32.mrf.mxu1 }
 0x15e   :  { %v1101_v23 = vpop.f32.mrf.mxu0 }
 0x15f   :  { %v1102_v46 = vadd.f32 %v1995_v10, %v1101_v23  ;;  %v2012_v28 = vpop.f32.mrf.mxu1 }
 0x160   :  { %v2013_v49 = vadd.f32 %v2012_v28, %v2011_v26  ;;  %v2177_v53 = vpop.f32.mrf.mxu0 }
 0x161   :  { %v2978_v4 = vmax.f32 %v810_v52, %v1102_v46  ;;  %v2014_v32 = vpop.f32.mrf.mxu1 }
 0x162   :  { %v1106_v36 = vpop.f32.mrf.mxu0 }
 0x163   :  { %v1107_v59 = vadd.f32 %v1998_v27, %v1106_v36  ;;  %v2015_v54 = vpop.f32.mrf.mxu1 }
 0x164   :  { %v2016_v61 = vadd.f32 %v2015_v54, %v2014_v32  ;;  %v2180_v13 = vpop.f32.mrf.mxu0 }
 0x165   :  { %v2983_v14 = vmax.f32 %v811_v60, %v1107_v59  ;;  %v2017_v39 = vpop.f32.mrf.mxu1 }
 0x166   :  { %v1109_v44 = vpop.f32.mrf.mxu0 }
 0x167   :  { %v1110_v10 = vadd.f32 %v2001_v40, %v1109_v44  ;;  %v2018_v6 = vpop.f32.mrf.mxu1 }
 0x168   :  { %v2019_v11 = vadd.f32 %v2018_v6, %v2017_v39  ;;  %v2181_v15 = vpop.f32.mrf.mxu0 }
 0x169   :  { %v2988_v20 = vmax.f32 %v812_v8, %v1110_v10  ;;  %v2990_v47 = vpop.f32.mrf.mxu1 }
 0x16a   :  { %v1114_v52 = vpop.f32.mrf.mxu0 }
 0x16b   :  { %v1115_v27 = vadd.f32 %v2004_v57, %v1114_v52  ;;  %v2992_v22 = vpop.f32.mrf.mxu1 }
 0x16c   :  { %v2184_v25 = vpop.f32.mrf.mxu0 }
 0x16d   :  { %v2997_v56 = vmax.f32 %v813_v0, %v1115_v27  ;;  %v2023_v60 = vpop.f32.mrf.mxu1 }
 0x16e   :  { %v1117_v40 = vpop.f32.mrf.mxu0 }
 0x16f   :  { %v1118_v34 = vadd.f32 %v2007_v18, %v1117_v40  ;;  %v2024_v30 = vpop.f32.mrf.mxu1 }
 0x170   :  { %v2185_v2 = vpop.f32.mrf.mxu0 }
 0x171   :  { %v3002_v5 = vmax.f32 %v814_v29, %v1118_v34  ;;  %v2051_v7 = vpop.f32.mrf.mxu1 }
 0x172   :  { %v1122_v8 = vpop.f32.mrf.mxu0 }
 0x173   :  { %v1123_v57 = vadd.f32 %v2010_v3, %v1122_v8  ;;  %v2052_v37 = vpop.f32.mrf.mxu1 }
 0x174   :  { %v2188_v43 = vpop.f32.mrf.mxu0 }
 0x175   :  { %v3007_v35 = vmax.f32 %v815_v38, %v1123_v57  ;;  %v2054_v12 = vpop.f32.mrf.mxu1 }
 0x176   :  { %v1125_v0 = vpop.f32.mrf.mxu0 }
 0x177   :  { %v1126_v18 = vadd.f32 %v2013_v49, %v1125_v0  ;;  %v2055_v26 = vpop.f32.mrf.mxu1 }
 0x178   :  { %v2189_v23 = vpop.f32.mrf.mxu0 }
 0x179   :  { %v3012_v41 = vmax.f32 %v816_v51, %v1126_v18  ;;  %v2057_v21 = vpop.f32.mrf.mxu1 }
 0x17a   :  { %v1130_v29 = vpop.f32.mrf.mxu0 }
 0x17b   :  { %v1131_v3 = vadd.f32 %v2016_v61, %v1130_v29  ;;  %v2058_v46 = vpop.f32.mrf.mxu1 }
 0x17c   :  { %v2192_v28 = vpop.f32.mrf.mxu0  ;;  %v2059_v40 = vadd.f32 %v2058_v46, %v2057_v21 }
 0x17d   :  { %v3017_v48 = vmax.f32 %v817_v1, %v1131_v3  ;;  %v2060_v33 = vpop.f32.mrf.mxu1  ;;  %v2053_v1 = vadd.f32 %v2052_v37, %v2051_v7 }
 0x17e   :  { %v1133_v38 = vpop.f32.mrf.mxu0 }
 0x17f   :  { %v1134_v49 = vadd.f32 %v2019_v11, %v1133_v38  ;;  %v2061_v53 = vpop.f32.mrf.mxu1 }
 0x180   :  { %v2193_v32 = vpop.f32.mrf.mxu0 }
 0x181   :  { %v3022_v55 = vmax.f32 %v818_v17, %v1134_v49  ;;  %v2063_v45 = vpop.f32.mrf.mxu1  ;;  %v2056_v17 = vadd.f32 %v2055_v26, %v2054_v12  ;;  %v2062_v12 = vadd.f32 %v2061_v53, %v2060_v33 }
 0x182   :  { %v3024_v51 = vpop.f32.mrf.mxu0 }
 0x183   :  { %v2064_v36 = vpop.f32.mrf.mxu1 }
 0x184   :  { %v2196_v59 = vpop.f32.mrf.mxu0  ;;  %v2065_v28 = vadd.f32 %v2064_v36, %v2063_v45 }
 0x185   :  { %v2066_v54 = vpop.f32.mrf.mxu1 }
 0x186   :  { %v1141_v61 = vpop.f32.mrf.mxu0 }
 0x187   :  { %v2067_v63 = vpop.f32.mrf.mxu1 }
 0x188   :  { %v2197_v42 = vpop.f32.mrf.mxu0 }
 0x189   :  { %v2069_v13 = vpop.f32.mrf.mxu1 }
 0x18a   :  { %v1427_v39 = vpop.f32.mrf.mxu0 }
 0x18b   :  { %v1428_v44 = vadd.f32 %v2053_v1, %v1427_v39  ;;  %v2070_v10 = vpop.f32.mrf.mxu1  ;;  %v2068_v1 = vadd.f32 %v2067_v63, %v2066_v54 }
 0x18c   :  { %v2204_v50 = vpop.f32.mrf.mxu0 }
 0x18d   :  { %v1481_v6 = vmax.f32 %v2963_v16, %v1428_v44  ;;  %v3032_v11 = vpop.f32.mrf.mxu1 }
 0x18e   :  { %v1430_v15 = vpop.f32.mrf.mxu0 }
 0x18f   :  { %v1501_v52 = vadd.f32 %v3029_v9, %v1481_v6  ;;  %v1431_v27 = vadd.f32 %v2056_v17, %v1430_v15  ;;  %v2073_v25 = vpop.f32.mrf.mxu1 }
 0x190   :  { %v2205_v60 = vpop.f32.mrf.mxu0 }
 0x191   :  { %v1514_v34 = vmax.f32 %v1501_v52, 0.0  ;;  %v1482_v30 = vmax.f32 %v2968_v24, %v1431_v27  ;;  %v3036_v2 = vpop.f32.mrf.mxu1  ;;  %v2071_v52 = vadd.f32 %v2070_v10, %v2069_v13  ;;  %v2074_v13 = vadd.f32 %v2073_v25, %v3032_v11 }
 0x192   :  { %v1435_v7 = vpop.f32.mrf.mxu0 }
 0x193   :  { %v1821_v8 = vpack.c.bf16 %v1514_v34, %v1514_v34  ;;  %v1502_v57 = vadd.f32 %v3029_v9, %v1482_v30  ;;  %v1436_v16 = vadd.f32 %v2059_v40, %v1435_v7  ;;  %v2076_v37 = vpop.f32.mrf.mxu1  ;;  %v2022_v7 = vadd.f32 %v2992_v22, %v2990_v47 }
 0x194   :  { %v2208_v43 = vpop.f32.mrf.mxu0  ;;  %v2077_v11 = vadd.f32 %v2076_v37, %v3036_v2 }
 0x195   :  { %1581 = vst.msk [vmem:[%s3140_s3] sm:$0xf] %vm1580_vm2, %v1821_v8  ;;  %v1515_v0 = vmax.f32 %v1502_v57, 0.0  ;;  %v1483_v18 = vmax.f32 %v2973_v62, %v1436_v16  ;;  %v3044_v24 = vpop.f32.mrf.mxu1  ;;  %v1139_v16 = vadd.f32 %v2022_v7, %v3024_v51 }
 0x196   :  { %v1438_v26 = vpop.f32.mrf.mxu0 }
 0x197   :  { %v1822_v23 = vpack.c.bf16 %v1515_v0, %v1515_v0  ;;  %v1503_v21 = vadd.f32 %v3029_v9, %v1483_v18  ;;  %v1439_v29 = vadd.f32 %v2062_v12, %v1438_v26  ;;  %v3047_v3 = vpop.f32.mrf.mxu1  ;;  %v1156_v51 = vmax.f32 %v819_v31, %v1139_v16 }
 0x198   :  { %v2209_v46 = vpop.f32.mrf.mxu0 }
 0x199   :  { %1582 = vst.msk [vmem:[%s3140_s3 + $0x4] sm:$0xf] %vm1580_vm2, %v1822_v23  ;;  %v1516_v33 = vmax.f32 %v1503_v21, 0.0  ;;  %v1484_v38 = vmax.f32 %v2978_v4, %v1439_v29  ;;  %v3054_v62 = vpop.f32.mrf.mxu1 }
 0x19a   :  { %v1443_v49 = vpop.f32.mrf.mxu0 }
 0x19b   :  { %v1823_v53 = vpack.c.bf16 %v1516_v33, %v1516_v33  ;;  %v1504_v32 = vadd.f32 %v3029_v9, %v1484_v38  ;;  %v1444_v59 = vadd.f32 %v2065_v28, %v1443_v49  ;;  %v3057_v61 = vpop.f32.mrf.mxu1  ;;  %v2080_v49 = vadd.f32 %v3047_v3, %v3044_v24 }
 0x19c   :  { %v2212_v42 = vpop.f32.mrf.mxu0  ;;  %v2083_v24 = vadd.f32 %v3057_v61, %v3054_v62 }
 0x19d   :  { %1583 = vst.msk [vmem:[%s3140_s3 + $0x8] sm:$0xf] %vm1580_vm2, %v1823_v53  ;;  %v1517_v45 = vmax.f32 %v1504_v32, 0.0  ;;  %v1485_v36 = vmax.f32 %v2983_v14, %v1444_v59  ;;  %v3064_v4 = vpop.f32.mrf.mxu1 }
 0x19e   :  { %v1446_v39 = vpop.f32.mrf.mxu0 }
 0x19f   :  { %v1824_v44 = vpack.c.bf16 %v1517_v45, %v1517_v45  ;;  %v1505_v50 = vadd.f32 %v3029_v9, %v1485_v36  ;;  %v1447_v17 = vadd.f32 %v2068_v1, %v1446_v39  ;;  %v3067_v6 = vpop.f32.mrf.mxu1 }
 0x1a0   :  { %v2213_v15 = vpop.f32.mrf.mxu0  ;;  %v2086_v61 = vadd.f32 %v3067_v6, %v3064_v4 }
 0x1a1   :  { %1584 = vst.msk [vmem:[%s3140_s3 + $0xc] sm:$0xf] %vm1580_vm2, %v1824_v44  ;;  %v1518_v54 = vmax.f32 %v1505_v50, 0.0  ;;  %v1486_v63 = vmax.f32 %v2988_v20, %v1447_v17  ;;  %v2087_v14 = vpop.f32.mrf.mxu1 }
 0x1a2   :  { %v1451_v27 = vpop.f32.mrf.mxu0 }
 0x1a3   :  { %v1825_v60 = vpack.c.bf16 %v1518_v54, %v1518_v54  ;;  %v1506_v40 = vadd.f32 %v3029_v9, %v1486_v63  ;;  %v1452_v34 = vadd.f32 %v2071_v52, %v1451_v27  ;;  %v2088_v30 = vpop.f32.mrf.mxu1 }
 0x1a4   :  { %v2216_v8 = vpop.f32.mrf.mxu0  ;;  %v2089_v43 = vadd.f32 %v2088_v30, %v2087_v14 }
 0x1a5   :  { %1585 = vst.msk [vmem:[%s3140_s3 + $0x10] sm:$0xf] %vm1580_vm2, %v1825_v60  ;;  %v1519_v10 = vmax.f32 %v1506_v40, 0.0  ;;  %v1487_v20 = vmax.f32 %v2997_v56, %v1452_v34  ;;  %v2090_v57 = vpop.f32.mrf.mxu1 }
 0x1a6   :  { %v1454_v12 = vpop.f32.mrf.mxu0 }
 0x1a7   :  { %v1826_v0 = vpack.c.bf16 %v1519_v10, %v1519_v10  ;;  %v1507_v18 = vadd.f32 %v3029_v9, %v1487_v20  ;;  %v1455_v47 = vadd.f32 %v2074_v13, %v1454_v12  ;;  %v2091_v22 = vpop.f32.mrf.mxu1 }
 0x1a8   :  { %v2217_v26 = vpop.f32.mrf.mxu0 }
 0x1a9   :  { %1586 = vst.msk [vmem:[%s3140_s3 + $0x14] sm:$0xf] %vm1580_vm2, %v1826_v0  ;;  %v1520_v25 = vmax.f32 %v1507_v18, 0.0  ;;  %v1488_v56 = vmax.f32 %v3002_v5, %v1455_v47  ;;  %v1475_v23 = vpop.f32.mrf.mxu1 }
 0x1aa   :  { %v1476_v21 = vadd.f32 %v2089_v43, %v1475_v23  ;;  %v1459_v29 = vpop.f32.mrf.mxu0 }
 0x1ab   :  { %v1827_v46 = vpack.c.bf16 %v1520_v25, %v1520_v25  ;;  %v1508_v28 = vadd.f32 %v3029_v9, %v1488_v56  ;;  %v1460_v33 = vadd.f32 %v2077_v11, %v1459_v29  ;;  %v2228_v2 = vpop.f32.mrf.mxu1 }
 0x1ac   :  { %v1493_v37 = vmax.f32 %v1156_v51, %v1476_v21  ;;  %v2220_v38 = vpop.f32.mrf.mxu0 }
 0x1ad   :  { %1587 = vst.msk [vmem:[%s3140_s3 + $0x18] sm:$0xf] %vm1580_vm2, %v1827_v46  ;;  %v1521_v5 = vmax.f32 %v1508_v28, 0.0  ;;  %v1489_v19 = vmax.f32 %v3007_v35, %v1460_v33  ;;  %v1478_v58 = vpop.f32.mrf.mxu1 }
 0x1ae   :  { %v1513_v31 = vadd.f32 %v3029_v9, %v1493_v37  ;;  %v1462_v53 = vpop.f32.mrf.mxu0 }
 0x1af   :  { %v1828_v32 = vpack.c.bf16 %v1521_v5, %v1521_v5  ;;  %v1509_v59 = vadd.f32 %v3029_v9, %v1489_v19  ;;  %v1463_v42 = vadd.f32 %v2080_v49, %v1462_v53  ;;  %v2229_v1 = vpop.f32.mrf.mxu1 }
 0x1b0   :  { %v1526_v45 = vmax.f32 %v1513_v31, 0.0  ;;  %v2221_v36 = vpop.f32.mrf.mxu0 }
 0x1b1   :  { %1588 = vst.msk [vmem:[%s3140_s3 + $0x1c] sm:$0xf] %vm1580_vm2, %v1828_v32  ;;  %v1522_v35 = vmax.f32 %v1509_v59, 0.0  ;;  %v1490_v3 = vmax.f32 %v3012_v41, %v1463_v42 }
 0x1b2   :  { %v1833_v39 = vpack.c.bf16 %v1526_v45, %v1526_v45  ;;  %v1467_v44 = vpop.f32.mrf.mxu0 }
 0x1b3   :  { %v1829_v50 = vpack.c.bf16 %v1522_v35, %v1522_v35  ;;  %v1510_v17 = vadd.f32 %v3029_v9, %v1490_v3  ;;  %v1468_v15 = vadd.f32 %v2083_v24, %v1467_v44 }
 0x1b4   :  { %1594 = vst.msk [vmem:[%s3140_s3 + $0x30] sm:$0x1] %vm1593_vm3, %v1833_v39  ;;  %v2224_v62 = vpop.f32.mrf.mxu0 }
 0x1b5   :  { %1589 = vst.msk [vmem:[%s3140_s3 + $0x20] sm:$0xf] %vm1580_vm2, %v1829_v50  ;;  %v1523_v41 = vmax.f32 %v1510_v17, 0.0  ;;  %v1491_v52 = vmax.f32 %v3017_v48, %v1468_v15 }
 0x1b6   :  { %v1470_v54 = vpop.f32.mrf.mxu0 }
 0x1b7   :  { %v1830_v63 = vpack.c.bf16 %v1523_v41, %v1523_v41  ;;  %v1511_v14 = vadd.f32 %v3029_v9, %v1491_v52  ;;  %v1471_v27 = vadd.f32 %v2086_v61, %v1470_v54 }
 0x1b8   :  { %v2225_v60 = vpop.f32.mrf.mxu0 }
 0x1b9   :  { %1590 = vst.msk [vmem:[%s3140_s3 + $0x24] sm:$0xf] %vm1580_vm2, %v1830_v63  ;;  %v1524_v4 = vmax.f32 %v1511_v14, 0.0  ;;  %v1492_v6 = vmax.f32 %v3022_v55, %v1471_v27 }
 0x1bb   :  { %v1831_v40 = vpack.c.bf16 %v1524_v4, %v1524_v4  ;;  %v1512_v34 = vadd.f32 %v3029_v9, %v1492_v6 }
 0x1bd   :  { %1591 = vst.msk [vmem:[%s3140_s3 + $0x28] sm:$0xf] %vm1580_vm2, %v1831_v40  ;;  %v1525_v48 = vmax.f32 %v1512_v34, 0.0 }
 0x1bf   :  { %v1832_v30 = vpack.c.bf16 %v1525_v48, %v1525_v48 }
 0x1c1   :  { %1592 = vst.msk [vmem:[%s3140_s3 + $0x2c] sm:$0xf] %vm1580_vm2, %v1832_v30 }

// kernel: minist_forward.5
= control target key start
LH: loop header
LB: loop body
LE: loop exit
PB: predicated region body
PF: predicated region fallthrough
CT: control target
= control target key end

     0   :  { %12 = vsyncpa [#allocation4], 0  ;;  %s10712_s24 = smov 0   ;;  %s12764_s0 = inlined_call_operand.vmem [shape: bf16[2,3328], index: 0, kind: input, shape index: {}]   ;;  %s12765_s1 = inlined_call_operand.vmem [shape: bf16[3328,1024], index: 1, kind: input, shape index: {}]   ;;  %s12766_s2 = inlined_call_operand.vmem [shape: f32[1,1024], index: 2, kind: input, shape index: {}]   ;;  %s12767_s3 = inlined_call_operand.vmem [shape: bf16[1024,512], index: 3, kind: input, shape index: {}]   ;;  %s12768_s4 = inlined_call_operand.vmem [shape: f32[1,512], index: 4, kind: input, shape index: {}]   ;;  %s12769_s5 = inlined_call_operand.vmem [shape: bf16[512,128], index: 5, kind: input, shape index: {}]   ;;  %s12770_s6 = inlined_call_operand.vmem [shape: f32[1,128], index: 6, kind: input, shape index: {}]   ;;  %s12771_s7 = inlined_call_operand.hbm [shape: f32[2,128], index: 7, kind: output, shape index: {}]  }
   0x1 LB: > { %s10718_s25 = sadd.s32 4294967295, %s10665_s24   ;;  %p9019_p0 = scmp.ge.s32.totalorder %s10665_s24, 1  ;;  %s10665_s24 = sphi %s10712_s24, %s18_s24  }
   0x2   : > { %p245_p1 = scmp.lt.s32.totalorder %s10665_s24, 3 }
   0x4   : > { %p246_p2 = pnand %p9019_p0, %p245_p1 }
   0x5   : > { %s277_s26 = smul.u32 (!%p246_p2), 13, %s10718_s25  ;;  %p9022_p5 = scmp.ne.s32.totalorder (!%p246_p2), %s10718_s25, 0 }
   0x6   : > { %249 = sbr.rel (%p246_p2) target bundleno = 1742 (0x6ce), region = 48 }
   0x7   : > { %s282_s27 = smul.u32 (!%p246_p2), 208, %s10718_s25  ;;  %p278_p3 = scmp.lt.s32.totalorder (!%p246_p2), %s277_s26, 25 }
   0x9   : > { %p283_p4 = scmp.lt.s32.totalorder (!%p246_p2), %s282_s27, 415 }
   0xb   : > { %s12773_s26 = smov (!%p278_p3, %s277_s26), 25  ;;  %s12775_s27 = smov (!%p283_p4, %s282_s27), 415 }
   0xc   : > { %s10727_s30 = scalar_lea.vmem %s12764_s0, %s12773_s26  ;;  %s10149_s8 = sshll.u32 %s12775_s27, 5 }
   0xd   : > { %s10732_s11 = scalar_lea.vmem %s12765_s1, %s10149_s8  ;;  %293 = sbr.rel (%p9022_p5) target bundleno = 20 (0x14), region = 52 }
  0x12   : > { %v10667_v0 = vmov 0.0  }
  0x13   : > { %294 = vst [vmem:[#allocation2] sm:$0xff] %v10667_v0  ;;  %295 = vst [vmem:[#allocation2 + $0x8] sm:$0xff] %v10667_v0 }
  0x14 PF: > { %v356_v1 = vld [vmem:[%s10732_s11 + $0x1c0] sm:$0xff]  ;;  %v10668_v33 = vmov 1966171168   ;;  %v1138_v35 = vlaneseq  ;;  %p9855_p6 = scmp.ne.s32.totalorder %s10718_s25, 1 }
  0x15   : > { %v360_v2 = vld [vmem:[%s10732_s11 + $0x1e0] sm:$0xff]  ;;  %v1136_v34 = vunpack.c.l.s4 %v10668_v33 }
  0x16   : > { %v484_v3 = vld [vmem:[%s10732_s11 + $0x5c0] sm:$0xff]  ;;  %v9080_v4 = vcombine.high %v356_v1, %v360_v2  ;;  %v9079_v6 = vcombine.low %v356_v1, %v360_v2  ;;  %v10757_v45 = vshrl.u32 %v1138_v35, 7 }
  0x17   : > { %v488_v5 = vld [vmem:[%s10732_s11 + $0x5e0] sm:$0xff]  ;;  %v1137_v44 = vunpack.c.0.s8 %v1136_v34 }
  0x18   : > { %v348_v7 = vld [vmem:[%s10732_s11 + $0x180] sm:$0xff]  ;;  %v9208_v9 = vcombine.high %v484_v3, %v488_v5  ;;  %v9207_v10 = vcombine.low %v484_v3, %v488_v5  ;;  %5395 = vmatprep.subr.bf16.mxu0 %v9080_v4 }
  0x19   : > { %v352_v8 = vld [vmem:[%s10732_s11 + $0x1a0] sm:$0xff]  ;;  %5396 = vmatpush1.bf16.msra.mxu0 %v9079_v6  ;;  %v10764_v54 = vsub.s32 %v1137_v44, %v10757_v45 }
  0x1a   : > { %v9072_v11 = vcombine.high %v348_v7, %v352_v8  ;;  %v476_v12 = vld [vmem:[%s10732_s11 + $0x580] sm:$0xff]  ;;  %5436 = vmatprep.subr.bf16.mxu1 %v9208_v9  ;;  %v9071_v19 = vcombine.low %v348_v7, %v352_v8 }
  0x1b   : > { %v480_v13 = vld [vmem:[%s10732_s11 + $0x5a0] sm:$0xff]  ;;  %5437 = vmatpush1.bf16.msra.mxu1 %v9207_v10 }
  0x1c   : > { %v340_v14 = vld [vmem:[%s10732_s11 + $0x140] sm:$0xff]  ;;  %v9200_v15 = vcombine.high %v476_v12, %v480_v13  ;;  %5397 = vmatprep.subr.bf16.mxu0 %v9072_v11  ;;  %v9199_v20 = vcombine.low %v476_v12, %v480_v13 }
  0x1d   : > { %v344_v16 = vld [vmem:[%s10732_s11 + $0x160] sm:$0xff]  ;;  %5398 = vmatpush1.bf16.msra.mxu0 %v9071_v19 }
  0x1e   : > { %v468_v17 = vld [vmem:[%s10732_s11 + $0x540] sm:$0xff]  ;;  %v9064_v21 = vcombine.high %v340_v14, %v344_v16  ;;  %5438 = vmatprep.subr.bf16.mxu1 %v9200_v15  ;;  %v9063_v27 = vcombine.low %v340_v14, %v344_v16 }
  0x1f   : > { %v472_v18 = vld [vmem:[%s10732_s11 + $0x560] sm:$0xff]  ;;  %5439 = vmatpush1.bf16.msra.mxu1 %v9199_v20 }
  0x20   : > { %v9192_v22 = vcombine.high %v468_v17, %v472_v18  ;;  %v332_v23 = vld [vmem:[%s10732_s11 + $0x100] sm:$0xff]  ;;  %5399 = vmatprep.subr.bf16.mxu0 %v9064_v21  ;;  %v9191_v28 = vcombine.low %v468_v17, %v472_v18 }
  0x21   : > { %v336_v24 = vld [vmem:[%s10732_s11 + $0x120] sm:$0xff]  ;;  %5400 = vmatpush1.bf16.msra.mxu0 %v9063_v27 }
  0x22   : > { %v460_v25 = vld [vmem:[%s10732_s11 + $0x500] sm:$0xff]  ;;  %v9056_v29 = vcombine.high %v332_v23, %v336_v24  ;;  %5440 = vmatprep.subr.bf16.mxu1 %v9192_v22  ;;  %v9055_v38 = vcombine.low %v332_v23, %v336_v24 }
  0x23   : > { %v464_v26 = vld [vmem:[%s10732_s11 + $0x520] sm:$0xff]  ;;  %5441 = vmatpush1.bf16.msra.mxu1 %v9191_v28 }
  0x24   : > { %v9184_v30 = vcombine.high %v460_v25, %v464_v26  ;;  %v324_v31 = vld [vmem:[%s10732_s11 + $0xc0] sm:$0xff]  ;;  %5401 = vmatprep.subr.bf16.mxu0 %v9056_v29  ;;  %v9183_v39 = vcombine.low %v460_v25, %v464_v26 }
  0x25   : > { %v328_v32 = vld [vmem:[%s10732_s11 + $0xe0] sm:$0xff]  ;;  %5402 = vmatpush1.bf16.msra.mxu0 %v9055_v38 }
  0x26   : > { %v452_v36 = vld [vmem:[%s10732_s11 + $0x4c0] sm:$0xff]  ;;  %v9048_v40 = vcombine.high %v324_v31, %v328_v32  ;;  %5442 = vmatprep.subr.bf16.mxu1 %v9184_v30  ;;  %v9047_v48 = vcombine.low %v324_v31, %v328_v32 }
  0x27   : > { %v456_v37 = vld [vmem:[%s10732_s11 + $0x4e0] sm:$0xff]  ;;  %5443 = vmatpush1.bf16.msra.mxu1 %v9183_v39 }
  0x28   : > { %v9176_v41 = vcombine.high %v452_v36, %v456_v37  ;;  %v316_v42 = vld [vmem:[%s10732_s11 + $0x80] sm:$0xff]  ;;  %5403 = vmatprep.subr.bf16.mxu0 %v9048_v40  ;;  %v9175_v49 = vcombine.low %v452_v36, %v456_v37 }
  0x29   : > { %v320_v43 = vld [vmem:[%s10732_s11 + $0xa0] sm:$0xff]  ;;  %5404 = vmatpush1.bf16.msra.mxu0 %v9047_v48 }
  0x2a   : > { %v444_v46 = vld [vmem:[%s10732_s11 + $0x480] sm:$0xff]  ;;  %v9040_v50 = vcombine.high %v316_v42, %v320_v43  ;;  %5444 = vmatprep.subr.bf16.mxu1 %v9176_v41  ;;  %v9039_v57 = vcombine.low %v316_v42, %v320_v43 }
  0x2b   : > { %v448_v47 = vld [vmem:[%s10732_s11 + $0x4a0] sm:$0xff]  ;;  %5445 = vmatpush1.bf16.msra.mxu1 %v9175_v49 }
  0x2c   : > { %v9168_v51 = vcombine.high %v444_v46, %v448_v47  ;;  %v308_v52 = vld [vmem:[%s10732_s11 + $0x40] sm:$0xff]  ;;  %5405 = vmatprep.subr.bf16.mxu0 %v9040_v50  ;;  %v9167_v58 = vcombine.low %v444_v46, %v448_v47 }
  0x2d   : > { %v312_v53 = vld [vmem:[%s10732_s11 + $0x60] sm:$0xff]  ;;  %5406 = vmatpush1.bf16.msra.mxu0 %v9039_v57 }
  0x2e   : > { %v436_v55 = vld [vmem:[%s10732_s11 + $0x440] sm:$0xff]  ;;  %v9032_v59 = vcombine.high %v308_v52, %v312_v53  ;;  %5446 = vmatprep.subr.bf16.mxu1 %v9168_v51  ;;  %v9031_v3 = vcombine.low %v308_v52, %v312_v53 }
  0x2f   : > { %v440_v56 = vld [vmem:[%s10732_s11 + $0x460] sm:$0xff]  ;;  %5447 = vmatpush1.bf16.msra.mxu1 %v9167_v58 }
  0x30   : > { %v10769_v60 = vld [vmem:[%s10727_s30] sm:$0xff]  ;;  %v9160_v61 = vcombine.high %v436_v55, %v440_v56  ;;  %5407 = vmatprep.subr.bf16.mxu0 %v9032_v59  ;;  %v9159_v5 = vcombine.low %v436_v55, %v440_v56 }
  0x31   : > { %v300_v62 = vld [vmem:[%s10732_s11] sm:$0xff]  ;;  %v10775_v0 = vrot.slane %v10769_v60, %v10764_v54  ;;  %5408 = vmatpush1.bf16.msra.mxu0 %v9031_v3 }
  0x32   : > { %v304_v63 = vld [vmem:[%s10732_s11 + $0x20] sm:$0xff]  ;;  %5448 = vmatprep.subr.bf16.mxu1 %v9160_v61 }
  0x33   : > { %v428_v1 = vld [vmem:[%s10732_s11 + $0x400] sm:$0xff]  ;;  %v1149_v4 = vcombine.high %v10775_v0, %v10775_v0  ;;  %v9024_v6 = vcombine.high %v300_v62, %v304_v63  ;;  %v9023_v13 = vcombine.low %v300_v62, %v304_v63  ;;  %5449 = vmatpush1.bf16.msra.mxu1 %v9159_v5 }
  0x34   : > { %v432_v2 = vld [vmem:[%s10732_s11 + $0x420] sm:$0xff] }
  0x35   : > { %v9152_v7 = vcombine.high %v428_v1, %v432_v2  ;;  %v420_v8 = vld [vmem:[%s10732_s11 + $0x3c0] sm:$0xff]  ;;  %v10784_v10 = vrot.slane %v1149_v4, %v10764_v54  ;;  %5409 = vmatprep.subr.bf16.mxu0 %v9024_v6  ;;  %v9151_v15 = vcombine.low %v428_v1, %v432_v2  ;;  %v1134_v2 = vcombine.high %v10769_v60, %v10769_v60 }
  0x36   : > { %v424_v9 = vld [vmem:[%s10732_s11 + $0x3e0] sm:$0xff]  ;;  %5410 = vmatpush1.bf16.msra.mxu0 %v9023_v13 }
  0x37   : > { %v548_v11 = vld [vmem:[%s10732_s11 + $0x7c0] sm:$0xff]  ;;  %5427 = vmatprep.mubr.bf16.mxu0 %v10784_v10  ;;  %v10791_v14 = vcombine.high %v10784_v10, %v10784_v10  ;;  %v9144_v16 = vcombine.high %v420_v8, %v424_v9  ;;  %5450 = vmatprep.subr.bf16.mxu1 %v9152_v7  ;;  %v9143_v22 = vcombine.low %v420_v8, %v424_v9 }
  0x38   : > { %v552_v12 = vld [vmem:[%s10732_s11 + $0x7e0] sm:$0xff]  ;;  %5451 = vmatpush1.bf16.msra.mxu1 %v9151_v15 }
  0x39   : > { %v9272_v17 = vcombine.high %v548_v11, %v552_v12  ;;  %v412_v18 = vld [vmem:[%s10732_s11 + $0x380] sm:$0xff]  ;;  %5468 = vmatprep.mubr.bf16.mxu1 %v10791_v14  ;;  %5411 = vmatprep.subr.bf16.mxu0 %v9144_v16  ;;  %v9271_v23 = vcombine.low %v548_v11, %v552_v12  ;;  %v10825_v12 = vrot.slane %v1134_v2, %v10764_v54 }
  0x3a   : > { %v416_v19 = vld [vmem:[%s10732_s11 + $0x3a0] sm:$0xff]  ;;  %5412 = vmatpush2.bf16.msra.mxu0 %v9143_v22 }
  0x3b   : > { %v540_v20 = vld [vmem:[%s10732_s11 + $0x780] sm:$0xff]  ;;  %v9136_v24 = vcombine.high %v412_v18, %v416_v19  ;;  %5452 = vmatprep.subr.bf16.mxu1 %v9272_v17  ;;  %v9135_v30 = vcombine.low %v412_v18, %v416_v19 }
  0x3c   : > { %v544_v21 = vld [vmem:[%s10732_s11 + $0x7a0] sm:$0xff]  ;;  %5453 = vmatpush2.bf16.msra.mxu1 %v9271_v23  ;;  %v10835_v23 = vrot.slane %v10775_v0, %v10764_v54 }
  0x3d   : > { %v9264_v25 = vcombine.high %v540_v20, %v544_v21  ;;  %v404_v26 = vld [vmem:[%s10732_s11 + $0x340] sm:$0xff]  ;;  %5413 = vmatprep.subr.bf16.mxu0 %v9136_v24  ;;  %v9263_v31 = vcombine.low %v540_v20, %v544_v21  ;;  %v1150_v21 = vcombine.high %v10825_v12, %v10825_v12 }
  0x3e   : > { %v408_v27 = vld [vmem:[%s10732_s11 + $0x360] sm:$0xff]  ;;  %5414 = vmatpush2.bf16.msra.mxu0 %v9135_v30  ;;  %v10846_v0 = vcombine.high %v10835_v23, %v10835_v23 }
  0x3f   : > { %v532_v28 = vld [vmem:[%s10732_s11 + $0x740] sm:$0xff]  ;;  %v9128_v32 = vcombine.high %v404_v26, %v408_v27  ;;  %5454 = vmatprep.subr.bf16.mxu1 %v9264_v25  ;;  %v9127_v38 = vcombine.low %v404_v26, %v408_v27 }
  0x40   : > { %v536_v29 = vld [vmem:[%s10732_s11 + $0x760] sm:$0xff]  ;;  %5455 = vmatpush2.bf16.msra.mxu1 %v9263_v31  ;;  %v10842_v31 = vrot.slane %v1150_v21, %v10764_v54 }
  0x41   : > { %v9256_v33 = vcombine.high %v532_v28, %v536_v29  ;;  %v396_v34 = vld [vmem:[%s10732_s11 + $0x300] sm:$0xff]  ;;  %5415 = vmatprep.subr.bf16.mxu0 %v9128_v32  ;;  %v9255_v39 = vcombine.low %v532_v28, %v536_v29 }
  0x42   : > { %v400_v35 = vld [vmem:[%s10732_s11 + $0x320] sm:$0xff]  ;;  %5416 = vmatpush2.bf16.msra.mxu0 %v9127_v38 }
  0x43   : > { %v524_v36 = vld [vmem:[%s10732_s11 + $0x700] sm:$0xff]  ;;  %v9120_v40 = vcombine.high %v396_v34, %v400_v35  ;;  %5456 = vmatprep.subr.bf16.mxu1 %v9256_v33  ;;  %v9119_v47 = vcombine.low %v396_v34, %v400_v35 }
  0x44   : > { %v528_v37 = vld [vmem:[%s10732_s11 + $0x720] sm:$0xff]  ;;  %5457 = vmatpush2.bf16.msra.mxu1 %v9255_v39 }
  0x45   : > { %v9248_v41 = vcombine.high %v524_v36, %v528_v37  ;;  %v388_v42 = vld [vmem:[%s10732_s11 + $0x2c0] sm:$0xff]  ;;  %5417 = vmatprep.subr.bf16.mxu0 %v9120_v40  ;;  %v9247_v48 = vcombine.low %v524_v36, %v528_v37  ;;  %v10855_v40 = vcombine.high %v10842_v31, %v10842_v31 }
  0x46   : > { %v392_v43 = vld [vmem:[%s10732_s11 + $0x2e0] sm:$0xff]  ;;  %5418 = vmatpush2.bf16.msra.mxu0 %v9119_v47 }
  0x47   : > { %v516_v44 = vld [vmem:[%s10732_s11 + $0x6c0] sm:$0xff]  ;;  %v9112_v49 = vcombine.high %v388_v42, %v392_v43  ;;  %5458 = vmatprep.subr.bf16.mxu1 %v9248_v41  ;;  %v9111_v56 = vcombine.low %v388_v42, %v392_v43 }
  0x48   : > { %v520_v46 = vld [vmem:[%s10732_s11 + $0x6e0] sm:$0xff]  ;;  %5459 = vmatpush2.bf16.msra.mxu1 %v9247_v48 }
  0x49   : > { %v9240_v50 = vcombine.high %v516_v44, %v520_v46  ;;  %v380_v51 = vld [vmem:[%s10732_s11 + $0x280] sm:$0xff]  ;;  %5419 = vmatprep.subr.bf16.mxu0 %v9112_v49  ;;  %v9239_v57 = vcombine.low %v516_v44, %v520_v46 }
  0x4a   : > { %v384_v52 = vld [vmem:[%s10732_s11 + $0x2a0] sm:$0xff]  ;;  %5420 = vmatpush2.bf16.msra.mxu0 %v9111_v56 }
  0x4b   : > { %v508_v53 = vld [vmem:[%s10732_s11 + $0x680] sm:$0xff]  ;;  %v9104_v58 = vcombine.high %v380_v51, %v384_v52  ;;  %5460 = vmatprep.subr.bf16.mxu1 %v9240_v50  ;;  %v9103_v3 = vcombine.low %v380_v51, %v384_v52 }
  0x4c   : > { %v512_v55 = vld [vmem:[%s10732_s11 + $0x6a0] sm:$0xff]  ;;  %5461 = vmatpush2.bf16.msra.mxu1 %v9239_v57 }
  0x4d   : > { %v9232_v59 = vcombine.high %v508_v53, %v512_v55  ;;  %v372_v61 = vld [vmem:[%s10732_s11 + $0x240] sm:$0xff]  ;;  %5421 = vmatprep.subr.bf16.mxu0 %v9104_v58  ;;  %v9231_v4 = vcombine.low %v508_v53, %v512_v55 }
  0x4e   : > { %v376_v62 = vld [vmem:[%s10732_s11 + $0x260] sm:$0xff]  ;;  %5422 = vmatpush2.bf16.msra.mxu0 %v9103_v3 }
  0x4f   : > { %v500_v63 = vld [vmem:[%s10732_s11 + $0x640] sm:$0xff]  ;;  %v9096_v5 = vcombine.high %v372_v61, %v376_v62  ;;  %5462 = vmatprep.subr.bf16.mxu1 %v9232_v59  ;;  %v9095_v60 = vcombine.low %v372_v61, %v376_v62 }
  0x50   : > { %v504_v1 = vld [vmem:[%s10732_s11 + $0x660] sm:$0xff]  ;;  %5463 = vmatpush2.bf16.msra.mxu1 %v9231_v4 }
  0x51   : > { %v9224_v6 = vcombine.high %v500_v63, %v504_v1  ;;  %v364_v7 = vld [vmem:[%s10732_s11 + $0x200] sm:$0xff]  ;;  %5423 = vmatprep.subr.bf16.mxu0 %v9096_v5  ;;  %v9223_v13 = vcombine.low %v500_v63, %v504_v1 }
  0x52   : > { %v368_v8 = vld [vmem:[%s10732_s11 + $0x220] sm:$0xff]  ;;  %5424 = vmatpush2.bf16.msra.mxu0 %v9095_v60 }
  0x53   : > { %v492_v9 = vld [vmem:[%s10732_s11 + $0x600] sm:$0xff]  ;;  %v9088_v15 = vcombine.high %v364_v7, %v368_v8  ;;  %5464 = vmatprep.subr.bf16.mxu1 %v9224_v6  ;;  %v9087_v22 = vcombine.low %v364_v7, %v368_v8 }
  0x54   : > { %v496_v11 = vld [vmem:[%s10732_s11 + $0x620] sm:$0xff]  ;;  %5465 = vmatpush2.bf16.msra.mxu1 %v9223_v13 }
  0x55   : > { %v9216_v16 = vcombine.high %v492_v9, %v496_v11  ;;  %v612_v17 = vld [vmem:[%s10732_s11 + $0x9c0] sm:$0xff]  ;;  %5425 = vmatprep.subr.bf16.mxu0 %v9088_v15  ;;  %v9215_v24 = vcombine.low %v492_v9, %v496_v11 }
  0x56   : > { %v616_v18 = vld [vmem:[%s10732_s11 + $0x9e0] sm:$0xff]  ;;  %5426 = vmatpush2.bf16.msra.mxu0 %v9087_v22 }
  0x57   : > { %v740_v19 = vld [vmem:[%s10732_s11 + $0xdc0] sm:$0xff]  ;;  %v9336_v25 = vcombine.high %v612_v17, %v616_v18  ;;  %5466 = vmatprep.subr.bf16.mxu1 %v9216_v16  ;;  %v9335_v32 = vcombine.low %v612_v17, %v616_v18 }
  0x58   : > { %v744_v20 = vld [vmem:[%s10732_s11 + $0xde0] sm:$0xff]  ;;  %5467 = vmatpush2.bf16.msra.mxu1 %v9215_v24 }
  0x59   : > { %v9464_v26 = vcombine.high %v740_v19, %v744_v20  ;;  %v604_v27 = vld [vmem:[%s10732_s11 + $0x980] sm:$0xff]  ;;  %5477 = vmatprep.subr.bf16.mxu0 %v9336_v25  ;;  %v9463_v33 = vcombine.low %v740_v19, %v744_v20  ;;  %5428 = vmatmul.mubr.bf16.vlgmr.msra.gmra.mxu0 %v10835_v23 }
  0x5a   : > { %v608_v28 = vld [vmem:[%s10732_s11 + $0x9a0] sm:$0xff]  ;;  %5478 = vmatpush1.bf16.msra.mxu0 %v9335_v32  ;;  %5509 = vmatprep.mubr.bf16.mxu0 %v10842_v31 }
  0x5b   : > { %v732_v29 = vld [vmem:[%s10732_s11 + $0xd80] sm:$0xff]  ;;  %v9328_v34 = vcombine.high %v604_v27, %v608_v28  ;;  %5518 = vmatprep.subr.bf16.mxu1 %v9464_v26  ;;  %5469 = vmatmul.mubr.bf16.vlgmr.msra.gmra.mxu1 %v10846_v0  ;;  %v9327_v41 = vcombine.low %v604_v27, %v608_v28 }
  0x5c   : > { %v736_v30 = vld [vmem:[%s10732_s11 + $0xda0] sm:$0xff]  ;;  %5519 = vmatpush1.bf16.msra.mxu1 %v9463_v33  ;;  %5550 = vmatprep.mubr.bf16.mxu1 %v10855_v40 }
  0x5d   : > { %v9456_v35 = vcombine.high %v732_v29, %v736_v30  ;;  %v596_v36 = vld [vmem:[%s10732_s11 + $0x940] sm:$0xff]  ;;  %5479 = vmatprep.subr.bf16.mxu0 %v9328_v34  ;;  %v9455_v42 = vcombine.low %v732_v29, %v736_v30 }
  0x5e   : > { %v600_v37 = vld [vmem:[%s10732_s11 + $0x960] sm:$0xff]  ;;  %5480 = vmatpush1.bf16.msra.mxu0 %v9327_v41 }
  0x5f   : > { %v724_v38 = vld [vmem:[%s10732_s11 + $0xd40] sm:$0xff]  ;;  %v9320_v43 = vcombine.high %v596_v36, %v600_v37  ;;  %5520 = vmatprep.subr.bf16.mxu1 %v9456_v35  ;;  %v9319_v50 = vcombine.low %v596_v36, %v600_v37 }
  0x60   : > { %v728_v39 = vld [vmem:[%s10732_s11 + $0xd60] sm:$0xff]  ;;  %5521 = vmatpush1.bf16.msra.mxu1 %v9455_v42 }
  0x61   : > { %v9448_v44 = vcombine.high %v724_v38, %v728_v39  ;;  %v588_v46 = vld [vmem:[%s10732_s11 + $0x900] sm:$0xff]  ;;  %5481 = vmatprep.subr.bf16.mxu0 %v9320_v43  ;;  %v9447_v51 = vcombine.low %v724_v38, %v728_v39 }
  0x62   : > { %v592_v47 = vld [vmem:[%s10732_s11 + $0x920] sm:$0xff]  ;;  %5482 = vmatpush1.bf16.msra.mxu0 %v9319_v50 }
  0x63   : > { %v716_v48 = vld [vmem:[%s10732_s11 + $0xd00] sm:$0xff]  ;;  %v9312_v52 = vcombine.high %v588_v46, %v592_v47  ;;  %5522 = vmatprep.subr.bf16.mxu1 %v9448_v44  ;;  %v9311_v59 = vcombine.low %v588_v46, %v592_v47 }
  0x64   : > { %v720_v49 = vld [vmem:[%s10732_s11 + $0xd20] sm:$0xff]  ;;  %5523 = vmatpush1.bf16.msra.mxu1 %v9447_v51 }
  0x65   : > { %v9440_v53 = vcombine.high %v716_v48, %v720_v49  ;;  %v580_v55 = vld [vmem:[%s10732_s11 + $0x8c0] sm:$0xff]  ;;  %5483 = vmatprep.subr.bf16.mxu0 %v9312_v52  ;;  %v9439_v61 = vcombine.low %v716_v48, %v720_v49 }
  0x66   : > { %v584_v56 = vld [vmem:[%s10732_s11 + $0x8e0] sm:$0xff]  ;;  %5484 = vmatpush1.bf16.msra.mxu0 %v9311_v59 }
  0x67   : > { %v708_v57 = vld [vmem:[%s10732_s11 + $0xcc0] sm:$0xff]  ;;  %v9304_v62 = vcombine.high %v580_v55, %v584_v56  ;;  %5524 = vmatprep.subr.bf16.mxu1 %v9440_v53  ;;  %v9303_v5 = vcombine.low %v580_v55, %v584_v56 }
  0x68   : > { %v712_v58 = vld [vmem:[%s10732_s11 + $0xce0] sm:$0xff]  ;;  %5525 = vmatpush1.bf16.msra.mxu1 %v9439_v61 }
  0x69   : > { %v9432_v63 = vcombine.high %v708_v57, %v712_v58  ;;  %v572_v1 = vld [vmem:[%s10732_s11 + $0x880] sm:$0xff]  ;;  %5485 = vmatprep.subr.bf16.mxu0 %v9304_v62  ;;  %v9431_v6 = vcombine.low %v708_v57, %v712_v58 }
  0x6a   : > { %v576_v2 = vld [vmem:[%s10732_s11 + $0x8a0] sm:$0xff]  ;;  %5486 = vmatpush1.bf16.msra.mxu0 %v9303_v5 }
  0x6b   : > { %v700_v3 = vld [vmem:[%s10732_s11 + $0xc80] sm:$0xff]  ;;  %v9296_v7 = vcombine.high %v572_v1, %v576_v2  ;;  %5526 = vmatprep.subr.bf16.mxu1 %v9432_v63  ;;  %v9295_v15 = vcombine.low %v572_v1, %v576_v2 }
  0x6c   : > { %v704_v4 = vld [vmem:[%s10732_s11 + $0xca0] sm:$0xff]  ;;  %5527 = vmatpush1.bf16.msra.mxu1 %v9431_v6 }
  0x6d   : > { %v9424_v8 = vcombine.high %v700_v3, %v704_v4  ;;  %v564_v9 = vld [vmem:[%s10732_s11 + $0x840] sm:$0xff]  ;;  %5487 = vmatprep.subr.bf16.mxu0 %v9296_v7  ;;  %v9423_v16 = vcombine.low %v700_v3, %v704_v4 }
  0x6e   : > { %v568_v11 = vld [vmem:[%s10732_s11 + $0x860] sm:$0xff]  ;;  %5488 = vmatpush1.bf16.msra.mxu0 %v9295_v15 }
  0x6f   : > { %v692_v60 = vld [vmem:[%s10732_s11 + $0xc40] sm:$0xff]  ;;  %v9288_v17 = vcombine.high %v564_v9, %v568_v11  ;;  %5528 = vmatprep.subr.bf16.mxu1 %v9424_v8  ;;  %v9287_v24 = vcombine.low %v564_v9, %v568_v11 }
  0x70   : > { %v696_v13 = vld [vmem:[%s10732_s11 + $0xc60] sm:$0xff]  ;;  %5529 = vmatpush1.bf16.msra.mxu1 %v9423_v16 }
  0x71   : > { %v9416_v18 = vcombine.high %v692_v60, %v696_v13  ;;  %v556_v19 = vld [vmem:[%s10732_s11 + $0x800] sm:$0xff]  ;;  %5489 = vmatprep.subr.bf16.mxu0 %v9288_v17  ;;  %v9415_v25 = vcombine.low %v692_v60, %v696_v13 }
  0x72   : > { %v560_v20 = vld [vmem:[%s10732_s11 + $0x820] sm:$0xff]  ;;  %5490 = vmatpush1.bf16.msra.mxu0 %v9287_v24 }
  0x73   : > { %v684_v21 = vld [vmem:[%s10732_s11 + $0xc00] sm:$0xff]  ;;  %v9280_v26 = vcombine.high %v556_v19, %v560_v20  ;;  %5530 = vmatprep.subr.bf16.mxu1 %v9416_v18  ;;  %v9279_v33 = vcombine.low %v556_v19, %v560_v20 }
  0x74   : > { %v688_v22 = vld [vmem:[%s10732_s11 + $0xc20] sm:$0xff]  ;;  %5531 = vmatpush1.bf16.msra.mxu1 %v9415_v25 }
  0x75   : > { %v9408_v27 = vcombine.high %v684_v21, %v688_v22  ;;  %v676_v28 = vld [vmem:[%s10732_s11 + $0xbc0] sm:$0xff]  ;;  %5491 = vmatprep.subr.bf16.mxu0 %v9280_v26  ;;  %v9407_v34 = vcombine.low %v684_v21, %v688_v22  ;;  %v10909_v26 = vld [vmem:[%s10727_s30 + $0x8] sm:$0x1f] }
  0x76   : > { %v680_v29 = vld [vmem:[%s10732_s11 + $0xbe0] sm:$0xff]  ;;  %5492 = vmatpush1.bf16.msra.mxu0 %v9279_v33 }
  0x77   : > { %v804_v30 = vld [vmem:[%s10732_s11 + $0xfc0] sm:$0xff]  ;;  %v9400_v35 = vcombine.high %v676_v28, %v680_v29  ;;  %5532 = vmatprep.subr.bf16.mxu1 %v9408_v27  ;;  %v9399_v42 = vcombine.low %v676_v28, %v680_v29 }
  0x78   : > { %v808_v32 = vld [vmem:[%s10732_s11 + $0xfe0] sm:$0xff]  ;;  %5533 = vmatpush1.bf16.msra.mxu1 %v9407_v34 }
  0x79   : > { %v9528_v36 = vcombine.high %v804_v30, %v808_v32  ;;  %v668_v37 = vld [vmem:[%s10732_s11 + $0xb80] sm:$0xff]  ;;  %5493 = vmatprep.subr.bf16.mxu0 %v9400_v35  ;;  %v9527_v43 = vcombine.low %v804_v30, %v808_v32  ;;  %v10917_v35 = vrot.slane %v10909_v26, %v10764_v54 }
  0x7a   : > { %v672_v38 = vld [vmem:[%s10732_s11 + $0xba0] sm:$0xff]  ;;  %5494 = vmatpush2.bf16.msra.mxu0 %v9399_v42 }
  0x7b   : > { %v796_v39 = vld [vmem:[%s10732_s11 + $0xf80] sm:$0xff]  ;;  %v9392_v44 = vcombine.high %v668_v37, %v672_v38  ;;  %5534 = vmatprep.subr.bf16.mxu1 %v9528_v36  ;;  %v9391_v51 = vcombine.low %v668_v37, %v672_v38 }
  0x7c   : > { %v800_v41 = vld [vmem:[%s10732_s11 + $0xfa0] sm:$0xff]  ;;  %5535 = vmatpush2.bf16.msra.mxu1 %v9527_v43 }
  0x7d   : > { %v9520_v46 = vcombine.high %v796_v39, %v800_v41  ;;  %v660_v47 = vld [vmem:[%s10732_s11 + $0xb40] sm:$0xff]  ;;  %5495 = vmatprep.subr.bf16.mxu0 %v9392_v44  ;;  %v9519_v52 = vcombine.low %v796_v39, %v800_v41 }
  0x7e   : > { %v664_v48 = vld [vmem:[%s10732_s11 + $0xb60] sm:$0xff]  ;;  %5496 = vmatpush2.bf16.msra.mxu0 %v9391_v51 }
  0x7f   : > { %v788_v49 = vld [vmem:[%s10732_s11 + $0xf40] sm:$0xff]  ;;  %v9384_v53 = vcombine.high %v660_v47, %v664_v48  ;;  %5536 = vmatprep.subr.bf16.mxu1 %v9520_v46  ;;  %v9383_v61 = vcombine.low %v660_v47, %v664_v48  ;;  %v1198_v46 = vcombine.high %v10917_v35, %v10917_v35  ;;  %v10927_v48 = vrot.slane %v10825_v12, %v10764_v54 }
  0x80   : > { %v792_v50 = vld [vmem:[%s10732_s11 + $0xf60] sm:$0xff]  ;;  %5537 = vmatpush2.bf16.msra.mxu1 %v9519_v52 }
  0x81   : > { %v9512_v55 = vcombine.high %v788_v49, %v792_v50  ;;  %v652_v56 = vld [vmem:[%s10732_s11 + $0xb00] sm:$0xff]  ;;  %5497 = vmatprep.subr.bf16.mxu0 %v9384_v53  ;;  %v9511_v62 = vcombine.low %v788_v49, %v792_v50  ;;  %v10938_v12 = vcombine.high %v10927_v48, %v10927_v48 }
  0x82   : > { %v656_v57 = vld [vmem:[%s10732_s11 + $0xb20] sm:$0xff]  ;;  %5498 = vmatpush2.bf16.msra.mxu0 %v9383_v61 }
  0x83   : > { %v780_v58 = vld [vmem:[%s10732_s11 + $0xf00] sm:$0xff]  ;;  %v9376_v63 = vcombine.high %v652_v56, %v656_v57  ;;  %5538 = vmatprep.subr.bf16.mxu1 %v9512_v55  ;;  %v9375_v6 = vcombine.low %v652_v56, %v656_v57  ;;  %v10934_v57 = vrot.slane %v1198_v46, %v10764_v54 }
  0x84   : > { %v784_v59 = vld [vmem:[%s10732_s11 + $0xf20] sm:$0xff]  ;;  %5539 = vmatpush2.bf16.msra.mxu1 %v9511_v62 }
  0x85   : > { %v9504_v1 = vcombine.high %v780_v58, %v784_v59  ;;  %v644_v2 = vld [vmem:[%s10732_s11 + $0xac0] sm:$0xff]  ;;  %5499 = vmatprep.subr.bf16.mxu0 %v9376_v63  ;;  %v9503_v7 = vcombine.low %v780_v58, %v784_v59 }
  0x86   : > { %v648_v3 = vld [vmem:[%s10732_s11 + $0xae0] sm:$0xff]  ;;  %5500 = vmatpush2.bf16.msra.mxu0 %v9375_v6 }
  0x87   : > { %v772_v4 = vld [vmem:[%s10732_s11 + $0xec0] sm:$0xff]  ;;  %v9368_v8 = vcombine.high %v644_v2, %v648_v3  ;;  %5540 = vmatprep.subr.bf16.mxu1 %v9504_v1  ;;  %v9367_v16 = vcombine.low %v644_v2, %v648_v3 }
  0x88   : > { %v776_v5 = vld [vmem:[%s10732_s11 + $0xee0] sm:$0xff]  ;;  %5541 = vmatpush2.bf16.msra.mxu1 %v9503_v7 }
  0x89   : > { %v9496_v9 = vcombine.high %v772_v4, %v776_v5  ;;  %v636_v11 = vld [vmem:[%s10732_s11 + $0xa80] sm:$0xff]  ;;  %5501 = vmatprep.subr.bf16.mxu0 %v9368_v8  ;;  %v9495_v17 = vcombine.low %v772_v4, %v776_v5  ;;  %v10947_v4 = vcombine.high %v10934_v57, %v10934_v57 }
  0x8a   : > { %v640_v60 = vld [vmem:[%s10732_s11 + $0xaa0] sm:$0xff]  ;;  %5502 = vmatpush2.bf16.msra.mxu0 %v9367_v16 }
  0x8b   : > { %v764_v13 = vld [vmem:[%s10732_s11 + $0xe80] sm:$0xff]  ;;  %v9360_v18 = vcombine.high %v636_v11, %v640_v60  ;;  %5542 = vmatprep.subr.bf16.mxu1 %v9496_v9  ;;  %v9359_v25 = vcombine.low %v636_v11, %v640_v60 }
  0x8c   : > { %v768_v15 = vld [vmem:[%s10732_s11 + $0xea0] sm:$0xff]  ;;  %5543 = vmatpush2.bf16.msra.mxu1 %v9495_v17 }
  0x8d   : > { %v9488_v19 = vcombine.high %v764_v13, %v768_v15  ;;  %v628_v20 = vld [vmem:[%s10732_s11 + $0xa40] sm:$0xff]  ;;  %5503 = vmatprep.subr.bf16.mxu0 %v9360_v18  ;;  %v9487_v27 = vcombine.low %v764_v13, %v768_v15 }
  0x8e   : > { %v632_v21 = vld [vmem:[%s10732_s11 + $0xa60] sm:$0xff]  ;;  %5504 = vmatpush2.bf16.msra.mxu0 %v9359_v25 }
  0x8f   : > { %v756_v22 = vld [vmem:[%s10732_s11 + $0xe40] sm:$0xff]  ;;  %v9352_v28 = vcombine.high %v628_v20, %v632_v21  ;;  %5544 = vmatprep.subr.bf16.mxu1 %v9488_v19  ;;  %v9351_v36 = vcombine.low %v628_v20, %v632_v21 }
  0x90   : > { %v760_v24 = vld [vmem:[%s10732_s11 + $0xe60] sm:$0xff]  ;;  %5545 = vmatpush2.bf16.msra.mxu1 %v9487_v27 }
  0x91   : > { %v9480_v29 = vcombine.high %v756_v22, %v760_v24  ;;  %v620_v30 = vld [vmem:[%s10732_s11 + $0xa00] sm:$0xff]  ;;  %5505 = vmatprep.subr.bf16.mxu0 %v9352_v28  ;;  %v9479_v37 = vcombine.low %v756_v22, %v760_v24 }
  0x92   : > { %v624_v32 = vld [vmem:[%s10732_s11 + $0xa20] sm:$0xff]  ;;  %5506 = vmatpush2.bf16.msra.mxu0 %v9351_v36 }
  0x93   : > { %v748_v33 = vld [vmem:[%s10732_s11 + $0xe00] sm:$0xff]  ;;  %v9344_v38 = vcombine.high %v620_v30, %v624_v32  ;;  %5546 = vmatprep.subr.bf16.mxu1 %v9480_v29  ;;  %v9343_v47 = vcombine.low %v620_v30, %v624_v32 }
  0x94   : > { %v752_v34 = vld [vmem:[%s10732_s11 + $0xe20] sm:$0xff]  ;;  %5547 = vmatpush2.bf16.msra.mxu1 %v9479_v37 }
  0x95   : > { %v9472_v39 = vcombine.high %v748_v33, %v752_v34  ;;  %v868_v41 = vld [vmem:[%s10732_s11 + $0x11c0] sm:$0xff]  ;;  %5507 = vmatprep.subr.bf16.mxu0 %v9344_v38  ;;  %v9471_v49 = vcombine.low %v748_v33, %v752_v34 }
  0x96   : > { %v872_v42 = vld [vmem:[%s10732_s11 + $0x11e0] sm:$0xff]  ;;  %5508 = vmatpush2.bf16.msra.mxu0 %v9343_v47 }
  0x97   : > { %v996_v43 = vld [vmem:[%s10732_s11 + $0x15c0] sm:$0xff]  ;;  %v9592_v50 = vcombine.high %v868_v41, %v872_v42  ;;  %5548 = vmatprep.subr.bf16.mxu1 %v9472_v39  ;;  %v9591_v58 = vcombine.low %v868_v41, %v872_v42 }
  0x98   : > { %v1000_v44 = vld [vmem:[%s10732_s11 + $0x15e0] sm:$0xff]  ;;  %5549 = vmatpush2.bf16.msra.mxu1 %v9471_v49 }
  0x99   : > { %v9720_v51 = vcombine.high %v996_v43, %v1000_v44  ;;  %v860_v52 = vld [vmem:[%s10732_s11 + $0x1180] sm:$0xff]  ;;  %5559 = vmatprep.subr.bf16.mxu0 %v9592_v50  ;;  %v9719_v59 = vcombine.low %v996_v43, %v1000_v44  ;;  %5510 = vmatmul.mubr.bf16.vlgmr.msra.gmra.mxu0 %v10927_v48 }
  0x9a   : > { %v864_v53 = vld [vmem:[%s10732_s11 + $0x11a0] sm:$0xff]  ;;  %5560 = vmatpush1.bf16.msra.mxu0 %v9591_v58  ;;  %5591 = vmatprep.mubr.bf16.mxu0 %v10934_v57 }
  0x9b   : > { %v988_v55 = vld [vmem:[%s10732_s11 + $0x1580] sm:$0xff]  ;;  %v9584_v61 = vcombine.high %v860_v52, %v864_v53  ;;  %5600 = vmatprep.subr.bf16.mxu1 %v9720_v51  ;;  %5551 = vmatmul.mubr.bf16.vlgmr.msra.gmra.mxu1 %v10938_v12  ;;  %v9583_v5 = vcombine.low %v860_v52, %v864_v53 }
  0x9c   : > { %v992_v56 = vld [vmem:[%s10732_s11 + $0x15a0] sm:$0xff]  ;;  %5601 = vmatpush1.bf16.msra.mxu1 %v9719_v59  ;;  %5632 = vmatprep.mubr.bf16.mxu1 %v10947_v4 }
  0x9d   : > { %v9712_v62 = vcombine.high %v988_v55, %v992_v56  ;;  %v852_v63 = vld [vmem:[%s10732_s11 + $0x1140] sm:$0xff]  ;;  %5561 = vmatprep.subr.bf16.mxu0 %v9584_v61  ;;  %v9711_v6 = vcombine.low %v988_v55, %v992_v56 }
  0x9e   : > { %v856_v1 = vld [vmem:[%s10732_s11 + $0x1160] sm:$0xff]  ;;  %5562 = vmatpush1.bf16.msra.mxu0 %v9583_v5 }
  0x9f   : > { %v980_v2 = vld [vmem:[%s10732_s11 + $0x1540] sm:$0xff]  ;;  %v9576_v7 = vcombine.high %v852_v63, %v856_v1  ;;  %5602 = vmatprep.subr.bf16.mxu1 %v9712_v62  ;;  %v9575_v15 = vcombine.low %v852_v63, %v856_v1 }
  0xa0   : > { %v984_v3 = vld [vmem:[%s10732_s11 + $0x1560] sm:$0xff]  ;;  %5603 = vmatpush1.bf16.msra.mxu1 %v9711_v6 }
  0xa1   : > { %v9704_v8 = vcombine.high %v980_v2, %v984_v3  ;;  %v844_v9 = vld [vmem:[%s10732_s11 + $0x1100] sm:$0xff]  ;;  %5563 = vmatprep.subr.bf16.mxu0 %v9576_v7  ;;  %v9703_v16 = vcombine.low %v980_v2, %v984_v3 }
  0xa2   : > { %v848_v11 = vld [vmem:[%s10732_s11 + $0x1120] sm:$0xff]  ;;  %5564 = vmatpush1.bf16.msra.mxu0 %v9575_v15 }
  0xa3   : > { %v972_v60 = vld [vmem:[%s10732_s11 + $0x1500] sm:$0xff]  ;;  %v9568_v17 = vcombine.high %v844_v9, %v848_v11  ;;  %5604 = vmatprep.subr.bf16.mxu1 %v9704_v8  ;;  %v9567_v24 = vcombine.low %v844_v9, %v848_v11 }
  0xa4   : > { %v976_v13 = vld [vmem:[%s10732_s11 + $0x1520] sm:$0xff]  ;;  %5605 = vmatpush1.bf16.msra.mxu1 %v9703_v16 }
  0xa5   : > { %v9696_v18 = vcombine.high %v972_v60, %v976_v13  ;;  %v836_v19 = vld [vmem:[%s10732_s11 + $0x10c0] sm:$0xff]  ;;  %5565 = vmatprep.subr.bf16.mxu0 %v9568_v17  ;;  %v9695_v25 = vcombine.low %v972_v60, %v976_v13 }
  0xa6   : > { %v840_v20 = vld [vmem:[%s10732_s11 + $0x10e0] sm:$0xff]  ;;  %5566 = vmatpush1.bf16.msra.mxu0 %v9567_v24 }
  0xa7   : > { %v964_v21 = vld [vmem:[%s10732_s11 + $0x14c0] sm:$0xff]  ;;  %v9560_v27 = vcombine.high %v836_v19, %v840_v20  ;;  %5606 = vmatprep.subr.bf16.mxu1 %v9696_v18  ;;  %v9559_v34 = vcombine.low %v836_v19, %v840_v20 }
  0xa8   : > { %v968_v22 = vld [vmem:[%s10732_s11 + $0x14e0] sm:$0xff]  ;;  %5607 = vmatpush1.bf16.msra.mxu1 %v9695_v25 }
  0xa9   : > { %v9688_v28 = vcombine.high %v964_v21, %v968_v22  ;;  %v828_v29 = vld [vmem:[%s10732_s11 + $0x1080] sm:$0xff]  ;;  %5567 = vmatprep.subr.bf16.mxu0 %v9560_v27  ;;  %v9687_v36 = vcombine.low %v964_v21, %v968_v22 }
  0xaa   : > { %v832_v30 = vld [vmem:[%s10732_s11 + $0x10a0] sm:$0xff]  ;;  %5568 = vmatpush1.bf16.msra.mxu0 %v9559_v34 }
  0xab   : > { %v956_v32 = vld [vmem:[%s10732_s11 + $0x1480] sm:$0xff]  ;;  %v9552_v37 = vcombine.high %v828_v29, %v832_v30  ;;  %5608 = vmatprep.subr.bf16.mxu1 %v9688_v28  ;;  %v9551_v44 = vcombine.low %v828_v29, %v832_v30 }
  0xac   : > { %v960_v33 = vld [vmem:[%s10732_s11 + $0x14a0] sm:$0xff]  ;;  %5609 = vmatpush1.bf16.msra.mxu1 %v9687_v36 }
  0xad   : > { %v9680_v38 = vcombine.high %v956_v32, %v960_v33  ;;  %v820_v39 = vld [vmem:[%s10732_s11 + $0x1040] sm:$0xff]  ;;  %5569 = vmatprep.subr.bf16.mxu0 %v9552_v37  ;;  %v9679_v46 = vcombine.low %v956_v32, %v960_v33 }
  0xae   : > { %v824_v41 = vld [vmem:[%s10732_s11 + $0x1060] sm:$0xff]  ;;  %5570 = vmatpush1.bf16.msra.mxu0 %v9551_v44 }
  0xaf   : > { %v948_v42 = vld [vmem:[%s10732_s11 + $0x1440] sm:$0xff]  ;;  %v9544_v47 = vcombine.high %v820_v39, %v824_v41  ;;  %5610 = vmatprep.subr.bf16.mxu1 %v9680_v38  ;;  %v9543_v55 = vcombine.low %v820_v39, %v824_v41 }
  0xb0   : > { %v952_v43 = vld [vmem:[%s10732_s11 + $0x1460] sm:$0xff]  ;;  %5611 = vmatpush1.bf16.msra.mxu1 %v9679_v46 }
  0xb1   : > { %v9672_v49 = vcombine.high %v948_v42, %v952_v43  ;;  %v812_v50 = vld [vmem:[%s10732_s11 + $0x1000] sm:$0xff]  ;;  %5571 = vmatprep.subr.bf16.mxu0 %v9544_v47  ;;  %v9671_v56 = vcombine.low %v948_v42, %v952_v43 }
  0xb2   : > { %v816_v51 = vld [vmem:[%s10732_s11 + $0x1020] sm:$0xff]  ;;  %5572 = vmatpush1.bf16.msra.mxu0 %v9543_v55 }
  0xb3   : > { %v940_v52 = vld [vmem:[%s10732_s11 + $0x1400] sm:$0xff]  ;;  %v9536_v58 = vcombine.high %v812_v50, %v816_v51  ;;  %5612 = vmatprep.subr.bf16.mxu1 %v9672_v49  ;;  %v9535_v2 = vcombine.low %v812_v50, %v816_v51 }
  0xb4   : > { %v944_v53 = vld [vmem:[%s10732_s11 + $0x1420] sm:$0xff]  ;;  %5613 = vmatpush1.bf16.msra.mxu1 %v9671_v56 }
  0xb5   : > { %v9664_v59 = vcombine.high %v940_v52, %v944_v53  ;;  %v932_v61 = vld [vmem:[%s10732_s11 + $0x13c0] sm:$0xff]  ;;  %5573 = vmatprep.subr.bf16.mxu0 %v9536_v58  ;;  %v9663_v3 = vcombine.low %v940_v52, %v944_v53 }
  0xb6   : > { %v936_v62 = vld [vmem:[%s10732_s11 + $0x13e0] sm:$0xff]  ;;  %5574 = vmatpush1.bf16.msra.mxu0 %v9535_v2 }
  0xb7   : > { %v1060_v63 = vld [vmem:[%s10732_s11 + $0x17c0] sm:$0xff]  ;;  %v9656_v5 = vcombine.high %v932_v61, %v936_v62  ;;  %5614 = vmatprep.subr.bf16.mxu1 %v9664_v59  ;;  %v9655_v60 = vcombine.low %v932_v61, %v936_v62 }
  0xb8   : > { %v1064_v1 = vld [vmem:[%s10732_s11 + $0x17e0] sm:$0xff]  ;;  %5615 = vmatpush1.bf16.msra.mxu1 %v9663_v3 }
  0xb9   : > { %v9784_v6 = vcombine.high %v1060_v63, %v1064_v1  ;;  %v924_v7 = vld [vmem:[%s10732_s11 + $0x1380] sm:$0xff]  ;;  %5575 = vmatprep.subr.bf16.mxu0 %v9656_v5  ;;  %v9783_v13 = vcombine.low %v1060_v63, %v1064_v1 }
  0xba   : > { %v928_v8 = vld [vmem:[%s10732_s11 + $0x13a0] sm:$0xff]  ;;  %5576 = vmatpush2.bf16.msra.mxu0 %v9655_v60 }
  0xbb   : > { %v1052_v9 = vld [vmem:[%s10732_s11 + $0x1780] sm:$0xff]  ;;  %v9648_v15 = vcombine.high %v924_v7, %v928_v8  ;;  %5616 = vmatprep.subr.bf16.mxu1 %v9784_v6  ;;  %v9647_v21 = vcombine.low %v924_v7, %v928_v8 }
  0xbc   : > { %v1056_v11 = vld [vmem:[%s10732_s11 + $0x17a0] sm:$0xff]  ;;  %5617 = vmatpush2.bf16.msra.mxu1 %v9783_v13 }
  0xbd   : > { %v9776_v16 = vcombine.high %v1052_v9, %v1056_v11  ;;  %v916_v17 = vld [vmem:[%s10732_s11 + $0x1340] sm:$0xff]  ;;  %5577 = vmatprep.subr.bf16.mxu0 %v9648_v15  ;;  %v9775_v22 = vcombine.low %v1052_v9, %v1056_v11 }
  0xbe   : > { %v920_v18 = vld [vmem:[%s10732_s11 + $0x1360] sm:$0xff]  ;;  %5578 = vmatpush2.bf16.msra.mxu0 %v9647_v21 }
  0xbf   : > { %v1044_v19 = vld [vmem:[%s10732_s11 + $0x1740] sm:$0xff]  ;;  %v9640_v24 = vcombine.high %v916_v17, %v920_v18  ;;  %5618 = vmatprep.subr.bf16.mxu1 %v9776_v16  ;;  %v9639_v32 = vcombine.low %v916_v17, %v920_v18  ;;  %v357_v17 = vld [vmem:[%s10732_s11 + $0x1c8] sm:$0xff] }
  0xc0   : > { %v1048_v20 = vld [vmem:[%s10732_s11 + $0x1760] sm:$0xff]  ;;  %5619 = vmatpush2.bf16.msra.mxu1 %v9775_v22  ;;  %v361_v18 = vld [vmem:[%s10732_s11 + $0x1e8] sm:$0xff] }
  0xc1   : > { %v9768_v25 = vcombine.high %v1044_v19, %v1048_v20  ;;  %v908_v27 = vld [vmem:[%s10732_s11 + $0x1300] sm:$0xff]  ;;  %5579 = vmatprep.subr.bf16.mxu0 %v9640_v24  ;;  %v9767_v33 = vcombine.low %v1044_v19, %v1048_v20  ;;  %v11010_v20 = vrot.slane %v10917_v35, %v10764_v54  ;;  %v9082_v24 = vcombine.high %v357_v17, %v361_v18 }
  0xc2   : > { %v912_v28 = vld [vmem:[%s10732_s11 + $0x1320] sm:$0xff]  ;;  %5580 = vmatpush2.bf16.msra.mxu0 %v9639_v32  ;;  %v9081_v32 = vcombine.low %v357_v17, %v361_v18  ;;  %v309_v17 = vld [vmem:[%s10732_s11 + $0x48] sm:$0xff] }
  0xc3   : > { %v1036_v29 = vld [vmem:[%s10732_s11 + $0x1700] sm:$0xff]  ;;  %v9632_v34 = vcombine.high %v908_v27, %v912_v28  ;;  %5620 = vmatprep.subr.bf16.mxu1 %v9768_v25  ;;  %v9631_v42 = vcombine.low %v908_v27, %v912_v28  ;;  %v349_v28 = vld [vmem:[%s10732_s11 + $0x188] sm:$0xff] }
  0xc4   : > { %v1040_v30 = vld [vmem:[%s10732_s11 + $0x1720] sm:$0xff]  ;;  %5621 = vmatpush2.bf16.msra.mxu1 %v9767_v33  ;;  %v313_v18 = vld [vmem:[%s10732_s11 + $0x68] sm:$0xff] }
  0xc5   : > { %v9760_v36 = vcombine.high %v1036_v29, %v1040_v30  ;;  %v900_v37 = vld [vmem:[%s10732_s11 + $0x12c0] sm:$0xff]  ;;  %5581 = vmatprep.subr.bf16.mxu0 %v9632_v34  ;;  %v9759_v43 = vcombine.low %v1036_v29, %v1040_v30  ;;  %v353_v29 = vld [vmem:[%s10732_s11 + $0x1a8] sm:$0xff]  ;;  %v11018_v30 = vcombine.high %v11010_v20, %v11010_v20 }
  0xc6   : > { %v904_v38 = vld [vmem:[%s10732_s11 + $0x12e0] sm:$0xff]  ;;  %5582 = vmatpush2.bf16.msra.mxu0 %v9631_v42  ;;  %v9074_v34 = vcombine.high %v349_v28, %v353_v29  ;;  %v9073_v42 = vcombine.low %v349_v28, %v353_v29  ;;  %v301_v28 = vld [vmem:[%s10732_s11 + $0x8] sm:$0xff] }
  0xc7   : > { %v1028_v39 = vld [vmem:[%s10732_s11 + $0x16c0] sm:$0xff]  ;;  %v9624_v44 = vcombine.high %v900_v37, %v904_v38  ;;  %5622 = vmatprep.subr.bf16.mxu1 %v9760_v36  ;;  %v9623_v52 = vcombine.low %v900_v37, %v904_v38  ;;  %v341_v38 = vld [vmem:[%s10732_s11 + $0x148] sm:$0xff] }
  0xc8   : > { %v1032_v41 = vld [vmem:[%s10732_s11 + $0x16e0] sm:$0xff]  ;;  %5623 = vmatpush2.bf16.msra.mxu1 %v9759_v43  ;;  %v305_v29 = vld [vmem:[%s10732_s11 + $0x28] sm:$0xff] }
  0xc9   : > { %v9752_v46 = vcombine.high %v1028_v39, %v1032_v41  ;;  %v892_v47 = vld [vmem:[%s10732_s11 + $0x1280] sm:$0xff]  ;;  %5583 = vmatprep.subr.bf16.mxu0 %v9624_v44  ;;  %v9751_v53 = vcombine.low %v1028_v39, %v1032_v41  ;;  %v345_v39 = vld [vmem:[%s10732_s11 + $0x168] sm:$0xff] }
  0xca   : > { %v896_v49 = vld [vmem:[%s10732_s11 + $0x12a0] sm:$0xff]  ;;  %5584 = vmatpush2.bf16.msra.mxu0 %v9623_v52  ;;  %v9066_v44 = vcombine.high %v341_v38, %v345_v39 }
  0xcb   : > { %v1020_v50 = vld [vmem:[%s10732_s11 + $0x1680] sm:$0xff]  ;;  %v9616_v55 = vcombine.high %v892_v47, %v896_v49  ;;  %5624 = vmatprep.subr.bf16.mxu1 %v9752_v46  ;;  %v9615_v63 = vcombine.low %v892_v47, %v896_v49  ;;  %v10669_v49 = vmov 0  }
  0xcc   : > { %v1024_v51 = vld [vmem:[%s10732_s11 + $0x16a0] sm:$0xff]  ;;  %5625 = vmatpush2.bf16.msra.mxu1 %v9751_v53  ;;  %v9065_v53 = vcombine.low %v341_v38, %v345_v39  ;;  %v489_v38 = vld [vmem:[%s10732_s11 + $0x5e8] sm:$0xff] }
  0xcd   : > { %v9744_v56 = vcombine.high %v1020_v50, %v1024_v51  ;;  %v884_v58 = vld [vmem:[%s10732_s11 + $0x1240] sm:$0xff]  ;;  %5585 = vmatprep.subr.bf16.mxu0 %v9616_v55  ;;  %v9743_v1 = vcombine.low %v1020_v50, %v1024_v51  ;;  %v333_v50 = vld [vmem:[%s10732_s11 + $0x108] sm:$0xff] }
  0xce   : > { %v888_v59 = vld [vmem:[%s10732_s11 + $0x1260] sm:$0xff]  ;;  %5586 = vmatpush2.bf16.msra.mxu0 %v9615_v63  ;;  %v337_v51 = vld [vmem:[%s10732_s11 + $0x128] sm:$0xff] }
  0xcf   : > { %v1012_v61 = vld [vmem:[%s10732_s11 + $0x1640] sm:$0xff]  ;;  %v9608_v2 = vcombine.high %v884_v58, %v888_v59  ;;  %5626 = vmatprep.subr.bf16.mxu1 %v9744_v56  ;;  %v9607_v9 = vcombine.low %v884_v58, %v888_v59  ;;  %v9058_v56 = vcombine.high %v333_v50, %v337_v51 }
  0xd0   : > { %v1016_v62 = vld [vmem:[%s10732_s11 + $0x1660] sm:$0xff]  ;;  %5627 = vmatpush2.bf16.msra.mxu1 %v9743_v1  ;;  %v9057_v1 = vcombine.low %v333_v50, %v337_v51  ;;  %v481_v50 = vld [vmem:[%s10732_s11 + $0x5a8] sm:$0xff] }
  0xd1   : > { %v9736_v3 = vcombine.high %v1012_v61, %v1016_v62  ;;  %v876_v5 = vld [vmem:[%s10732_s11 + $0x1200] sm:$0xff]  ;;  %5587 = vmatprep.subr.bf16.mxu0 %v9608_v2  ;;  %v9735_v11 = vcombine.low %v1012_v61, %v1016_v62  ;;  %v325_v61 = vld [vmem:[%s10732_s11 + $0xc8] sm:$0xff] }
  0xd2   : > { %v880_v6 = vld [vmem:[%s10732_s11 + $0x1220] sm:$0xff]  ;;  %5588 = vmatpush2.bf16.msra.mxu0 %v9607_v9  ;;  %v329_v62 = vld [vmem:[%s10732_s11 + $0xe8] sm:$0xff] }
  0xd3   : > { %v1004_v7 = vld [vmem:[%s10732_s11 + $0x1600] sm:$0xff]  ;;  %v9600_v60 = vcombine.high %v876_v5, %v880_v6  ;;  %5628 = vmatprep.subr.bf16.mxu1 %v9736_v3  ;;  %v9599_v19 = vcombine.low %v876_v5, %v880_v6  ;;  %v9050_v3 = vcombine.high %v325_v61, %v329_v62 }
  0xd4   : > { %v1008_v8 = vld [vmem:[%s10732_s11 + $0x1620] sm:$0xff]  ;;  %5629 = vmatpush2.bf16.msra.mxu1 %v9735_v11  ;;  %v9049_v11 = vcombine.low %v325_v61, %v329_v62  ;;  %v469_v61 = vld [vmem:[%s10732_s11 + $0x548] sm:$0xff] }
  0xd5   : > { %v9728_v13 = vcombine.high %v1004_v7, %v1008_v8  ;;  %v1124_v15 = vld [vmem:[%s10732_s11 + $0x19c0] sm:$0xff]  ;;  %5589 = vmatprep.subr.bf16.mxu0 %v9600_v60  ;;  %v9727_v21 = vcombine.low %v1004_v7, %v1008_v8  ;;  %v317_v7 = vld [vmem:[%s10732_s11 + $0x88] sm:$0xff] }
  0xd6   : > { %v1128_v16 = vld [vmem:[%s10732_s11 + $0x19e0] sm:$0xff]  ;;  %5590 = vmatpush2.bf16.msra.mxu0 %v9599_v19  ;;  %v321_v8 = vld [vmem:[%s10732_s11 + $0xa8] sm:$0xff] }
  0xd7   : > { %v9848_v22 = vcombine.high %v1124_v15, %v1128_v16  ;;  %5630 = vmatprep.subr.bf16.mxu1 %v9728_v13  ;;  %v1116_v25 = vld [vmem:[%s10732_s11 + $0x1980] sm:$0xff]  ;;  %v9847_v35 = vcombine.low %v1124_v15, %v1128_v16  ;;  %v9042_v13 = vcombine.high %v317_v7, %v321_v8  ;;  %v473_v62 = vld [vmem:[%s10732_s11 + $0x568] sm:$0xff] }
  0xd8   : > { %v1120_v27 = vld [vmem:[%s10732_s11 + $0x19a0] sm:$0xff]  ;;  %5631 = vmatpush2.bf16.msra.mxu1 %v9727_v21  ;;  %v9041_v21 = vcombine.low %v317_v7, %v321_v8  ;;  %v465_v7 = vld [vmem:[%s10732_s11 + $0x528] sm:$0xff] }
  0xd9   : > { %5641 = vmatprep.subr.bf16.mxu0 %v9848_v22  ;;  %v9840_v33 = vcombine.high %v1116_v25, %v1120_v27  ;;  %5682 = vmatprep.subr.bf16.mxu1 %v9082_v24  ;;  %v1108_v36 = vld [vmem:[%s10732_s11 + $0x1940] sm:$0xff]  ;;  %v9839_v41 = vcombine.low %v1116_v25, %v1120_v27  ;;  %v9034_v24 = vcombine.high %v309_v17, %v313_v18  ;;  %v397_v8 = vld [vmem:[%s10732_s11 + $0x308] sm:$0xff] }
  0xda   : > { %v1112_v37 = vld [vmem:[%s10732_s11 + $0x1960] sm:$0xff]  ;;  %5592 = vmatmul.mubr.bf16.vlgmr.msra.gmra.mxu0 %v11010_v20 }
  0xdb   : > { %5633 = vmatmul.mubr.bf16.vlgmr.msra.gmra.mxu1 %v11018_v30  ;;  %5642 = vmatpush1.bf16.msra.mxu0 %v9847_v35  ;;  %v9832_v43 = vcombine.high %v1108_v36, %v1112_v37  ;;  %v1100_v46 = vld [vmem:[%s10732_s11 + $0x1900] sm:$0xff]  ;;  %v9831_v52 = vcombine.low %v1108_v36, %v1112_v37  ;;  %v1183_v35 = vcombine.high %v10909_v26, %v10909_v26  ;;  %v485_v37 = vld [vmem:[%s10732_s11 + $0x5c8] sm:$0xff] }
  0xdc   : > { %5683 = vmatpush1.bf16.msra.mxu1 %v9081_v32  ;;  %5643 = vmatprep.subr.bf16.mxu0 %v9840_v33  ;;  %v1104_v47 = vld [vmem:[%s10732_s11 + $0x1920] sm:$0xff]  ;;  %v9033_v33 = vcombine.low %v309_v17, %v313_v18  ;;  %v9026_v36 = vcombine.high %v301_v28, %v305_v29  ;;  %v457_v17 = vld [vmem:[%s10732_s11 + $0x4e8] sm:$0xff] }
  0xdd   : > { %5684 = vmatprep.subr.bf16.mxu1 %v9074_v34  ;;  %5673 = vmatprep.mubr.bf16.mxu0 %v10669_v49  ;;  %v9824_v55 = vcombine.high %v1100_v46, %v1104_v47  ;;  %v1092_v58 = vld [vmem:[%s10732_s11 + $0x18c0] sm:$0xff]  ;;  %v9823_v63 = vcombine.low %v1100_v46, %v1104_v47  ;;  %v1197_v39 = vrot.slane %v1183_v35, %v10764_v54  ;;  %v477_v47 = vld [vmem:[%s10732_s11 + $0x588] sm:$0xff] }
  0xde   : > { %5714 = vmatprep.mubr.bf16.mxu1 %v10784_v10  ;;  %v1096_v59 = vld [vmem:[%s10732_s11 + $0x18e0] sm:$0xff]  ;;  %v389_v18 = vld [vmem:[%s10732_s11 + $0x2c8] sm:$0xff] }
  0xdf   : > { %5644 = vmatpush1.bf16.msra.mxu0 %v9839_v41  ;;  %v9816_v2 = vcombine.high %v1092_v58, %v1096_v59  ;;  %v1084_v5 = vld [vmem:[%s10732_s11 + $0x1880] sm:$0xff]  ;;  %v9815_v9 = vcombine.low %v1092_v58, %v1096_v59  ;;  %v421_v41 = vld [vmem:[%s10732_s11 + $0x3c8] sm:$0xff]  ;;  %v11058_v51 = vrot.slane %v1197_v39, %v10764_v54  ;;  %v9202_v58 = vcombine.high %v477_v47, %v481_v50 }
  0xe0   : > { %5685 = vmatpush1.bf16.msra.mxu1 %v9073_v42  ;;  %5645 = vmatprep.subr.bf16.mxu0 %v9832_v43  ;;  %v1088_v6 = vld [vmem:[%s10732_s11 + $0x18a0] sm:$0xff]  ;;  %v425_v42 = vld [vmem:[%s10732_s11 + $0x3e8] sm:$0xff]  ;;  %v9025_v43 = vcombine.low %v301_v28, %v305_v29 }
  0xe1   : > { %5686 = vmatprep.subr.bf16.mxu1 %v9066_v44  ;;  %v9808_v60 = vcombine.high %v1084_v5, %v1088_v6  ;;  %v1076_v15 = vld [vmem:[%s10732_s11 + $0x1840] sm:$0xff]  ;;  %v9807_v19 = vcombine.low %v1084_v5, %v1088_v6  ;;  %v9210_v44 = vcombine.high %v485_v37, %v489_v38  ;;  %v9146_v46 = vcombine.high %v421_v41, %v425_v42  ;;  %v405_v54 = vld [vmem:[%s10732_s11 + $0x348] sm:$0xff] }
  0xe2   : > { %v1080_v16 = vld [vmem:[%s10732_s11 + $0x1860] sm:$0xff]  ;;  %v461_v6 = vld [vmem:[%s10732_s11 + $0x508] sm:$0xff] }
  0xe3   : > { %5646 = vmatpush1.bf16.msra.mxu0 %v9831_v52  ;;  %v9800_v22 = vcombine.high %v1076_v15, %v1080_v16  ;;  %v1068_v25 = vld [vmem:[%s10732_s11 + $0x1800] sm:$0xff]  ;;  %v9799_v32 = vcombine.low %v1076_v15, %v1080_v16  ;;  %v413_v52 = vld [vmem:[%s10732_s11 + $0x388] sm:$0xff] }
  0xe4   : > { %5687 = vmatpush1.bf16.msra.mxu1 %v9065_v53  ;;  %5647 = vmatprep.subr.bf16.mxu0 %v9824_v55  ;;  %v1072_v27 = vld [vmem:[%s10732_s11 + $0x1820] sm:$0xff]  ;;  %v417_v53 = vld [vmem:[%s10732_s11 + $0x3a8] sm:$0xff]  ;;  %v9209_v55 = vcombine.low %v485_v37, %v489_v38 }
  0xe5   : > { %5688 = vmatprep.subr.bf16.mxu1 %v9058_v56  ;;  %v9792_v34 = vcombine.high %v1068_v25, %v1072_v27  ;;  %v9791_v26 = vcombine.low %v1068_v25, %v1072_v27  ;;  %v9145_v56 = vcombine.low %v421_v41, %v425_v42  ;;  %v9138_v59 = vcombine.high %v413_v52, %v417_v53  ;;  %v453_v16 = vld [vmem:[%s10732_s11 + $0x4c8] sm:$0xff] }
  0xe6   : > { %v445_v27 = vld [vmem:[%s10732_s11 + $0x488] sm:$0xff] }
  0xe7   : > { %5648 = vmatpush1.bf16.msra.mxu0 %v9823_v63  ;;  %v409_v63 = vld [vmem:[%s10732_s11 + $0x368] sm:$0xff] }
  0xe8   : > { %5689 = vmatpush1.bf16.msra.mxu1 %v9057_v1  ;;  %5649 = vmatprep.subr.bf16.mxu0 %v9816_v2  ;;  %v9201_v1 = vcombine.low %v477_v47, %v481_v50  ;;  %v9137_v2 = vcombine.low %v413_v52, %v417_v53  ;;  %v9130_v5 = vcombine.high %v405_v54, %v409_v63  ;;  %v449_v28 = vld [vmem:[%s10732_s11 + $0x4a8] sm:$0xff] }
  0xe9   : > { %5690 = vmatprep.subr.bf16.mxu1 %v9050_v3  ;;  %v9194_v3 = vcombine.high %v469_v61, %v473_v62  ;;  %v381_v29 = vld [vmem:[%s10732_s11 + $0x288] sm:$0xff]  ;;  %v9169_v42 = vcombine.low %v445_v27, %v449_v28 }
  0xea   : > { %v385_v35 = vld [vmem:[%s10732_s11 + $0x2a8] sm:$0xff] }
  0xeb   : > { %5650 = vmatpush1.bf16.msra.mxu0 %v9815_v9  ;;  %v401_v9 = vld [vmem:[%s10732_s11 + $0x328] sm:$0xff] }
  0xec   : > { %5691 = vmatpush1.bf16.msra.mxu1 %v9049_v11  ;;  %5651 = vmatprep.subr.bf16.mxu0 %v9808_v60  ;;  %v9193_v11 = vcombine.low %v469_v61, %v473_v62  ;;  %v9129_v60 = vcombine.low %v405_v54, %v409_v63  ;;  %v9122_v15 = vcombine.high %v397_v8, %v401_v9  ;;  %v437_v37 = vld [vmem:[%s10732_s11 + $0x448] sm:$0xff] }
  0xed   : > { %5692 = vmatprep.subr.bf16.mxu1 %v9042_v13  ;;  %v9186_v13 = vcombine.high %v461_v6, %v465_v7  ;;  %v441_v38 = vld [vmem:[%s10732_s11 + $0x468] sm:$0xff] }
  0xee   : > { %v373_v39 = vld [vmem:[%s10732_s11 + $0x248] sm:$0xff]  ;;  %v9161_v53 = vcombine.low %v437_v37, %v441_v38 }
  0xef   : > { %5652 = vmatpush1.bf16.msra.mxu0 %v9807_v19  ;;  %v393_v19 = vld [vmem:[%s10732_s11 + $0x2e8] sm:$0xff] }
  0xf0   : > { %5693 = vmatpush1.bf16.msra.mxu1 %v9041_v21  ;;  %5653 = vmatprep.subr.bf16.mxu0 %v9800_v22  ;;  %v9185_v21 = vcombine.low %v461_v6, %v465_v7  ;;  %v9121_v22 = vcombine.low %v397_v8, %v401_v9  ;;  %v9114_v25 = vcombine.high %v389_v18, %v393_v19  ;;  %v377_v41 = vld [vmem:[%s10732_s11 + $0x268] sm:$0xff] }
  0xf1   : > { %5694 = vmatprep.subr.bf16.mxu1 %v9034_v24  ;;  %v9178_v24 = vcombine.high %v453_v16, %v457_v17  ;;  %v433_v47 = vld [vmem:[%s10732_s11 + $0x428] sm:$0xff] }
  0xf2   : > { %v365_v50 = vld [vmem:[%s10732_s11 + $0x208] sm:$0xff] }
  0xf3   : > { %5654 = vmatpush1.bf16.msra.mxu0 %v9799_v32  ;;  %v9177_v32 = vcombine.low %v453_v16, %v457_v17  ;;  %v369_v52 = vld [vmem:[%s10732_s11 + $0x228] sm:$0xff] }
  0xf4   : > { %5695 = vmatpush1.bf16.msra.mxu1 %v9033_v33  ;;  %5655 = vmatprep.subr.bf16.mxu0 %v9792_v34  ;;  %v9113_v33 = vcombine.low %v389_v18, %v393_v19  ;;  %v9170_v34 = vcombine.high %v445_v27, %v449_v28  ;;  %v553_v61 = vld [vmem:[%s10732_s11 + $0x7e8] sm:$0xff] }
  0xf5   : > { %5696 = vmatprep.subr.bf16.mxu1 %v9026_v36  ;;  %v9106_v36 = vcombine.high %v381_v29, %v385_v35  ;;  %v613_v62 = vld [vmem:[%s10732_s11 + $0x9c8] sm:$0xff] }
  0xf6   : > { %v617_v54 = vld [vmem:[%s10732_s11 + $0x9e8] sm:$0xff] }
  0xf7   : > { %5656 = vmatpush1.bf16.msra.mxu0 %v9791_v26  ;;  %v9105_v26 = vcombine.low %v381_v29, %v385_v35  ;;  %v545_v6 = vld [vmem:[%s10732_s11 + $0x7a8] sm:$0xff] }
  0xf8   : > { %5697 = vmatpush1.bf16.msra.mxu1 %v9025_v43  ;;  %5723 = vmatprep.subr.bf16.mxu0 %v9210_v44  ;;  %v9162_v43 = vcombine.high %v437_v37, %v441_v38  ;;  %v9098_v44 = vcombine.high %v373_v39, %v377_v41  ;;  %v605_v7 = vld [vmem:[%s10732_s11 + $0x988] sm:$0xff] }
  0xf9   : > { %5698 = vmatprep.subr.bf16.mxu1 %v9146_v46  ;;  %v429_v46 = vld [vmem:[%s10732_s11 + $0x408] sm:$0xff] }
  0xfa   : > { %5674 = vmatmul.mubr.bf16.vlgmr.msra.gmra.mxu0 %v11058_v51  ;;  %v9153_v63 = vcombine.low %v429_v46, %v433_v47  ;;  %v609_v8 = vld [vmem:[%s10732_s11 + $0x9a8] sm:$0xff] }
  0xfb   : > { %5724 = vmatpush1.bf16.msra.mxu0 %v9209_v55  ;;  %5755 = vmatprep.mubr.bf16.mxu0 %v10791_v14  ;;  %v9097_v55 = vcombine.low %v373_v39, %v377_v41  ;;  %v537_v16 = vld [vmem:[%s10732_s11 + $0x768] sm:$0xff]  ;;  %v9329_v27 = vcombine.low %v605_v7, %v609_v8 }
  0xfc   : > { %5699 = vmatpush2.bf16.msra.mxu1 %v9145_v56  ;;  %5725 = vmatprep.subr.bf16.mxu0 %v9202_v58  ;;  %v9154_v56 = vcombine.high %v429_v46, %v433_v47  ;;  %v9090_v58 = vcombine.high %v365_v50, %v369_v52  ;;  %v597_v18 = vld [vmem:[%s10732_s11 + $0x948] sm:$0xff] }
  0xfd   : > { %5700 = vmatprep.subr.bf16.mxu1 %v9138_v59  ;;  %v549_v59 = vld [vmem:[%s10732_s11 + $0x7c8] sm:$0xff] }
  0xfe   : > { %v9273_v9 = vcombine.low %v549_v59, %v553_v61  ;;  %v601_v19 = vld [vmem:[%s10732_s11 + $0x968] sm:$0xff] }
  0xff   : > { %5726 = vmatpush1.bf16.msra.mxu0 %v9201_v1  ;;  %v9089_v1 = vcombine.low %v365_v50, %v369_v52  ;;  %v9322_v35 = vcombine.high %v597_v18, %v601_v19  ;;  %v589_v37 = vld [vmem:[%s10732_s11 + $0x908] sm:$0xff] }
 0x100   : > { %5701 = vmatpush2.bf16.msra.mxu1 %v9137_v2  ;;  %5727 = vmatprep.subr.bf16.mxu0 %v9194_v3  ;;  %v9274_v2 = vcombine.high %v549_v59, %v553_v61  ;;  %v9338_v3 = vcombine.high %v613_v62, %v617_v54  ;;  %v593_v38 = vld [vmem:[%s10732_s11 + $0x928] sm:$0xff] }
 0x101   : > { %5702 = vmatprep.subr.bf16.mxu1 %v9130_v5  ;;  %v541_v5 = vld [vmem:[%s10732_s11 + $0x788] sm:$0xff]  ;;  %v9314_v46 = vcombine.high %v589_v37, %v593_v38 }
 0x102   : > { %v517_v47 = vld [vmem:[%s10732_s11 + $0x6c8] sm:$0xff] }
 0x103   : > { %5728 = vmatpush1.bf16.msra.mxu0 %v9193_v11  ;;  %v9337_v11 = vcombine.low %v613_v62, %v617_v54  ;;  %v521_v50 = vld [vmem:[%s10732_s11 + $0x6e8] sm:$0xff] }
 0x104   : > { %5703 = vmatpush2.bf16.msra.mxu1 %v9129_v60  ;;  %5729 = vmatprep.subr.bf16.mxu0 %v9186_v13  ;;  %v9266_v60 = vcombine.high %v541_v5, %v545_v6  ;;  %v9330_v13 = vcombine.high %v605_v7, %v609_v8  ;;  %v581_v52 = vld [vmem:[%s10732_s11 + $0x8c8] sm:$0xff] }
 0x105   : > { %5704 = vmatprep.subr.bf16.mxu1 %v9122_v15  ;;  %v533_v15 = vld [vmem:[%s10732_s11 + $0x748] sm:$0xff] }
 0x106   : > { %v9258_v28 = vcombine.high %v533_v15, %v537_v16  ;;  %v9257_v41 = vcombine.low %v533_v15, %v537_v16  ;;  %v509_v61 = vld [vmem:[%s10732_s11 + $0x688] sm:$0xff] }
 0x107   : > { %5730 = vmatpush1.bf16.msra.mxu0 %v9185_v21  ;;  %v513_v62 = vld [vmem:[%s10732_s11 + $0x6a8] sm:$0xff] }
 0x108   : > { %5705 = vmatpush2.bf16.msra.mxu1 %v9121_v22  ;;  %5731 = vmatprep.subr.bf16.mxu0 %v9178_v24  ;;  %v9265_v22 = vcombine.low %v541_v5, %v545_v6  ;;  %v573_v54 = vld [vmem:[%s10732_s11 + $0x888] sm:$0xff] }
 0x109   : > { %5706 = vmatprep.subr.bf16.mxu1 %v9114_v25  ;;  %v501_v6 = vld [vmem:[%s10732_s11 + $0x648] sm:$0xff] }
 0x10a   : > { %v505_v7 = vld [vmem:[%s10732_s11 + $0x668] sm:$0xff] }
 0x10b   : > { %5732 = vmatpush1.bf16.msra.mxu0 %v9177_v32  ;;  %v525_v32 = vld [vmem:[%s10732_s11 + $0x708] sm:$0xff] }
 0x10c   : > { %5707 = vmatpush2.bf16.msra.mxu1 %v9113_v33  ;;  %5733 = vmatprep.subr.bf16.mxu0 %v9170_v34  ;;  %v529_v33 = vld [vmem:[%s10732_s11 + $0x728] sm:$0xff] }
 0x10d   : > { %5708 = vmatprep.subr.bf16.mxu1 %v9106_v36  ;;  %v565_v8 = vld [vmem:[%s10732_s11 + $0x848] sm:$0xff] }
 0x10e   : > { %v493_v16 = vld [vmem:[%s10732_s11 + $0x608] sm:$0xff] }
 0x10f   : > { %5734 = vmatpush1.bf16.msra.mxu0 %v9169_v42 }
 0x110   : > { %5709 = vmatpush2.bf16.msra.mxu1 %v9105_v26  ;;  %5735 = vmatprep.subr.bf16.mxu0 %v9162_v43  ;;  %v9321_v26 = vcombine.low %v597_v18, %v601_v19  ;;  %v9250_v43 = vcombine.high %v525_v32, %v529_v33  ;;  %v557_v18 = vld [vmem:[%s10732_s11 + $0x808] sm:$0xff] }
 0x111   : > { %5710 = vmatprep.subr.bf16.mxu1 %v9098_v44  ;;  %v561_v19 = vld [vmem:[%s10732_s11 + $0x828] sm:$0xff] }
 0x113   : > { %5736 = vmatpush1.bf16.msra.mxu0 %v9161_v53  ;;  %v585_v53 = vld [vmem:[%s10732_s11 + $0x8e8] sm:$0xff] }
 0x114   : > { %5711 = vmatpush2.bf16.msra.mxu1 %v9097_v55  ;;  %5737 = vmatprep.subr.bf16.mxu0 %v9154_v56  ;;  %v9249_v55 = vcombine.low %v525_v32, %v529_v33  ;;  %v9313_v56 = vcombine.low %v589_v37, %v593_v38  ;;  %v9306_v59 = vcombine.high %v581_v52, %v585_v53  ;;  %v681_v32 = vld [vmem:[%s10732_s11 + $0xbe8] sm:$0xff] }
 0x115   : > { %5712 = vmatprep.subr.bf16.mxu1 %v9090_v58  ;;  %v9242_v58 = vcombine.high %v517_v47, %v521_v50 }
 0x117   : > { %5738 = vmatpush1.bf16.msra.mxu0 %v9153_v63  ;;  %v577_v63 = vld [vmem:[%s10732_s11 + $0x8a8] sm:$0xff] }
 0x118   : > { %5713 = vmatpush2.bf16.msra.mxu1 %v9089_v1  ;;  %5739 = vmatprep.subr.bf16.mxu0 %v9274_v2  ;;  %v9241_v1 = vcombine.low %v517_v47, %v521_v50  ;;  %v9305_v2 = vcombine.low %v581_v52, %v585_v53  ;;  %v9298_v5 = vcombine.high %v573_v54, %v577_v63  ;;  %v725_v50 = vld [vmem:[%s10732_s11 + $0xd48] sm:$0xff] }
 0x119   : > { %5764 = vmatprep.subr.bf16.mxu1 %v9338_v3  ;;  %v5429_v17 = vpop.f32.mrf.mxu0  ;;  %v9234_v3 = vcombine.high %v509_v61, %v513_v62  ;;  %v729_v52 = vld [vmem:[%s10732_s11 + $0xd68] sm:$0xff] }
 0x11a   : > { %v661_v53 = vld [vmem:[%s10732_s11 + $0xb48] sm:$0xff] }
 0x11b   : > { %v5470_v21 = vpop.f32.mrf.mxu1  ;;  %5715 = vmatmul.mubr.bf16.vlgmr.msra.gmra.mxu1 %v10835_v23  ;;  %5740 = vmatpush2.bf16.msra.mxu0 %v9273_v9  ;;  %v5431_v25 = vpop.f32.mrf.mxu0  ;;  %v569_v9 = vld [vmem:[%s10732_s11 + $0x868] sm:$0xff] }
 0x11c   : > { %v11101_v24 = vadd.f32 %v5470_v21, %v5429_v17  ;;  %5765 = vmatpush1.bf16.msra.mxu1 %v9337_v11  ;;  %5741 = vmatprep.subr.bf16.mxu0 %v9266_v60  ;;  %v9233_v11 = vcombine.low %v509_v61, %v513_v62  ;;  %v9297_v60 = vcombine.low %v573_v54, %v577_v63  ;;  %v497_v17 = vld [vmem:[%s10732_s11 + $0x628] sm:$0xff] }
 0x11d   : > { %v5472_v29 = vpop.f32.mrf.mxu1  ;;  %5766 = vmatprep.subr.bf16.mxu1 %v9330_v13  ;;  %5796 = vmatprep.mubr.bf16.mxu1 %v10842_v31  ;;  %v5433_v36 = vpop.f32.mrf.mxu0  ;;  %v9226_v13 = vcombine.high %v501_v6, %v505_v7  ;;  %v9290_v15 = vcombine.high %v565_v8, %v569_v9  ;;  %v9225_v21 = vcombine.low %v501_v6, %v505_v7  ;;  %v717_v62 = vld [vmem:[%s10732_s11 + $0xd08] sm:$0xff] }
 0x11e   : > { %v11106_v34 = vadd.f32 %v5472_v29, %v5431_v25  ;;  %v9218_v25 = vcombine.high %v493_v16, %v497_v17  ;;  %v745_v29 = vld [vmem:[%s10732_s11 + $0xde8] sm:$0xff]  ;;  %v9217_v33 = vcombine.low %v493_v16, %v497_v17  ;;  %v9281_v36 = vcombine.low %v557_v18, %v561_v19 }
 0x11f   : > { %v5474_v39 = vpop.f32.mrf.mxu1  ;;  %5742 = vmatpush2.bf16.msra.mxu0 %v9265_v22  ;;  %v5434_v42 = vpop.f32.mrf.mxu0  ;;  %v9289_v22 = vcombine.low %v565_v8, %v569_v9  ;;  %v721_v54 = vld [vmem:[%s10732_s11 + $0xd28] sm:$0xff] }
 0x120   : > { %5767 = vmatpush1.bf16.msra.mxu1 %v9329_v27  ;;  %5743 = vmatprep.subr.bf16.mxu0 %v9258_v28  ;;  %v9282_v27 = vcombine.high %v557_v18, %v561_v19  ;;  %v741_v28 = vld [vmem:[%s10732_s11 + $0xdc8] sm:$0xff] }
 0x121   : > { %v5475_v44 = vpop.f32.mrf.mxu1  ;;  %5768 = vmatprep.subr.bf16.mxu1 %v9322_v35  ;;  %v677_v35 = vld [vmem:[%s10732_s11 + $0xbc8] sm:$0xff]  ;;  %v9466_v37 = vcombine.high %v741_v28, %v745_v29 }
 0x122   : > { %v9402_v38 = vcombine.high %v677_v35, %v681_v32  ;;  %v733_v39 = vld [vmem:[%s10732_s11 + $0xd88] sm:$0xff]  ;;  %v9401_v44 = vcombine.low %v677_v35, %v681_v32 }
 0x123   : > { %5744 = vmatpush2.bf16.msra.mxu0 %v9257_v41  ;;  %v737_v41 = vld [vmem:[%s10732_s11 + $0xda8] sm:$0xff] }
 0x124   : > { %5769 = vmatpush1.bf16.msra.mxu1 %v9321_v26  ;;  %5745 = vmatprep.subr.bf16.mxu0 %v9250_v43  ;;  %v669_v42 = vld [vmem:[%s10732_s11 + $0xb88] sm:$0xff]  ;;  %v9465_v43 = vcombine.low %v741_v28, %v745_v29 }
 0x125   : > { %5770 = vmatprep.subr.bf16.mxu1 %v9314_v46  ;;  %v673_v26 = vld [vmem:[%s10732_s11 + $0xba8] sm:$0xff]  ;;  %v9458_v46 = vcombine.high %v733_v39, %v737_v41 }
 0x126   : > { %v9394_v47 = vcombine.high %v669_v42, %v673_v26  ;;  %v653_v63 = vld [vmem:[%s10732_s11 + $0xb08] sm:$0xff] }
 0x127   : > { %5746 = vmatpush2.bf16.msra.mxu0 %v9249_v55  ;;  %v665_v55 = vld [vmem:[%s10732_s11 + $0xb68] sm:$0xff] }
 0x128   : > { %5771 = vmatpush1.bf16.msra.mxu1 %v9313_v56  ;;  %5747 = vmatprep.subr.bf16.mxu0 %v9242_v58  ;;  %v9457_v56 = vcombine.low %v733_v39, %v737_v41  ;;  %v9393_v58 = vcombine.low %v669_v42, %v673_v26  ;;  %v9386_v61 = vcombine.high %v661_v53, %v665_v55  ;;  %v709_v7 = vld [vmem:[%s10732_s11 + $0xcc8] sm:$0xff] }
 0x129   : > { %5772 = vmatprep.subr.bf16.mxu1 %v9306_v59  ;;  %v9450_v59 = vcombine.high %v725_v50, %v729_v52  ;;  %v713_v8 = vld [vmem:[%s10732_s11 + $0xce8] sm:$0xff] }
 0x12a   : > { %v645_v9 = vld [vmem:[%s10732_s11 + $0xac8] sm:$0xff] }
 0x12b   : > { %5748 = vmatpush2.bf16.msra.mxu0 %v9241_v1  ;;  %v657_v1 = vld [vmem:[%s10732_s11 + $0xb28] sm:$0xff] }
 0x12c   : > { %5773 = vmatpush1.bf16.msra.mxu1 %v9305_v2  ;;  %5749 = vmatprep.subr.bf16.mxu0 %v9234_v3  ;;  %v9449_v2 = vcombine.low %v725_v50, %v729_v52  ;;  %v9385_v3 = vcombine.low %v661_v53, %v665_v55  ;;  %v9378_v6 = vcombine.high %v653_v63, %v657_v1  ;;  %v701_v17 = vld [vmem:[%s10732_s11 + $0xc88] sm:$0xff] }
 0x12d   : > { %5774 = vmatprep.subr.bf16.mxu1 %v9298_v5  ;;  %v9442_v5 = vcombine.high %v717_v62, %v721_v54  ;;  %v705_v18 = vld [vmem:[%s10732_s11 + $0xca8] sm:$0xff] }
 0x12e   : > { %v637_v19 = vld [vmem:[%s10732_s11 + $0xa88] sm:$0xff] }
 0x12f   : > { %5750 = vmatpush2.bf16.msra.mxu0 %v9233_v11  ;;  %v649_v11 = vld [vmem:[%s10732_s11 + $0xae8] sm:$0xff] }
 0x130   : > { %5775 = vmatpush1.bf16.msra.mxu1 %v9297_v60  ;;  %5751 = vmatprep.subr.bf16.mxu0 %v9226_v13  ;;  %v9441_v60 = vcombine.low %v717_v62, %v721_v54  ;;  %v9377_v13 = vcombine.low %v653_v63, %v657_v1  ;;  %v9370_v16 = vcombine.high %v645_v9, %v649_v11  ;;  %v693_v29 = vld [vmem:[%s10732_s11 + $0xc48] sm:$0xff] }
 0x131   : > { %5776 = vmatprep.subr.bf16.mxu1 %v9290_v15  ;;  %v9434_v15 = vcombine.high %v709_v7, %v713_v8  ;;  %v697_v35 = vld [vmem:[%s10732_s11 + $0xc68] sm:$0xff] }
 0x132   : > { %v629_v32 = vld [vmem:[%s10732_s11 + $0xa48] sm:$0xff] }
 0x133   : > { %5752 = vmatpush2.bf16.msra.mxu0 %v9225_v21  ;;  %v641_v21 = vld [vmem:[%s10732_s11 + $0xaa8] sm:$0xff] }
 0x134   : > { %5777 = vmatpush1.bf16.msra.mxu1 %v9289_v22  ;;  %5753 = vmatprep.subr.bf16.mxu0 %v9218_v25  ;;  %v9433_v22 = vcombine.low %v709_v7, %v713_v8  ;;  %v9369_v25 = vcombine.low %v645_v9, %v649_v11  ;;  %v9362_v28 = vcombine.high %v637_v19, %v641_v21  ;;  %v685_v41 = vld [vmem:[%s10732_s11 + $0xc08] sm:$0xff] }
 0x135   : > { %5778 = vmatprep.subr.bf16.mxu1 %v9282_v27  ;;  %v9426_v27 = vcombine.high %v701_v17, %v705_v18  ;;  %v689_v42 = vld [vmem:[%s10732_s11 + $0xc28] sm:$0xff] }
 0x136   : > { %v621_v26 = vld [vmem:[%s10732_s11 + $0xa08] sm:$0xff] }
 0x137   : > { %5754 = vmatpush2.bf16.msra.mxu0 %v9217_v33  ;;  %v633_v33 = vld [vmem:[%s10732_s11 + $0xa68] sm:$0xff] }
 0x138   : > { %5779 = vmatpush1.bf16.msra.mxu1 %v9281_v36  ;;  %5805 = vmatprep.subr.bf16.mxu0 %v9466_v37  ;;  %v9425_v36 = vcombine.low %v701_v17, %v705_v18  ;;  %v9361_v37 = vcombine.low %v637_v19, %v641_v21  ;;  %v9354_v39 = vcombine.high %v629_v32, %v633_v33  ;;  %v805_v52 = vld [vmem:[%s10732_s11 + $0xfc8] sm:$0xff] }
 0x139   : > { %5780 = vmatprep.subr.bf16.mxu1 %v9402_v38  ;;  %v9418_v38 = vcombine.high %v693_v29, %v697_v35  ;;  %v809_v53 = vld [vmem:[%s10732_s11 + $0xfe8] sm:$0xff] }
 0x13a   : > { %5756 = vmatmul.mubr.bf16.vlgmr.msra.gmra.mxu0 %v10846_v0  ;;  %v869_v55 = vld [vmem:[%s10732_s11 + $0x11c8] sm:$0xff] }
 0x13b   : > { %5806 = vmatpush1.bf16.msra.mxu0 %v9465_v43  ;;  %5837 = vmatprep.mubr.bf16.mxu0 %v10855_v40  ;;  %v625_v43 = vld [vmem:[%s10732_s11 + $0xa28] sm:$0xff] }
 0x13c   : > { %5781 = vmatpush2.bf16.msra.mxu1 %v9401_v44  ;;  %5807 = vmatprep.subr.bf16.mxu0 %v9458_v46  ;;  %v9417_v44 = vcombine.low %v693_v29, %v697_v35  ;;  %v9353_v46 = vcombine.low %v629_v32, %v633_v33  ;;  %v9346_v50 = vcombine.high %v621_v26, %v625_v43  ;;  %v797_v54 = vld [vmem:[%s10732_s11 + $0xf88] sm:$0xff] }
 0x13d   : > { %5782 = vmatprep.subr.bf16.mxu1 %v9394_v47  ;;  %v9410_v47 = vcombine.high %v685_v41, %v689_v42  ;;  %v801_v63 = vld [vmem:[%s10732_s11 + $0xfa8] sm:$0xff] }
 0x13e   : > { %v861_v1 = vld [vmem:[%s10732_s11 + $0x1188] sm:$0xff]  ;;  %v9521_v17 = vcombine.low %v797_v54, %v801_v63 }
 0x13f   : > { %5808 = vmatpush1.bf16.msra.mxu0 %v9457_v56  ;;  %v873_v56 = vld [vmem:[%s10732_s11 + $0x11e8] sm:$0xff] }
 0x140   : > { %5783 = vmatpush2.bf16.msra.mxu1 %v9393_v58  ;;  %5809 = vmatprep.subr.bf16.mxu0 %v9450_v59  ;;  %v9409_v58 = vcombine.low %v685_v41, %v689_v42  ;;  %v9345_v59 = vcombine.low %v621_v26, %v625_v43  ;;  %v9594_v62 = vcombine.high %v869_v55, %v873_v56  ;;  %v789_v8 = vld [vmem:[%s10732_s11 + $0xf48] sm:$0xff] }
 0x141   : > { %5784 = vmatprep.subr.bf16.mxu1 %v9386_v61  ;;  %v9530_v61 = vcombine.high %v805_v52, %v809_v53  ;;  %v793_v9 = vld [vmem:[%s10732_s11 + $0xf68] sm:$0xff] }
 0x142   : > { %v9514_v21 = vcombine.high %v789_v8, %v793_v9  ;;  %v785_v29 = vld [vmem:[%s10732_s11 + $0xf28] sm:$0xff] }
 0x143   : > { %5810 = vmatpush1.bf16.msra.mxu0 %v9449_v2  ;;  %v865_v2 = vld [vmem:[%s10732_s11 + $0x11a8] sm:$0xff] }
 0x144   : > { %5785 = vmatpush2.bf16.msra.mxu1 %v9385_v3  ;;  %5811 = vmatprep.subr.bf16.mxu0 %v9442_v5  ;;  %v9529_v3 = vcombine.low %v805_v52, %v809_v53  ;;  %v9593_v5 = vcombine.low %v869_v55, %v873_v56  ;;  %v9586_v7 = vcombine.high %v861_v1, %v865_v2  ;;  %v845_v32 = vld [vmem:[%s10732_s11 + $0x1108] sm:$0xff] }
 0x145   : > { %5786 = vmatprep.subr.bf16.mxu1 %v9378_v6  ;;  %v9522_v6 = vcombine.high %v797_v54, %v801_v63  ;;  %v9585_v19 = vcombine.low %v861_v1, %v865_v2  ;;  %v849_v33 = vld [vmem:[%s10732_s11 + $0x1128] sm:$0xff] }
 0x146   : > { %v9570_v26 = vcombine.high %v845_v32, %v849_v33  ;;  %v773_v43 = vld [vmem:[%s10732_s11 + $0xec8] sm:$0xff]  ;;  %v9569_v52 = vcombine.low %v845_v32, %v849_v33 }
 0x147   : > { %5812 = vmatpush1.bf16.msra.mxu0 %v9441_v60  ;;  %v853_v60 = vld [vmem:[%s10732_s11 + $0x1148] sm:$0xff] }
 0x148   : > { %5787 = vmatpush2.bf16.msra.mxu1 %v9377_v13  ;;  %5813 = vmatprep.subr.bf16.mxu0 %v9434_v15  ;;  %v857_v13 = vld [vmem:[%s10732_s11 + $0x1168] sm:$0xff] }
 0x149   : > { %5788 = vmatprep.subr.bf16.mxu1 %v9370_v16  ;;  %v765_v56 = vld [vmem:[%s10732_s11 + $0xe88] sm:$0xff] }
 0x14a   : > { %v757_v2 = vld [vmem:[%s10732_s11 + $0xe48] sm:$0xff] }
 0x14b   : > { %5814 = vmatpush1.bf16.msra.mxu0 %v9433_v22 }
 0x14c   : > { %5789 = vmatpush2.bf16.msra.mxu1 %v9369_v25  ;;  %5815 = vmatprep.subr.bf16.mxu0 %v9426_v27 }
 0x14d   : > { %5790 = vmatprep.subr.bf16.mxu1 %v9362_v28  ;;  %v781_v28 = vld [vmem:[%s10732_s11 + $0xf08] sm:$0xff] }
 0x14e   : > { %v9506_v41 = vcombine.high %v781_v28, %v785_v29 }
 0x14f   : > { %5816 = vmatpush1.bf16.msra.mxu0 %v9425_v36 }
 0x150   : > { %5791 = vmatpush2.bf16.msra.mxu1 %v9361_v37  ;;  %5817 = vmatprep.subr.bf16.mxu0 %v9418_v38  ;;  %v9513_v38 = vcombine.low %v789_v8, %v793_v9 }
 0x151   : > { %5792 = vmatprep.subr.bf16.mxu1 %v9354_v39  ;;  %v9577_v39 = vcombine.low %v853_v60, %v857_v13 }
 0x153   : > { %5818 = vmatpush1.bf16.msra.mxu0 %v9417_v44  ;;  %v777_v44 = vld [vmem:[%s10732_s11 + $0xee8] sm:$0xff] }
 0x154   : > { %5793 = vmatpush2.bf16.msra.mxu1 %v9353_v46  ;;  %5819 = vmatprep.subr.bf16.mxu0 %v9410_v47  ;;  %v837_v46 = vld [vmem:[%s10732_s11 + $0x10c8] sm:$0xff]  ;;  %v9498_v53 = vcombine.high %v773_v43, %v777_v44 }
 0x155   : > { %5794 = vmatprep.subr.bf16.mxu1 %v9346_v50  ;;  %v841_v47 = vld [vmem:[%s10732_s11 + $0x10e8] sm:$0xff]  ;;  %v9505_v50 = vcombine.low %v781_v28, %v785_v29 }
 0x156   : > { %v9562_v55 = vcombine.high %v837_v46, %v841_v47  ;;  %v9561_v54 = vcombine.low %v837_v46, %v841_v47  ;;  %v937_v28 = vld [vmem:[%s10732_s11 + $0x13e8] sm:$0xff] }
 0x157   : > { %5820 = vmatpush1.bf16.msra.mxu0 %v9409_v58  ;;  %v769_v58 = vld [vmem:[%s10732_s11 + $0xea8] sm:$0xff] }
 0x158   : > { %5795 = vmatpush2.bf16.msra.mxu1 %v9345_v59  ;;  %5821 = vmatprep.subr.bf16.mxu0 %v9530_v61  ;;  %v829_v59 = vld [vmem:[%s10732_s11 + $0x1088] sm:$0xff]  ;;  %v9490_v63 = vcombine.high %v765_v56, %v769_v58 }
 0x159   : > { %5846 = vmatprep.subr.bf16.mxu1 %v9594_v62  ;;  %v5511_v11 = vpop.f32.mrf.mxu0  ;;  %v833_v61 = vld [vmem:[%s10732_s11 + $0x10a8] sm:$0xff]  ;;  %v9497_v62 = vcombine.low %v773_v43, %v777_v44 }
 0x15a   : > { %v5512_v15 = vadd.f32 %v5511_v11, %v11101_v24  ;;  %v9578_v24 = vcombine.high %v853_v60, %v857_v13  ;;  %v9554_v1 = vcombine.high %v829_v59, %v833_v61  ;;  %v9553_v8 = vcombine.low %v829_v59, %v833_v61  ;;  %v749_v60 = vld [vmem:[%s10732_s11 + $0xe08] sm:$0xff] }
 0x15b   : > { %v5552_v16 = vpop.f32.mrf.mxu1  ;;  %5797 = vmatmul.mubr.bf16.vlgmr.msra.gmra.mxu1 %v10927_v48  ;;  %5822 = vmatpush2.bf16.msra.mxu0 %v9529_v3  ;;  %v5513_v18 = vpop.f32.mrf.mxu0  ;;  %v761_v3 = vld [vmem:[%s10732_s11 + $0xe68] sm:$0xff] }
 0x15c   : > { %5847 = vmatpush1.bf16.msra.mxu1 %v9593_v5  ;;  %5823 = vmatprep.subr.bf16.mxu0 %v9522_v6  ;;  %v11174_v22 = vadd.f32 %v5552_v16, %v5512_v15  ;;  %v5514_v25 = vadd.f32 %v5513_v18, %v11106_v34  ;;  %v821_v5 = vld [vmem:[%s10732_s11 + $0x1048] sm:$0xff]  ;;  %v9482_v9 = vcombine.high %v757_v2, %v761_v3 }
 0x15d   : > { %v5554_v27 = vpop.f32.mrf.mxu1  ;;  %5848 = vmatprep.subr.bf16.mxu1 %v9586_v7  ;;  %5878 = vmatprep.mubr.bf16.mxu1 %v10934_v57  ;;  %v5515_v35 = vpop.f32.mrf.mxu0  ;;  %v825_v6 = vld [vmem:[%s10732_s11 + $0x1068] sm:$0xff]  ;;  %v9489_v7 = vcombine.low %v765_v56, %v769_v58 }
 0x15e   : > { %v11182_v36 = vadd.f32 %v5554_v27, %v5514_v25  ;;  %v9546_v11 = vcombine.high %v821_v5, %v825_v6  ;;  %v753_v13 = vld [vmem:[%s10732_s11 + $0xe28] sm:$0xff]  ;;  %v9545_v18 = vcombine.low %v821_v5, %v825_v6 }
 0x15f   : > { %v5556_v37 = vpop.f32.mrf.mxu1  ;;  %5824 = vmatpush2.bf16.msra.mxu0 %v9521_v17  ;;  %v5516_v34 = vpop.f32.mrf.mxu0  ;;  %v813_v15 = vld [vmem:[%s10732_s11 + $0x1008] sm:$0xff]  ;;  %v9481_v17 = vcombine.low %v757_v2, %v761_v3  ;;  %v9473_v29 = vcombine.low %v749_v60, %v753_v13 }
 0x160   : > { %5849 = vmatpush1.bf16.msra.mxu1 %v9585_v19  ;;  %5825 = vmatprep.subr.bf16.mxu0 %v9514_v21  ;;  %v817_v16 = vld [vmem:[%s10732_s11 + $0x1028] sm:$0xff]  ;;  %v9474_v19 = vcombine.high %v749_v60, %v753_v13 }
 0x161   : > { %v5557_v42 = vpop.f32.mrf.mxu1  ;;  %5850 = vmatprep.subr.bf16.mxu1 %v9578_v24  ;;  %v9538_v21 = vcombine.high %v813_v15, %v817_v16  ;;  %v997_v25 = vld [vmem:[%s10732_s11 + $0x15c8] sm:$0xff]  ;;  %v9537_v35 = vcombine.low %v813_v15, %v817_v16 }
 0x162   : > { %v1001_v27 = vld [vmem:[%s10732_s11 + $0x15e8] sm:$0xff] }
 0x163   : > { %5826 = vmatpush2.bf16.msra.mxu0 %v9513_v38  ;;  %v933_v24 = vld [vmem:[%s10732_s11 + $0x13c8] sm:$0xff]  ;;  %v9722_v32 = vcombine.high %v997_v25, %v1001_v27 }
 0x164   : > { %5851 = vmatpush1.bf16.msra.mxu1 %v9577_v39  ;;  %5827 = vmatprep.subr.bf16.mxu0 %v9506_v41  ;;  %v9658_v33 = vcombine.high %v933_v24, %v937_v28  ;;  %v989_v37 = vld [vmem:[%s10732_s11 + $0x1588] sm:$0xff]  ;;  %v9721_v41 = vcombine.low %v997_v25, %v1001_v27  ;;  %v9657_v42 = vcombine.low %v933_v24, %v937_v28 }
 0x165   : > { %5852 = vmatprep.subr.bf16.mxu1 %v9570_v26  ;;  %v993_v38 = vld [vmem:[%s10732_s11 + $0x15a8] sm:$0xff] }
 0x166   : > { %v925_v34 = vld [vmem:[%s10732_s11 + $0x1388] sm:$0xff]  ;;  %v9714_v26 = vcombine.high %v989_v37, %v993_v38 }
 0x167   : > { %5828 = vmatpush2.bf16.msra.mxu0 %v9505_v50  ;;  %v929_v39 = vld [vmem:[%s10732_s11 + $0x13a8] sm:$0xff] }
 0x168   : > { %5853 = vmatpush1.bf16.msra.mxu1 %v9569_v52  ;;  %5829 = vmatprep.subr.bf16.mxu0 %v9498_v53  ;;  %v9650_v43 = vcombine.high %v925_v34, %v929_v39  ;;  %v981_v44 = vld [vmem:[%s10732_s11 + $0x1548] sm:$0xff]  ;;  %v9713_v52 = vcombine.low %v989_v37, %v993_v38  ;;  %v9649_v53 = vcombine.low %v925_v34, %v929_v39 }
 0x169   : > { %5854 = vmatprep.subr.bf16.mxu1 %v9562_v55  ;;  %v985_v46 = vld [vmem:[%s10732_s11 + $0x1568] sm:$0xff] }
 0x16a   : > { %v917_v47 = vld [vmem:[%s10732_s11 + $0x1348] sm:$0xff]  ;;  %v9706_v55 = vcombine.high %v981_v44, %v985_v46 }
 0x16b   : > { %5830 = vmatpush2.bf16.msra.mxu0 %v9497_v62  ;;  %v921_v50 = vld [vmem:[%s10732_s11 + $0x1368] sm:$0xff] }
 0x16c   : > { %5855 = vmatpush1.bf16.msra.mxu1 %v9561_v54  ;;  %5831 = vmatprep.subr.bf16.mxu0 %v9490_v63  ;;  %v9642_v56 = vcombine.high %v917_v47, %v921_v50  ;;  %v973_v58 = vld [vmem:[%s10732_s11 + $0x1508] sm:$0xff]  ;;  %v9705_v54 = vcombine.low %v981_v44, %v985_v46  ;;  %v9641_v63 = vcombine.low %v917_v47, %v921_v50 }
 0x16d   : > { %5856 = vmatprep.subr.bf16.mxu1 %v9554_v1  ;;  %v977_v59 = vld [vmem:[%s10732_s11 + $0x1528] sm:$0xff] }
 0x16e   : > { %v909_v61 = vld [vmem:[%s10732_s11 + $0x1308] sm:$0xff]  ;;  %v9698_v1 = vcombine.high %v973_v58, %v977_v59 }
 0x16f   : > { %5832 = vmatpush2.bf16.msra.mxu0 %v9489_v7  ;;  %v913_v62 = vld [vmem:[%s10732_s11 + $0x1328] sm:$0xff] }
 0x170   : > { %5857 = vmatpush1.bf16.msra.mxu1 %v9553_v8  ;;  %5833 = vmatprep.subr.bf16.mxu0 %v9482_v9  ;;  %v9634_v2 = vcombine.high %v909_v61, %v913_v62  ;;  %v965_v3 = vld [vmem:[%s10732_s11 + $0x14c8] sm:$0xff]  ;;  %v9697_v8 = vcombine.low %v973_v58, %v977_v59  ;;  %v9633_v9 = vcombine.low %v909_v61, %v913_v62 }
 0x171   : > { %5858 = vmatprep.subr.bf16.mxu1 %v9546_v11  ;;  %v969_v5 = vld [vmem:[%s10732_s11 + $0x14e8] sm:$0xff] }
 0x172   : > { %v901_v6 = vld [vmem:[%s10732_s11 + $0x12c8] sm:$0xff]  ;;  %v9690_v11 = vcombine.high %v965_v3, %v969_v5 }
 0x173   : > { %5834 = vmatpush2.bf16.msra.mxu0 %v9481_v17  ;;  %v905_v7 = vld [vmem:[%s10732_s11 + $0x12e8] sm:$0xff] }
 0x174   : > { %5859 = vmatpush1.bf16.msra.mxu1 %v9545_v18  ;;  %5835 = vmatprep.subr.bf16.mxu0 %v9474_v19  ;;  %v9626_v60 = vcombine.high %v901_v6, %v905_v7  ;;  %v957_v13 = vld [vmem:[%s10732_s11 + $0x1488] sm:$0xff]  ;;  %v9689_v18 = vcombine.low %v965_v3, %v969_v5  ;;  %v9625_v19 = vcombine.low %v901_v6, %v905_v7 }
 0x175   : > { %5860 = vmatprep.subr.bf16.mxu1 %v9538_v21  ;;  %v961_v15 = vld [vmem:[%s10732_s11 + $0x14a8] sm:$0xff] }
 0x176   : > { %v893_v16 = vld [vmem:[%s10732_s11 + $0x1288] sm:$0xff]  ;;  %v9682_v21 = vcombine.high %v957_v13, %v961_v15 }
 0x177   : > { %5836 = vmatpush2.bf16.msra.mxu0 %v9473_v29  ;;  %v897_v17 = vld [vmem:[%s10732_s11 + $0x12a8] sm:$0xff] }
 0x178   : > { %5861 = vmatpush1.bf16.msra.mxu1 %v9537_v35  ;;  %5887 = vmatprep.subr.bf16.mxu0 %v9722_v32  ;;  %v9618_v25 = vcombine.high %v893_v16, %v897_v17  ;;  %v949_v27 = vld [vmem:[%s10732_s11 + $0x1448] sm:$0xff]  ;;  %v9681_v35 = vcombine.low %v957_v13, %v961_v15  ;;  %v9617_v32 = vcombine.low %v893_v16, %v897_v17 }
 0x179   : > { %5862 = vmatprep.subr.bf16.mxu1 %v9658_v33  ;;  %v953_v24 = vld [vmem:[%s10732_s11 + $0x1468] sm:$0xff] }
 0x17a   : > { %5838 = vmatmul.mubr.bf16.vlgmr.msra.gmra.mxu0 %v10938_v12  ;;  %v885_v28 = vld [vmem:[%s10732_s11 + $0x1248] sm:$0xff]  ;;  %v9674_v33 = vcombine.high %v949_v27, %v953_v24 }
 0x17b   : > { %5888 = vmatpush1.bf16.msra.mxu0 %v9721_v41  ;;  %5919 = vmatprep.mubr.bf16.mxu0 %v10947_v4  ;;  %v889_v29 = vld [vmem:[%s10732_s11 + $0x1268] sm:$0xff] }
 0x17c   : > { %5863 = vmatpush2.bf16.msra.mxu1 %v9657_v42  ;;  %5889 = vmatprep.subr.bf16.mxu0 %v9714_v26  ;;  %v9610_v37 = vcombine.high %v885_v28, %v889_v29  ;;  %v941_v38 = vld [vmem:[%s10732_s11 + $0x1408] sm:$0xff]  ;;  %v9673_v42 = vcombine.low %v949_v27, %v953_v24  ;;  %v9609_v26 = vcombine.low %v885_v28, %v889_v29 }
 0x17d   : > { %5864 = vmatprep.subr.bf16.mxu1 %v9650_v43  ;;  %v945_v34 = vld [vmem:[%s10732_s11 + $0x1428] sm:$0xff] }
 0x17e   : > { %v877_v39 = vld [vmem:[%s10732_s11 + $0x1208] sm:$0xff]  ;;  %v9666_v43 = vcombine.high %v941_v38, %v945_v34 }
 0x17f   : > { %5890 = vmatpush1.bf16.msra.mxu0 %v9713_v52  ;;  %v881_v41 = vld [vmem:[%s10732_s11 + $0x1228] sm:$0xff] }
 0x180   : > { %5865 = vmatpush2.bf16.msra.mxu1 %v9649_v53  ;;  %5891 = vmatprep.subr.bf16.mxu0 %v9706_v55  ;;  %v9602_v44 = vcombine.high %v877_v39, %v881_v41  ;;  %v1061_v46 = vld [vmem:[%s10732_s11 + $0x17c8] sm:$0xff]  ;;  %v9665_v53 = vcombine.low %v941_v38, %v945_v34  ;;  %v9601_v55 = vcombine.low %v877_v39, %v881_v41 }
 0x181   : > { %5866 = vmatprep.subr.bf16.mxu1 %v9642_v56  ;;  %v1065_v47 = vld [vmem:[%s10732_s11 + $0x17e8] sm:$0xff] }
 0x182   : > { %v1125_v50 = vld [vmem:[%s10732_s11 + $0x19c8] sm:$0xff]  ;;  %v9786_v56 = vcombine.high %v1061_v46, %v1065_v47 }
 0x183   : > { %5892 = vmatpush1.bf16.msra.mxu0 %v9705_v54  ;;  %v1129_v52 = vld [vmem:[%s10732_s11 + $0x19e8] sm:$0xff] }
 0x184   : > { %5867 = vmatpush2.bf16.msra.mxu1 %v9641_v63  ;;  %5893 = vmatprep.subr.bf16.mxu0 %v9698_v1  ;;  %v9850_v58 = vcombine.high %v1125_v50, %v1129_v52  ;;  %v1053_v59 = vld [vmem:[%s10732_s11 + $0x1788] sm:$0xff]  ;;  %v9785_v63 = vcombine.low %v1061_v46, %v1065_v47  ;;  %v9849_v1 = vcombine.low %v1125_v50, %v1129_v52 }
 0x185   : > { %5868 = vmatprep.subr.bf16.mxu1 %v9634_v2  ;;  %v1057_v61 = vld [vmem:[%s10732_s11 + $0x17a8] sm:$0xff] }
 0x186   : > { %v1117_v62 = vld [vmem:[%s10732_s11 + $0x1988] sm:$0xff]  ;;  %v9778_v2 = vcombine.high %v1053_v59, %v1057_v61  ;;  %v9777_v13 = vcombine.low %v1053_v59, %v1057_v61 }
 0x187   : > { %5894 = vmatpush1.bf16.msra.mxu0 %v9697_v8  ;;  %v1121_v54 = vld [vmem:[%s10732_s11 + $0x19a8] sm:$0xff] }
 0x188   : > { %5869 = vmatpush2.bf16.msra.mxu1 %v9633_v9  ;;  %5895 = vmatprep.subr.bf16.mxu0 %v9690_v11  ;;  %v9842_v3 = vcombine.high %v1117_v62, %v1121_v54  ;;  %v1045_v5 = vld [vmem:[%s10732_s11 + $0x1748] sm:$0xff]  ;;  %v9841_v16 = vcombine.low %v1117_v62, %v1121_v54 }
 0x189   : > { %5870 = vmatprep.subr.bf16.mxu1 %v9626_v60  ;;  %v1049_v6 = vld [vmem:[%s10732_s11 + $0x1768] sm:$0xff] }
 0x18a   : > { %v1109_v8 = vld [vmem:[%s10732_s11 + $0x1948] sm:$0xff]  ;;  %v9770_v17 = vcombine.high %v1045_v5, %v1049_v6 }
 0x18b   : > { %5896 = vmatpush1.bf16.msra.mxu0 %v9689_v18  ;;  %v1113_v9 = vld [vmem:[%s10732_s11 + $0x1968] sm:$0xff] }
 0x18c   : > { %5871 = vmatpush2.bf16.msra.mxu1 %v9625_v19  ;;  %5897 = vmatprep.subr.bf16.mxu0 %v9682_v21  ;;  %v1041_v27 = vld [vmem:[%s10732_s11 + $0x1728] sm:$0xff] }
 0x18d   : > { %5872 = vmatprep.subr.bf16.mxu1 %v9618_v25  ;;  %v1037_v25 = vld [vmem:[%s10732_s11 + $0x1708] sm:$0xff] }
 0x18e   : > { %v1101_v28 = vld [vmem:[%s10732_s11 + $0x1908] sm:$0xff]  ;;  %v9762_v38 = vcombine.high %v1037_v25, %v1041_v27 }
 0x18f   : > { %5898 = vmatpush1.bf16.msra.mxu0 %v9681_v35  ;;  %v1105_v29 = vld [vmem:[%s10732_s11 + $0x1928] sm:$0xff] }
 0x190   : > { %5873 = vmatpush2.bf16.msra.mxu1 %v9617_v32  ;;  %5899 = vmatprep.subr.bf16.mxu0 %v9674_v33  ;;  %v9769_v33 = vcombine.low %v1045_v5, %v1049_v6  ;;  %v9826_v39 = vcombine.high %v1101_v28, %v1105_v29  ;;  %v1029_v41 = vld [vmem:[%s10732_s11 + $0x16c8] sm:$0xff]  ;;  %v9825_v46 = vcombine.low %v1101_v28, %v1105_v29 }
 0x191   : > { %5874 = vmatprep.subr.bf16.mxu1 %v9610_v37  ;;  %v9833_v37 = vcombine.low %v1109_v8, %v1113_v9  ;;  %v1021_v52 = vld [vmem:[%s10732_s11 + $0x1688] sm:$0xff] }
 0x192   : > { %v1013_v54 = vld [vmem:[%s10732_s11 + $0x1648] sm:$0xff] }
 0x193   : > { %5900 = vmatpush1.bf16.msra.mxu0 %v9673_v42  ;;  %v1033_v42 = vld [vmem:[%s10732_s11 + $0x16e8] sm:$0xff] }
 0x194   : > { %5875 = vmatpush2.bf16.msra.mxu1 %v9609_v26  ;;  %5901 = vmatprep.subr.bf16.mxu0 %v9666_v43  ;;  %v1093_v26 = vld [vmem:[%s10732_s11 + $0x18c8] sm:$0xff]  ;;  %v9754_v47 = vcombine.high %v1029_v41, %v1033_v42 }
 0x195   : > { %5876 = vmatprep.subr.bf16.mxu1 %v9602_v44  ;;  %v1097_v43 = vld [vmem:[%s10732_s11 + $0x18e8] sm:$0xff]  ;;  %v9761_v44 = vcombine.low %v1037_v25, %v1041_v27  ;;  %v490_v25 = vld [vmem:[%s10732_s11 + $0x5f0] sm:$0xff] }
 0x196   : > { %v9818_v50 = vcombine.high %v1093_v26, %v1097_v43  ;;  %v9817_v59 = vcombine.low %v1093_v26, %v1097_v43  ;;  %v346_v26 = vld [vmem:[%s10732_s11 + $0x170] sm:$0xff] }
 0x197   : > { %5902 = vmatpush1.bf16.msra.mxu0 %v9665_v53  ;;  %v1025_v53 = vld [vmem:[%s10732_s11 + $0x16a8] sm:$0xff] }
 0x198   : > { %5877 = vmatpush2.bf16.msra.mxu1 %v9601_v55  ;;  %5903 = vmatprep.subr.bf16.mxu0 %v9786_v56  ;;  %v1085_v55 = vld [vmem:[%s10732_s11 + $0x1888] sm:$0xff]  ;;  %v9746_v61 = vcombine.high %v1021_v52, %v1025_v53 }
 0x199   : > { %5928 = vmatprep.subr.bf16.mxu1 %v9850_v58  ;;  %v1089_v56 = vld [vmem:[%s10732_s11 + $0x18a8] sm:$0xff]  ;;  %v9753_v58 = vcombine.low %v1029_v41, %v1033_v42  ;;  %v342_v42 = vld [vmem:[%s10732_s11 + $0x150] sm:$0xff] }
 0x19a   : > { %v5593_v7 = vpop.f32.mrf.mxu0  ;;  %v9810_v62 = vcombine.high %v1085_v55, %v1089_v56  ;;  %v9809_v5 = vcombine.low %v1085_v55, %v1089_v56  ;;  %v9068_v55 = vcombine.high %v342_v42, %v346_v26 }
 0x19b   : > { %v5594_v11 = vadd.f32 %v5593_v7, %v11174_v22  ;;  %v5634_v60 = vpop.f32.mrf.mxu1  ;;  %5879 = vmatmul.mubr.bf16.vlgmr.msra.gmra.mxu1 %v11010_v20  ;;  %5904 = vmatpush2.bf16.msra.mxu0 %v9785_v63  ;;  %v9834_v22 = vcombine.high %v1109_v8, %v1113_v9  ;;  %v1017_v63 = vld [vmem:[%s10732_s11 + $0x1668] sm:$0xff] }
 0x19c   : > { %5929 = vmatpush1.bf16.msra.mxu1 %v9849_v1  ;;  %v5595_v15 = vpop.f32.mrf.mxu0  ;;  %5905 = vmatprep.subr.bf16.mxu0 %v9778_v2  ;;  %v1077_v1 = vld [vmem:[%s10732_s11 + $0x1848] sm:$0xff]  ;;  %v9738_v6 = vcombine.high %v1013_v54, %v1017_v63 }
 0x19d   : > { %v11248_v18 = vadd.f32 %v5634_v60, %v5594_v11  ;;  %v5596_v19 = vadd.f32 %v5595_v15, %v11182_v36  ;;  %v5636_v21 = vpop.f32.mrf.mxu1  ;;  %5930 = vmatprep.subr.bf16.mxu1 %v9842_v3  ;;  %5960 = vmatprep.mubr.bf16.mxu1 %v10669_v49  ;;  %v1081_v2 = vld [vmem:[%s10732_s11 + $0x1868] sm:$0xff]  ;;  %v9745_v3 = vcombine.low %v1021_v52, %v1025_v53 }
 0x19e   : > { %v5597_v24 = vpop.f32.mrf.mxu0  ;;  %v9802_v7 = vcombine.high %v1077_v1, %v1081_v2  ;;  %v1005_v8 = vld [vmem:[%s10732_s11 + $0x1608] sm:$0xff]  ;;  %v9801_v15 = vcombine.low %v1077_v1, %v1081_v2 }
 0x19f   : > { %v11256_v35 = vadd.f32 %v5636_v21, %v5596_v19  ;;  %v5638_v32 = vpop.f32.mrf.mxu1  ;;  %5906 = vmatpush2.bf16.msra.mxu0 %v9777_v13  ;;  %v1009_v9 = vld [vmem:[%s10732_s11 + $0x1628] sm:$0xff]  ;;  %v9737_v13 = vcombine.low %v1013_v54, %v1017_v63  ;;  %v358_v19 = vld [vmem:[%s10732_s11 + $0x1d0] sm:$0xff] }
 0x1a0   : > { %5931 = vmatpush1.bf16.msra.mxu1 %v9841_v16  ;;  %v5598_v36 = vpop.f32.mrf.mxu0  ;;  %5907 = vmatprep.subr.bf16.mxu0 %v9770_v17  ;;  %v1069_v11 = vld [vmem:[%s10732_s11 + $0x1808] sm:$0xff]  ;;  %v9730_v16 = vcombine.high %v1005_v8, %v1009_v9  ;;  %v362_v21 = vld [vmem:[%s10732_s11 + $0x1f0] sm:$0xff]  ;;  %v9729_v27 = vcombine.low %v1005_v8, %v1009_v9 }
 0x1a1   : > { %v5639_v34 = vpop.f32.mrf.mxu1  ;;  %5932 = vmatprep.subr.bf16.mxu1 %v9834_v22  ;;  %v1073_v60 = vld [vmem:[%s10732_s11 + $0x1828] sm:$0xff]  ;;  %v486_v22 = vld [vmem:[%s10732_s11 + $0x5d0] sm:$0xff]  ;;  %v9084_v28 = vcombine.high %v358_v19, %v362_v21 }
 0x1a2   : > { %v9794_v17 = vcombine.high %v1069_v11, %v1073_v60  ;;  %v9793_v24 = vcombine.low %v1069_v11, %v1073_v60  ;;  %v9212_v29 = vcombine.high %v486_v22, %v490_v25  ;;  %v350_v32 = vld [vmem:[%s10732_s11 + $0x190] sm:$0xff]  ;;  %v9211_v34 = vcombine.low %v486_v22, %v490_v25 }
 0x1a3   : > { %5908 = vmatpush2.bf16.msra.mxu0 %v9769_v33  ;;  %v354_v33 = vld [vmem:[%s10732_s11 + $0x1b0] sm:$0xff] }
 0x1a4   : > { %5933 = vmatpush1.bf16.msra.mxu1 %v9833_v37  ;;  %5909 = vmatprep.subr.bf16.mxu0 %v9762_v38  ;;  %v478_v36 = vld [vmem:[%s10732_s11 + $0x590] sm:$0xff]  ;;  %v9083_v38 = vcombine.low %v358_v19, %v362_v21 }
 0x1a5   : > { %5934 = vmatprep.subr.bf16.mxu1 %v9826_v39  ;;  %v482_v37 = vld [vmem:[%s10732_s11 + $0x5b0] sm:$0xff]  ;;  %v9076_v39 = vcombine.high %v350_v32, %v354_v33 }
 0x1a6   : > { %v9204_v41 = vcombine.high %v478_v36, %v482_v37  ;;  %v9203_v53 = vcombine.low %v478_v36, %v482_v37  ;;  %v466_v54 = vld [vmem:[%s10732_s11 + $0x530] sm:$0xff] }
 0x1a7   : > { %5910 = vmatpush2.bf16.msra.mxu0 %v9761_v44  ;;  %v470_v44 = vld [vmem:[%s10732_s11 + $0x550] sm:$0xff] }
 0x1a8   : > { %5935 = vmatpush1.bf16.msra.mxu1 %v9825_v46  ;;  %5911 = vmatprep.subr.bf16.mxu0 %v9754_v47  ;;  %v474_v46 = vld [vmem:[%s10732_s11 + $0x570] sm:$0xff] }
 0x1a9   : > { %5936 = vmatprep.subr.bf16.mxu1 %v9818_v50  ;;  %v9075_v50 = vcombine.low %v350_v32, %v354_v33  ;;  %v9195_v2 = vcombine.low %v470_v44, %v474_v46  ;;  %v454_v8 = vld [vmem:[%s10732_s11 + $0x4d0] sm:$0xff] }
 0x1aa   : > { %v458_v9 = vld [vmem:[%s10732_s11 + $0x4f0] sm:$0xff] }
 0x1ab   : > { %5912 = vmatpush2.bf16.msra.mxu0 %v9753_v58  ;;  %v9196_v58 = vcombine.high %v470_v44, %v474_v46  ;;  %v446_v19 = vld [vmem:[%s10732_s11 + $0x490] sm:$0xff]  ;;  %v9179_v25 = vcombine.low %v454_v8, %v458_v9 }
 0x1ac   : > { %5937 = vmatpush1.bf16.msra.mxu1 %v9817_v59  ;;  %5913 = vmatprep.subr.bf16.mxu0 %v9746_v61  ;;  %v334_v59 = vld [vmem:[%s10732_s11 + $0x110] sm:$0xff] }
 0x1ad   : > { %5938 = vmatprep.subr.bf16.mxu1 %v9810_v62  ;;  %v338_v61 = vld [vmem:[%s10732_s11 + $0x130] sm:$0xff] }
 0x1ae   : > { %v462_v62 = vld [vmem:[%s10732_s11 + $0x510] sm:$0xff]  ;;  %v9059_v11 = vcombine.low %v334_v59, %v338_v61 }
 0x1af   : > { %5914 = vmatpush2.bf16.msra.mxu0 %v9745_v3  ;;  %v9060_v3 = vcombine.high %v334_v59, %v338_v61  ;;  %v9187_v60 = vcombine.low %v462_v62, %v466_v54  ;;  %v450_v21 = vld [vmem:[%s10732_s11 + $0x4b0] sm:$0xff] }
 0x1b0   : > { %5939 = vmatpush1.bf16.msra.mxu1 %v9809_v5  ;;  %5915 = vmatprep.subr.bf16.mxu0 %v9738_v6  ;;  %v9188_v5 = vcombine.high %v462_v62, %v466_v54  ;;  %v326_v6 = vld [vmem:[%s10732_s11 + $0xd0] sm:$0xff]  ;;  %v9171_v37 = vcombine.low %v446_v19, %v450_v21 }
 0x1b1   : > { %5940 = vmatprep.subr.bf16.mxu1 %v9802_v7  ;;  %v330_v7 = vld [vmem:[%s10732_s11 + $0xf0] sm:$0xff] }
 0x1b2   : > { %v9051_v22 = vcombine.low %v326_v6, %v330_v7  ;;  %v438_v32 = vld [vmem:[%s10732_s11 + $0x450] sm:$0xff] }
 0x1b3   : > { %5916 = vmatpush2.bf16.msra.mxu0 %v9737_v13  ;;  %v9052_v13 = vcombine.high %v326_v6, %v330_v7  ;;  %v442_v33 = vld [vmem:[%s10732_s11 + $0x470] sm:$0xff] }
 0x1b4   : > { %5941 = vmatpush1.bf16.msra.mxu1 %v9801_v15  ;;  %5917 = vmatprep.subr.bf16.mxu0 %v9730_v16  ;;  %v9180_v15 = vcombine.high %v454_v8, %v458_v9  ;;  %v318_v16 = vld [vmem:[%s10732_s11 + $0x90] sm:$0xff]  ;;  %v9163_v44 = vcombine.low %v438_v32, %v442_v33 }
 0x1b5   : > { %5942 = vmatprep.subr.bf16.mxu1 %v9794_v17  ;;  %v322_v17 = vld [vmem:[%s10732_s11 + $0xb0] sm:$0xff] }
 0x1b6   : > { %v9043_v36 = vcombine.low %v318_v16, %v322_v17  ;;  %v414_v54 = vld [vmem:[%s10732_s11 + $0x390] sm:$0xff] }
 0x1b7   : > { %5918 = vmatpush2.bf16.msra.mxu0 %v9729_v27  ;;  %v9044_v27 = vcombine.high %v318_v16, %v322_v17  ;;  %v406_v8 = vld [vmem:[%s10732_s11 + $0x350] sm:$0xff] }
 0x1b8   : > { %5943 = vmatpush1.bf16.msra.mxu1 %v9793_v24  ;;  %5969 = vmatprep.subr.bf16.mxu0 %v9084_v28  ;;  %v9172_v24 = vcombine.high %v446_v19, %v450_v21  ;;  %v310_v28 = vld [vmem:[%s10732_s11 + $0x50] sm:$0xff] }
 0x1b9   : > { %6010 = vmatprep.subr.bf16.mxu1 %v9212_v29  ;;  %v314_v29 = vld [vmem:[%s10732_s11 + $0x70] sm:$0xff] }
 0x1ba   : > { %v5675_v43 = vpop.f32.mrf.mxu0  ;;  %5920 = vmatmul.mubr.bf16.vlgmr.msra.gmra.mxu0 %v11018_v30  ;;  %v410_v9 = vld [vmem:[%s10732_s11 + $0x370] sm:$0xff] }
 0x1bb   : > { %v11288_v47 = vadd.f32 %v5675_v43, %v11248_v18  ;;  %5961 = vmatmul.mubr.bf16.vlgmr.msra.gmra.mxu1 %v11058_v51  ;;  %5970 = vmatpush1.bf16.msra.mxu0 %v9083_v38  ;;  %v9036_v38 = vcombine.high %v310_v28, %v314_v29  ;;  %v9035_v43 = vcombine.low %v310_v28, %v314_v29 }
 0x1bc   : > { %6011 = vmatpush1.bf16.msra.mxu1 %v9211_v34  ;;  %v5677_v52 = vpop.f32.mrf.mxu0  ;;  %5971 = vmatprep.subr.bf16.mxu0 %v9076_v39  ;;  %v9164_v34 = vcombine.high %v438_v32, %v442_v33  ;;  %v302_v39 = vld [vmem:[%s10732_s11 + $0x10] sm:$0xff]  ;;  %v9132_v17 = vcombine.high %v406_v8, %v410_v9  ;;  %v9131_v29 = vcombine.low %v406_v8, %v410_v9 }
 0x1bd   : > { %v11292_v56 = vadd.f32 %v5677_v52, %v11256_v35  ;;  %6012 = vmatprep.subr.bf16.mxu1 %v9204_v41  ;;  %6001 = vmatprep.mubr.bf16.mxu0 %v10784_v10  ;;  %v9067_v35 = vcombine.low %v342_v42, %v346_v26  ;;  %v306_v41 = vld [vmem:[%s10732_s11 + $0x30] sm:$0xff] }
 0x1be   : > { %v5679_v18 = vpop.f32.mrf.mxu0  ;;  %6042 = vmatprep.mubr.bf16.mxu1 %v10791_v14  ;;  %v430_v42 = vld [vmem:[%s10732_s11 + $0x410] sm:$0xff]  ;;  %v9028_v46 = vcombine.high %v302_v39, %v306_v41  ;;  %v9027_v59 = vcombine.low %v302_v39, %v306_v41 }
 0x1bf   : > { %v6551_v63 = vcombine.low %v11288_v47, %v11292_v56  ;;  %5972 = vmatpush1.bf16.msra.mxu0 %v9075_v50  ;;  %v434_v26 = vld [vmem:[%s10732_s11 + $0x430] sm:$0xff]  ;;  %v319_v47 = vld [vmem:[%s10732_s11 + $0x98] sm:$0xff] }
 0x1c0   : > { %6013 = vmatpush1.bf16.msra.mxu1 %v9203_v53  ;;  %v5680_v1 = vpop.f32.mrf.mxu0  ;;  %5973 = vmatprep.subr.bf16.mxu0 %v9068_v55  ;;  %v9156_v50 = vcombine.high %v430_v42, %v434_v26  ;;  %v422_v52 = vld [vmem:[%s10732_s11 + $0x3d0] sm:$0xff]  ;;  %v9155_v61 = vcombine.low %v430_v42, %v434_v26  ;;  %v323_v56 = vld [vmem:[%s10732_s11 + $0xb8] sm:$0xff] }
 0x1c1   : > { %6014 = vmatprep.subr.bf16.mxu1 %v9196_v58  ;;  %v426_v53 = vld [vmem:[%s10732_s11 + $0x3f0] sm:$0xff] }
 0x1c2   : > { %v550_v55 = vld [vmem:[%s10732_s11 + $0x7d0] sm:$0xff]  ;;  %v9148_v18 = vcombine.high %v422_v52, %v426_v53 }
 0x1c3   : > { %5974 = vmatpush1.bf16.msra.mxu0 %v9067_v35  ;;  %v554_v58 = vld [vmem:[%s10732_s11 + $0x7f0] sm:$0xff] }
 0x1c4   : > { %6015 = vmatpush1.bf16.msra.mxu1 %v9195_v2  ;;  %5975 = vmatprep.subr.bf16.mxu0 %v9060_v3  ;;  %v9276_v62 = vcombine.high %v550_v55, %v554_v58  ;;  %v418_v35 = vld [vmem:[%s10732_s11 + $0x3b0] sm:$0xff]  ;;  %v9147_v3 = vcombine.low %v422_v52, %v426_v53 }
 0x1c5   : > { %6016 = vmatprep.subr.bf16.mxu1 %v9188_v5  ;;  %v542_v1 = vld [vmem:[%s10732_s11 + $0x790] sm:$0xff]  ;;  %v9275_v5 = vcombine.low %v550_v55, %v554_v58  ;;  %v9140_v6 = vcombine.high %v414_v54, %v418_v35 }
 0x1c6   : > { %v546_v2 = vld [vmem:[%s10732_s11 + $0x7b0] sm:$0xff] }
 0x1c7   : > { %5976 = vmatpush1.bf16.msra.mxu0 %v9059_v11  ;;  %v9268_v7 = vcombine.high %v542_v1, %v546_v2  ;;  %v534_v11 = vld [vmem:[%s10732_s11 + $0x750] sm:$0xff]  ;;  %v9267_v16 = vcombine.low %v542_v1, %v546_v2 }
 0x1c8   : > { %6017 = vmatpush1.bf16.msra.mxu1 %v9187_v60  ;;  %5977 = vmatprep.subr.bf16.mxu0 %v9052_v13  ;;  %v538_v60 = vld [vmem:[%s10732_s11 + $0x770] sm:$0xff] }
 0x1c9   : > { %6018 = vmatprep.subr.bf16.mxu1 %v9180_v15  ;;  %v9139_v15 = vcombine.low %v414_v54, %v418_v35  ;;  %v9260_v21 = vcombine.high %v534_v11, %v538_v60  ;;  %v9259_v32 = vcombine.low %v534_v11, %v538_v60  ;;  %v518_v39 = vld [vmem:[%s10732_s11 + $0x6d0] sm:$0xff] }
 0x1ca   : > { %v522_v41 = vld [vmem:[%s10732_s11 + $0x6f0] sm:$0xff] }
 0x1cb   : > { %5978 = vmatpush1.bf16.msra.mxu0 %v9051_v22  ;;  %v398_v22 = vld [vmem:[%s10732_s11 + $0x310] sm:$0xff]  ;;  %v9243_v58 = vcombine.low %v518_v39, %v522_v41 }
 0x1cc   : > { %6019 = vmatpush1.bf16.msra.mxu1 %v9179_v25  ;;  %5979 = vmatprep.subr.bf16.mxu0 %v9044_v27  ;;  %v402_v25 = vld [vmem:[%s10732_s11 + $0x330] sm:$0xff] }
 0x1cd   : > { %6020 = vmatprep.subr.bf16.mxu1 %v9172_v24  ;;  %v526_v27 = vld [vmem:[%s10732_s11 + $0x710] sm:$0xff]  ;;  %v9124_v33 = vcombine.high %v398_v22, %v402_v25  ;;  %v9123_v42 = vcombine.low %v398_v22, %v402_v25 }
 0x1ce   : > { %v530_v24 = vld [vmem:[%s10732_s11 + $0x730] sm:$0xff] }
 0x1cf   : > { %5980 = vmatpush1.bf16.msra.mxu0 %v9043_v36  ;;  %v9251_v26 = vcombine.low %v526_v27, %v530_v24  ;;  %v510_v52 = vld [vmem:[%s10732_s11 + $0x690] sm:$0xff] }
 0x1d0   : > { %6021 = vmatpush1.bf16.msra.mxu1 %v9171_v37  ;;  %5981 = vmatprep.subr.bf16.mxu0 %v9036_v38  ;;  %v9252_v37 = vcombine.high %v526_v27, %v530_v24  ;;  %v390_v38 = vld [vmem:[%s10732_s11 + $0x2d0] sm:$0xff] }
 0x1d1   : > { %6022 = vmatprep.subr.bf16.mxu1 %v9164_v34  ;;  %v394_v34 = vld [vmem:[%s10732_s11 + $0x2f0] sm:$0xff] }
 0x1d2   : > { %v514_v53 = vld [vmem:[%s10732_s11 + $0x6b0] sm:$0xff]  ;;  %v9115_v55 = vcombine.low %v390_v38, %v394_v34 }
 0x1d3   : > { %5982 = vmatpush1.bf16.msra.mxu0 %v9035_v43  ;;  %v9116_v43 = vcombine.high %v390_v38, %v394_v34  ;;  %v502_v54 = vld [vmem:[%s10732_s11 + $0x650] sm:$0xff]  ;;  %v9235_v2 = vcombine.low %v510_v52, %v514_v53 }
 0x1d4   : > { %6023 = vmatpush1.bf16.msra.mxu1 %v9163_v44  ;;  %5983 = vmatprep.subr.bf16.mxu0 %v9028_v46  ;;  %v9244_v44 = vcombine.high %v518_v39, %v522_v41  ;;  %v382_v46 = vld [vmem:[%s10732_s11 + $0x290] sm:$0xff] }
 0x1d5   : > { %6024 = vmatprep.subr.bf16.mxu1 %v9156_v50  ;;  %v386_v50 = vld [vmem:[%s10732_s11 + $0x2b0] sm:$0xff] }
 0x1d6   : > { %v506_v35 = vld [vmem:[%s10732_s11 + $0x670] sm:$0xff]  ;;  %v9107_v1 = vcombine.low %v382_v46, %v386_v50 }
 0x1d7   : > { %5984 = vmatpush1.bf16.msra.mxu0 %v9027_v59  ;;  %v9108_v59 = vcombine.high %v382_v46, %v386_v50  ;;  %v494_v8 = vld [vmem:[%s10732_s11 + $0x610] sm:$0xff]  ;;  %v9227_v60 = vcombine.low %v502_v54, %v506_v35 }
 0x1d8   : > { %6025 = vmatpush1.bf16.msra.mxu1 %v9155_v61  ;;  %5985 = vmatprep.subr.bf16.mxu0 %v9148_v18  ;;  %v9236_v61 = vcombine.high %v510_v52, %v514_v53  ;;  %v374_v18 = vld [vmem:[%s10732_s11 + $0x250] sm:$0xff] }
 0x1d9   : > { %6026 = vmatprep.subr.bf16.mxu1 %v9276_v62  ;;  %v378_v62 = vld [vmem:[%s10732_s11 + $0x270] sm:$0xff] }
 0x1da   : > { %v498_v9 = vld [vmem:[%s10732_s11 + $0x630] sm:$0xff]  ;;  %v9099_v11 = vcombine.low %v374_v18, %v378_v62 }
 0x1db   : > { %v11330_v13 = vpop.f32.mrf.mxu1  ;;  %5986 = vmatpush2.bf16.msra.mxu0 %v9147_v3  ;;  %v9100_v3 = vcombine.high %v374_v18, %v378_v62  ;;  %v742_v22 = vld [vmem:[%s10732_s11 + $0xdd0] sm:$0xff]  ;;  %v9219_v24 = vcombine.low %v494_v8, %v498_v9 }
 0x1dc   : > { %6027 = vmatpush2.bf16.msra.mxu1 %v9275_v5  ;;  %5987 = vmatprep.subr.bf16.mxu0 %v9140_v6  ;;  %v9228_v5 = vcombine.high %v502_v54, %v506_v35  ;;  %v366_v6 = vld [vmem:[%s10732_s11 + $0x210] sm:$0xff] }
 0x1dd   : > { %v11332_v19 = vpop.f32.mrf.mxu1  ;;  %6028 = vmatprep.subr.bf16.mxu1 %v9268_v7  ;;  %v370_v7 = vld [vmem:[%s10732_s11 + $0x230] sm:$0xff] }
 0x1de   : > { %v746_v25 = vld [vmem:[%s10732_s11 + $0xdf0] sm:$0xff]  ;;  %v9091_v27 = vcombine.low %v366_v6, %v370_v7 }
 0x1df   : > { %v5720_v28 = vpop.f32.mrf.mxu1  ;;  %5988 = vmatpush2.bf16.msra.mxu0 %v9139_v15  ;;  %v9092_v15 = vcombine.high %v366_v6, %v370_v7  ;;  %v9467_v34 = vcombine.low %v742_v22, %v746_v25  ;;  %v730_v46 = vld [vmem:[%s10732_s11 + $0xd70] sm:$0xff] }
 0x1e0   : > { %6029 = vmatpush2.bf16.msra.mxu1 %v9267_v16  ;;  %5989 = vmatprep.subr.bf16.mxu0 %v9132_v17  ;;  %v9220_v16 = vcombine.high %v494_v8, %v498_v9  ;;  %v614_v17 = vld [vmem:[%s10732_s11 + $0x9d0] sm:$0xff] }
 0x1e1   : > { %v5721_v36 = vpop.f32.mrf.mxu1  ;;  %6030 = vmatprep.subr.bf16.mxu1 %v9260_v21  ;;  %v618_v21 = vld [vmem:[%s10732_s11 + $0x9f0] sm:$0xff] }
 0x1e2   : > { %v9340_v28 = vcombine.high %v614_v17, %v618_v21  ;;  %v734_v36 = vld [vmem:[%s10732_s11 + $0xd90] sm:$0xff]  ;;  %v9339_v38 = vcombine.low %v614_v17, %v618_v21 }
 0x1e3   : > { %5990 = vmatpush2.bf16.msra.mxu0 %v9131_v29  ;;  %v9468_v29 = vcombine.high %v742_v22, %v746_v25  ;;  %v590_v18 = vld [vmem:[%s10732_s11 + $0x910] sm:$0xff] }
 0x1e4   : > { %6031 = vmatpush2.bf16.msra.mxu1 %v9259_v32  ;;  %5991 = vmatprep.subr.bf16.mxu0 %v9124_v33  ;;  %v606_v32 = vld [vmem:[%s10732_s11 + $0x990] sm:$0xff] }
 0x1e5   : > { %6032 = vmatprep.subr.bf16.mxu1 %v9252_v37  ;;  %v610_v33 = vld [vmem:[%s10732_s11 + $0x9b0] sm:$0xff] }
 0x1e6   : > { %v738_v37 = vld [vmem:[%s10732_s11 + $0xdb0] sm:$0xff]  ;;  %v9332_v39 = vcombine.high %v606_v32, %v610_v33  ;;  %v9331_v52 = vcombine.low %v606_v32, %v610_v33 }
 0x1e7   : > { %5992 = vmatpush2.bf16.msra.mxu0 %v9123_v42  ;;  %v9460_v41 = vcombine.high %v734_v36, %v738_v37  ;;  %v598_v42 = vld [vmem:[%s10732_s11 + $0x950] sm:$0xff] }
 0x1e8   : > { %6033 = vmatpush2.bf16.msra.mxu1 %v9251_v26  ;;  %5993 = vmatprep.subr.bf16.mxu0 %v9116_v43  ;;  %v602_v26 = vld [vmem:[%s10732_s11 + $0x970] sm:$0xff] }
 0x1e9   : > { %6034 = vmatprep.subr.bf16.mxu1 %v9244_v44  ;;  %v726_v44 = vld [vmem:[%s10732_s11 + $0xd50] sm:$0xff] }
 0x1ea   : > { %v718_v54 = vld [vmem:[%s10732_s11 + $0xd10] sm:$0xff] }
 0x1eb   : > { %5994 = vmatpush2.bf16.msra.mxu0 %v9115_v55  ;;  %v9459_v55 = vcombine.low %v734_v36, %v738_v37  ;;  %v722_v35 = vld [vmem:[%s10732_s11 + $0xd30] sm:$0xff] }
 0x1ec   : > { %6035 = vmatpush2.bf16.msra.mxu1 %v9243_v58  ;;  %5995 = vmatprep.subr.bf16.mxu0 %v9108_v59  ;;  %v9324_v58 = vcombine.high %v598_v42, %v602_v26  ;;  %v582_v6 = vld [vmem:[%s10732_s11 + $0x8d0] sm:$0xff] }
 0x1ed   : > { %6036 = vmatprep.subr.bf16.mxu1 %v9236_v61  ;;  %v9452_v61 = vcombine.high %v726_v44, %v730_v46  ;;  %v586_v7 = vld [vmem:[%s10732_s11 + $0x8f0] sm:$0xff] }
 0x1ee   : > { %v710_v8 = vld [vmem:[%s10732_s11 + $0xcd0] sm:$0xff] }
 0x1ef   : > { %5996 = vmatpush2.bf16.msra.mxu0 %v9107_v1  ;;  %v9323_v1 = vcombine.low %v598_v42, %v602_v26  ;;  %v714_v9 = vld [vmem:[%s10732_s11 + $0xcf0] sm:$0xff] }
 0x1f0   : > { %6037 = vmatpush2.bf16.msra.mxu1 %v9235_v2  ;;  %5997 = vmatprep.subr.bf16.mxu0 %v9100_v3  ;;  %v9451_v2 = vcombine.low %v726_v44, %v730_v46  ;;  %v574_v17 = vld [vmem:[%s10732_s11 + $0x890] sm:$0xff] }
 0x1f1   : > { %6038 = vmatprep.subr.bf16.mxu1 %v9228_v5  ;;  %v9444_v5 = vcombine.high %v718_v54, %v722_v35  ;;  %v578_v21 = vld [vmem:[%s10732_s11 + $0x8b0] sm:$0xff] }
 0x1f2   : > { %v702_v22 = vld [vmem:[%s10732_s11 + $0xc90] sm:$0xff] }
 0x1f3   : > { %5998 = vmatpush2.bf16.msra.mxu0 %v9099_v11  ;;  %v706_v25 = vld [vmem:[%s10732_s11 + $0xcb0] sm:$0xff] }
 0x1f4   : > { %6039 = vmatpush2.bf16.msra.mxu1 %v9227_v60  ;;  %5999 = vmatprep.subr.bf16.mxu0 %v9092_v15  ;;  %v9443_v60 = vcombine.low %v718_v54, %v722_v35  ;;  %v9308_v15 = vcombine.high %v582_v6, %v586_v7  ;;  %v566_v32 = vld [vmem:[%s10732_s11 + $0x850] sm:$0xff] }
 0x1f5   : > { %6040 = vmatprep.subr.bf16.mxu1 %v9220_v16  ;;  %v9436_v16 = vcombine.high %v710_v8, %v714_v9  ;;  %v570_v33 = vld [vmem:[%s10732_s11 + $0x870] sm:$0xff] }
 0x1f6   : > { %v694_v36 = vld [vmem:[%s10732_s11 + $0xc50] sm:$0xff]  ;;  %v9291_v46 = vcombine.low %v566_v32, %v570_v33 }
 0x1f7   : > { %6000 = vmatpush2.bf16.msra.mxu0 %v9091_v27  ;;  %v9307_v27 = vcombine.low %v582_v6, %v586_v7  ;;  %v698_v37 = vld [vmem:[%s10732_s11 + $0xc70] sm:$0xff] }
 0x1f8   : > { %6041 = vmatpush2.bf16.msra.mxu1 %v9219_v24  ;;  %6051 = vmatprep.subr.bf16.mxu0 %v9340_v28  ;;  %v9435_v24 = vcombine.low %v710_v8, %v714_v9  ;;  %v9300_v28 = vcombine.high %v574_v17, %v578_v21  ;;  %v558_v42 = vld [vmem:[%s10732_s11 + $0x810] sm:$0xff] }
 0x1f9   : > { %6092 = vmatprep.subr.bf16.mxu1 %v9468_v29  ;;  %v9428_v29 = vcombine.high %v702_v22, %v706_v25  ;;  %v562_v26 = vld [vmem:[%s10732_s11 + $0x830] sm:$0xff] }
 0x1fa   : > { %v5757_v43 = vpop.f32.mrf.mxu0  ;;  %6002 = vmatmul.mubr.bf16.vlgmr.msra.gmra.mxu0 %v10835_v23  ;;  %v690_v44 = vld [vmem:[%s10732_s11 + $0xc30] sm:$0xff] }
 0x1fb   : > { %v11368_v50 = vadd.f32 %v5757_v43, %v11330_v13  ;;  %6043 = vmatmul.mubr.bf16.vlgmr.msra.gmra.mxu1 %v10846_v0  ;;  %6052 = vmatpush1.bf16.msra.mxu0 %v9339_v38  ;;  %v594_v13 = vld [vmem:[%s10732_s11 + $0x930] sm:$0xff]  ;;  %v9299_v38 = vcombine.low %v574_v17, %v578_v21 }
 0x1fc   : > { %6093 = vmatpush1.bf16.msra.mxu1 %v9467_v34  ;;  %v5759_v53 = vpop.f32.mrf.mxu0  ;;  %6053 = vmatprep.subr.bf16.mxu0 %v9332_v39  ;;  %v9316_v3 = vcombine.high %v590_v18, %v594_v13  ;;  %v9315_v11 = vcombine.low %v590_v18, %v594_v13  ;;  %v9427_v34 = vcombine.low %v702_v22, %v706_v25  ;;  %v686_v43 = vld [vmem:[%s10732_s11 + $0xc10] sm:$0xff] }
 0x1fd   : > { %v11372_v59 = vadd.f32 %v5759_v53, %v11332_v19  ;;  %6094 = vmatprep.subr.bf16.mxu1 %v9460_v41  ;;  %6083 = vmatprep.mubr.bf16.mxu0 %v10842_v31  ;;  %v9292_v39 = vcombine.high %v566_v32, %v570_v33  ;;  %v9420_v41 = vcombine.high %v694_v36, %v698_v37  ;;  %v806_v18 = vld [vmem:[%s10732_s11 + $0xfd0] sm:$0xff] }
 0x1fe   : > { %v5761_v62 = vpop.f32.mrf.mxu0  ;;  %6124 = vmatprep.mubr.bf16.mxu1 %v10855_v40  ;;  %v9284_v53 = vcombine.high %v558_v42, %v562_v26  ;;  %v810_v13 = vld [vmem:[%s10732_s11 + $0xff0] sm:$0xff]  ;;  %v9411_v54 = vcombine.low %v686_v43, %v690_v44 }
 0x1ff   : > { %6054 = vmatpush1.bf16.msra.mxu0 %v9331_v52  ;;  %v9419_v52 = vcombine.low %v694_v36, %v698_v37  ;;  %v9283_v62 = vcombine.low %v558_v42, %v562_v26  ;;  %v9531_v7 = vcombine.low %v806_v18, %v810_v13  ;;  %v658_v32 = vld [vmem:[%s10732_s11 + $0xb30] sm:$0xff] }
 0x200   : > { %6095 = vmatpush1.bf16.msra.mxu1 %v9459_v55  ;;  %v5762_v19 = vpop.f32.mrf.mxu0  ;;  %6055 = vmatprep.subr.bf16.mxu0 %v9324_v58  ;;  %v9412_v55 = vcombine.high %v686_v43, %v690_v44  ;;  %v678_v58 = vld [vmem:[%s10732_s11 + $0xbd0] sm:$0xff] }
 0x201   : > { %6096 = vmatprep.subr.bf16.mxu1 %v9452_v61  ;;  %v682_v61 = vld [vmem:[%s10732_s11 + $0xbf0] sm:$0xff] }
 0x202   : > { %v9404_v35 = vcombine.high %v678_v58, %v682_v61  ;;  %v670_v19 = vld [vmem:[%s10732_s11 + $0xb90] sm:$0xff]  ;;  %v9403_v6 = vcombine.low %v678_v58, %v682_v61 }
 0x203   : > { %6056 = vmatpush1.bf16.msra.mxu0 %v9323_v1  ;;  %v9532_v1 = vcombine.high %v806_v18, %v810_v13  ;;  %v782_v36 = vld [vmem:[%s10732_s11 + $0xf10] sm:$0xff] }
 0x204   : > { %6097 = vmatpush1.bf16.msra.mxu1 %v9451_v2  ;;  %6057 = vmatprep.subr.bf16.mxu0 %v9316_v3  ;;  %v674_v2 = vld [vmem:[%s10732_s11 + $0xbb0] sm:$0xff] }
 0x205   : > { %6098 = vmatprep.subr.bf16.mxu1 %v9444_v5  ;;  %v798_v3 = vld [vmem:[%s10732_s11 + $0xf90] sm:$0xff]  ;;  %v9396_v8 = vcombine.high %v670_v19, %v674_v2  ;;  %v9395_v21 = vcombine.low %v670_v19, %v674_v2 }
 0x206   : > { %v802_v5 = vld [vmem:[%s10732_s11 + $0xfb0] sm:$0xff] }
 0x207   : > { %6058 = vmatpush1.bf16.msra.mxu0 %v9315_v11  ;;  %v9524_v9 = vcombine.high %v798_v3, %v802_v5  ;;  %v662_v11 = vld [vmem:[%s10732_s11 + $0xb50] sm:$0xff]  ;;  %v9523_v25 = vcombine.low %v798_v3, %v802_v5 }
 0x208   : > { %6099 = vmatpush1.bf16.msra.mxu1 %v9443_v60  ;;  %6059 = vmatprep.subr.bf16.mxu0 %v9308_v15  ;;  %v666_v60 = vld [vmem:[%s10732_s11 + $0xb70] sm:$0xff] }
 0x209   : > { %6100 = vmatprep.subr.bf16.mxu1 %v9436_v16  ;;  %v790_v15 = vld [vmem:[%s10732_s11 + $0xf50] sm:$0xff] }
 0x20a   : > { %v794_v16 = vld [vmem:[%s10732_s11 + $0xf70] sm:$0xff] }
 0x20b   : > { %6060 = vmatpush1.bf16.msra.mxu0 %v9307_v27  ;;  %v9388_v27 = vcombine.high %v662_v11, %v666_v60  ;;  %v786_v37 = vld [vmem:[%s10732_s11 + $0xf30] sm:$0xff] }
 0x20c   : > { %6101 = vmatpush1.bf16.msra.mxu1 %v9435_v24  ;;  %6061 = vmatprep.subr.bf16.mxu0 %v9300_v28  ;;  %v9516_v28 = vcombine.high %v790_v15, %v794_v16  ;;  %v9508_v42 = vcombine.high %v782_v36, %v786_v37  ;;  %v646_v26 = vld [vmem:[%s10732_s11 + $0xad0] sm:$0xff] }
 0x20d   : > { %6102 = vmatprep.subr.bf16.mxu1 %v9428_v29  ;;  %v654_v29 = vld [vmem:[%s10732_s11 + $0xb10] sm:$0xff] }
 0x20e   : > { %v774_v43 = vld [vmem:[%s10732_s11 + $0xed0] sm:$0xff] }
 0x20f   : > { %6062 = vmatpush1.bf16.msra.mxu0 %v9299_v38  ;;  %v9387_v38 = vcombine.low %v662_v11, %v666_v60  ;;  %v778_v44 = vld [vmem:[%s10732_s11 + $0xef0] sm:$0xff] }
 0x210   : > { %6103 = vmatpush1.bf16.msra.mxu1 %v9427_v34  ;;  %6063 = vmatprep.subr.bf16.mxu0 %v9292_v39  ;;  %v9515_v34 = vcombine.low %v790_v15, %v794_v16  ;;  %v9380_v39 = vcombine.high %v654_v29, %v658_v32  ;;  %v638_v58 = vld [vmem:[%s10732_s11 + $0xa90] sm:$0xff] }
 0x211   : > { %6104 = vmatprep.subr.bf16.mxu1 %v9420_v41  ;;  %v642_v61 = vld [vmem:[%s10732_s11 + $0xab0] sm:$0xff] }
 0x212   : > { %v766_v18 = vld [vmem:[%s10732_s11 + $0xe90] sm:$0xff] }
 0x213   : > { %6064 = vmatpush1.bf16.msra.mxu0 %v9291_v46  ;;  %v9379_v46 = vcombine.low %v654_v29, %v658_v32  ;;  %v770_v13 = vld [vmem:[%s10732_s11 + $0xeb0] sm:$0xff] }
 0x214   : > { %6105 = vmatpush1.bf16.msra.mxu1 %v9419_v52  ;;  %6065 = vmatprep.subr.bf16.mxu0 %v9284_v53  ;;  %v9507_v52 = vcombine.low %v782_v36, %v786_v37  ;;  %v630_v19 = vld [vmem:[%s10732_s11 + $0xa50] sm:$0xff] }
 0x215   : > { %6106 = vmatprep.subr.bf16.mxu1 %v9412_v55  ;;  %v9500_v55 = vcombine.high %v774_v43, %v778_v44  ;;  %v634_v2 = vld [vmem:[%s10732_s11 + $0xa70] sm:$0xff] }
 0x216   : > { %v758_v3 = vld [vmem:[%s10732_s11 + $0xe50] sm:$0xff] }
 0x217   : > { %6066 = vmatpush1.bf16.msra.mxu0 %v9283_v62  ;;  %v762_v5 = vld [vmem:[%s10732_s11 + $0xe70] sm:$0xff] }
 0x218   : > { %6107 = vmatpush1.bf16.msra.mxu1 %v9411_v54  ;;  %6067 = vmatprep.subr.bf16.mxu0 %v9404_v35  ;;  %v9499_v54 = vcombine.low %v774_v43, %v778_v44  ;;  %v9364_v35 = vcombine.high %v638_v58, %v642_v61  ;;  %v622_v11 = vld [vmem:[%s10732_s11 + $0xa10] sm:$0xff] }
 0x219   : > { %6108 = vmatprep.subr.bf16.mxu1 %v9532_v1  ;;  %v9492_v1 = vcombine.high %v766_v18, %v770_v13  ;;  %v626_v60 = vld [vmem:[%s10732_s11 + $0xa30] sm:$0xff] }
 0x21a   : > { %v750_v15 = vld [vmem:[%s10732_s11 + $0xe10] sm:$0xff]  ;;  %v9347_v36 = vcombine.low %v622_v11, %v626_v60 }
 0x21b   : > { %v5798_v17 = vpop.f32.mrf.mxu1  ;;  %6068 = vmatpush2.bf16.msra.mxu0 %v9403_v6  ;;  %v9363_v6 = vcombine.low %v638_v58, %v642_v61  ;;  %v754_v16 = vld [vmem:[%s10732_s11 + $0xe30] sm:$0xff] }
 0x21c   : > { %v11409_v22 = vadd.f32 %v5798_v17, %v11368_v50  ;;  %6109 = vmatpush2.bf16.msra.mxu1 %v9531_v7  ;;  %6069 = vmatprep.subr.bf16.mxu0 %v9396_v8  ;;  %v9491_v7 = vcombine.low %v766_v18, %v770_v13  ;;  %v9356_v8 = vcombine.high %v630_v19, %v634_v2  ;;  %v998_v29 = vld [vmem:[%s10732_s11 + $0x15d0] sm:$0xff] }
 0x21d   : > { %v5800_v24 = vpop.f32.mrf.mxu1  ;;  %6110 = vmatprep.subr.bf16.mxu1 %v9524_v9  ;;  %v9484_v9 = vcombine.high %v758_v3, %v762_v5  ;;  %v9355_v17 = vcombine.low %v630_v19, %v634_v2  ;;  %v1002_v32 = vld [vmem:[%s10732_s11 + $0x15f0] sm:$0xff]  ;;  %v9475_v37 = vcombine.low %v750_v15, %v754_v16 }
 0x21e   : > { %v11414_v33 = vadd.f32 %v5800_v24, %v11372_v59  ;;  %v650_v59 = vld [vmem:[%s10732_s11 + $0xaf0] sm:$0xff] }
 0x21f   : > { %v5802_v50 = vpop.f32.mrf.mxu1  ;;  %6070 = vmatpush2.bf16.msra.mxu0 %v9395_v21  ;;  %v9372_v53 = vcombine.high %v646_v26, %v650_v59  ;;  %v9371_v62 = vcombine.low %v646_v26, %v650_v59  ;;  %v9483_v21 = vcombine.low %v758_v3, %v762_v5  ;;  %v870_v24 = vld [vmem:[%s10732_s11 + $0x11d0] sm:$0xff]  ;;  %v9723_v59 = vcombine.low %v998_v29, %v1002_v32 }
 0x220   : > { %6111 = vmatpush2.bf16.msra.mxu1 %v9523_v25  ;;  %6071 = vmatprep.subr.bf16.mxu0 %v9388_v27  ;;  %v9348_v25 = vcombine.high %v622_v11, %v626_v60  ;;  %v9476_v27 = vcombine.high %v750_v15, %v754_v16  ;;  %v986_v58 = vld [vmem:[%s10732_s11 + $0x1570] sm:$0xff] }
 0x221   : > { %v5803_v41 = vpop.f32.mrf.mxu1  ;;  %6112 = vmatprep.subr.bf16.mxu1 %v9516_v28  ;;  %v874_v28 = vld [vmem:[%s10732_s11 + $0x11f0] sm:$0xff] }
 0x222   : > { %v9596_v50 = vcombine.high %v870_v24, %v874_v28  ;;  %v990_v41 = vld [vmem:[%s10732_s11 + $0x1590] sm:$0xff]  ;;  %v9595_v26 = vcombine.low %v870_v24, %v874_v28 }
 0x223   : > { %6072 = vmatpush2.bf16.msra.mxu0 %v9387_v38  ;;  %v9724_v38 = vcombine.high %v998_v29, %v1002_v32  ;;  %v974_v2 = vld [vmem:[%s10732_s11 + $0x1510] sm:$0xff] }
 0x224   : > { %6113 = vmatpush2.bf16.msra.mxu1 %v9515_v34  ;;  %6073 = vmatprep.subr.bf16.mxu0 %v9380_v39  ;;  %v862_v34 = vld [vmem:[%s10732_s11 + $0x1190] sm:$0xff] }
 0x225   : > { %6114 = vmatprep.subr.bf16.mxu1 %v9508_v42  ;;  %v866_v39 = vld [vmem:[%s10732_s11 + $0x11b0] sm:$0xff] }
 0x226   : > { %v994_v42 = vld [vmem:[%s10732_s11 + $0x15b0] sm:$0xff]  ;;  %v9588_v43 = vcombine.high %v862_v34, %v866_v39  ;;  %v9587_v61 = vcombine.low %v862_v34, %v866_v39 }
 0x227   : > { %6074 = vmatpush2.bf16.msra.mxu0 %v9379_v46  ;;  %v9716_v44 = vcombine.high %v990_v41, %v994_v42  ;;  %v854_v46 = vld [vmem:[%s10732_s11 + $0x1150] sm:$0xff]  ;;  %v9715_v13 = vcombine.low %v990_v41, %v994_v42 }
 0x228   : > { %6115 = vmatpush2.bf16.msra.mxu1 %v9507_v52  ;;  %6075 = vmatprep.subr.bf16.mxu0 %v9372_v53  ;;  %v858_v52 = vld [vmem:[%s10732_s11 + $0x1170] sm:$0xff] }
 0x229   : > { %6116 = vmatprep.subr.bf16.mxu1 %v9500_v55  ;;  %v982_v55 = vld [vmem:[%s10732_s11 + $0x1550] sm:$0xff]  ;;  %v9579_v5 = vcombine.low %v854_v46, %v858_v52 }
 0x22a   : > { %v978_v3 = vld [vmem:[%s10732_s11 + $0x1530] sm:$0xff] }
 0x22b   : > { %6076 = vmatpush2.bf16.msra.mxu0 %v9371_v62  ;;  %v9580_v62 = vcombine.high %v854_v46, %v858_v52  ;;  %v838_v11 = vld [vmem:[%s10732_s11 + $0x10d0] sm:$0xff] }
 0x22c   : > { %6117 = vmatpush2.bf16.msra.mxu1 %v9499_v54  ;;  %6077 = vmatprep.subr.bf16.mxu0 %v9364_v35  ;;  %v9708_v54 = vcombine.high %v982_v55, %v986_v58  ;;  %v846_v35 = vld [vmem:[%s10732_s11 + $0x1110] sm:$0xff] }
 0x22d   : > { %6118 = vmatprep.subr.bf16.mxu1 %v9492_v1  ;;  %v850_v1 = vld [vmem:[%s10732_s11 + $0x1130] sm:$0xff] }
 0x22e   : > { %v842_v60 = vld [vmem:[%s10732_s11 + $0x10f0] sm:$0xff] }
 0x22f   : > { %6078 = vmatpush2.bf16.msra.mxu0 %v9363_v6  ;;  %v966_v15 = vld [vmem:[%s10732_s11 + $0x14d0] sm:$0xff] }
 0x230   : > { %6119 = vmatpush2.bf16.msra.mxu1 %v9491_v7  ;;  %6079 = vmatprep.subr.bf16.mxu0 %v9356_v8  ;;  %v9707_v7 = vcombine.low %v982_v55, %v986_v58  ;;  %v9572_v8 = vcombine.high %v846_v35, %v850_v1  ;;  %v970_v16 = vld [vmem:[%s10732_s11 + $0x14f0] sm:$0xff] }
 0x231   : > { %6120 = vmatprep.subr.bf16.mxu1 %v9484_v9  ;;  %v9700_v9 = vcombine.high %v974_v2, %v978_v3  ;;  %v830_v24 = vld [vmem:[%s10732_s11 + $0x1090] sm:$0xff] }
 0x232   : > { %v834_v28 = vld [vmem:[%s10732_s11 + $0x10b0] sm:$0xff] }
 0x233   : > { %6080 = vmatpush2.bf16.msra.mxu0 %v9355_v17  ;;  %v9571_v17 = vcombine.low %v846_v35, %v850_v1  ;;  %v958_v29 = vld [vmem:[%s10732_s11 + $0x1490] sm:$0xff] }
 0x234   : > { %6121 = vmatpush2.bf16.msra.mxu1 %v9483_v21  ;;  %6081 = vmatprep.subr.bf16.mxu0 %v9348_v25  ;;  %v9699_v21 = vcombine.low %v974_v2, %v978_v3  ;;  %v9564_v25 = vcombine.high %v838_v11, %v842_v60  ;;  %v962_v32 = vld [vmem:[%s10732_s11 + $0x14b0] sm:$0xff] }
 0x235   : > { %6122 = vmatprep.subr.bf16.mxu1 %v9476_v27  ;;  %v9692_v27 = vcombine.high %v966_v15, %v970_v16  ;;  %v822_v34 = vld [vmem:[%s10732_s11 + $0x1050] sm:$0xff] }
 0x236   : > { %v826_v39 = vld [vmem:[%s10732_s11 + $0x1070] sm:$0xff] }
 0x237   : > { %6082 = vmatpush2.bf16.msra.mxu0 %v9347_v36  ;;  %v9563_v36 = vcombine.low %v838_v11, %v842_v60  ;;  %v950_v41 = vld [vmem:[%s10732_s11 + $0x1450] sm:$0xff] }
 0x238   : > { %6123 = vmatpush2.bf16.msra.mxu1 %v9475_v37  ;;  %6133 = vmatprep.subr.bf16.mxu0 %v9596_v50  ;;  %v9691_v37 = vcombine.low %v966_v15, %v970_v16  ;;  %v9556_v50 = vcombine.high %v830_v24, %v834_v28  ;;  %v954_v42 = vld [vmem:[%s10732_s11 + $0x1470] sm:$0xff] }
 0x239   : > { %6174 = vmatprep.subr.bf16.mxu1 %v9724_v38  ;;  %v9684_v38 = vcombine.high %v958_v29, %v962_v32  ;;  %v814_v46 = vld [vmem:[%s10732_s11 + $0x1010] sm:$0xff] }
 0x23a   : > { %v11444_v53 = vpop.f32.mrf.mxu0  ;;  %6084 = vmatmul.mubr.bf16.vlgmr.msra.gmra.mxu0 %v10927_v48  ;;  %v818_v52 = vld [vmem:[%s10732_s11 + $0x1030] sm:$0xff] }
 0x23b   : > { %6125 = vmatmul.mubr.bf16.vlgmr.msra.gmra.mxu1 %v10938_v12  ;;  %6134 = vmatpush1.bf16.msra.mxu0 %v9595_v26  ;;  %v9555_v26 = vcombine.low %v830_v24, %v834_v28  ;;  %v942_v55 = vld [vmem:[%s10732_s11 + $0x1410] sm:$0xff]  ;;  %v9539_v3 = vcombine.low %v814_v46, %v818_v52 }
 0x23c   : > { %6175 = vmatpush1.bf16.msra.mxu1 %v9723_v59  ;;  %v11450_v18 = vpop.f32.mrf.mxu0  ;;  %6135 = vmatprep.subr.bf16.mxu0 %v9588_v43  ;;  %v9683_v59 = vcombine.low %v958_v29, %v962_v32  ;;  %v9548_v43 = vcombine.high %v822_v34, %v826_v39  ;;  %v946_v58 = vld [vmem:[%s10732_s11 + $0x1430] sm:$0xff] }
 0x23d   : > { %6176 = vmatprep.subr.bf16.mxu1 %v9716_v44  ;;  %6165 = vmatprep.mubr.bf16.mxu0 %v10934_v57  ;;  %v9676_v44 = vcombine.high %v950_v41, %v954_v42  ;;  %v934_v35 = vld [vmem:[%s10732_s11 + $0x13d0] sm:$0xff] }
 0x23e   : > { %v5843_v19 = vpop.f32.mrf.mxu0  ;;  %6206 = vmatprep.mubr.bf16.mxu1 %v10947_v4  ;;  %v938_v1 = vld [vmem:[%s10732_s11 + $0x13f0] sm:$0xff] }
 0x23f   : > { %6136 = vmatpush1.bf16.msra.mxu0 %v9587_v61  ;;  %v9547_v61 = vcombine.low %v822_v34, %v826_v39  ;;  %v1062_v19 = vld [vmem:[%s10732_s11 + $0x17d0] sm:$0xff]  ;;  %v9659_v15 = vcombine.low %v934_v35, %v938_v1 }
 0x240   : > { %6177 = vmatpush1.bf16.msra.mxu1 %v9715_v13  ;;  %v5844_v6 = vpop.f32.mrf.mxu0  ;;  %6137 = vmatprep.subr.bf16.mxu0 %v9580_v62  ;;  %v9675_v13 = vcombine.low %v950_v41, %v954_v42  ;;  %v9540_v62 = vcombine.high %v814_v46, %v818_v52  ;;  %v1066_v2 = vld [vmem:[%s10732_s11 + $0x17f0] sm:$0xff] }
 0x241   : > { %6178 = vmatprep.subr.bf16.mxu1 %v9708_v54  ;;  %v9668_v54 = vcombine.high %v942_v55, %v946_v58  ;;  %v9660_v6 = vcombine.high %v934_v35, %v938_v1  ;;  %v1054_v11 = vld [vmem:[%s10732_s11 + $0x1790] sm:$0xff]  ;;  %v9787_v16 = vcombine.low %v1062_v19, %v1066_v2 }
 0x242   : > { %v1058_v60 = vld [vmem:[%s10732_s11 + $0x17b0] sm:$0xff] }
 0x243   : > { %6138 = vmatpush1.bf16.msra.mxu0 %v9579_v5  ;;  %v9667_v5 = vcombine.low %v942_v55, %v946_v58  ;;  %v1046_v24 = vld [vmem:[%s10732_s11 + $0x1750] sm:$0xff] }
 0x244   : > { %6179 = vmatpush1.bf16.msra.mxu1 %v9707_v7  ;;  %6139 = vmatprep.subr.bf16.mxu0 %v9572_v8  ;;  %v9788_v7 = vcombine.high %v1062_v19, %v1066_v2  ;;  %v926_v8 = vld [vmem:[%s10732_s11 + $0x1390] sm:$0xff] }
 0x245   : > { %6180 = vmatprep.subr.bf16.mxu1 %v9700_v9  ;;  %v930_v9 = vld [vmem:[%s10732_s11 + $0x13b0] sm:$0xff] }
 0x246   : > { %v1050_v28 = vld [vmem:[%s10732_s11 + $0x1770] sm:$0xff]  ;;  %v9651_v32 = vcombine.low %v926_v8, %v930_v9 }
 0x247   : > { %6140 = vmatpush1.bf16.msra.mxu0 %v9571_v17  ;;  %v9652_v17 = vcombine.high %v926_v8, %v930_v9  ;;  %v910_v34 = vld [vmem:[%s10732_s11 + $0x1310] sm:$0xff] }
 0x248   : > { %6181 = vmatpush1.bf16.msra.mxu1 %v9699_v21  ;;  %6141 = vmatprep.subr.bf16.mxu0 %v9564_v25  ;;  %v9780_v21 = vcombine.high %v1054_v11, %v1058_v60  ;;  %v918_v25 = vld [vmem:[%s10732_s11 + $0x1350] sm:$0xff] }
 0x249   : > { %6182 = vmatprep.subr.bf16.mxu1 %v9692_v27  ;;  %v922_v27 = vld [vmem:[%s10732_s11 + $0x1370] sm:$0xff] }
 0x24a   : > { %v914_v39 = vld [vmem:[%s10732_s11 + $0x1330] sm:$0xff] }
 0x24b   : > { %6142 = vmatpush1.bf16.msra.mxu0 %v9563_v36  ;;  %v9779_v36 = vcombine.low %v1054_v11, %v1058_v60  ;;  %v1038_v41 = vld [vmem:[%s10732_s11 + $0x1710] sm:$0xff] }
 0x24c   : > { %6183 = vmatpush1.bf16.msra.mxu1 %v9691_v37  ;;  %6143 = vmatprep.subr.bf16.mxu0 %v9556_v50  ;;  %v9644_v37 = vcombine.high %v918_v25, %v922_v27  ;;  %v1042_v42 = vld [vmem:[%s10732_s11 + $0x1730] sm:$0xff] }
 0x24d   : > { %6184 = vmatprep.subr.bf16.mxu1 %v9684_v38  ;;  %v9772_v38 = vcombine.high %v1046_v24, %v1050_v28  ;;  %v9764_v52 = vcombine.high %v1038_v41, %v1042_v42  ;;  %v902_v55 = vld [vmem:[%s10732_s11 + $0x12d0] sm:$0xff] }
 0x24e   : > { %v906_v58 = vld [vmem:[%s10732_s11 + $0x12f0] sm:$0xff] }
 0x24f   : > { %6144 = vmatpush1.bf16.msra.mxu0 %v9555_v26  ;;  %v9628_v35 = vcombine.high %v902_v55, %v906_v58  ;;  %v894_v19 = vld [vmem:[%s10732_s11 + $0x1290] sm:$0xff] }
 0x250   : > { %6185 = vmatpush1.bf16.msra.mxu1 %v9683_v59  ;;  %6145 = vmatprep.subr.bf16.mxu0 %v9548_v43  ;;  %v9643_v59 = vcombine.low %v918_v25, %v922_v27  ;;  %v9771_v43 = vcombine.low %v1046_v24, %v1050_v28  ;;  %v898_v2 = vld [vmem:[%s10732_s11 + $0x12b0] sm:$0xff] }
 0x251   : > { %6186 = vmatprep.subr.bf16.mxu1 %v9676_v44  ;;  %v9636_v44 = vcombine.high %v910_v34, %v914_v39  ;;  %v9620_v8 = vcombine.high %v894_v19, %v898_v2  ;;  %v886_v11 = vld [vmem:[%s10732_s11 + $0x1250] sm:$0xff] }
 0x252   : > { %v890_v60 = vld [vmem:[%s10732_s11 + $0x1270] sm:$0xff] }
 0x253   : > { %6146 = vmatpush1.bf16.msra.mxu0 %v9547_v61  ;;  %v1030_v61 = vld [vmem:[%s10732_s11 + $0x16d0] sm:$0xff]  ;;  %v9612_v25 = vcombine.high %v886_v11, %v890_v60 }
 0x254   : > { %6187 = vmatpush1.bf16.msra.mxu1 %v9675_v13  ;;  %6147 = vmatprep.subr.bf16.mxu0 %v9540_v62  ;;  %v1034_v13 = vld [vmem:[%s10732_s11 + $0x16f0] sm:$0xff]  ;;  %v9635_v62 = vcombine.low %v910_v34, %v914_v39 }
 0x255   : > { %6188 = vmatprep.subr.bf16.mxu1 %v9668_v54  ;;  %v9763_v54 = vcombine.low %v1038_v41, %v1042_v42  ;;  %v9756_v1 = vcombine.high %v1030_v61, %v1034_v13  ;;  %v878_v24 = vld [vmem:[%s10732_s11 + $0x1210] sm:$0xff] }
 0x256   : > { %v882_v28 = vld [vmem:[%s10732_s11 + $0x1230] sm:$0xff] }
 0x257   : > { %6148 = vmatpush1.bf16.msra.mxu0 %v9539_v3  ;;  %v1022_v3 = vld [vmem:[%s10732_s11 + $0x1690] sm:$0xff]  ;;  %v9604_v34 = vcombine.high %v878_v24, %v882_v28 }
 0x258   : > { %6189 = vmatpush1.bf16.msra.mxu1 %v9667_v5  ;;  %6149 = vmatprep.subr.bf16.mxu0 %v9660_v6  ;;  %v1026_v5 = vld [vmem:[%s10732_s11 + $0x16b0] sm:$0xff]  ;;  %v9627_v6 = vcombine.low %v902_v55, %v906_v58 }
 0x259   : > { %6190 = vmatprep.subr.bf16.mxu1 %v9788_v7  ;;  %v9755_v7 = vcombine.low %v1030_v61, %v1034_v13  ;;  %v9748_v9 = vcombine.high %v1022_v3, %v1026_v5  ;;  %v1126_v41 = vld [vmem:[%s10732_s11 + $0x19d0] sm:$0xff]  ;;  %v351_v61 = vld [vmem:[%s10732_s11 + $0x198] sm:$0xff] }
 0x25a   : > { %v1130_v42 = vld [vmem:[%s10732_s11 + $0x19f0] sm:$0xff]  ;;  %v355_v13 = vld [vmem:[%s10732_s11 + $0x1b8] sm:$0xff] }
 0x25b   : > { %v11486_v29 = vpop.f32.mrf.mxu1  ;;  %6150 = vmatpush2.bf16.msra.mxu0 %v9659_v15  ;;  %v1014_v15 = vld [vmem:[%s10732_s11 + $0x1650] sm:$0xff] }
 0x25c   : > { %6191 = vmatpush2.bf16.msra.mxu1 %v9787_v16  ;;  %6151 = vmatprep.subr.bf16.mxu0 %v9652_v17  ;;  %v1018_v16 = vld [vmem:[%s10732_s11 + $0x1670] sm:$0xff]  ;;  %v9619_v17 = vcombine.low %v894_v19, %v898_v2 }
 0x25d   : > { %v11488_v50 = vpop.f32.mrf.mxu1  ;;  %6192 = vmatprep.subr.bf16.mxu1 %v9780_v21  ;;  %v9747_v21 = vcombine.low %v1022_v3, %v1026_v5  ;;  %v9740_v27 = vcombine.high %v1014_v15, %v1018_v16  ;;  %v1118_v55 = vld [vmem:[%s10732_s11 + $0x1990] sm:$0xff]  ;;  %v5842_v3 = vadd.f32 %v11450_v18, %v11414_v33 }
 0x25e   : > { %v1122_v58 = vld [vmem:[%s10732_s11 + $0x19b0] sm:$0xff] }
 0x25f   : > { %v5884_v26 = vpop.f32.mrf.mxu1  ;;  %6152 = vmatpush2.bf16.msra.mxu0 %v9651_v32  ;;  %v1006_v32 = vld [vmem:[%s10732_s11 + $0x1610] sm:$0xff]  ;;  %v9844_v2 = vcombine.high %v1118_v55, %v1122_v58  ;;  %v9843_v33 = vcombine.low %v1118_v55, %v1122_v58  ;;  %v327_v55 = vld [vmem:[%s10732_s11 + $0xd8] sm:$0xff] }
 0x260   : > { %6193 = vmatpush2.bf16.msra.mxu1 %v9779_v36  ;;  %6153 = vmatprep.subr.bf16.mxu0 %v9644_v37  ;;  %v1010_v36 = vld [vmem:[%s10732_s11 + $0x1630] sm:$0xff]  ;;  %v9611_v37 = vcombine.low %v886_v11, %v890_v60  ;;  %v359_v26 = vld [vmem:[%s10732_s11 + $0x1d8] sm:$0xff]  ;;  %v5883_v60 = vadd.f32 %v11488_v50, %v5842_v3 }
 0x261   : > { %v5885_v46 = vpop.f32.mrf.mxu1  ;;  %6194 = vmatprep.subr.bf16.mxu1 %v9772_v38  ;;  %v9739_v38 = vcombine.low %v1014_v15, %v1018_v16  ;;  %v9732_v39 = vcombine.high %v1006_v32, %v1010_v36  ;;  %v1106_v50 = vld [vmem:[%s10732_s11 + $0x1930] sm:$0xff]  ;;  %v331_v58 = vld [vmem:[%s10732_s11 + $0xf8] sm:$0xff] }
 0x262   : > { %v9852_v46 = vcombine.high %v1126_v41, %v1130_v42  ;;  %v1086_v3 = vld [vmem:[%s10732_s11 + $0x1890] sm:$0xff] }
 0x263   : > { %6154 = vmatpush2.bf16.msra.mxu0 %v9643_v59  ;;  %v363_v59 = vld [vmem:[%s10732_s11 + $0x1f8] sm:$0xff] }
 0x264   : > { %6195 = vmatpush2.bf16.msra.mxu1 %v9771_v43  ;;  %6155 = vmatprep.subr.bf16.mxu0 %v9636_v44  ;;  %v9603_v43 = vcombine.low %v878_v24, %v882_v28  ;;  %v9731_v44 = vcombine.low %v1006_v32, %v1010_v36  ;;  %v9085_v19 = vcombine.low %v359_v26, %v363_v59  ;;  %v1102_v24 = vld [vmem:[%s10732_s11 + $0x1910] sm:$0xff]  ;;  %v335_v32 = vld [vmem:[%s10732_s11 + $0x118] sm:$0xff] }
 0x265   : > { %6196 = vmatprep.subr.bf16.mxu1 %v9764_v52  ;;  %v9086_v52 = vcombine.high %v359_v26, %v363_v59  ;;  %v339_v36 = vld [vmem:[%s10732_s11 + $0x138] sm:$0xff]  ;;  %v9828_v59 = vcombine.high %v1102_v24, %v1106_v50 }
 0x267   : > { %6156 = vmatpush2.bf16.msra.mxu0 %v9635_v62  ;;  %v10670_v62 = vmov 1983009808  }
 0x268   : > { %6197 = vmatpush2.bf16.msra.mxu1 %v9763_v54  ;;  %6157 = vmatprep.subr.bf16.mxu0 %v9628_v35  ;;  %v6554_v54 = vunpack.c.l.s4 %v10670_v62  ;;  %v5840_v35 = vadd.f32 %v11444_v53, %v11409_v22  ;;  %v343_v22 = vld [vmem:[%s10732_s11 + $0x158] sm:$0xff]  ;;  %v9827_v62 = vcombine.low %v1102_v24, %v1106_v50 }
 0x269   : > { %6198 = vmatprep.subr.bf16.mxu1 %v9756_v1  ;;  %v9851_v1 = vcombine.low %v1126_v41, %v1130_v42  ;;  %v347_v53 = vld [vmem:[%s10732_s11 + $0x178] sm:$0xff] }
 0x26a   : > { %v5881_v5 = vadd.f32 %v11486_v29, %v5840_v35  ;;  %v6555_v11 = vunpack.c.0.s8 %v6554_v54  ;;  %v9077_v29 = vcombine.low %v351_v61, %v355_v13  ;;  %v9069_v26 = vcombine.low %v343_v22, %v347_v53  ;;  %v296_v54 = vld [vmem:[#allocation2] sm:$0xff] }
 0x26b   : > { %6158 = vmatpush2.bf16.msra.mxu0 %v9627_v6  ;;  %v9078_v6 = vcombine.high %v351_v61, %v355_v13  ;;  %v9061_v35 = vcombine.low %v335_v32, %v339_v36 }
 0x26c   : > { %6199 = vmatpush2.bf16.msra.mxu1 %v9755_v7  ;;  %6159 = vmatprep.subr.bf16.mxu0 %v9620_v8  ;;  %v1110_v7 = vld [vmem:[%s10732_s11 + $0x1950] sm:$0xff] }
 0x26d   : > { %6200 = vmatprep.subr.bf16.mxu1 %v9748_v9  ;;  %v1114_v8 = vld [vmem:[%s10732_s11 + $0x1970] sm:$0xff] }
 0x26e   : > { %v9835_v41 = vcombine.low %v1110_v7, %v1114_v8 }
 0x26f   : > { %6160 = vmatpush2.bf16.msra.mxu0 %v9619_v17  ;;  %v9836_v17 = vcombine.high %v1110_v7, %v1114_v8  ;;  %v9053_v7 = vcombine.low %v327_v55, %v331_v58 }
 0x270   : > { %6201 = vmatpush2.bf16.msra.mxu1 %v9747_v21  ;;  %6161 = vmatprep.subr.bf16.mxu0 %v9612_v25 }
 0x271   : > { %6202 = vmatprep.subr.bf16.mxu1 %v9740_v27  ;;  %v9070_v27 = vcombine.high %v343_v22, %v347_v53  ;;  %v1078_v22 = vld [vmem:[%s10732_s11 + $0x1850] sm:$0xff] }
 0x272   : > { %v1082_v53 = vld [vmem:[%s10732_s11 + $0x1870] sm:$0xff] }
 0x273   : > { %6162 = vmatpush2.bf16.msra.mxu0 %v9611_v37  ;;  %v11537_v37 = vsub.s32 %v6555_v11, %v10757_v45  ;;  %v311_v11 = vld [vmem:[%s10732_s11 + $0x58] sm:$0xff] }
 0x274   : > { %6203 = vmatpush2.bf16.msra.mxu1 %v9739_v38  ;;  %6163 = vmatprep.subr.bf16.mxu0 %v9604_v34 }
 0x275   : > { %6204 = vmatprep.subr.bf16.mxu1 %v9732_v39  ;;  %v6559_v61 = vrot.slane %v6551_v63, %v11537_v37 }
 0x277   : > { %6164 = vmatpush2.bf16.msra.mxu0 %v9603_v43 }
 0x278   : > { %6205 = vmatpush2.bf16.msra.mxu1 %v9731_v44  ;;  %6215 = vmatprep.subr.bf16.mxu0 %v9852_v46  ;;  %v1094_v46 = vld [vmem:[%s10732_s11 + $0x18d0] sm:$0xff] }
 0x279   : > { %6256 = vmatprep.subr.bf16.mxu1 %v9086_v52  ;;  %v1098_v52 = vld [vmem:[%s10732_s11 + $0x18f0] sm:$0xff] }
 0x27a   : > { %v5921_v9 = vpop.f32.mrf.mxu0  ;;  %6166 = vmatmul.mubr.bf16.vlgmr.msra.gmra.mxu0 %v11010_v20 }
 0x27b   : > { %v5922_v15 = vadd.f32 %v5921_v9, %v5881_v5  ;;  %v5962_v16 = vpop.f32.mrf.mxu1  ;;  %6207 = vmatmul.mubr.bf16.vlgmr.msra.gmra.mxu1 %v11018_v30  ;;  %6216 = vmatpush1.bf16.msra.mxu0 %v9851_v1  ;;  %v9820_v1 = vcombine.high %v1094_v46, %v1098_v52  ;;  %v1090_v5 = vld [vmem:[%s10732_s11 + $0x18b0] sm:$0xff]  ;;  %v9046_v9 = vcombine.high %v319_v47, %v323_v56 }
 0x27c   : > { %6257 = vmatpush1.bf16.msra.mxu1 %v9085_v19  ;;  %v5923_v18 = vpop.f32.mrf.mxu0  ;;  %6217 = vmatprep.subr.bf16.mxu0 %v9844_v2  ;;  %v9054_v2 = vcombine.high %v327_v55, %v331_v58  ;;  %v9812_v8 = vcombine.high %v1086_v3, %v1090_v5 }
 0x27d   : > { %v5924_v21 = vadd.f32 %v5923_v18, %v5883_v60  ;;  %v5964_v25 = vpop.f32.mrf.mxu1  ;;  %6258 = vmatprep.subr.bf16.mxu1 %v9078_v6  ;;  %6247 = vmatprep.mubr.bf16.mxu0 %v10669_v49  ;;  %v5963_v38 = vadd.f32 %v5962_v16, %v5922_v15  ;;  %v9819_v6 = vcombine.low %v1094_v46, %v1098_v52  ;;  %v315_v60 = vld [vmem:[%s10732_s11 + $0x78] sm:$0xff] }
 0x27e   : > { %v5925_v28 = vpop.f32.mrf.mxu0  ;;  %6288 = vmatprep.mubr.bf16.mxu1 %v10784_v10  ;;  %v9062_v10 = vcombine.high %v335_v32, %v339_v36  ;;  %v9811_v15 = vcombine.low %v1086_v3, %v1090_v5  ;;  %v9045_v16 = vcombine.low %v319_v47, %v323_v56  ;;  %v9038_v18 = vcombine.high %v311_v11, %v315_v60  ;;  %v487_v32 = vld [vmem:[%s10732_s11 + $0x5d8] sm:$0xff] }
 0x27f   : > { %v5965_v34 = vadd.f32 %v5964_v25, %v5924_v21  ;;  %v5966_v39 = vpop.f32.mrf.mxu1  ;;  %6218 = vmatpush1.bf16.msra.mxu0 %v9843_v33  ;;  %v9804_v33 = vcombine.high %v1078_v22, %v1082_v53  ;;  %v303_v21 = vld [vmem:[%s10732_s11 + $0x18] sm:$0xff]  ;;  %v9037_v24 = vcombine.low %v311_v11, %v315_v60 }
 0x280   : > { %6259 = vmatpush1.bf16.msra.mxu1 %v9077_v29  ;;  %v5926_v42 = vpop.f32.mrf.mxu0  ;;  %6219 = vmatprep.subr.bf16.mxu0 %v9836_v17  ;;  %v1070_v29 = vld [vmem:[%s10732_s11 + $0x1810] sm:$0xff]  ;;  %v307_v25 = vld [vmem:[%s10732_s11 + $0x38] sm:$0xff] }
 0x281   : > { %v6552_v43 = vcombine.low %v5963_v38, %v5965_v34  ;;  %v5967_v44 = vpop.f32.mrf.mxu1  ;;  %6260 = vmatprep.subr.bf16.mxu1 %v9070_v27  ;;  %v1074_v17 = vld [vmem:[%s10732_s11 + $0x1830] sm:$0xff]  ;;  %v9803_v27 = vcombine.low %v1078_v22, %v1082_v53  ;;  %v9030_v28 = vcombine.high %v303_v21, %v307_v25  ;;  %v491_v36 = vld [vmem:[%s10732_s11 + $0x5f8] sm:$0xff] }
 0x282   : > { %v9796_v50 = vcombine.high %v1070_v29, %v1074_v17  ;;  %v423_v38 = vld [vmem:[%s10732_s11 + $0x3d8] sm:$0xff]  ;;  %v9795_v39 = vcombine.low %v1070_v29, %v1074_v17  ;;  %v9214_v42 = vcombine.high %v487_v32, %v491_v36  ;;  %v9213_v46 = vcombine.low %v487_v32, %v491_v36 }
 0x283   : > { %v6566_v13 = vrot.slane %v6552_v43, %v11537_v37  ;;  %6220 = vmatpush1.bf16.msra.mxu0 %v9835_v41  ;;  %v427_v34 = vld [vmem:[%s10732_s11 + $0x3f8] sm:$0xff]  ;;  %v9029_v41 = vcombine.low %v303_v21, %v307_v25 }
 0x284   : > { %6261 = vmatpush1.bf16.msra.mxu1 %v9069_v26  ;;  %6221 = vmatprep.subr.bf16.mxu0 %v9828_v59  ;;  %v9150_v26 = vcombine.high %v423_v38, %v427_v34  ;;  %v479_v59 = vld [vmem:[%s10732_s11 + $0x598] sm:$0xff]  ;;  %v9149_v52 = vcombine.low %v423_v38, %v427_v34 }
 0x285   : > { %v6567_v19 = vcombine.low %v6559_v61, %v6566_v13  ;;  %6262 = vmatprep.subr.bf16.mxu1 %v9062_v10  ;;  %v483_v43 = vld [vmem:[%s10732_s11 + $0x5b8] sm:$0xff] }
 0x286   : > { %v415_v44 = vld [vmem:[%s10732_s11 + $0x398] sm:$0xff]  ;;  %v9206_v55 = vcombine.high %v479_v59, %v483_v43 }
 0x287   : > { %v6587_v63 = vadd.f32 %v6567_v19, %v296_v54  ;;  %6222 = vmatpush1.bf16.msra.mxu0 %v9827_v62  ;;  %v419_v10 = vld [vmem:[%s10732_s11 + $0x3b8] sm:$0xff] }
 0x288   : > { %6263 = vmatpush1.bf16.msra.mxu1 %v9061_v35  ;;  %6223 = vmatprep.subr.bf16.mxu0 %v9820_v1  ;;  %v9142_v58 = vcombine.high %v415_v44, %v419_v10  ;;  %v471_v61 = vld [vmem:[%s10732_s11 + $0x558] sm:$0xff]  ;;  %v9205_v35 = vcombine.low %v479_v59, %v483_v43  ;;  %v9141_v1 = vcombine.low %v415_v44, %v419_v10 }
 0x289   : > { %6589 = vst [vmem:[#allocation2] sm:$0xff] %v6587_v63  ;;  %6264 = vmatprep.subr.bf16.mxu1 %v9054_v2  ;;  %v475_v13 = vld [vmem:[%s10732_s11 + $0x578] sm:$0xff] }
 0x28a   : > { %v407_v62 = vld [vmem:[%s10732_s11 + $0x358] sm:$0xff]  ;;  %v9198_v19 = vcombine.high %v471_v61, %v475_v13  ;;  %v9197_v63 = vcombine.low %v471_v61, %v475_v13 }
 0x28b   : > { %6224 = vmatpush1.bf16.msra.mxu0 %v9819_v6  ;;  %v411_v54 = vld [vmem:[%s10732_s11 + $0x378] sm:$0xff] }
 0x28c   : > { %6265 = vmatpush1.bf16.msra.mxu1 %v9053_v7  ;;  %6225 = vmatprep.subr.bf16.mxu0 %v9812_v8  ;;  %v9134_v2 = vcombine.high %v407_v62, %v411_v54  ;;  %v463_v3 = vld [vmem:[%s10732_s11 + $0x518] sm:$0xff]  ;;  %v9133_v6 = vcombine.low %v407_v62, %v411_v54 }
 0x28d   : > { %6266 = vmatprep.subr.bf16.mxu1 %v9046_v9  ;;  %v467_v5 = vld [vmem:[%s10732_s11 + $0x538] sm:$0xff] }
 0x28e   : > { %v399_v47 = vld [vmem:[%s10732_s11 + $0x318] sm:$0xff]  ;;  %v9189_v11 = vcombine.low %v463_v3, %v467_v5 }
 0x28f   : > { %6226 = vmatpush1.bf16.msra.mxu0 %v9811_v15  ;;  %v403_v56 = vld [vmem:[%s10732_s11 + $0x338] sm:$0xff] }
 0x290   : > { %6267 = vmatpush1.bf16.msra.mxu1 %v9045_v16  ;;  %6227 = vmatprep.subr.bf16.mxu0 %v9804_v33  ;;  %v9126_v7 = vcombine.high %v399_v47, %v403_v56  ;;  %v455_v8 = vld [vmem:[%s10732_s11 + $0x4d8] sm:$0xff]  ;;  %v9125_v60 = vcombine.low %v399_v47, %v403_v56 }
 0x291   : > { %6268 = vmatprep.subr.bf16.mxu1 %v9038_v18  ;;  %v459_v9 = vld [vmem:[%s10732_s11 + $0x4f8] sm:$0xff] }
 0x292   : > { %v391_v22 = vld [vmem:[%s10732_s11 + $0x2d8] sm:$0xff]  ;;  %v9182_v15 = vcombine.high %v455_v8, %v459_v9  ;;  %v9181_v21 = vcombine.low %v455_v8, %v459_v9 }
 0x293   : > { %6228 = vmatpush1.bf16.msra.mxu0 %v9803_v27  ;;  %v395_v53 = vld [vmem:[%s10732_s11 + $0x2f8] sm:$0xff] }
 0x294   : > { %6269 = vmatpush1.bf16.msra.mxu1 %v9037_v24  ;;  %6229 = vmatprep.subr.bf16.mxu0 %v9796_v50  ;;  %v9118_v16 = vcombine.high %v391_v22, %v395_v53  ;;  %v447_v33 = vld [vmem:[%s10732_s11 + $0x498] sm:$0xff]  ;;  %v9117_v25 = vcombine.low %v391_v22, %v395_v53 }
 0x295   : > { %6270 = vmatprep.subr.bf16.mxu1 %v9030_v28  ;;  %v451_v18 = vld [vmem:[%s10732_s11 + $0x4b8] sm:$0xff] }
 0x296   : > { %v383_v29 = vld [vmem:[%s10732_s11 + $0x298] sm:$0xff]  ;;  %v9174_v27 = vcombine.high %v447_v33, %v451_v18  ;;  %v9173_v38 = vcombine.low %v447_v33, %v451_v18 }
 0x297   : > { %6230 = vmatpush1.bf16.msra.mxu0 %v9795_v39  ;;  %v387_v17 = vld [vmem:[%s10732_s11 + $0x2b8] sm:$0xff] }
 0x298   : > { %6271 = vmatpush1.bf16.msra.mxu1 %v9029_v41  ;;  %6297 = vmatprep.subr.bf16.mxu0 %v9214_v42  ;;  %v9110_v24 = vcombine.high %v383_v29, %v387_v17  ;;  %v439_v50 = vld [vmem:[%s10732_s11 + $0x458] sm:$0xff]  ;;  %v9109_v34 = vcombine.low %v383_v29, %v387_v17 }
 0x299   : > { %6272 = vmatprep.subr.bf16.mxu1 %v9150_v26  ;;  %v443_v28 = vld [vmem:[%s10732_s11 + $0x478] sm:$0xff] }
 0x29a   : > { %6248 = vmatmul.mubr.bf16.vlgmr.msra.gmra.mxu0 %v11058_v51  ;;  %v375_v32 = vld [vmem:[%s10732_s11 + $0x258] sm:$0xff]  ;;  %v9166_v39 = vcombine.high %v439_v50, %v443_v28  ;;  %v9165_v44 = vcombine.low %v439_v50, %v443_v28 }
 0x29b   : > { %6298 = vmatpush1.bf16.msra.mxu0 %v9213_v46  ;;  %6329 = vmatprep.mubr.bf16.mxu0 %v10791_v14  ;;  %v9190_v14 = vcombine.high %v463_v3, %v467_v5  ;;  %v379_v36 = vld [vmem:[%s10732_s11 + $0x278] sm:$0xff] }
 0x29c   : > { %6273 = vmatpush2.bf16.msra.mxu1 %v9149_v52  ;;  %6299 = vmatprep.subr.bf16.mxu0 %v9206_v55  ;;  %v9102_v41 = vcombine.high %v375_v32, %v379_v36  ;;  %v431_v42 = vld [vmem:[%s10732_s11 + $0x418] sm:$0xff]  ;;  %v9101_v10 = vcombine.low %v375_v32, %v379_v36 }
 0x29d   : > { %6274 = vmatprep.subr.bf16.mxu1 %v9142_v58  ;;  %v435_v26 = vld [vmem:[%s10732_s11 + $0x438] sm:$0xff] }
 0x29e   : > { %v367_v59 = vld [vmem:[%s10732_s11 + $0x218] sm:$0xff]  ;;  %v9158_v46 = vcombine.high %v431_v42, %v435_v26  ;;  %v9157_v62 = vcombine.low %v431_v42, %v435_v26 }
 0x29f   : > { %6300 = vmatpush1.bf16.msra.mxu0 %v9205_v35  ;;  %v371_v43 = vld [vmem:[%s10732_s11 + $0x238] sm:$0xff] }
 0x2a0   : > { %6275 = vmatpush2.bf16.msra.mxu1 %v9141_v1  ;;  %6301 = vmatprep.subr.bf16.mxu0 %v9198_v19  ;;  %v9094_v52 = vcombine.high %v367_v59, %v371_v43  ;;  %v551_v55 = vld [vmem:[%s10732_s11 + $0x7d8] sm:$0xff]  ;;  %v9093_v54 = vcombine.low %v367_v59, %v371_v43 }
 0x2a1   : > { %6276 = vmatprep.subr.bf16.mxu1 %v9134_v2  ;;  %v555_v58 = vld [vmem:[%s10732_s11 + $0x7f8] sm:$0xff] }
 0x2a2   : > { %v615_v61 = vld [vmem:[%s10732_s11 + $0x9d8] sm:$0xff]  ;;  %v9278_v35 = vcombine.high %v551_v55, %v555_v58  ;;  %v9277_v47 = vcombine.low %v551_v55, %v555_v58 }
 0x2a3   : > { %6302 = vmatpush1.bf16.msra.mxu0 %v9197_v63  ;;  %v619_v13 = vld [vmem:[%s10732_s11 + $0x9f8] sm:$0xff] }
 0x2a4   : > { %6277 = vmatpush2.bf16.msra.mxu1 %v9133_v6  ;;  %6303 = vmatprep.subr.bf16.mxu0 %v9190_v14  ;;  %v9342_v1 = vcombine.high %v615_v61, %v619_v13  ;;  %v543_v19 = vld [vmem:[%s10732_s11 + $0x798] sm:$0xff]  ;;  %v9341_v56 = vcombine.low %v615_v61, %v619_v13 }
 0x2a5   : > { %6278 = vmatprep.subr.bf16.mxu1 %v9126_v7  ;;  %v547_v2 = vld [vmem:[%s10732_s11 + $0x7b8] sm:$0xff] }
 0x2a6   : > { %v607_v3 = vld [vmem:[%s10732_s11 + $0x998] sm:$0xff]  ;;  %v9270_v63 = vcombine.high %v543_v19, %v547_v2 }
 0x2a7   : > { %6304 = vmatpush1.bf16.msra.mxu0 %v9189_v11  ;;  %v611_v5 = vld [vmem:[%s10732_s11 + $0x9b8] sm:$0xff]  ;;  %v9269_v11 = vcombine.low %v543_v19, %v547_v2 }
 0x2a8   : > { %6279 = vmatpush2.bf16.msra.mxu1 %v9125_v60  ;;  %6305 = vmatprep.subr.bf16.mxu0 %v9182_v15  ;;  %v9334_v6 = vcombine.high %v607_v3, %v611_v5  ;;  %v535_v14 = vld [vmem:[%s10732_s11 + $0x758] sm:$0xff] }
 0x2a9   : > { %6280 = vmatprep.subr.bf16.mxu1 %v9118_v16  ;;  %v539_v7 = vld [vmem:[%s10732_s11 + $0x778] sm:$0xff]  ;;  %v9333_v16 = vcombine.low %v607_v3, %v611_v5 }
 0x2aa   : > { %v599_v9 = vld [vmem:[%s10732_s11 + $0x958] sm:$0xff]  ;;  %v9262_v33 = vcombine.high %v535_v14, %v539_v7  ;;  %v9261_v28 = vcombine.low %v535_v14, %v539_v7 }
 0x2ab   : > { %6306 = vmatpush1.bf16.msra.mxu0 %v9181_v21  ;;  %v603_v22 = vld [vmem:[%s10732_s11 + $0x978] sm:$0xff] }
 0x2ac   : > { %6281 = vmatpush2.bf16.msra.mxu1 %v9117_v25  ;;  %6307 = vmatprep.subr.bf16.mxu0 %v9174_v27  ;;  %v9326_v29 = vcombine.high %v599_v9, %v603_v22  ;;  %v527_v17 = vld [vmem:[%s10732_s11 + $0x718] sm:$0xff]  ;;  %v9325_v36 = vcombine.low %v599_v9, %v603_v22 }
 0x2ad   : > { %6282 = vmatprep.subr.bf16.mxu1 %v9110_v24  ;;  %v531_v21 = vld [vmem:[%s10732_s11 + $0x738] sm:$0xff] }
 0x2ae   : > { %v591_v27 = vld [vmem:[%s10732_s11 + $0x918] sm:$0xff]  ;;  %v9253_v59 = vcombine.low %v527_v17, %v531_v21 }
 0x2af   : > { %6308 = vmatpush1.bf16.msra.mxu0 %v9173_v38  ;;  %v595_v24 = vld [vmem:[%s10732_s11 + $0x938] sm:$0xff]  ;;  %v9254_v38 = vcombine.high %v527_v17, %v531_v21 }
 0x2b0   : > { %6283 = vmatpush2.bf16.msra.mxu1 %v9109_v34  ;;  %6309 = vmatprep.subr.bf16.mxu0 %v9166_v39  ;;  %v519_v39 = vld [vmem:[%s10732_s11 + $0x6d8] sm:$0xff]  ;;  %v9317_v43 = vcombine.low %v591_v27, %v595_v24 }
 0x2b1   : > { %6284 = vmatprep.subr.bf16.mxu1 %v9102_v41  ;;  %v523_v41 = vld [vmem:[%s10732_s11 + $0x6f8] sm:$0xff] }
 0x2b2   : > { %v583_v42 = vld [vmem:[%s10732_s11 + $0x8d8] sm:$0xff]  ;;  %v9245_v61 = vcombine.low %v519_v39, %v523_v41 }
 0x2b3   : > { %6310 = vmatpush1.bf16.msra.mxu0 %v9165_v44  ;;  %v587_v26 = vld [vmem:[%s10732_s11 + $0x8f8] sm:$0xff]  ;;  %v9246_v44 = vcombine.high %v519_v39, %v523_v41 }
 0x2b4   : > { %6285 = vmatpush2.bf16.msra.mxu1 %v9101_v10  ;;  %6311 = vmatprep.subr.bf16.mxu0 %v9158_v46  ;;  %v9310_v10 = vcombine.high %v583_v42, %v587_v26  ;;  %v511_v46 = vld [vmem:[%s10732_s11 + $0x698] sm:$0xff]  ;;  %v9309_v13 = vcombine.low %v583_v42, %v587_v26 }
 0x2b5   : > { %6286 = vmatprep.subr.bf16.mxu1 %v9094_v52  ;;  %v515_v52 = vld [vmem:[%s10732_s11 + $0x6b8] sm:$0xff] }
 0x2b6   : > { %v575_v55 = vld [vmem:[%s10732_s11 + $0x898] sm:$0xff]  ;;  %v9237_v3 = vcombine.low %v511_v46, %v515_v52 }
 0x2b7   : > { %6312 = vmatpush1.bf16.msra.mxu0 %v9157_v62  ;;  %v579_v58 = vld [vmem:[%s10732_s11 + $0x8b8] sm:$0xff]  ;;  %v9238_v62 = vcombine.high %v511_v46, %v515_v52 }
 0x2b8   : > { %6287 = vmatpush2.bf16.msra.mxu1 %v9093_v54  ;;  %6313 = vmatprep.subr.bf16.mxu0 %v9278_v35  ;;  %v9302_v54 = vcombine.high %v575_v55, %v579_v58  ;;  %v503_v35 = vld [vmem:[%s10732_s11 + $0x658] sm:$0xff]  ;;  %v9301_v5 = vcombine.low %v575_v55, %v579_v58 }
 0x2b9   : > { %6338 = vmatprep.subr.bf16.mxu1 %v9342_v1  ;;  %v507_v1 = vld [vmem:[%s10732_s11 + $0x678] sm:$0xff] }
 0x2ba   : > { %v6003_v8 = vpop.f32.mrf.mxu0  ;;  %v567_v19 = vld [vmem:[%s10732_s11 + $0x858] sm:$0xff] }
 0x2bb   : > { %v6044_v53 = vpop.f32.mrf.mxu1  ;;  %6289 = vmatmul.mubr.bf16.vlgmr.msra.gmra.mxu1 %v10835_v23  ;;  %6314 = vmatpush2.bf16.msra.mxu0 %v9277_v47  ;;  %v571_v2 = vld [vmem:[%s10732_s11 + $0x878] sm:$0xff]  ;;  %v9230_v47 = vcombine.high %v503_v35, %v507_v1 }
 0x2bc   : > { %v11607_v60 = vadd.f32 %v6044_v53, %v6003_v8  ;;  %6339 = vmatpush1.bf16.msra.mxu1 %v9341_v56  ;;  %v6005_v15 = vpop.f32.mrf.mxu0  ;;  %6315 = vmatprep.subr.bf16.mxu0 %v9270_v63  ;;  %v9294_v56 = vcombine.high %v567_v19, %v571_v2  ;;  %v495_v63 = vld [vmem:[%s10732_s11 + $0x618] sm:$0xff]  ;;  %v9229_v8 = vcombine.low %v503_v35, %v507_v1 }
 0x2bd   : > { %v6046_v18 = vpop.f32.mrf.mxu1  ;;  %6340 = vmatprep.subr.bf16.mxu1 %v9334_v6  ;;  %6370 = vmatprep.mubr.bf16.mxu1 %v10842_v31  ;;  %v9318_v31 = vcombine.high %v591_v27, %v595_v24  ;;  %v499_v6 = vld [vmem:[%s10732_s11 + $0x638] sm:$0xff]  ;;  %v9293_v9 = vcombine.low %v567_v19, %v571_v2 }
 0x2be   : > { %v11612_v23 = vadd.f32 %v6046_v18, %v6005_v15  ;;  %v6007_v25 = vpop.f32.mrf.mxu0  ;;  %v559_v14 = vld [vmem:[%s10732_s11 + $0x818] sm:$0xff]  ;;  %v9222_v22 = vcombine.high %v495_v63, %v499_v6  ;;  %v9221_v18 = vcombine.low %v495_v63, %v499_v6 }
 0x2bf   : > { %v6048_v50 = vpop.f32.mrf.mxu1  ;;  %6316 = vmatpush2.bf16.msra.mxu0 %v9269_v11  ;;  %v563_v7 = vld [vmem:[%s10732_s11 + $0x838] sm:$0xff] }
 0x2c0   : > { %6341 = vmatpush1.bf16.msra.mxu1 %v9333_v16  ;;  %v6008_v32 = vpop.f32.mrf.mxu0  ;;  %6317 = vmatprep.subr.bf16.mxu0 %v9262_v33  ;;  %v9286_v53 = vcombine.high %v559_v14, %v563_v7  ;;  %v743_v11 = vld [vmem:[%s10732_s11 + $0xdd8] sm:$0xff] }
 0x2c1   : > { %v6049_v34 = vpop.f32.mrf.mxu1  ;;  %6342 = vmatprep.subr.bf16.mxu1 %v9326_v29  ;;  %v747_v15 = vld [vmem:[%s10732_s11 + $0xdf8] sm:$0xff]  ;;  %v9285_v29 = vcombine.low %v559_v14, %v563_v7 }
 0x2c2   : > { %v679_v16 = vld [vmem:[%s10732_s11 + $0xbd8] sm:$0xff]  ;;  %v9470_v17 = vcombine.high %v743_v11, %v747_v15 }
 0x2c3   : > { %6318 = vmatpush2.bf16.msra.mxu0 %v9261_v28  ;;  %v683_v33 = vld [vmem:[%s10732_s11 + $0xbf8] sm:$0xff]  ;;  %v9469_v28 = vcombine.low %v743_v11, %v747_v15 }
 0x2c4   : > { %6343 = vmatpush1.bf16.msra.mxu1 %v9325_v36  ;;  %6319 = vmatprep.subr.bf16.mxu0 %v9254_v38  ;;  %v9406_v21 = vcombine.high %v679_v16, %v683_v33  ;;  %v735_v25 = vld [vmem:[%s10732_s11 + $0xd98] sm:$0xff]  ;;  %v9405_v32 = vcombine.low %v679_v16, %v683_v33 }
 0x2c5   : > { %6344 = vmatprep.subr.bf16.mxu1 %v9318_v31  ;;  %v739_v27 = vld [vmem:[%s10732_s11 + $0xdb8] sm:$0xff] }
 0x2c6   : > { %v671_v24 = vld [vmem:[%s10732_s11 + $0xb98] sm:$0xff]  ;;  %v9462_v36 = vcombine.high %v735_v25, %v739_v27  ;;  %v9461_v42 = vcombine.low %v735_v25, %v739_v27 }
 0x2c7   : > { %6320 = vmatpush2.bf16.msra.mxu0 %v9253_v59  ;;  %v675_v50 = vld [vmem:[%s10732_s11 + $0xbb8] sm:$0xff] }
 0x2c8   : > { %6345 = vmatpush1.bf16.msra.mxu1 %v9317_v43  ;;  %6321 = vmatprep.subr.bf16.mxu0 %v9246_v44  ;;  %v9398_v38 = vcombine.high %v671_v24, %v675_v50  ;;  %v727_v34 = vld [vmem:[%s10732_s11 + $0xd58] sm:$0xff]  ;;  %v9397_v26 = vcombine.low %v671_v24, %v675_v50 }
 0x2c9   : > { %6346 = vmatprep.subr.bf16.mxu1 %v9310_v10  ;;  %v731_v31 = vld [vmem:[%s10732_s11 + $0xd78] sm:$0xff] }
 0x2ca   : > { %v663_v39 = vld [vmem:[%s10732_s11 + $0xb58] sm:$0xff]  ;;  %v9454_v59 = vcombine.high %v727_v34, %v731_v31  ;;  %v9453_v52 = vcombine.low %v727_v34, %v731_v31 }
 0x2cb   : > { %6322 = vmatpush2.bf16.msra.mxu0 %v9245_v61  ;;  %v667_v41 = vld [vmem:[%s10732_s11 + $0xb78] sm:$0xff] }
 0x2cc   : > { %6347 = vmatpush1.bf16.msra.mxu1 %v9309_v13  ;;  %6323 = vmatprep.subr.bf16.mxu0 %v9238_v62  ;;  %v9390_v43 = vcombine.high %v663_v39, %v667_v41  ;;  %v719_v44 = vld [vmem:[%s10732_s11 + $0xd18] sm:$0xff]  ;;  %v9389_v55 = vcombine.low %v663_v39, %v667_v41 }
 0x2cd   : > { %6348 = vmatprep.subr.bf16.mxu1 %v9302_v54  ;;  %v723_v10 = vld [vmem:[%s10732_s11 + $0xd38] sm:$0xff] }
 0x2ce   : > { %v655_v46 = vld [vmem:[%s10732_s11 + $0xb18] sm:$0xff]  ;;  %v9445_v35 = vcombine.low %v719_v44, %v723_v10 }
 0x2cf   : > { %6324 = vmatpush2.bf16.msra.mxu0 %v9237_v3  ;;  %v711_v61 = vld [vmem:[%s10732_s11 + $0xcd8] sm:$0xff] }
 0x2d0   : > { %6349 = vmatpush1.bf16.msra.mxu1 %v9301_v5  ;;  %6325 = vmatprep.subr.bf16.mxu0 %v9230_v47  ;;  %v715_v13 = vld [vmem:[%s10732_s11 + $0xcf8] sm:$0xff] }
 0x2d1   : > { %6350 = vmatprep.subr.bf16.mxu1 %v9294_v56  ;;  %v647_v62 = vld [vmem:[%s10732_s11 + $0xad8] sm:$0xff]  ;;  %v9438_v19 = vcombine.high %v711_v61, %v715_v13  ;;  %v9437_v63 = vcombine.low %v711_v61, %v715_v13 }
 0x2d2   : > { %v651_v54 = vld [vmem:[%s10732_s11 + $0xaf8] sm:$0xff] }
 0x2d3   : > { %6326 = vmatpush2.bf16.msra.mxu0 %v9229_v8  ;;  %v9374_v2 = vcombine.high %v647_v62, %v651_v54  ;;  %v703_v3 = vld [vmem:[%s10732_s11 + $0xc98] sm:$0xff]  ;;  %v9373_v6 = vcombine.low %v647_v62, %v651_v54 }
 0x2d4   : > { %6351 = vmatpush1.bf16.msra.mxu1 %v9293_v9  ;;  %6327 = vmatprep.subr.bf16.mxu0 %v9222_v22  ;;  %v707_v5 = vld [vmem:[%s10732_s11 + $0xcb8] sm:$0xff] }
 0x2d5   : > { %6352 = vmatprep.subr.bf16.mxu1 %v9286_v53  ;;  %v639_v47 = vld [vmem:[%s10732_s11 + $0xa98] sm:$0xff]  ;;  %v9430_v14 = vcombine.high %v703_v3, %v707_v5  ;;  %v9429_v11 = vcombine.low %v703_v3, %v707_v5 }
 0x2d6   : > { %v643_v56 = vld [vmem:[%s10732_s11 + $0xab8] sm:$0xff] }
 0x2d7   : > { %6328 = vmatpush2.bf16.msra.mxu0 %v9221_v18  ;;  %v9366_v7 = vcombine.high %v639_v47, %v643_v56  ;;  %v695_v8 = vld [vmem:[%s10732_s11 + $0xc58] sm:$0xff]  ;;  %v9365_v15 = vcombine.low %v639_v47, %v643_v56 }
 0x2d8   : > { %6353 = vmatpush1.bf16.msra.mxu1 %v9285_v29  ;;  %6379 = vmatprep.subr.bf16.mxu0 %v9470_v17  ;;  %v699_v9 = vld [vmem:[%s10732_s11 + $0xc78] sm:$0xff] }
 0x2d9   : > { %6354 = vmatprep.subr.bf16.mxu1 %v9406_v21  ;;  %v631_v22 = vld [vmem:[%s10732_s11 + $0xa58] sm:$0xff]  ;;  %v9422_v16 = vcombine.high %v695_v8, %v699_v9  ;;  %v9421_v25 = vcombine.low %v695_v8, %v699_v9 }
 0x2da   : > { %6330 = vmatmul.mubr.bf16.vlgmr.msra.gmra.mxu0 %v10846_v0  ;;  %v659_v0 = vld [vmem:[%s10732_s11 + $0xb38] sm:$0xff] }
 0x2db   : > { %6380 = vmatpush1.bf16.msra.mxu0 %v9469_v28  ;;  %6411 = vmatprep.mubr.bf16.mxu0 %v10855_v40  ;;  %v9446_v40 = vcombine.high %v719_v44, %v723_v10  ;;  %v9382_v58 = vcombine.high %v655_v46, %v659_v0  ;;  %v9381_v1 = vcombine.low %v655_v46, %v659_v0  ;;  %v635_v53 = vld [vmem:[%s10732_s11 + $0xa78] sm:$0xff] }
 0x2dc   : > { %6355 = vmatpush2.bf16.msra.mxu1 %v9405_v32  ;;  %6381 = vmatprep.subr.bf16.mxu0 %v9462_v36  ;;  %v9358_v33 = vcombine.high %v631_v22, %v635_v53  ;;  %v687_v18 = vld [vmem:[%s10732_s11 + $0xc18] sm:$0xff]  ;;  %v9357_v27 = vcombine.low %v631_v22, %v635_v53 }
 0x2dd   : > { %6356 = vmatprep.subr.bf16.mxu1 %v9398_v38  ;;  %v691_v29 = vld [vmem:[%s10732_s11 + $0xc38] sm:$0xff] }
 0x2de   : > { %v623_v17 = vld [vmem:[%s10732_s11 + $0xa18] sm:$0xff]  ;;  %v9414_v24 = vcombine.high %v687_v18, %v691_v29  ;;  %v9413_v34 = vcombine.low %v687_v18, %v691_v29 }
 0x2df   : > { %6382 = vmatpush1.bf16.msra.mxu0 %v9461_v42  ;;  %v627_v21 = vld [vmem:[%s10732_s11 + $0xa38] sm:$0xff] }
 0x2e0   : > { %6357 = vmatpush2.bf16.msra.mxu1 %v9397_v26  ;;  %6383 = vmatprep.subr.bf16.mxu0 %v9454_v59  ;;  %v9350_v50 = vcombine.high %v623_v17, %v627_v21  ;;  %v807_v28 = vld [vmem:[%s10732_s11 + $0xfd8] sm:$0xff]  ;;  %v9349_v31 = vcombine.low %v623_v17, %v627_v21 }
 0x2e1   : > { %6358 = vmatprep.subr.bf16.mxu1 %v9390_v43  ;;  %v811_v32 = vld [vmem:[%s10732_s11 + $0xff8] sm:$0xff] }
 0x2e2   : > { %v871_v36 = vld [vmem:[%s10732_s11 + $0x11d8] sm:$0xff]  ;;  %v9534_v39 = vcombine.high %v807_v28, %v811_v32  ;;  %v9533_v44 = vcombine.low %v807_v28, %v811_v32 }
 0x2e3   : > { %6384 = vmatpush1.bf16.msra.mxu0 %v9453_v52  ;;  %v875_v38 = vld [vmem:[%s10732_s11 + $0x11f8] sm:$0xff] }
 0x2e4   : > { %6359 = vmatpush2.bf16.msra.mxu1 %v9389_v55  ;;  %6385 = vmatprep.subr.bf16.mxu0 %v9446_v40  ;;  %v9598_v41 = vcombine.high %v871_v36, %v875_v38  ;;  %v799_v42 = vld [vmem:[%s10732_s11 + $0xf98] sm:$0xff]  ;;  %v9597_v10 = vcombine.low %v871_v36, %v875_v38 }
 0x2e5   : > { %6360 = vmatprep.subr.bf16.mxu1 %v9382_v58  ;;  %v803_v26 = vld [vmem:[%s10732_s11 + $0xfb8] sm:$0xff] }
 0x2e6   : > { %v863_v59 = vld [vmem:[%s10732_s11 + $0x1198] sm:$0xff]  ;;  %v9526_v46 = vcombine.high %v799_v42, %v803_v26  ;;  %v9525_v54 = vcombine.low %v799_v42, %v803_v26 }
 0x2e7   : > { %6386 = vmatpush1.bf16.msra.mxu0 %v9445_v35  ;;  %v867_v43 = vld [vmem:[%s10732_s11 + $0x11b8] sm:$0xff] }
 0x2e8   : > { %6361 = vmatpush2.bf16.msra.mxu1 %v9381_v1  ;;  %6387 = vmatprep.subr.bf16.mxu0 %v9438_v19  ;;  %v9590_v0 = vcombine.high %v863_v59, %v867_v43  ;;  %v791_v52 = vld [vmem:[%s10732_s11 + $0xf58] sm:$0xff]  ;;  %v9589_v1 = vcombine.low %v863_v59, %v867_v43 }
 0x2e9   : > { %6362 = vmatprep.subr.bf16.mxu1 %v9374_v2  ;;  %v795_v55 = vld [vmem:[%s10732_s11 + $0xf78] sm:$0xff] }
 0x2ea   : > { %v855_v58 = vld [vmem:[%s10732_s11 + $0x1158] sm:$0xff]  ;;  %v9518_v19 = vcombine.high %v791_v52, %v795_v55  ;;  %v9517_v8 = vcombine.low %v791_v52, %v795_v55 }
 0x2eb   : > { %6388 = vmatpush1.bf16.msra.mxu0 %v9437_v63  ;;  %v859_v61 = vld [vmem:[%s10732_s11 + $0x1178] sm:$0xff] }
 0x2ec   : > { %6363 = vmatpush2.bf16.msra.mxu1 %v9373_v6  ;;  %6389 = vmatprep.subr.bf16.mxu0 %v9430_v14  ;;  %v783_v47 = vld [vmem:[%s10732_s11 + $0xf18] sm:$0xff]  ;;  %v9581_v9 = vcombine.low %v855_v58, %v859_v61 }
 0x2ed   : > { %6364 = vmatprep.subr.bf16.mxu1 %v9366_v7  ;;  %v787_v56 = vld [vmem:[%s10732_s11 + $0xf38] sm:$0xff] }
 0x2ee   : > { %v847_v63 = vld [vmem:[%s10732_s11 + $0x1118] sm:$0xff]  ;;  %v9510_v22 = vcombine.high %v783_v47, %v787_v56  ;;  %v9509_v18 = vcombine.low %v783_v47, %v787_v56 }
 0x2ef   : > { %6390 = vmatpush1.bf16.msra.mxu0 %v9429_v11  ;;  %v851_v6 = vld [vmem:[%s10732_s11 + $0x1138] sm:$0xff] }
 0x2f0   : > { %6365 = vmatpush2.bf16.msra.mxu1 %v9365_v15  ;;  %6391 = vmatprep.subr.bf16.mxu0 %v9422_v16  ;;  %v775_v11 = vld [vmem:[%s10732_s11 + $0xed8] sm:$0xff]  ;;  %v9573_v29 = vcombine.low %v847_v63, %v851_v6 }
 0x2f1   : > { %6366 = vmatprep.subr.bf16.mxu1 %v9358_v33  ;;  %v779_v15 = vld [vmem:[%s10732_s11 + $0xef8] sm:$0xff] }
 0x2f2   : > { %v839_v16 = vld [vmem:[%s10732_s11 + $0x10d8] sm:$0xff]  ;;  %v9502_v17 = vcombine.high %v775_v11, %v779_v15  ;;  %v9501_v28 = vcombine.low %v775_v11, %v779_v15 }
 0x2f3   : > { %6392 = vmatpush1.bf16.msra.mxu0 %v9421_v25  ;;  %v843_v33 = vld [vmem:[%s10732_s11 + $0x10f8] sm:$0xff] }
 0x2f4   : > { %6367 = vmatpush2.bf16.msra.mxu1 %v9357_v27  ;;  %6393 = vmatprep.subr.bf16.mxu0 %v9414_v24  ;;  %v9566_v21 = vcombine.high %v839_v16, %v843_v33  ;;  %v767_v25 = vld [vmem:[%s10732_s11 + $0xe98] sm:$0xff]  ;;  %v9565_v32 = vcombine.low %v839_v16, %v843_v33 }
 0x2f5   : > { %6368 = vmatprep.subr.bf16.mxu1 %v9350_v50  ;;  %v771_v27 = vld [vmem:[%s10732_s11 + $0xeb8] sm:$0xff] }
 0x2f6   : > { %v831_v24 = vld [vmem:[%s10732_s11 + $0x1098] sm:$0xff]  ;;  %v9494_v36 = vcombine.high %v767_v25, %v771_v27  ;;  %v9493_v42 = vcombine.low %v767_v25, %v771_v27 }
 0x2f7   : > { %6394 = vmatpush1.bf16.msra.mxu0 %v9413_v34  ;;  %v835_v50 = vld [vmem:[%s10732_s11 + $0x10b8] sm:$0xff] }
 0x2f8   : > { %6369 = vmatpush2.bf16.msra.mxu1 %v9349_v31  ;;  %6395 = vmatprep.subr.bf16.mxu0 %v9534_v39  ;;  %v9558_v38 = vcombine.high %v831_v24, %v835_v50  ;;  %v759_v34 = vld [vmem:[%s10732_s11 + $0xe58] sm:$0xff]  ;;  %v9557_v26 = vcombine.low %v831_v24, %v835_v50 }
 0x2f9   : > { %6420 = vmatprep.subr.bf16.mxu1 %v9598_v41  ;;  %v763_v31 = vld [vmem:[%s10732_s11 + $0xe78] sm:$0xff] }
 0x2fa   : > { %v6085_v40 = vpop.f32.mrf.mxu0  ;;  %v823_v39 = vld [vmem:[%s10732_s11 + $0x1058] sm:$0xff]  ;;  %v9486_v59 = vcombine.high %v759_v34, %v763_v31  ;;  %v9485_v52 = vcombine.low %v759_v34, %v763_v31 }
 0x2fb   : > { %v6086_v13 = vadd.f32 %v6085_v40, %v11607_v60  ;;  %v6126_v62 = vpop.f32.mrf.mxu1  ;;  %6371 = vmatmul.mubr.bf16.vlgmr.msra.gmra.mxu1 %v10927_v48  ;;  %6396 = vmatpush2.bf16.msra.mxu0 %v9533_v44  ;;  %v9582_v60 = vcombine.high %v855_v58, %v859_v61  ;;  %v827_v41 = vld [vmem:[%s10732_s11 + $0x1078] sm:$0xff] }
 0x2fc   : > { %6421 = vmatpush1.bf16.msra.mxu1 %v9597_v10  ;;  %v6087_v35 = vpop.f32.mrf.mxu0  ;;  %6397 = vmatprep.subr.bf16.mxu0 %v9526_v46  ;;  %v9550_v43 = vcombine.high %v823_v39, %v827_v41  ;;  %v751_v44 = vld [vmem:[%s10732_s11 + $0xe18] sm:$0xff]  ;;  %v9549_v55 = vcombine.low %v823_v39, %v827_v41 }
 0x2fd   : > { %v11680_v2 = vadd.f32 %v6126_v62, %v6086_v13  ;;  %v6088_v3 = vadd.f32 %v6087_v35, %v11612_v23  ;;  %v6128_v5 = vpop.f32.mrf.mxu1  ;;  %6422 = vmatprep.subr.bf16.mxu1 %v9590_v0  ;;  %6452 = vmatprep.mubr.bf16.mxu1 %v10934_v57  ;;  %v9574_v57 = vcombine.high %v847_v63, %v851_v6  ;;  %v755_v10 = vld [vmem:[%s10732_s11 + $0xe38] sm:$0xff] }
 0x2fe   : > { %v6089_v48 = vpop.f32.mrf.mxu0  ;;  %v815_v46 = vld [vmem:[%s10732_s11 + $0x1018] sm:$0xff]  ;;  %v9478_v40 = vcombine.high %v751_v44, %v755_v10  ;;  %v9477_v35 = vcombine.low %v751_v44, %v755_v10 }
 0x2ff   : > { %v11688_v14 = vadd.f32 %v6128_v5, %v6088_v3  ;;  %v6130_v7 = vpop.f32.mrf.mxu1  ;;  %6398 = vmatpush2.bf16.msra.mxu0 %v9525_v54  ;;  %v819_v0 = vld [vmem:[%s10732_s11 + $0x1038] sm:$0xff] }
 0x300   : > { %6423 = vmatpush1.bf16.msra.mxu1 %v9589_v1  ;;  %v6090_v23 = vpop.f32.mrf.mxu0  ;;  %6399 = vmatprep.subr.bf16.mxu0 %v9518_v19  ;;  %v9542_v58 = vcombine.high %v815_v46, %v819_v0  ;;  %v999_v61 = vld [vmem:[%s10732_s11 + $0x15d8] sm:$0xff]  ;;  %v9541_v1 = vcombine.low %v815_v46, %v819_v0 }
 0x301   : > { %v6131_v53 = vpop.f32.mrf.mxu1  ;;  %6424 = vmatprep.subr.bf16.mxu1 %v9582_v60  ;;  %v1003_v13 = vld [vmem:[%s10732_s11 + $0x15f8] sm:$0xff] }
 0x302   : > { %v935_v62 = vld [vmem:[%s10732_s11 + $0x13d8] sm:$0xff]  ;;  %v9726_v19 = vcombine.high %v999_v61, %v1003_v13  ;;  %v9725_v48 = vcombine.low %v999_v61, %v1003_v13 }
 0x303   : > { %6400 = vmatpush2.bf16.msra.mxu0 %v9517_v8  ;;  %v939_v54 = vld [vmem:[%s10732_s11 + $0x13f8] sm:$0xff] }
 0x304   : > { %6425 = vmatpush1.bf16.msra.mxu1 %v9581_v9  ;;  %6401 = vmatprep.subr.bf16.mxu0 %v9510_v22  ;;  %v9662_v3 = vcombine.high %v935_v62, %v939_v54  ;;  %v991_v5 = vld [vmem:[%s10732_s11 + $0x1598] sm:$0xff]  ;;  %v9661_v63 = vcombine.low %v935_v62, %v939_v54 }
 0x305   : > { %6426 = vmatprep.subr.bf16.mxu1 %v9574_v57  ;;  %v995_v60 = vld [vmem:[%s10732_s11 + $0x15b8] sm:$0xff] }
 0x306   : > { %v927_v47 = vld [vmem:[%s10732_s11 + $0x1398] sm:$0xff]  ;;  %v9718_v6 = vcombine.high %v991_v5, %v995_v60  ;;  %v9717_v53 = vcombine.low %v991_v5, %v995_v60 }
 0x307   : > { %6402 = vmatpush2.bf16.msra.mxu0 %v9509_v18  ;;  %v931_v56 = vld [vmem:[%s10732_s11 + $0x13b8] sm:$0xff] }
 0x308   : > { %6427 = vmatpush1.bf16.msra.mxu1 %v9573_v29  ;;  %6403 = vmatprep.subr.bf16.mxu0 %v9502_v17  ;;  %v9654_v7 = vcombine.high %v927_v47, %v931_v56  ;;  %v983_v8 = vld [vmem:[%s10732_s11 + $0x1558] sm:$0xff]  ;;  %v9653_v57 = vcombine.low %v927_v47, %v931_v56 }
 0x309   : > { %6428 = vmatprep.subr.bf16.mxu1 %v9566_v21  ;;  %v987_v23 = vld [vmem:[%s10732_s11 + $0x1578] sm:$0xff] }
 0x30a   : > { %v919_v9 = vld [vmem:[%s10732_s11 + $0x1358] sm:$0xff]  ;;  %v9710_v11 = vcombine.high %v983_v8, %v987_v23  ;;  %v9709_v29 = vcombine.low %v983_v8, %v987_v23 }
 0x30b   : > { %6404 = vmatpush2.bf16.msra.mxu0 %v9501_v28  ;;  %v923_v22 = vld [vmem:[%s10732_s11 + $0x1378] sm:$0xff] }
 0x30c   : > { %6429 = vmatpush1.bf16.msra.mxu1 %v9565_v32  ;;  %6405 = vmatprep.subr.bf16.mxu0 %v9494_v36  ;;  %v9646_v15 = vcombine.high %v919_v9, %v923_v22  ;;  %v975_v16 = vld [vmem:[%s10732_s11 + $0x1518] sm:$0xff]  ;;  %v9645_v17 = vcombine.low %v919_v9, %v923_v22 }
 0x30d   : > { %6430 = vmatprep.subr.bf16.mxu1 %v9558_v38  ;;  %v979_v33 = vld [vmem:[%s10732_s11 + $0x1538] sm:$0xff] }
 0x30e   : > { %v911_v18 = vld [vmem:[%s10732_s11 + $0x1318] sm:$0xff]  ;;  %v9701_v28 = vcombine.low %v975_v16, %v979_v33 }
 0x30f   : > { %6406 = vmatpush2.bf16.msra.mxu0 %v9493_v42  ;;  %v967_v25 = vld [vmem:[%s10732_s11 + $0x14d8] sm:$0xff] }
 0x310   : > { %6431 = vmatpush1.bf16.msra.mxu1 %v9557_v26  ;;  %6407 = vmatprep.subr.bf16.mxu0 %v9486_v59  ;;  %v971_v27 = vld [vmem:[%s10732_s11 + $0x14f8] sm:$0xff] }
 0x311   : > { %6432 = vmatprep.subr.bf16.mxu1 %v9550_v43  ;;  %v903_v24 = vld [vmem:[%s10732_s11 + $0x12d8] sm:$0xff]  ;;  %v9694_v36 = vcombine.high %v967_v25, %v971_v27  ;;  %v9693_v42 = vcombine.low %v967_v25, %v971_v27 }
 0x312   : > { %v907_v50 = vld [vmem:[%s10732_s11 + $0x12f8] sm:$0xff] }
 0x313   : > { %6408 = vmatpush2.bf16.msra.mxu0 %v9485_v52  ;;  %v9630_v38 = vcombine.high %v903_v24, %v907_v50  ;;  %v959_v34 = vld [vmem:[%s10732_s11 + $0x1498] sm:$0xff]  ;;  %v9629_v26 = vcombine.low %v903_v24, %v907_v50 }
 0x314   : > { %6433 = vmatpush1.bf16.msra.mxu1 %v9549_v55  ;;  %6409 = vmatprep.subr.bf16.mxu0 %v9478_v40  ;;  %v963_v31 = vld [vmem:[%s10732_s11 + $0x14b8] sm:$0xff] }
 0x315   : > { %6434 = vmatprep.subr.bf16.mxu1 %v9542_v58  ;;  %v895_v39 = vld [vmem:[%s10732_s11 + $0x1298] sm:$0xff]  ;;  %v9686_v59 = vcombine.high %v959_v34, %v963_v31  ;;  %v9685_v52 = vcombine.low %v959_v34, %v963_v31 }
 0x316   : > { %v899_v41 = vld [vmem:[%s10732_s11 + $0x12b8] sm:$0xff] }
 0x317   : > { %6410 = vmatpush2.bf16.msra.mxu0 %v9477_v35  ;;  %v9622_v43 = vcombine.high %v895_v39, %v899_v41  ;;  %v951_v44 = vld [vmem:[%s10732_s11 + $0x1458] sm:$0xff]  ;;  %v9621_v55 = vcombine.low %v895_v39, %v899_v41 }
 0x318   : > { %6435 = vmatpush1.bf16.msra.mxu1 %v9541_v1  ;;  %6461 = vmatprep.subr.bf16.mxu0 %v9726_v19  ;;  %v955_v10 = vld [vmem:[%s10732_s11 + $0x1478] sm:$0xff] }
 0x319   : > { %6436 = vmatprep.subr.bf16.mxu1 %v9662_v3  ;;  %v887_v46 = vld [vmem:[%s10732_s11 + $0x1258] sm:$0xff]  ;;  %v9678_v40 = vcombine.high %v951_v44, %v955_v10  ;;  %v9677_v35 = vcombine.low %v951_v44, %v955_v10 }
 0x31a   : > { %6412 = vmatmul.mubr.bf16.vlgmr.msra.gmra.mxu0 %v10938_v12  ;;  %v915_v12 = vld [vmem:[%s10732_s11 + $0x1338] sm:$0xff] }
 0x31b   : > { %6462 = vmatpush1.bf16.msra.mxu0 %v9725_v48  ;;  %6493 = vmatprep.mubr.bf16.mxu0 %v10947_v4  ;;  %v9702_v4 = vcombine.high %v975_v16, %v979_v33  ;;  %v9638_v21 = vcombine.high %v911_v18, %v915_v12  ;;  %v9637_v32 = vcombine.low %v911_v18, %v915_v12  ;;  %v891_v0 = vld [vmem:[%s10732_s11 + $0x1278] sm:$0xff] }
 0x31c   : > { %6437 = vmatpush2.bf16.msra.mxu1 %v9661_v63  ;;  %6463 = vmatprep.subr.bf16.mxu0 %v9718_v6  ;;  %v9614_v58 = vcombine.high %v887_v46, %v891_v0  ;;  %v943_v61 = vld [vmem:[%s10732_s11 + $0x1418] sm:$0xff]  ;;  %v9613_v1 = vcombine.low %v887_v46, %v891_v0 }
 0x31d   : > { %6438 = vmatprep.subr.bf16.mxu1 %v9654_v7  ;;  %v947_v13 = vld [vmem:[%s10732_s11 + $0x1438] sm:$0xff] }
 0x31e   : > { %v879_v62 = vld [vmem:[%s10732_s11 + $0x1218] sm:$0xff]  ;;  %v9670_v19 = vcombine.high %v943_v61, %v947_v13  ;;  %v9669_v48 = vcombine.low %v943_v61, %v947_v13 }
 0x31f   : > { %6464 = vmatpush1.bf16.msra.mxu0 %v9717_v53  ;;  %v883_v54 = vld [vmem:[%s10732_s11 + $0x1238] sm:$0xff] }
 0x320   : > { %6439 = vmatpush2.bf16.msra.mxu1 %v9653_v57  ;;  %6465 = vmatprep.subr.bf16.mxu0 %v9710_v11  ;;  %v9606_v3 = vcombine.high %v879_v62, %v883_v54  ;;  %v1063_v5 = vld [vmem:[%s10732_s11 + $0x17d8] sm:$0xff]  ;;  %v9605_v63 = vcombine.low %v879_v62, %v883_v54 }
 0x321   : > { %6440 = vmatprep.subr.bf16.mxu1 %v9646_v15  ;;  %v1067_v60 = vld [vmem:[%s10732_s11 + $0x17f8] sm:$0xff] }
 0x322   : > { %v1127_v47 = vld [vmem:[%s10732_s11 + $0x19d8] sm:$0xff]  ;;  %v9790_v6 = vcombine.high %v1063_v5, %v1067_v60  ;;  %v9789_v53 = vcombine.low %v1063_v5, %v1067_v60 }
 0x323   : > { %6466 = vmatpush1.bf16.msra.mxu0 %v9709_v29  ;;  %v1131_v56 = vld [vmem:[%s10732_s11 + $0x19f8] sm:$0xff] }
 0x324   : > { %6441 = vmatpush2.bf16.msra.mxu1 %v9645_v17  ;;  %6467 = vmatprep.subr.bf16.mxu0 %v9702_v4  ;;  %v9854_v7 = vcombine.high %v1127_v47, %v1131_v56  ;;  %v1055_v8 = vld [vmem:[%s10732_s11 + $0x1798] sm:$0xff]  ;;  %v9853_v57 = vcombine.low %v1127_v47, %v1131_v56 }
 0x325   : > { %6442 = vmatprep.subr.bf16.mxu1 %v9638_v21  ;;  %v1059_v23 = vld [vmem:[%s10732_s11 + $0x17b8] sm:$0xff] }
 0x326   : > { %v1119_v9 = vld [vmem:[%s10732_s11 + $0x1998] sm:$0xff]  ;;  %v9782_v11 = vcombine.high %v1055_v8, %v1059_v23  ;;  %v9781_v21 = vcombine.low %v1055_v8, %v1059_v23 }
 0x327   : > { %6468 = vmatpush1.bf16.msra.mxu0 %v9701_v28  ;;  %v1123_v22 = vld [vmem:[%s10732_s11 + $0x19b8] sm:$0xff] }
 0x328   : > { %6443 = vmatpush2.bf16.msra.mxu1 %v9637_v32  ;;  %6469 = vmatprep.subr.bf16.mxu0 %v9694_v36  ;;  %v9846_v15 = vcombine.high %v1119_v9, %v1123_v22  ;;  %v1047_v16 = vld [vmem:[%s10732_s11 + $0x1758] sm:$0xff]  ;;  %v9845_v27 = vcombine.low %v1119_v9, %v1123_v22 }
 0x329   : > { %6444 = vmatprep.subr.bf16.mxu1 %v9630_v38  ;;  %v1051_v33 = vld [vmem:[%s10732_s11 + $0x1778] sm:$0xff] }
 0x32a   : > { %v1111_v12 = vld [vmem:[%s10732_s11 + $0x1958] sm:$0xff]  ;;  %v9774_v24 = vcombine.high %v1047_v16, %v1051_v33 }
 0x32b   : > { %6470 = vmatpush1.bf16.msra.mxu0 %v9693_v42  ;;  %v1115_v29 = vld [vmem:[%s10732_s11 + $0x1978] sm:$0xff]  ;;  %v9773_v42 = vcombine.low %v1047_v16, %v1051_v33 }
 0x32c   : > { %6445 = vmatpush2.bf16.msra.mxu1 %v9629_v26  ;;  %6471 = vmatprep.subr.bf16.mxu0 %v9686_v59  ;;  %v1039_v36 = vld [vmem:[%s10732_s11 + $0x1718] sm:$0xff]  ;;  %v9837_v26 = vcombine.low %v1111_v12, %v1115_v29 }
 0x32d   : > { %6446 = vmatprep.subr.bf16.mxu1 %v9622_v43  ;;  %v1043_v38 = vld [vmem:[%s10732_s11 + $0x1738] sm:$0xff] }
 0x32e   : > { %v1103_v34 = vld [vmem:[%s10732_s11 + $0x1918] sm:$0xff]  ;;  %v9766_v59 = vcombine.high %v1039_v36, %v1043_v38 }
 0x32f   : > { %6472 = vmatpush1.bf16.msra.mxu0 %v9685_v52  ;;  %v1107_v31 = vld [vmem:[%s10732_s11 + $0x1938] sm:$0xff]  ;;  %v9765_v52 = vcombine.low %v1039_v36, %v1043_v38 }
 0x330   : > { %6447 = vmatpush2.bf16.msra.mxu1 %v9621_v55  ;;  %6473 = vmatprep.subr.bf16.mxu0 %v9678_v40  ;;  %v1031_v44 = vld [vmem:[%s10732_s11 + $0x16d8] sm:$0xff]  ;;  %v9829_v55 = vcombine.low %v1103_v34, %v1107_v31 }
 0x331   : > { %6448 = vmatprep.subr.bf16.mxu1 %v9614_v58  ;;  %v1035_v10 = vld [vmem:[%s10732_s11 + $0x16f8] sm:$0xff] }
 0x332   : > { %v1095_v46 = vld [vmem:[%s10732_s11 + $0x18d8] sm:$0xff]  ;;  %v9758_v40 = vcombine.high %v1031_v44, %v1035_v10 }
 0x333   : > { %6474 = vmatpush1.bf16.msra.mxu0 %v9677_v35  ;;  %v1099_v0 = vld [vmem:[%s10732_s11 + $0x18f8] sm:$0xff]  ;;  %v9757_v35 = vcombine.low %v1031_v44, %v1035_v10 }
 0x334   : > { %6449 = vmatpush2.bf16.msra.mxu1 %v9613_v1  ;;  %6475 = vmatprep.subr.bf16.mxu0 %v9670_v19  ;;  %v9822_v58 = vcombine.high %v1095_v46, %v1099_v0  ;;  %v1023_v61 = vld [vmem:[%s10732_s11 + $0x1698] sm:$0xff]  ;;  %v9821_v1 = vcombine.low %v1095_v46, %v1099_v0 }
 0x335   : > { %6450 = vmatprep.subr.bf16.mxu1 %v9606_v3  ;;  %v1027_v13 = vld [vmem:[%s10732_s11 + $0x16b8] sm:$0xff] }
 0x336   : > { %v1087_v62 = vld [vmem:[%s10732_s11 + $0x1898] sm:$0xff]  ;;  %v9750_v19 = vcombine.high %v1023_v61, %v1027_v13 }
 0x337   : > { %6476 = vmatpush1.bf16.msra.mxu0 %v9669_v48  ;;  %v1091_v54 = vld [vmem:[%s10732_s11 + $0x18b8] sm:$0xff]  ;;  %v9749_v48 = vcombine.low %v1023_v61, %v1027_v13 }
 0x338   : > { %6451 = vmatpush2.bf16.msra.mxu1 %v9605_v63  ;;  %6477 = vmatprep.subr.bf16.mxu0 %v9790_v6  ;;  %v9814_v3 = vcombine.high %v1087_v62, %v1091_v54  ;;  %v1015_v5 = vld [vmem:[%s10732_s11 + $0x1658] sm:$0xff]  ;;  %v9813_v63 = vcombine.low %v1087_v62, %v1091_v54 }
 0x339   : > { %6502 = vmatprep.subr.bf16.mxu1 %v9854_v7  ;;  %v1019_v60 = vld [vmem:[%s10732_s11 + $0x1678] sm:$0xff] }
 0x33a   : > { %v6167_v18 = vpop.f32.mrf.mxu0  ;;  %v1079_v47 = vld [vmem:[%s10732_s11 + $0x1858] sm:$0xff]  ;;  %v9742_v6 = vcombine.high %v1015_v5, %v1019_v60 }
 0x33b   : > { %v6168_v17 = vadd.f32 %v6167_v18, %v11680_v2  ;;  %v6208_v4 = vpop.f32.mrf.mxu1  ;;  %6453 = vmatmul.mubr.bf16.vlgmr.msra.gmra.mxu1 %v11010_v20  ;;  %6478 = vmatpush2.bf16.msra.mxu0 %v9789_v53  ;;  %v9838_v2 = vcombine.high %v1111_v12, %v1115_v29  ;;  %v1083_v56 = vld [vmem:[%s10732_s11 + $0x1878] sm:$0xff]  ;;  %v9741_v53 = vcombine.low %v1015_v5, %v1019_v60 }
 0x33c   : > { %6503 = vmatpush1.bf16.msra.mxu1 %v9853_v57  ;;  %v6169_v25 = vpop.f32.mrf.mxu0  ;;  %6479 = vmatprep.subr.bf16.mxu0 %v9782_v11  ;;  %v9806_v7 = vcombine.high %v1079_v47, %v1083_v56  ;;  %v1007_v8 = vld [vmem:[%s10732_s11 + $0x1618] sm:$0xff]  ;;  %v9805_v57 = vcombine.low %v1079_v47, %v1083_v56 }
 0x33d   : > { %v11754_v50 = vadd.f32 %v6208_v4, %v6168_v17  ;;  %v6170_v28 = vadd.f32 %v6169_v25, %v11688_v14  ;;  %v6210_v32 = vpop.f32.mrf.mxu1  ;;  %6504 = vmatprep.subr.bf16.mxu1 %v9846_v15  ;;  %6534 = vmatprep.mubr.bf16.mxu1 %v10669_v49  ;;  %v9830_v49 = vcombine.high %v1103_v34, %v1107_v31  ;;  %v1011_v23 = vld [vmem:[%s10732_s11 + $0x1638] sm:$0xff] }
 0x33e   : > { %v6171_v20 = vpop.f32.mrf.mxu0  ;;  %v1071_v9 = vld [vmem:[%s10732_s11 + $0x1818] sm:$0xff]  ;;  %v9734_v11 = vcombine.high %v1007_v8, %v1011_v23  ;;  %v9733_v16 = vcombine.low %v1007_v8, %v1011_v23 }
 0x33f   : > { %v11762_v39 = vadd.f32 %v6210_v32, %v6170_v28  ;;  %v6212_v41 = vpop.f32.mrf.mxu1  ;;  %6480 = vmatpush2.bf16.msra.mxu0 %v9781_v21  ;;  %v1075_v22 = vld [vmem:[%s10732_s11 + $0x1838] sm:$0xff] }
 0x340   : > { %6505 = vmatpush1.bf16.msra.mxu1 %v9845_v27  ;;  %v6172_v14 = vpop.f32.mrf.mxu0  ;;  %6481 = vmatprep.subr.bf16.mxu0 %v9774_v24  ;;  %v9798_v15 = vcombine.high %v1071_v9, %v1075_v22  ;;  %v9797_v33 = vcombine.low %v1071_v9, %v1075_v22 }
 0x341   : > { %v6213_v43 = vpop.f32.mrf.mxu1  ;;  %6506 = vmatprep.subr.bf16.mxu1 %v9838_v2 }
 0x343   : > { %6482 = vmatpush2.bf16.msra.mxu0 %v9773_v42 }
 0x344   : > { %6507 = vmatpush1.bf16.msra.mxu1 %v9837_v26  ;;  %6483 = vmatprep.subr.bf16.mxu0 %v9766_v59 }
 0x345   : > { %6508 = vmatprep.subr.bf16.mxu1 %v9830_v49 }
 0x347   : > { %6484 = vmatpush2.bf16.msra.mxu0 %v9765_v52 }
 0x348   : > { %6509 = vmatpush1.bf16.msra.mxu1 %v9829_v55  ;;  %6485 = vmatprep.subr.bf16.mxu0 %v9758_v40 }
 0x349   : > { %6510 = vmatprep.subr.bf16.mxu1 %v9822_v58 }
 0x34b   : > { %6486 = vmatpush2.bf16.msra.mxu0 %v9757_v35 }
 0x34c   : > { %6511 = vmatpush1.bf16.msra.mxu1 %v9821_v1  ;;  %6487 = vmatprep.subr.bf16.mxu0 %v9750_v19 }
 0x34d   : > { %6512 = vmatprep.subr.bf16.mxu1 %v9814_v3 }
 0x34f   : > { %6488 = vmatpush2.bf16.msra.mxu0 %v9749_v48 }
 0x350   : > { %6513 = vmatpush1.bf16.msra.mxu1 %v9813_v63  ;;  %6489 = vmatprep.subr.bf16.mxu0 %v9742_v6  ;;  %v297_v6 = vld [vmem:[#allocation2 + $0x8] sm:$0xff] }
 0x351   : > { %6514 = vmatprep.subr.bf16.mxu1 %v9806_v7 }
 0x353   : > { %6490 = vmatpush2.bf16.msra.mxu0 %v9741_v53 }
 0x354   : > { %6515 = vmatpush1.bf16.msra.mxu1 %v9805_v57  ;;  %6491 = vmatprep.subr.bf16.mxu0 %v9734_v11 }
 0x355   : > { %6516 = vmatprep.subr.bf16.mxu1 %v9798_v15 }
 0x357   : > { %6492 = vmatpush2.bf16.msra.mxu0 %v9733_v16 }
 0x358   : > { %6517 = vmatpush1.bf16.msra.mxu1 %v9797_v33 }
 0x35a   : > { %v6249_v18 = vpop.f32.mrf.mxu0  ;;  %6494 = vmatmul.mubr.bf16.vlgmr.msra.gmra.mxu0 %v11018_v30 }
 0x35b   : > { %v6250_v12 = vadd.f32 %v6249_v18, %v11754_v50  ;;  %6535 = vmatmul.mubr.bf16.vlgmr.msra.gmra.mxu1 %v11058_v51 }
 0x35c   : > { %v6251_v29 = vpop.f32.mrf.mxu0 }
 0x35d   : > { %v6252_v17 = vadd.f32 %v6251_v29, %v11762_v39 }
 0x35e   : > { %v6253_v4 = vpop.f32.mrf.mxu0 }
 0x35f   : > { %v6568_v21 = vcombine.low %v6250_v12, %v6252_v17 }
 0x360   : > { %v6254_v25 = vpop.f32.mrf.mxu0 }
 0x361   : > { %v6576_v48 = vrot.slane %v6568_v21, %v11537_v37 }
 0x37b   : > { %v6290_v27 = vpop.f32.mrf.mxu1 }
 0x37d   : > { %v6292_v24 = vpop.f32.mrf.mxu1 }
 0x37f   : > { %v6294_v28 = vpop.f32.mrf.mxu1 }
 0x381   : > { %v6295_v32 = vpop.f32.mrf.mxu1 }
 0x39a   : > { %v6331_v2 = vpop.f32.mrf.mxu0 }
 0x39b   : > { %v6332_v36 = vadd.f32 %v6331_v2, %v6290_v27 }
 0x39c   : > { %v6333_v38 = vpop.f32.mrf.mxu0 }
 0x39d   : > { %v6334_v20 = vadd.f32 %v6333_v38, %v6292_v24 }
 0x39e   : > { %v6335_v34 = vpop.f32.mrf.mxu0 }
 0x3a0   : > { %v6336_v30 = vpop.f32.mrf.mxu0 }
 0x3bb   : > { %v6372_v31 = vpop.f32.mrf.mxu1 }
 0x3bc   : > { %v6373_v50 = vadd.f32 %v6372_v31, %v6332_v36 }
 0x3bd   : > { %v6374_v41 = vpop.f32.mrf.mxu1 }
 0x3be   : > { %v6375_v51 = vadd.f32 %v6374_v41, %v6334_v20 }
 0x3bf   : > { %v6376_v42 = vpop.f32.mrf.mxu1 }
 0x3c1   : > { %v6377_v14 = vpop.f32.mrf.mxu1 }
 0x3da   : > { %v6413_v39 = vpop.f32.mrf.mxu0 }
 0x3db   : > { %v6414_v0 = vadd.f32 %v6413_v39, %v6373_v50 }
 0x3dc   : > { %v6415_v26 = vpop.f32.mrf.mxu0 }
 0x3dd   : > { %v6416_v52 = vadd.f32 %v6415_v26, %v6375_v51 }
 0x3de   : > { %v6417_v59 = vpop.f32.mrf.mxu0 }
 0x3e0   : > { %v6418_v43 = vpop.f32.mrf.mxu0 }
 0x3fb   : > { %v6454_v49 = vpop.f32.mrf.mxu1 }
 0x3fc   : > { %v6455_v55 = vadd.f32 %v6454_v49, %v6414_v0 }
 0x3fd   : > { %v6456_v44 = vpop.f32.mrf.mxu1 }
 0x3fe   : > { %v6457_v58 = vadd.f32 %v6456_v44, %v6416_v52 }
 0x3ff   : > { %v6458_v10 = vpop.f32.mrf.mxu1 }
 0x401   : > { %v6459_v46 = vpop.f32.mrf.mxu1 }
 0x41a   : > { %v6495_v40 = vpop.f32.mrf.mxu0 }
 0x41b   : > { %v6496_v61 = vadd.f32 %v6495_v40, %v6455_v55  ;;  %v6536_v13 = vpop.f32.mrf.mxu1 }
 0x41c   : > { %v6497_v62 = vpop.f32.mrf.mxu0 }
 0x41d   : > { %v6498_v54 = vadd.f32 %v6497_v62, %v6457_v58  ;;  %v6538_v35 = vpop.f32.mrf.mxu1  ;;  %v6537_v19 = vadd.f32 %v6536_v13, %v6496_v61 }
 0x41e   : > { %v6499_v1 = vpop.f32.mrf.mxu0 }
 0x41f   : > { %v6539_v3 = vadd.f32 %v6538_v35, %v6498_v54  ;;  %v6540_v5 = vpop.f32.mrf.mxu1 }
 0x420   : > { %v6500_v60 = vpop.f32.mrf.mxu0 }
 0x421   : > { %v6569_v47 = vcombine.low %v6537_v19, %v6539_v3  ;;  %v6541_v56 = vpop.f32.mrf.mxu1 }
 0x423   : > { %v6583_v63 = vrot.slane %v6569_v47, %v11537_v37 }
 0x425   : > { %v6584_v7 = vcombine.low %v6576_v48, %v6583_v63  ;;  %6594 = sbr.rel (%p9855_p6) target bundleno = 1727 (0x6bf), region = 56 }
 0x427   : > { %v6588_v8 = vadd.f32 %v6584_v7, %v297_v6 }
 0x429   : > { %6590 = vst [vmem:[#allocation2 + $0x8] sm:$0xff] %v6588_v8 }
 0x42a   : > { %v10215_v23 = vld [vmem:[%s12767_s3 + $0xe4] ss:$16 sps:$4 sm:$0xff]   ;;  %v10219_v22 = vld [vmem:[%s12767_s3 + $0xe0] ss:$16 sps:$4 sm:$0xff]   ;;  %v6601_v58 = vsub.s32 0, %v10757_v45  ;;  %v6605_v13 = vsub.s32 1, %v10757_v45 }
 0x42b   : > { %v10217_v9 = vld [vmem:[%s12767_s3 + $0x2e4] ss:$16 sps:$4 sm:$0xff]   ;;  %8281 = vmatprep.subr.bf16.mxu0 %v10215_v23  ;;  %v10220_v53 = vld [vmem:[%s12767_s3 + $0x2e0] ss:$16 sps:$4 sm:$0xff]   ;;  %v6609_v62 = vsub.s32 2, %v10757_v45  ;;  %v6613_v35 = vsub.s32 3, %v10757_v45 }
 0x42c   : > { %8322 = vmatprep.subr.bf16.mxu1 %v10217_v9  ;;  %v10221_v57 = vld [vmem:[%s12767_s3 + $0xc4] ss:$16 sps:$4 sm:$0xff]   ;;  %8282 = vmatpush1.bf16.msra.mxu0 %v10219_v22  ;;  %v10225_v15 = vld [vmem:[%s12767_s3 + $0xc0] ss:$16 sps:$4 sm:$0xff]  }
 0x42d   : > { %8323 = vmatpush1.bf16.msra.mxu1 %v10220_v53  ;;  %v10223_v11 = vld [vmem:[%s12767_s3 + $0x2c4] ss:$16 sps:$4 sm:$0xff]   ;;  %8283 = vmatprep.subr.bf16.mxu0 %v10221_v57  ;;  %v10226_v16 = vld [vmem:[%s12767_s3 + $0x2c0] ss:$16 sps:$4 sm:$0xff]  }
 0x42e   : > { %8324 = vmatprep.subr.bf16.mxu1 %v10223_v11  ;;  %v10227_v33 = vld [vmem:[%s12767_s3 + $0xa4] ss:$16 sps:$4 sm:$0xff]   ;;  %v10231_v12 = vld [vmem:[%s12767_s3 + $0xa0] ss:$16 sps:$4 sm:$0xff]  }
 0x42f   : > { %v10229_v18 = vld [vmem:[%s12767_s3 + $0x2a4] ss:$16 sps:$4 sm:$0xff]   ;;  %v10232_v29 = vld [vmem:[%s12767_s3 + $0x2a0] ss:$16 sps:$4 sm:$0xff]  }
 0x430   : > { %8284 = vmatpush1.bf16.msra.mxu0 %v10225_v15  ;;  %v10233_v17 = vld [vmem:[%s12767_s3 + $0x84] ss:$16 sps:$4 sm:$0xff]   ;;  %v10237_v21 = vld [vmem:[%s12767_s3 + $0x80] ss:$16 sps:$4 sm:$0xff]  }
 0x431   : > { %8325 = vmatpush1.bf16.msra.mxu1 %v10226_v16  ;;  %8285 = vmatprep.subr.bf16.mxu0 %v10227_v33  ;;  %v10235_v4 = vld [vmem:[%s12767_s3 + $0x284] ss:$16 sps:$4 sm:$0xff]   ;;  %v10238_v25 = vld [vmem:[%s12767_s3 + $0x280] ss:$16 sps:$4 sm:$0xff]  }
 0x432   : > { %8326 = vmatprep.subr.bf16.mxu1 %v10229_v18  ;;  %v10239_v27 = vld [vmem:[%s12767_s3 + $0x64] ss:$16 sps:$4 sm:$0xff]   ;;  %v10243_v28 = vld [vmem:[%s12767_s3 + $0x60] ss:$16 sps:$4 sm:$0xff]  }
 0x433   : > { %v10241_v24 = vld [vmem:[%s12767_s3 + $0x264] ss:$16 sps:$4 sm:$0xff]   ;;  %v10244_v32 = vld [vmem:[%s12767_s3 + $0x260] ss:$16 sps:$4 sm:$0xff]  }
 0x434   : > { %8286 = vmatpush1.bf16.msra.mxu0 %v10231_v12  ;;  %v10245_v2 = vld [vmem:[%s12767_s3 + $0x44] ss:$16 sps:$4 sm:$0xff]   ;;  %v10249_v38 = vld [vmem:[%s12767_s3 + $0x40] ss:$16 sps:$4 sm:$0xff]  }
 0x435   : > { %8327 = vmatpush1.bf16.msra.mxu1 %v10232_v29  ;;  %8287 = vmatprep.subr.bf16.mxu0 %v10233_v17  ;;  %v10247_v36 = vld [vmem:[%s12767_s3 + $0x244] ss:$16 sps:$4 sm:$0xff]   ;;  %v10250_v20 = vld [vmem:[%s12767_s3 + $0x240] ss:$16 sps:$4 sm:$0xff]  }
 0x436   : > { %8328 = vmatprep.subr.bf16.mxu1 %v10235_v4  ;;  %v10251_v34 = vld [vmem:[%s12767_s3 + $0x24] ss:$16 sps:$4 sm:$0xff]   ;;  %v10255_v31 = vld [vmem:[%s12767_s3 + $0x20] ss:$16 sps:$4 sm:$0xff]  }
 0x437   : > { %v10253_v30 = vld [vmem:[%s12767_s3 + $0x224] ss:$16 sps:$4 sm:$0xff]   ;;  %v10256_v50 = vld [vmem:[%s12767_s3 + $0x220] ss:$16 sps:$4 sm:$0xff]  }
 0x438   : > { %8288 = vmatpush1.bf16.msra.mxu0 %v10237_v21  ;;  %v10257_v41 = vld [vmem:[%s12767_s3 + $0x4] ss:$16 sps:$4 sm:$0xff]   ;;  %v10261_v42 = vld [vmem:[%s12767_s3] ss:$16 sps:$4 sm:$0xff]  }
 0x439   : > { %8329 = vmatpush1.bf16.msra.mxu1 %v10238_v25  ;;  %8289 = vmatprep.subr.bf16.mxu0 %v10239_v27  ;;  %v10259_v51 = vld [vmem:[%s12767_s3 + $0x204] ss:$16 sps:$4 sm:$0xff]   ;;  %v10262_v14 = vld [vmem:[%s12767_s3 + $0x200] ss:$16 sps:$4 sm:$0xff]  }
 0x43a   : > { %8330 = vmatprep.subr.bf16.mxu1 %v10241_v24  ;;  %v10263_v39 = vld [vmem:[%s12767_s3 + $0x1e4] ss:$16 sps:$4 sm:$0xff]   ;;  %v10267_v59 = vld [vmem:[%s12767_s3 + $0x1e0] ss:$16 sps:$4 sm:$0xff]  }
 0x43b   : > { %v10265_v26 = vld [vmem:[%s12767_s3 + $0x3e4] ss:$16 sps:$4 sm:$0xff]   ;;  %v10268_v43 = vld [vmem:[%s12767_s3 + $0x3e0] ss:$16 sps:$4 sm:$0xff]  }
 0x43c   : > { %8290 = vmatpush1.bf16.msra.mxu0 %v10243_v28  ;;  %v10269_v49 = vld [vmem:[%s12767_s3 + $0x1c4] ss:$16 sps:$4 sm:$0xff]   ;;  %v10273_v10 = vld [vmem:[%s12767_s3 + $0x1c0] ss:$16 sps:$4 sm:$0xff]  }
 0x43d   : > { %8331 = vmatpush1.bf16.msra.mxu1 %v10244_v32  ;;  %8291 = vmatprep.subr.bf16.mxu0 %v10245_v2  ;;  %v10271_v44 = vld [vmem:[%s12767_s3 + $0x3c4] ss:$16 sps:$4 sm:$0xff]   ;;  %v10274_v46 = vld [vmem:[%s12767_s3 + $0x3c0] ss:$16 sps:$4 sm:$0xff]  }
 0x43e   : > { %8332 = vmatprep.subr.bf16.mxu1 %v10247_v36  ;;  %v10275_v0 = vld [vmem:[%s12767_s3 + $0x1a4] ss:$16 sps:$4 sm:$0xff]   ;;  %v10279_v55 = vld [vmem:[%s12767_s3 + $0x1a0] ss:$16 sps:$4 sm:$0xff]  }
 0x43f   : > { %v10277_v52 = vld [vmem:[%s12767_s3 + $0x3a4] ss:$16 sps:$4 sm:$0xff]   ;;  %v10280_v40 = vld [vmem:[%s12767_s3 + $0x3a0] ss:$16 sps:$4 sm:$0xff]  }
 0x440   : > { %8292 = vmatpush1.bf16.msra.mxu0 %v10249_v38  ;;  %v10281_v61 = vld [vmem:[%s12767_s3 + $0x184] ss:$16 sps:$4 sm:$0xff]   ;;  %v10285_v19 = vld [vmem:[%s12767_s3 + $0x180] ss:$16 sps:$4 sm:$0xff]  }
 0x441   : > { %8333 = vmatpush1.bf16.msra.mxu1 %v10250_v20  ;;  %8293 = vmatprep.subr.bf16.mxu0 %v10251_v34  ;;  %v10283_v54 = vld [vmem:[%s12767_s3 + $0x384] ss:$16 sps:$4 sm:$0xff]   ;;  %v10286_v3 = vld [vmem:[%s12767_s3 + $0x380] ss:$16 sps:$4 sm:$0xff]  }
 0x442   : > { %8334 = vmatprep.subr.bf16.mxu1 %v10253_v30  ;;  %v11932_v1 = vld [vmem:[%s12766_s2] sm:$0xff] }
 0x443   : > { %v6602_v5 = vrot.slane %v11932_v1, %v6601_v58  ;;  %v6606_v60 = vrot.slane %v11932_v1, %v6605_v13  ;;  %v6610_v47 = vrot.slane %v11932_v1, %v6609_v62  ;;  %v10287_v56 = vld [vmem:[%s12767_s3 + $0x164] ss:$16 sps:$4 sm:$0xff]   ;;  %v6614_v63 = vrot.slane %v11932_v1, %v6613_v35  ;;  %v10291_v8 = vld [vmem:[%s12767_s3 + $0x160] ss:$16 sps:$4 sm:$0xff]  }
 0x444   : > { %8294 = vmatpush1.bf16.msra.mxu0 %v10255_v31  ;;  %v10289_v48 = vld [vmem:[%s12767_s3 + $0x364] ss:$16 sps:$4 sm:$0xff]   ;;  %v10292_v23 = vld [vmem:[%s12767_s3 + $0x360] ss:$16 sps:$4 sm:$0xff]  }
 0x445   : > { %8335 = vmatpush1.bf16.msra.mxu1 %v10256_v50  ;;  %8295 = vmatprep.subr.bf16.mxu0 %v10257_v41  ;;  %v6631_v6 = vcombine.low %v6602_v5, %v6606_v60  ;;  %v6632_v7 = vcombine.low %v6610_v47, %v6614_v63  ;;  %v10293_v22 = vld [vmem:[%s12767_s3 + $0x144] ss:$16 sps:$4 sm:$0xff]   ;;  %v10297_v16 = vld [vmem:[%s12767_s3 + $0x140] ss:$16 sps:$4 sm:$0xff]  }
 0x446   : > { %8336 = vmatprep.subr.bf16.mxu1 %v10259_v51  ;;  %v10295_v53 = vld [vmem:[%s12767_s3 + $0x344] ss:$16 sps:$4 sm:$0xff]   ;;  %v10298_v33 = vld [vmem:[%s12767_s3 + $0x340] ss:$16 sps:$4 sm:$0xff]  }
 0x447   : > { %v6639_v9 = vrot.slane %v6631_v6, %v11537_v37  ;;  %v6646_v57 = vrot.slane %v6632_v7, %v11537_v37  ;;  %v6595_v11 = vld [vmem:[#allocation2] sm:$0xff] }
 0x448   : > { %8296 = vmatpush1.bf16.msra.mxu0 %v10261_v42  ;;  %v10299_v18 = vld [vmem:[%s12767_s3 + $0x124] ss:$16 sps:$4 sm:$0xff]   ;;  %v10303_v4 = vld [vmem:[%s12767_s3 + $0x120] ss:$16 sps:$4 sm:$0xff]  }
 0x449   : > { %8337 = vmatpush1.bf16.msra.mxu1 %v10262_v14  ;;  %8297 = vmatprep.subr.bf16.mxu0 %v10263_v39  ;;  %v6647_v15 = vcombine.low %v6639_v9, %v6646_v57  ;;  %v10301_v12 = vld [vmem:[%s12767_s3 + $0x324] ss:$16 sps:$4 sm:$0xff]   ;;  %v10304_v21 = vld [vmem:[%s12767_s3 + $0x320] ss:$16 sps:$4 sm:$0xff]  }
 0x44a   : > { %8338 = vmatprep.subr.bf16.mxu1 %v10265_v26  ;;  %v10305_v25 = vld [vmem:[%s12767_s3 + $0x104] ss:$16 sps:$4 sm:$0xff]   ;;  %v10309_v36 = vld [vmem:[%s12767_s3 + $0x100] ss:$16 sps:$4 sm:$0xff]  }
 0x44b   : > { %v6667_v29 = vadd.f32 %v6647_v15, %v6595_v11  ;;  %v10307_v27 = vld [vmem:[%s12767_s3 + $0x304] ss:$16 sps:$4 sm:$0xff]   ;;  %v10310_v38 = vld [vmem:[%s12767_s3 + $0x300] ss:$16 sps:$4 sm:$0xff]  }
 0x44c   : > { %8298 = vmatpush2.bf16.msra.mxu0 %v10267_v59  ;;  %v10313_v30 = vld [vmem:[%s12767_s3 + $0x4e4] ss:$16 sps:$4 sm:$0xff]   ;;  %v10311_v42 = vld [vmem:[%s12767_s3 + $0x4e0] ss:$16 sps:$4 sm:$0xff]   ;;  %v6617_v59 = vsub.s32 4, %v10757_v45 }
 0x44d   : > { %8339 = vmatpush2.bf16.msra.mxu1 %v10268_v43  ;;  %8299 = vmatprep.subr.bf16.mxu0 %v10269_v49  ;;  %v6669_v17 = vmax.f32 %v6667_v29, 0.0  ;;  %v10316_v31 = vld [vmem:[%s12767_s3 + $0x6e4] ss:$16 sps:$4 sm:$0xff]   ;;  %v10314_v14 = vld [vmem:[%s12767_s3 + $0x6e0] ss:$16 sps:$4 sm:$0xff]   ;;  %v6621_v43 = vsub.s32 5, %v10757_v45 }
 0x44e   : > { %8340 = vmatprep.subr.bf16.mxu1 %v10271_v44  ;;  %v10319_v39 = vld [vmem:[%s12767_s3 + $0x4c4] ss:$16 sps:$4 sm:$0xff]   ;;  %v6625_v49 = vsub.s32 6, %v10757_v45  ;;  %v6629_v44 = vsub.s32 7, %v10757_v45  ;;  %v10338_v9 = vld [vmem:[%s12767_s3 + $0x660] ss:$16 sps:$4 sm:$0xff]  }
 0x44f   : > { %v6680_v24 = vrot.slane %v6669_v17, %v11537_v37  ;;  %v6673_v28 = vcombine.high %v6669_v17, %v6669_v17  ;;  %v10322_v26 = vld [vmem:[%s12767_s3 + $0x6c4] ss:$16 sps:$4 sm:$0xff]   ;;  %v10341_v11 = vld [vmem:[%s12767_s3 + $0x440] ss:$16 sps:$4 sm:$0xff]  }
 0x450   : > { %8300 = vmatpush2.bf16.msra.mxu0 %v10273_v10  ;;  %v10317_v10 = vld [vmem:[%s12767_s3 + $0x4c0] ss:$16 sps:$4 sm:$0xff]   ;;  %v10331_v5 = vld [vmem:[%s12767_s3 + $0x484] ss:$16 sps:$4 sm:$0xff]  }
 0x451   : > { %8341 = vmatpush2.bf16.msra.mxu1 %v10274_v46  ;;  %8301 = vmatprep.subr.bf16.mxu0 %v10275_v0  ;;  %v6688_v32 = vcombine.high %v6680_v24, %v6680_v24  ;;  %v6687_v2 = vrot.slane %v6673_v28, %v11537_v37  ;;  %v12015_v41 = vpack.c.bf16 %v6680_v24, %v6680_v24  ;;  %v10320_v46 = vld [vmem:[%s12767_s3 + $0x6c0] ss:$16 sps:$4 sm:$0xff]   ;;  %v10325_v0 = vld [vmem:[%s12767_s3 + $0x4a4] ss:$16 sps:$4 sm:$0xff]  }
 0x452   : > { %8342 = vmatprep.subr.bf16.mxu1 %v10277_v52  ;;  %v10328_v52 = vld [vmem:[%s12767_s3 + $0x6a4] ss:$16 sps:$4 sm:$0xff]   ;;  %v10344_v15 = vld [vmem:[%s12767_s3 + $0x640] ss:$16 sps:$4 sm:$0xff]  }
 0x453   : > { %v12004_v20 = vpack.c.bf16 %v6688_v32, %v6688_v32  ;;  %v6689_v34 = vcombine.high %v6687_v2, %v6687_v2  ;;  %v12017_v51 = vpack.c.bf16 %v6687_v2, %v6687_v2  ;;  %v10337_v63 = vld [vmem:[%s12767_s3 + $0x464] ss:$16 sps:$4 sm:$0xff]   ;;  %v10350_v17 = vld [vmem:[%s12767_s3 + $0x620] ss:$16 sps:$4 sm:$0xff]  }
 0x454   : > { %8302 = vmatpush2.bf16.msra.mxu0 %v10279_v55  ;;  %v6618_v55 = vrot.slane %v11932_v1, %v6617_v59  ;;  %v10340_v6 = vld [vmem:[%s12767_s3 + $0x664] ss:$16 sps:$4 sm:$0xff]   ;;  %v10356_v32 = vld [vmem:[%s12767_s3 + $0x600] ss:$16 sps:$4 sm:$0xff]  }
 0x455   : > { %8343 = vmatpush2.bf16.msra.mxu1 %v10280_v40  ;;  %8303 = vmatprep.subr.bf16.mxu0 %v10281_v61  ;;  %v12013_v50 = vpack.c.bf16 %v6689_v34, %v6689_v34  ;;  %v6622_v40 = vrot.slane %v11932_v1, %v6621_v43  ;;  %v6626_v61 = vrot.slane %v11932_v1, %v6625_v49  ;;  %v10361_v2 = vld [vmem:[%s12767_s3 + $0x5e4] ss:$16 sps:$4 sm:$0xff]   ;;  %v10365_v59 = vld [vmem:[%s12767_s3 + $0x5c0] ss:$16 sps:$4 sm:$0xff]  }
 0x456   : > { %8344 = vmatprep.subr.bf16.mxu1 %v10283_v54  ;;  %8313 = vmatprep.mubr.bf16.mxu0 %v12004_v20  ;;  %v6630_v54 = vrot.slane %v11932_v1, %v6629_v44  ;;  %v10334_v1 = vld [vmem:[%s12767_s3 + $0x684] ss:$16 sps:$4 sm:$0xff]   ;;  %v10368_v43 = vld [vmem:[%s12767_s3 + $0x7c0] ss:$16 sps:$4 sm:$0xff]  }
 0x457   : > { %8354 = vmatprep.mubr.bf16.mxu1 %v12013_v50  ;;  %v6648_v60 = vcombine.low %v6618_v55, %v6622_v40  ;;  %v10373_v49 = vld [vmem:[%s12767_s3 + $0x5a4] ss:$16 sps:$4 sm:$0xff]   ;;  %v10377_v55 = vld [vmem:[%s12767_s3 + $0x580] ss:$16 sps:$4 sm:$0xff]  }
 0x458   : > { %8304 = vmatpush2.bf16.msra.mxu0 %v10285_v19  ;;  %v10323_v19 = vld [vmem:[%s12767_s3 + $0x4a0] ss:$16 sps:$4 sm:$0xff]   ;;  %v6649_v47 = vcombine.low %v6626_v61, %v6630_v54  ;;  %v10376_v44 = vld [vmem:[%s12767_s3 + $0x7a4] ss:$16 sps:$4 sm:$0xff]  }
 0x459   : > { %8345 = vmatpush2.bf16.msra.mxu1 %v10286_v3  ;;  %8305 = vmatprep.subr.bf16.mxu0 %v10287_v56  ;;  %v10326_v3 = vld [vmem:[%s12767_s3 + $0x6a0] ss:$16 sps:$4 sm:$0xff]   ;;  %v6656_v7 = vrot.slane %v6648_v60, %v11537_v37  ;;  %v10385_v61 = vld [vmem:[%s12767_s3 + $0x564] ss:$16 sps:$4 sm:$0xff]  }
 0x45a   : > { %8346 = vmatprep.subr.bf16.mxu1 %v10289_v48  ;;  %v10329_v56 = vld [vmem:[%s12767_s3 + $0x480] ss:$16 sps:$4 sm:$0xff]   ;;  %v10388_v54 = vld [vmem:[%s12767_s3 + $0x764] ss:$16 sps:$4 sm:$0xff]  }
 0x45b   : > { %v10332_v48 = vld [vmem:[%s12767_s3 + $0x680] ss:$16 sps:$4 sm:$0xff]  }
 0x45c   : > { %8306 = vmatpush2.bf16.msra.mxu0 %v10291_v8  ;;  %v6663_v8 = vrot.slane %v6649_v47, %v11537_v37  ;;  %v10380_v40 = vld [vmem:[%s12767_s3 + $0x780] ss:$16 sps:$4 sm:$0xff]  }
 0x45d   : > { %8347 = vmatpush2.bf16.msra.mxu1 %v10292_v23  ;;  %8307 = vmatprep.subr.bf16.mxu0 %v10293_v22  ;;  %v10335_v23 = vld [vmem:[%s12767_s3 + $0x460] ss:$16 sps:$4 sm:$0xff]   ;;  %v10343_v22 = vld [vmem:[%s12767_s3 + $0x444] ss:$16 sps:$4 sm:$0xff]  }
 0x45e   : > { %8348 = vmatprep.subr.bf16.mxu1 %v10295_v53  ;;  %v10346_v53 = vld [vmem:[%s12767_s3 + $0x644] ss:$16 sps:$4 sm:$0xff]   ;;  %v6664_v57 = vcombine.low %v6656_v7, %v6663_v8  ;;  %v10389_v60 = vld [vmem:[%s12767_s3 + $0x540] ss:$16 sps:$4 sm:$0xff]  }
 0x45f   : > { %v10392_v47 = vld [vmem:[%s12767_s3 + $0x740] ss:$16 sps:$4 sm:$0xff]   ;;  %v10403_v7 = vld [vmem:[%s12767_s3 + $0x504] ss:$16 sps:$4 sm:$0xff]  }
 0x460   : > { %8308 = vmatpush2.bf16.msra.mxu0 %v10297_v16  ;;  %v10349_v16 = vld [vmem:[%s12767_s3 + $0x424] ss:$16 sps:$4 sm:$0xff]  }
 0x461   : > { %8349 = vmatpush2.bf16.msra.mxu1 %v10298_v33  ;;  %8309 = vmatprep.subr.bf16.mxu0 %v10299_v18  ;;  %v10352_v33 = vld [vmem:[%s12767_s3 + $0x624] ss:$16 sps:$4 sm:$0xff]   ;;  %v6596_v18 = vld [vmem:[#allocation2 + $0x8] sm:$0xff] }
 0x462   : > { %8350 = vmatprep.subr.bf16.mxu1 %v10301_v12  ;;  %v10347_v12 = vld [vmem:[%s12767_s3 + $0x420] ss:$16 sps:$4 sm:$0xff]   ;;  %v6668_v29 = vadd.f32 %v6664_v57, %v6596_v18  ;;  %v10406_v8 = vld [vmem:[%s12767_s3 + $0x704] ss:$16 sps:$4 sm:$0xff]   ;;  %v10418_v18 = vld [vmem:[%s12767_s3 + $0x2cc] ss:$16 sps:$4 sm:$0xff]  }
 0x464   : > { %8310 = vmatpush2.bf16.msra.mxu0 %v10303_v4  ;;  %v10355_v4 = vld [vmem:[%s12767_s3 + $0x404] ss:$16 sps:$4 sm:$0xff]  }
 0x465   : > { %8351 = vmatpush2.bf16.msra.mxu1 %v10304_v21  ;;  %8311 = vmatprep.subr.bf16.mxu0 %v10305_v25  ;;  %v10358_v21 = vld [vmem:[%s12767_s3 + $0x604] ss:$16 sps:$4 sm:$0xff]   ;;  %v6670_v25 = vmax.f32 %v6668_v29, 0.0  ;;  %v10416_v29 = vld [vmem:[%s12767_s3 + $0x2c8] ss:$16 sps:$4 sm:$0xff]  }
 0x466   : > { %8352 = vmatprep.subr.bf16.mxu1 %v10307_v27  ;;  %v10353_v27 = vld [vmem:[%s12767_s3 + $0x400] ss:$16 sps:$4 sm:$0xff]  }
 0x467   : > { %v12120_v24 = vrot.slane %v6670_v25, %v11537_v37  ;;  %v6690_v28 = vcombine.high %v6670_v25, %v6670_v25  ;;  %v10422_v25 = vld [vmem:[%s12767_s3 + $0x2a8] ss:$16 sps:$4 sm:$0xff]  }
 0x468   : > { %8312 = vmatpush2.bf16.msra.mxu0 %v10309_v36  ;;  %v10364_v36 = vld [vmem:[%s12767_s3 + $0x7e4] ss:$16 sps:$4 sm:$0xff]  }
 0x469   : > { %8353 = vmatpush2.bf16.msra.mxu1 %v10310_v38  ;;  %8363 = vmatprep.subr.bf16.mxu0 %v10313_v30  ;;  %v6705_v38 = vcombine.high %v12120_v24, %v12120_v24  ;;  %v12134_v34 = vrot.slane %v6690_v28, %v11537_v37  ;;  %v10359_v30 = vld [vmem:[%s12767_s3 + $0x5e0] ss:$16 sps:$4 sm:$0xff]   ;;  %v10367_v37 = vld [vmem:[%s12767_s3 + $0x5c4] ss:$16 sps:$4 sm:$0xff]   ;;  %v12242_v57 = vpack.c.bf16 %v12120_v24, %v12120_v24  ;;  %v10428_v24 = vld [vmem:[%s12767_s3 + $0x288] ss:$16 sps:$4 sm:$0xff]  }
 0x46a   : > { %8404 = vmatprep.subr.bf16.mxu1 %v10316_v31  ;;  %v10433_v28 = vld [vmem:[%s12767_s3 + $0x6c] ss:$16 sps:$4 sm:$0xff]  }
 0x46b   : > { %8314 = vmatmul.mubr.bf16.vlgmr.msra.gmra.mxu0 %v12015_v41  ;;  %v12139_v31 = vpack.c.bf16 %v6705_v38, %v6705_v38  ;;  %v10439_v38 = vld [vmem:[%s12767_s3 + $0x4c] ss:$16 sps:$4 sm:$0xff]  }
 0x46c   : > { %8355 = vmatmul.mubr.bf16.vlgmr.msra.gmra.mxu1 %v12017_v51  ;;  %8364 = vmatpush1.bf16.msra.mxu0 %v10311_v42  ;;  %v6706_v42 = vcombine.high %v12134_v34, %v12134_v34 }
 0x46d   : > { %8405 = vmatpush1.bf16.msra.mxu1 %v10314_v14  ;;  %8365 = vmatprep.subr.bf16.mxu0 %v10319_v39  ;;  %v10362_v14 = vld [vmem:[%s12767_s3 + $0x7e0] ss:$16 sps:$4 sm:$0xff]   ;;  %v10370_v39 = vld [vmem:[%s12767_s3 + $0x7c4] ss:$16 sps:$4 sm:$0xff]  }
 0x46e   : > { %8406 = vmatprep.subr.bf16.mxu1 %v10322_v26  ;;  %v12152_v26 = vpack.c.bf16 %v6706_v42, %v6706_v42  ;;  %8395 = vmatprep.mubr.bf16.mxu0 %v12139_v31  ;;  %v10440_v42 = vld [vmem:[%s12767_s3 + $0x248] ss:$16 sps:$4 sm:$0xff]  }
 0x470   : > { %8366 = vmatpush1.bf16.msra.mxu0 %v10317_v10  ;;  %8436 = vmatprep.mubr.bf16.mxu1 %v12152_v26  ;;  %v10371_v10 = vld [vmem:[%s12767_s3 + $0x5a0] ss:$16 sps:$4 sm:$0xff]  }
 0x471   : > { %8407 = vmatpush1.bf16.msra.mxu1 %v10320_v46  ;;  %8367 = vmatprep.subr.bf16.mxu0 %v10325_v0  ;;  %v10374_v46 = vld [vmem:[%s12767_s3 + $0x7a0] ss:$16 sps:$4 sm:$0xff]   ;;  %v10379_v0 = vld [vmem:[%s12767_s3 + $0x584] ss:$16 sps:$4 sm:$0xff]  }
 0x472   : > { %8408 = vmatprep.subr.bf16.mxu1 %v10328_v52  ;;  %v10382_v52 = vld [vmem:[%s12767_s3 + $0x784] ss:$16 sps:$4 sm:$0xff]  }
 0x474   : > { %8368 = vmatpush1.bf16.msra.mxu0 %v10323_v19  ;;  %v10383_v19 = vld [vmem:[%s12767_s3 + $0x560] ss:$16 sps:$4 sm:$0xff]  }
 0x475   : > { %8409 = vmatpush1.bf16.msra.mxu1 %v10326_v3  ;;  %8369 = vmatprep.subr.bf16.mxu0 %v10331_v5  ;;  %v10386_v3 = vld [vmem:[%s12767_s3 + $0x760] ss:$16 sps:$4 sm:$0xff]   ;;  %v10391_v5 = vld [vmem:[%s12767_s3 + $0x544] ss:$16 sps:$4 sm:$0xff]  }
 0x476   : > { %8410 = vmatprep.subr.bf16.mxu1 %v10334_v1  ;;  %v10394_v1 = vld [vmem:[%s12767_s3 + $0x744] ss:$16 sps:$4 sm:$0xff]  }
 0x478   : > { %8370 = vmatpush1.bf16.msra.mxu0 %v10329_v56  ;;  %v10397_v56 = vld [vmem:[%s12767_s3 + $0x524] ss:$16 sps:$4 sm:$0xff]  }
 0x479   : > { %8411 = vmatpush1.bf16.msra.mxu1 %v10332_v48  ;;  %8371 = vmatprep.subr.bf16.mxu0 %v10337_v63  ;;  %v10400_v48 = vld [vmem:[%s12767_s3 + $0x724] ss:$16 sps:$4 sm:$0xff]   ;;  %v10395_v63 = vld [vmem:[%s12767_s3 + $0x520] ss:$16 sps:$4 sm:$0xff]  }
 0x47a   : > { %8412 = vmatprep.subr.bf16.mxu1 %v10340_v6  ;;  %v10398_v6 = vld [vmem:[%s12767_s3 + $0x720] ss:$16 sps:$4 sm:$0xff]  }
 0x47c   : > { %8372 = vmatpush1.bf16.msra.mxu0 %v10335_v23  ;;  %v10401_v23 = vld [vmem:[%s12767_s3 + $0x500] ss:$16 sps:$4 sm:$0xff]  }
 0x47d   : > { %8413 = vmatpush1.bf16.msra.mxu1 %v10338_v9  ;;  %8373 = vmatprep.subr.bf16.mxu0 %v10343_v22  ;;  %v10404_v9 = vld [vmem:[%s12767_s3 + $0x700] ss:$16 sps:$4 sm:$0xff]   ;;  %v10409_v22 = vld [vmem:[%s12767_s3 + $0xec] ss:$16 sps:$4 sm:$0xff]  }
 0x47e   : > { %8414 = vmatprep.subr.bf16.mxu1 %v10346_v53  ;;  %v10412_v53 = vld [vmem:[%s12767_s3 + $0x2ec] ss:$16 sps:$4 sm:$0xff]  }
 0x480   : > { %8374 = vmatpush1.bf16.msra.mxu0 %v10341_v11  ;;  %v12246_v11 = vpack.c.bf16 %v12134_v34, %v12134_v34  ;;  %v10442_v34 = vld [vmem:[%s12767_s3 + $0x24c] ss:$16 sps:$4 sm:$0xff]  }
 0x481   : > { %8415 = vmatpush1.bf16.msra.mxu1 %v10344_v15  ;;  %8375 = vmatprep.subr.bf16.mxu0 %v10349_v16  ;;  %v10407_v15 = vld [vmem:[%s12767_s3 + $0xe8] ss:$16 sps:$4 sm:$0xff]  }
 0x482   : > { %8416 = vmatprep.subr.bf16.mxu1 %v10352_v33  ;;  %v10410_v16 = vld [vmem:[%s12767_s3 + $0x2e8] ss:$16 sps:$4 sm:$0xff]   ;;  %v10415_v33 = vld [vmem:[%s12767_s3 + $0xcc] ss:$16 sps:$4 sm:$0xff]  }
 0x484   : > { %8376 = vmatpush1.bf16.msra.mxu0 %v10347_v12  ;;  %v10413_v12 = vld [vmem:[%s12767_s3 + $0xc8] ss:$16 sps:$4 sm:$0xff]  }
 0x485   : > { %8417 = vmatpush1.bf16.msra.mxu1 %v10350_v17  ;;  %8377 = vmatprep.subr.bf16.mxu0 %v10355_v4  ;;  %v10421_v17 = vld [vmem:[%s12767_s3 + $0xac] ss:$16 sps:$4 sm:$0xff]  }
 0x486   : > { %8418 = vmatprep.subr.bf16.mxu1 %v10358_v21  ;;  %v10424_v4 = vld [vmem:[%s12767_s3 + $0x2ac] ss:$16 sps:$4 sm:$0xff]   ;;  %v10419_v21 = vld [vmem:[%s12767_s3 + $0xa8] ss:$16 sps:$4 sm:$0xff]  }
 0x488   : > { %8378 = vmatpush1.bf16.msra.mxu0 %v10353_v27  ;;  %v10427_v27 = vld [vmem:[%s12767_s3 + $0x8c] ss:$16 sps:$4 sm:$0xff]  }
 0x489   : > { %8419 = vmatpush1.bf16.msra.mxu1 %v10356_v32  ;;  %8379 = vmatprep.subr.bf16.mxu0 %v10361_v2  ;;  %v10436_v32 = vld [vmem:[%s12767_s3 + $0x26c] ss:$16 sps:$4 sm:$0xff]   ;;  %v10431_v2 = vld [vmem:[%s12767_s3 + $0x68] ss:$16 sps:$4 sm:$0xff]  }
 0x48a   : > { %8420 = vmatprep.subr.bf16.mxu1 %v10364_v36  ;;  %v10434_v36 = vld [vmem:[%s12767_s3 + $0x268] ss:$16 sps:$4 sm:$0xff]  }
 0x48c   : > { %8380 = vmatpush2.bf16.msra.mxu0 %v10359_v30  ;;  %v10437_v30 = vld [vmem:[%s12767_s3 + $0x48] ss:$16 sps:$4 sm:$0xff]  }
 0x48d   : > { %8421 = vmatpush2.bf16.msra.mxu1 %v10362_v14  ;;  %8381 = vmatprep.subr.bf16.mxu0 %v10367_v37  ;;  %v10445_v14 = vld [vmem:[%s12767_s3 + $0x2c] ss:$16 sps:$4 sm:$0xff]  }
 0x48e   : > { %8422 = vmatprep.subr.bf16.mxu1 %v10370_v39  ;;  %v10448_v37 = vld [vmem:[%s12767_s3 + $0x22c] ss:$16 sps:$4 sm:$0xff]   ;;  %v10443_v39 = vld [vmem:[%s12767_s3 + $0x28] ss:$16 sps:$4 sm:$0xff]  }
 0x490   : > { %8382 = vmatpush2.bf16.msra.mxu0 %v10365_v59  ;;  %v10446_v59 = vld [vmem:[%s12767_s3 + $0x228] ss:$16 sps:$4 sm:$0xff]  }
 0x491   : > { %8423 = vmatpush2.bf16.msra.mxu1 %v10368_v43  ;;  %8383 = vmatprep.subr.bf16.mxu0 %v10373_v49  ;;  %v10451_v43 = vld [vmem:[%s12767_s3 + $0xc] ss:$16 sps:$4 sm:$0xff]  }
 0x492   : > { %8424 = vmatprep.subr.bf16.mxu1 %v10376_v44  ;;  %v10454_v49 = vld [vmem:[%s12767_s3 + $0x20c] ss:$16 sps:$4 sm:$0xff]   ;;  %v10449_v44 = vld [vmem:[%s12767_s3 + $0x8] ss:$16 sps:$4 sm:$0xff]  }
 0x494   : > { %8384 = vmatpush2.bf16.msra.mxu0 %v10371_v10  ;;  %v10452_v10 = vld [vmem:[%s12767_s3 + $0x208] ss:$16 sps:$4 sm:$0xff]  }
 0x495   : > { %8425 = vmatpush2.bf16.msra.mxu1 %v10374_v46  ;;  %8385 = vmatprep.subr.bf16.mxu0 %v10379_v0  ;;  %v10457_v46 = vld [vmem:[%s12767_s3 + $0x1ec] ss:$16 sps:$4 sm:$0xff]  }
 0x496   : > { %8426 = vmatprep.subr.bf16.mxu1 %v10382_v52  ;;  %v10460_v0 = vld [vmem:[%s12767_s3 + $0x3ec] ss:$16 sps:$4 sm:$0xff]   ;;  %v10455_v52 = vld [vmem:[%s12767_s3 + $0x1e8] ss:$16 sps:$4 sm:$0xff]  }
 0x498   : > { %8386 = vmatpush2.bf16.msra.mxu0 %v10377_v55  ;;  %v10458_v55 = vld [vmem:[%s12767_s3 + $0x3e8] ss:$16 sps:$4 sm:$0xff]  }
 0x499   : > { %8427 = vmatpush2.bf16.msra.mxu1 %v10380_v40  ;;  %8387 = vmatprep.subr.bf16.mxu0 %v10385_v61  ;;  %v10463_v40 = vld [vmem:[%s12767_s3 + $0x1cc] ss:$16 sps:$4 sm:$0xff]  }
 0x49a   : > { %8428 = vmatprep.subr.bf16.mxu1 %v10388_v54  ;;  %v10466_v61 = vld [vmem:[%s12767_s3 + $0x3cc] ss:$16 sps:$4 sm:$0xff]   ;;  %v10461_v54 = vld [vmem:[%s12767_s3 + $0x1c8] ss:$16 sps:$4 sm:$0xff]  }
 0x49c   : > { %8388 = vmatpush2.bf16.msra.mxu0 %v10383_v19  ;;  %v10464_v19 = vld [vmem:[%s12767_s3 + $0x3c8] ss:$16 sps:$4 sm:$0xff]  }
 0x49d   : > { %8429 = vmatpush2.bf16.msra.mxu1 %v10386_v3  ;;  %8389 = vmatprep.subr.bf16.mxu0 %v10391_v5  ;;  %v10469_v3 = vld [vmem:[%s12767_s3 + $0x1ac] ss:$16 sps:$4 sm:$0xff]  }
 0x49e   : > { %8430 = vmatprep.subr.bf16.mxu1 %v10394_v1  ;;  %v10472_v5 = vld [vmem:[%s12767_s3 + $0x3ac] ss:$16 sps:$4 sm:$0xff]   ;;  %v10467_v1 = vld [vmem:[%s12767_s3 + $0x1a8] ss:$16 sps:$4 sm:$0xff]  }
 0x4a0   : > { %8390 = vmatpush2.bf16.msra.mxu0 %v10389_v60  ;;  %v10470_v60 = vld [vmem:[%s12767_s3 + $0x3a8] ss:$16 sps:$4 sm:$0xff]  }
 0x4a1   : > { %8431 = vmatpush2.bf16.msra.mxu1 %v10392_v47  ;;  %8391 = vmatprep.subr.bf16.mxu0 %v10397_v56  ;;  %v10475_v47 = vld [vmem:[%s12767_s3 + $0x18c] ss:$16 sps:$4 sm:$0xff]  }
 0x4a2   : > { %8432 = vmatprep.subr.bf16.mxu1 %v10400_v48  ;;  %v10478_v56 = vld [vmem:[%s12767_s3 + $0x38c] ss:$16 sps:$4 sm:$0xff]   ;;  %v10473_v48 = vld [vmem:[%s12767_s3 + $0x188] ss:$16 sps:$4 sm:$0xff]  }
 0x4a4   : > { %8392 = vmatpush2.bf16.msra.mxu0 %v10395_v63  ;;  %v10476_v63 = vld [vmem:[%s12767_s3 + $0x388] ss:$16 sps:$4 sm:$0xff]  }
 0x4a5   : > { %8433 = vmatpush2.bf16.msra.mxu1 %v10398_v6  ;;  %8393 = vmatprep.subr.bf16.mxu0 %v10403_v7  ;;  %v10481_v6 = vld [vmem:[%s12767_s3 + $0x16c] ss:$16 sps:$4 sm:$0xff]  }
 0x4a6   : > { %8434 = vmatprep.subr.bf16.mxu1 %v10406_v8  ;;  %v10484_v7 = vld [vmem:[%s12767_s3 + $0x36c] ss:$16 sps:$4 sm:$0xff]   ;;  %v10479_v8 = vld [vmem:[%s12767_s3 + $0x168] ss:$16 sps:$4 sm:$0xff]  }
 0x4a8   : > { %8394 = vmatpush2.bf16.msra.mxu0 %v10401_v23  ;;  %v10482_v23 = vld [vmem:[%s12767_s3 + $0x368] ss:$16 sps:$4 sm:$0xff]  }
 0x4a9   : > { %8435 = vmatpush2.bf16.msra.mxu1 %v10404_v9  ;;  %8445 = vmatprep.subr.bf16.mxu0 %v10409_v22  ;;  %v10487_v9 = vld [vmem:[%s12767_s3 + $0x14c] ss:$16 sps:$4 sm:$0xff]  }
 0x4aa   : > { %8486 = vmatprep.subr.bf16.mxu1 %v10412_v53  ;;  %v10490_v22 = vld [vmem:[%s12767_s3 + $0x34c] ss:$16 sps:$4 sm:$0xff]   ;;  %v10485_v53 = vld [vmem:[%s12767_s3 + $0x148] ss:$16 sps:$4 sm:$0xff]  }
 0x4ab   : > { %8396 = vmatmul.mubr.bf16.vlgmr.msra.gmra.mxu0 %v12242_v57 }
 0x4ac   : > { %8437 = vmatmul.mubr.bf16.vlgmr.msra.gmra.mxu1 %v12246_v11  ;;  %8446 = vmatpush1.bf16.msra.mxu0 %v10407_v15  ;;  %v10488_v15 = vld [vmem:[%s12767_s3 + $0x348] ss:$16 sps:$4 sm:$0xff]  }
 0x4ad   : > { %8487 = vmatpush1.bf16.msra.mxu1 %v10410_v16  ;;  %8447 = vmatprep.subr.bf16.mxu0 %v10415_v33  ;;  %v10493_v16 = vld [vmem:[%s12767_s3 + $0x12c] ss:$16 sps:$4 sm:$0xff]  }
 0x4ae   : > { %8488 = vmatprep.subr.bf16.mxu1 %v10418_v18  ;;  %8477 = vmatprep.mubr.bf16.mxu0 %v12004_v20  ;;  %v10430_v20 = vld [vmem:[%s12767_s3 + $0x28c] ss:$16 sps:$4 sm:$0xff]   ;;  %v10491_v18 = vld [vmem:[%s12767_s3 + $0x128] ss:$16 sps:$4 sm:$0xff]  }
 0x4af   : > { %8518 = vmatprep.mubr.bf16.mxu1 %v12013_v50  ;;  %v10425_v50 = vld [vmem:[%s12767_s3 + $0x88] ss:$16 sps:$4 sm:$0xff]   ;;  %v10496_v33 = vld [vmem:[%s12767_s3 + $0x32c] ss:$16 sps:$4 sm:$0xff]  }
 0x4b0   : > { %8448 = vmatpush1.bf16.msra.mxu0 %v10413_v12  ;;  %v10494_v12 = vld [vmem:[%s12767_s3 + $0x328] ss:$16 sps:$4 sm:$0xff]  }
 0x4b1   : > { %8489 = vmatpush1.bf16.msra.mxu1 %v10416_v29  ;;  %8449 = vmatprep.subr.bf16.mxu0 %v10421_v17  ;;  %v10499_v29 = vld [vmem:[%s12767_s3 + $0x10c] ss:$16 sps:$4 sm:$0xff]  }
 0x4b2   : > { %8490 = vmatprep.subr.bf16.mxu1 %v10424_v4  ;;  %v10502_v17 = vld [vmem:[%s12767_s3 + $0x30c] ss:$16 sps:$4 sm:$0xff]   ;;  %v10497_v4 = vld [vmem:[%s12767_s3 + $0x108] ss:$16 sps:$4 sm:$0xff]  }
 0x4b4   : > { %8450 = vmatpush1.bf16.msra.mxu0 %v10419_v21  ;;  %v10500_v21 = vld [vmem:[%s12767_s3 + $0x308] ss:$16 sps:$4 sm:$0xff]  }
 0x4b5   : > { %8491 = vmatpush1.bf16.msra.mxu1 %v10422_v25  ;;  %8451 = vmatprep.subr.bf16.mxu0 %v10427_v27  ;;  %v10505_v25 = vld [vmem:[%s12767_s3 + $0x4ec] ss:$16 sps:$4 sm:$0xff]  }
 0x4b6   : > { %8492 = vmatprep.subr.bf16.mxu1 %v10430_v20  ;;  %v10508_v27 = vld [vmem:[%s12767_s3 + $0x6ec] ss:$16 sps:$4 sm:$0xff]   ;;  %v10503_v20 = vld [vmem:[%s12767_s3 + $0x4e8] ss:$16 sps:$4 sm:$0xff]  }
 0x4b8   : > { %8452 = vmatpush1.bf16.msra.mxu0 %v10425_v50  ;;  %v10506_v50 = vld [vmem:[%s12767_s3 + $0x6e8] ss:$16 sps:$4 sm:$0xff]  }
 0x4b9   : > { %8493 = vmatpush1.bf16.msra.mxu1 %v10428_v24  ;;  %8453 = vmatprep.subr.bf16.mxu0 %v10433_v28  ;;  %v10511_v24 = vld [vmem:[%s12767_s3 + $0x4cc] ss:$16 sps:$4 sm:$0xff]  }
 0x4ba   : > { %8494 = vmatprep.subr.bf16.mxu1 %v10436_v32  ;;  %v10514_v28 = vld [vmem:[%s12767_s3 + $0x6cc] ss:$16 sps:$4 sm:$0xff]   ;;  %v10509_v32 = vld [vmem:[%s12767_s3 + $0x4c8] ss:$16 sps:$4 sm:$0xff]  }
 0x4bc   : > { %8454 = vmatpush1.bf16.msra.mxu0 %v10431_v2  ;;  %v10512_v2 = vld [vmem:[%s12767_s3 + $0x6c8] ss:$16 sps:$4 sm:$0xff]  }
 0x4bd   : > { %8495 = vmatpush1.bf16.msra.mxu1 %v10434_v36  ;;  %8455 = vmatprep.subr.bf16.mxu0 %v10439_v38  ;;  %v10517_v36 = vld [vmem:[%s12767_s3 + $0x4ac] ss:$16 sps:$4 sm:$0xff]  }
 0x4be   : > { %8496 = vmatprep.subr.bf16.mxu1 %v10442_v34  ;;  %v10520_v38 = vld [vmem:[%s12767_s3 + $0x6ac] ss:$16 sps:$4 sm:$0xff]  }
 0x4bf   : > { %v10523_v34 = vld [vmem:[%s12767_s3 + $0x48c] ss:$16 sps:$4 sm:$0xff]  }
 0x4c0   : > { %8456 = vmatpush1.bf16.msra.mxu0 %v10437_v30  ;;  %v10524_v30 = vld [vmem:[%s12767_s3 + $0x688] ss:$16 sps:$4 sm:$0xff]  }
 0x4c1   : > { %8497 = vmatpush1.bf16.msra.mxu1 %v10440_v42  ;;  %8457 = vmatprep.subr.bf16.mxu0 %v10445_v14  ;;  %v10529_v42 = vld [vmem:[%s12767_s3 + $0x46c] ss:$16 sps:$4 sm:$0xff]  }
 0x4c2   : > { %8498 = vmatprep.subr.bf16.mxu1 %v10448_v37  ;;  %v10532_v14 = vld [vmem:[%s12767_s3 + $0x66c] ss:$16 sps:$4 sm:$0xff]   ;;  %v10527_v37 = vld [vmem:[%s12767_s3 + $0x468] ss:$16 sps:$4 sm:$0xff]  }
 0x4c4   : > { %8458 = vmatpush1.bf16.msra.mxu0 %v10443_v39  ;;  %v10530_v39 = vld [vmem:[%s12767_s3 + $0x668] ss:$16 sps:$4 sm:$0xff]  }
 0x4c5   : > { %8499 = vmatpush1.bf16.msra.mxu1 %v10446_v59  ;;  %8459 = vmatprep.subr.bf16.mxu0 %v10451_v43  ;;  %v10535_v59 = vld [vmem:[%s12767_s3 + $0x44c] ss:$16 sps:$4 sm:$0xff]  }
 0x4c6   : > { %8500 = vmatprep.subr.bf16.mxu1 %v10454_v49  ;;  %v10538_v43 = vld [vmem:[%s12767_s3 + $0x64c] ss:$16 sps:$4 sm:$0xff]   ;;  %v10533_v49 = vld [vmem:[%s12767_s3 + $0x448] ss:$16 sps:$4 sm:$0xff]  }
 0x4c8   : > { %8460 = vmatpush1.bf16.msra.mxu0 %v10449_v44  ;;  %v10536_v44 = vld [vmem:[%s12767_s3 + $0x648] ss:$16 sps:$4 sm:$0xff]  }
 0x4c9   : > { %8501 = vmatpush1.bf16.msra.mxu1 %v10452_v10  ;;  %8461 = vmatprep.subr.bf16.mxu0 %v10457_v46  ;;  %v10541_v10 = vld [vmem:[%s12767_s3 + $0x42c] ss:$16 sps:$4 sm:$0xff]  }
 0x4ca   : > { %8502 = vmatprep.subr.bf16.mxu1 %v10460_v0  ;;  %v10544_v46 = vld [vmem:[%s12767_s3 + $0x62c] ss:$16 sps:$4 sm:$0xff]   ;;  %v10539_v0 = vld [vmem:[%s12767_s3 + $0x428] ss:$16 sps:$4 sm:$0xff]  }
 0x4cc   : > { %8462 = vmatpush2.bf16.msra.mxu0 %v10455_v52  ;;  %v10542_v52 = vld [vmem:[%s12767_s3 + $0x628] ss:$16 sps:$4 sm:$0xff]  }
 0x4cd   : > { %8503 = vmatpush2.bf16.msra.mxu1 %v10458_v55  ;;  %8463 = vmatprep.subr.bf16.mxu0 %v10463_v40  ;;  %v10547_v55 = vld [vmem:[%s12767_s3 + $0x40c] ss:$16 sps:$4 sm:$0xff]  }
 0x4ce   : > { %8504 = vmatprep.subr.bf16.mxu1 %v10466_v61  ;;  %v10550_v40 = vld [vmem:[%s12767_s3 + $0x60c] ss:$16 sps:$4 sm:$0xff]   ;;  %v10545_v61 = vld [vmem:[%s12767_s3 + $0x408] ss:$16 sps:$4 sm:$0xff]  }
 0x4d0   : > { %8464 = vmatpush2.bf16.msra.mxu0 %v10461_v54  ;;  %v10548_v54 = vld [vmem:[%s12767_s3 + $0x608] ss:$16 sps:$4 sm:$0xff]  }
 0x4d1   : > { %8505 = vmatpush2.bf16.msra.mxu1 %v10464_v19  ;;  %8465 = vmatprep.subr.bf16.mxu0 %v10469_v3  ;;  %v10553_v19 = vld [vmem:[%s12767_s3 + $0x5ec] ss:$16 sps:$4 sm:$0xff]  }
 0x4d2   : > { %8506 = vmatprep.subr.bf16.mxu1 %v10472_v5  ;;  %v10556_v3 = vld [vmem:[%s12767_s3 + $0x7ec] ss:$16 sps:$4 sm:$0xff]   ;;  %v10551_v5 = vld [vmem:[%s12767_s3 + $0x5e8] ss:$16 sps:$4 sm:$0xff]  }
 0x4d4   : > { %8466 = vmatpush2.bf16.msra.mxu0 %v10467_v1  ;;  %v10554_v1 = vld [vmem:[%s12767_s3 + $0x7e8] ss:$16 sps:$4 sm:$0xff]  }
 0x4d5   : > { %8507 = vmatpush2.bf16.msra.mxu1 %v10470_v60  ;;  %8467 = vmatprep.subr.bf16.mxu0 %v10475_v47  ;;  %v10559_v60 = vld [vmem:[%s12767_s3 + $0x5cc] ss:$16 sps:$4 sm:$0xff]  }
 0x4d6   : > { %8508 = vmatprep.subr.bf16.mxu1 %v10478_v56  ;;  %v10562_v47 = vld [vmem:[%s12767_s3 + $0x7cc] ss:$16 sps:$4 sm:$0xff]   ;;  %v10557_v56 = vld [vmem:[%s12767_s3 + $0x5c8] ss:$16 sps:$4 sm:$0xff]  }
 0x4d8   : > { %8468 = vmatpush2.bf16.msra.mxu0 %v10473_v48  ;;  %v10560_v48 = vld [vmem:[%s12767_s3 + $0x7c8] ss:$16 sps:$4 sm:$0xff]  }
 0x4d9   : > { %8509 = vmatpush2.bf16.msra.mxu1 %v10476_v63  ;;  %8469 = vmatprep.subr.bf16.mxu0 %v10481_v6  ;;  %v10565_v63 = vld [vmem:[%s12767_s3 + $0x5ac] ss:$16 sps:$4 sm:$0xff]  }
 0x4da   : > { %8510 = vmatprep.subr.bf16.mxu1 %v10484_v7  ;;  %v10568_v6 = vld [vmem:[%s12767_s3 + $0x7ac] ss:$16 sps:$4 sm:$0xff]   ;;  %v10563_v7 = vld [vmem:[%s12767_s3 + $0x5a8] ss:$16 sps:$4 sm:$0xff]  }
 0x4dc   : > { %8470 = vmatpush2.bf16.msra.mxu0 %v10479_v8  ;;  %v10566_v8 = vld [vmem:[%s12767_s3 + $0x7a8] ss:$16 sps:$4 sm:$0xff]  }
 0x4dd   : > { %8511 = vmatpush2.bf16.msra.mxu1 %v10482_v23  ;;  %8471 = vmatprep.subr.bf16.mxu0 %v10487_v9  ;;  %v10571_v23 = vld [vmem:[%s12767_s3 + $0x58c] ss:$16 sps:$4 sm:$0xff]  }
 0x4de   : > { %8512 = vmatprep.subr.bf16.mxu1 %v10490_v22  ;;  %v10574_v9 = vld [vmem:[%s12767_s3 + $0x78c] ss:$16 sps:$4 sm:$0xff]   ;;  %v10569_v22 = vld [vmem:[%s12767_s3 + $0x588] ss:$16 sps:$4 sm:$0xff]  }
 0x4e0   : > { %8472 = vmatpush2.bf16.msra.mxu0 %v10485_v53  ;;  %v10572_v53 = vld [vmem:[%s12767_s3 + $0x788] ss:$16 sps:$4 sm:$0xff]  }
 0x4e1   : > { %8513 = vmatpush2.bf16.msra.mxu1 %v10488_v15  ;;  %8473 = vmatprep.subr.bf16.mxu0 %v10493_v16  ;;  %v10577_v15 = vld [vmem:[%s12767_s3 + $0x56c] ss:$16 sps:$4 sm:$0xff]  }
 0x4e2   : > { %8514 = vmatprep.subr.bf16.mxu1 %v10496_v33  ;;  %v10580_v16 = vld [vmem:[%s12767_s3 + $0x76c] ss:$16 sps:$4 sm:$0xff]   ;;  %v10575_v33 = vld [vmem:[%s12767_s3 + $0x568] ss:$16 sps:$4 sm:$0xff]  }
 0x4e4   : > { %8474 = vmatpush2.bf16.msra.mxu0 %v10491_v18  ;;  %v10578_v18 = vld [vmem:[%s12767_s3 + $0x768] ss:$16 sps:$4 sm:$0xff]  }
 0x4e5   : > { %8515 = vmatpush2.bf16.msra.mxu1 %v10494_v12  ;;  %8475 = vmatprep.subr.bf16.mxu0 %v10499_v29  ;;  %v10583_v12 = vld [vmem:[%s12767_s3 + $0x54c] ss:$16 sps:$4 sm:$0xff]  }
 0x4e6   : > { %8516 = vmatprep.subr.bf16.mxu1 %v10502_v17  ;;  %v10586_v29 = vld [vmem:[%s12767_s3 + $0x74c] ss:$16 sps:$4 sm:$0xff]   ;;  %v10581_v17 = vld [vmem:[%s12767_s3 + $0x548] ss:$16 sps:$4 sm:$0xff]  }
 0x4e8   : > { %8476 = vmatpush2.bf16.msra.mxu0 %v10497_v4  ;;  %v10584_v4 = vld [vmem:[%s12767_s3 + $0x748] ss:$16 sps:$4 sm:$0xff]  }
 0x4e9   : > { %8517 = vmatpush2.bf16.msra.mxu1 %v10500_v21  ;;  %8527 = vmatprep.subr.bf16.mxu0 %v10505_v25  ;;  %v10589_v21 = vld [vmem:[%s12767_s3 + $0x52c] ss:$16 sps:$4 sm:$0xff]  }
 0x4ea   : > { %8568 = vmatprep.subr.bf16.mxu1 %v10508_v27  ;;  %v10592_v25 = vld [vmem:[%s12767_s3 + $0x72c] ss:$16 sps:$4 sm:$0xff]   ;;  %v10587_v27 = vld [vmem:[%s12767_s3 + $0x528] ss:$16 sps:$4 sm:$0xff]  }
 0x4eb   : > { %8478 = vmatmul.mubr.bf16.vlgmr.msra.gmra.mxu0 %v12015_v41  ;;  %v10515_v41 = vld [vmem:[%s12767_s3 + $0x4a8] ss:$16 sps:$4 sm:$0xff]  }
 0x4ec   : > { %8519 = vmatmul.mubr.bf16.vlgmr.msra.gmra.mxu1 %v12017_v51  ;;  %8528 = vmatpush1.bf16.msra.mxu0 %v10503_v20  ;;  %v10518_v51 = vld [vmem:[%s12767_s3 + $0x6a8] ss:$16 sps:$4 sm:$0xff]  }
 0x4ed   : > { %8569 = vmatpush1.bf16.msra.mxu1 %v10506_v50  ;;  %8529 = vmatprep.subr.bf16.mxu0 %v10511_v24  ;;  %v10590_v20 = vld [vmem:[%s12767_s3 + $0x728] ss:$16 sps:$4 sm:$0xff]   ;;  %v10595_v50 = vld [vmem:[%s12767_s3 + $0x50c] ss:$16 sps:$4 sm:$0xff]  }
 0x4ee   : > { %8570 = vmatprep.subr.bf16.mxu1 %v10514_v28  ;;  %8559 = vmatprep.mubr.bf16.mxu0 %v12139_v31  ;;  %v10526_v31 = vld [vmem:[%s12767_s3 + $0x68c] ss:$16 sps:$4 sm:$0xff]   ;;  %v10593_v28 = vld [vmem:[%s12767_s3 + $0x508] ss:$16 sps:$4 sm:$0xff]  }
 0x4ef   : > { %8600 = vmatprep.mubr.bf16.mxu1 %v12152_v26  ;;  %v10521_v26 = vld [vmem:[%s12767_s3 + $0x488] ss:$16 sps:$4 sm:$0xff]   ;;  %v10598_v24 = vld [vmem:[%s12767_s3 + $0x70c] ss:$16 sps:$4 sm:$0xff]  }
 0x4f0   : > { %8530 = vmatpush1.bf16.msra.mxu0 %v10509_v32  ;;  %v10596_v32 = vld [vmem:[%s12767_s3 + $0x708] ss:$16 sps:$4 sm:$0xff]  }
 0x4f1   : > { %8571 = vmatpush1.bf16.msra.mxu1 %v10512_v2  ;;  %8531 = vmatprep.subr.bf16.mxu0 %v10517_v36  ;;  %v10599_v2 = vld [vmem:[%s12769_s5 + $0x78] sm:$0xff]  }
 0x4f2   : > { %8572 = vmatprep.subr.bf16.mxu1 %v10520_v38  ;;  %v10600_v36 = vld [vmem:[%s12769_s5 + $0x38] sm:$0xff]   ;;  %v10601_v38 = vld [vmem:[%s12769_s5 + $0x70] sm:$0xff]  }
 0x4f4   : > { %8532 = vmatpush1.bf16.msra.mxu0 %v10515_v41 }
 0x4f5   : > { %8573 = vmatpush1.bf16.msra.mxu1 %v10518_v51  ;;  %8533 = vmatprep.subr.bf16.mxu0 %v10523_v34  ;;  %v10602_v34 = vld [vmem:[%s12769_s5 + $0x30] sm:$0xff]  }
 0x4f6   : > { %8574 = vmatprep.subr.bf16.mxu1 %v10526_v31 }
 0x4f8   : > { %8534 = vmatpush1.bf16.msra.mxu0 %v10521_v26 }
 0x4f9   : > { %8575 = vmatpush1.bf16.msra.mxu1 %v10524_v30  ;;  %8535 = vmatprep.subr.bf16.mxu0 %v10529_v42  ;;  %v10603_v30 = vld [vmem:[%s12769_s5 + $0x68] sm:$0xff]  }
 0x4fa   : > { %8576 = vmatprep.subr.bf16.mxu1 %v10532_v14 }
 0x4fc   : > { %8536 = vmatpush1.bf16.msra.mxu0 %v10527_v37 }
 0x4fd   : > { %8577 = vmatpush1.bf16.msra.mxu1 %v10530_v39  ;;  %8537 = vmatprep.subr.bf16.mxu0 %v10535_v59  ;;  %v10615_v59 = vld [vmem:[%s12769_s5 + $0xf8] sm:$0xff]  }
 0x4fe   : > { %8578 = vmatprep.subr.bf16.mxu1 %v10538_v43  ;;  %v10616_v43 = vld [vmem:[%s12769_s5 + $0xb8] sm:$0xff]  }
 0x500   : > { %8538 = vmatpush1.bf16.msra.mxu0 %v10533_v49  ;;  %v10617_v49 = vld [vmem:[%s12769_s5 + $0xf0] sm:$0xff]  }
 0x501   : > { %8579 = vmatpush1.bf16.msra.mxu1 %v10536_v44  ;;  %8539 = vmatprep.subr.bf16.mxu0 %v10541_v10  ;;  %v10606_v44 = vld [vmem:[%s12769_s5 + $0x20] sm:$0xff]   ;;  %v10618_v10 = vld [vmem:[%s12769_s5 + $0xb0] sm:$0xff]  }
 0x502   : > { %8580 = vmatprep.subr.bf16.mxu1 %v10544_v46  ;;  %v10607_v46 = vld [vmem:[%s12769_s5 + $0x58] sm:$0xff]  }
 0x504   : > { %8540 = vmatpush1.bf16.msra.mxu0 %v10539_v0  ;;  %v10619_v0 = vld [vmem:[%s12769_s5 + $0xe8] sm:$0xff]  }
 0x505   : > { %8581 = vmatpush1.bf16.msra.mxu1 %v10542_v52  ;;  %8541 = vmatprep.subr.bf16.mxu0 %v10547_v55  ;;  %v10608_v52 = vld [vmem:[%s12769_s5 + $0x18] sm:$0xff]   ;;  %v10620_v55 = vld [vmem:[%s12769_s5 + $0xa8] sm:$0xff]  }
 0x506   : > { %8582 = vmatprep.subr.bf16.mxu1 %v10550_v40  ;;  %v10609_v40 = vld [vmem:[%s12769_s5 + $0x50] sm:$0xff]  }
 0x508   : > { %8542 = vmatpush1.bf16.msra.mxu0 %v10545_v61  ;;  %v10621_v61 = vld [vmem:[%s12769_s5 + $0xe0] sm:$0xff]  }
 0x509   : > { %8583 = vmatpush1.bf16.msra.mxu1 %v10548_v54  ;;  %8543 = vmatprep.subr.bf16.mxu0 %v10553_v19  ;;  %v10610_v54 = vld [vmem:[%s12769_s5 + $0x10] sm:$0xff]   ;;  %v10622_v19 = vld [vmem:[%s12769_s5 + $0xa0] sm:$0xff]  }
 0x50a   : > { %8584 = vmatprep.subr.bf16.mxu1 %v10556_v3  ;;  %v10611_v3 = vld [vmem:[%s12769_s5 + $0x48] sm:$0xff]  }
 0x50c   : > { %8544 = vmatpush2.bf16.msra.mxu0 %v10551_v5  ;;  %v10623_v5 = vld [vmem:[%s12769_s5 + $0xd8] sm:$0xff]  }
 0x50d   : > { %8585 = vmatpush2.bf16.msra.mxu1 %v10554_v1  ;;  %8545 = vmatprep.subr.bf16.mxu0 %v10559_v60  ;;  %v10612_v1 = vld [vmem:[%s12769_s5 + $0x8] sm:$0xff]   ;;  %v10624_v60 = vld [vmem:[%s12769_s5 + $0x98] sm:$0xff]  }
 0x50e   : > { %8586 = vmatprep.subr.bf16.mxu1 %v10562_v47  ;;  %v10613_v47 = vld [vmem:[%s12769_s5 + $0x40] sm:$0xff]  }
 0x510   : > { %8546 = vmatpush2.bf16.msra.mxu0 %v10557_v56  ;;  %v10614_v56 = vld [vmem:[%s12769_s5] sm:$0xff]  }
 0x511   : > { %8587 = vmatpush2.bf16.msra.mxu1 %v10560_v48  ;;  %8547 = vmatprep.subr.bf16.mxu0 %v10565_v63  ;;  %v6979_v48 = vld [vmem:[%s12768_s4] sm:$0xf] }
 0x512   : > { %8588 = vmatprep.subr.bf16.mxu1 %v10568_v6  ;;  %v6984_v63 = vrot.slane %v6979_v48, %v6601_v58  ;;  %v6988_v6 = vrot.slane %v6979_v48, %v6605_v13 }
 0x514   : > { %8548 = vmatpush2.bf16.msra.mxu0 %v10563_v7 }
 0x515   : > { %8589 = vmatpush2.bf16.msra.mxu1 %v10566_v8  ;;  %8549 = vmatprep.subr.bf16.mxu0 %v10571_v23  ;;  %v10625_v23 = vld [vmem:[%s12769_s5 + $0xd0] sm:$0xff]  }
 0x516   : > { %8590 = vmatprep.subr.bf16.mxu1 %v10574_v9 }
 0x518   : > { %8550 = vmatpush2.bf16.msra.mxu0 %v10569_v22  ;;  %v10626_v22 = vld [vmem:[%s12769_s5 + $0x90] sm:$0xff]  }
 0x519   : > { %8591 = vmatpush2.bf16.msra.mxu1 %v10572_v53  ;;  %8551 = vmatprep.subr.bf16.mxu0 %v10577_v15 }
 0x51a   : > { %8592 = vmatprep.subr.bf16.mxu1 %v10580_v16 }
 0x51c   : > { %8552 = vmatpush2.bf16.msra.mxu0 %v10575_v33 }
 0x51d   : > { %8593 = vmatpush2.bf16.msra.mxu1 %v10578_v18  ;;  %8553 = vmatprep.subr.bf16.mxu0 %v10583_v12  ;;  %v10627_v18 = vld [vmem:[%s12769_s5 + $0xc8] sm:$0xff]  }
 0x51e   : > { %8594 = vmatprep.subr.bf16.mxu1 %v10586_v29 }
 0x520   : > { %8554 = vmatpush2.bf16.msra.mxu0 %v10581_v17  ;;  %v10628_v17 = vld [vmem:[%s12769_s5 + $0x88] sm:$0xff]  }
 0x521   : > { %8595 = vmatpush2.bf16.msra.mxu1 %v10584_v4  ;;  %8555 = vmatprep.subr.bf16.mxu0 %v10589_v21 }
 0x522   : > { %8596 = vmatprep.subr.bf16.mxu1 %v10592_v25 }
 0x524   : > { %8556 = vmatpush2.bf16.msra.mxu0 %v10587_v27 }
 0x525   : > { %8597 = vmatpush2.bf16.msra.mxu1 %v10590_v20  ;;  %8557 = vmatprep.subr.bf16.mxu0 %v10595_v50 }
 0x526   : > { %8598 = vmatprep.subr.bf16.mxu1 %v10598_v24  ;;  %v10629_v24 = vld [vmem:[%s12769_s5 + $0xc0] sm:$0xff]  }
 0x528   : > { %8558 = vmatpush2.bf16.msra.mxu0 %v10593_v28 }
 0x529   : > { %8599 = vmatpush2.bf16.msra.mxu1 %v10596_v32  ;;  %10150 = vmatprep.subr.bf16.mxu0 %v10599_v2  ;;  %v10630_v32 = vld [vmem:[%s12769_s5 + $0x80] sm:$0xff]  }
 0x52a   : > { %10172 = vmatprep.subr.bf16.mxu1 %v10615_v59 }
 0x52b   : > { %v8315_v41 = vpop.f32.mrf.mxu0  ;;  %8560 = vmatmul.mubr.bf16.vlgmr.msra.gmra.mxu0 %v12242_v57  ;;  %v10604_v57 = vld [vmem:[%s12769_s5 + $0x28] sm:$0xff]  }
 0x52c   : > { %v12643_v51 = vpop.f32.mrf.mxu1  ;;  %8601 = vmatmul.mubr.bf16.vlgmr.msra.gmra.mxu1 %v12246_v11  ;;  %10151 = vmatpush3.bf16.msra.mxu0 %v10600_v36  ;;  %v10605_v11 = vld [vmem:[%s12769_s5 + $0x60] sm:$0xff]   ;;  %v8316_v7 = vadd.f32 %v8315_v41, %v6984_v63 }
 0x52d   : > { %v8317_v31 = vpop.f32.mrf.mxu0  ;;  %10152 = vmatprep.subr.bf16.mxu0 %v10601_v38  ;;  %10173 = vmatpush3.bf16.msra.mxu1 %v10616_v43 }
 0x52e   : > { %v8358_v26 = vpop.f32.mrf.mxu1  ;;  %10174 = vmatprep.subr.bf16.mxu1 %v10617_v49  ;;  %v8318_v8 = vadd.f32 %v8317_v31, %v6988_v6  ;;  %v8357_v9 = vadd.f32 %v12643_v51, %v8316_v7 }
 0x52f   : > { %v8319_v42 = vpop.f32.mrf.mxu0 }
 0x530   : > { %v8360_v14 = vpop.f32.mrf.mxu1  ;;  %10153 = vmatpush3.bf16.msra.mxu0 %v10602_v34  ;;  %v8359_v16 = vadd.f32 %v8358_v26, %v8318_v8 }
 0x531   : > { %v8320_v37 = vpop.f32.mrf.mxu0  ;;  %10154 = vmatprep.subr.bf16.mxu0 %v10603_v30  ;;  %10175 = vmatpush3.bf16.msra.mxu1 %v10618_v10  ;;  %v6992_v14 = vrot.slane %v6979_v48, %v6609_v62 }
 0x532   : > { %v8361_v39 = vpop.f32.mrf.mxu1  ;;  %10176 = vmatprep.subr.bf16.mxu1 %v10619_v0 }
 0x534   : > { %10155 = vmatpush3.bf16.msra.mxu0 %v10604_v57  ;;  %v6996_v57 = vrot.slane %v6979_v48, %v6613_v35  ;;  %v10112_v48 = vld [vmem:[%s12770_s6] ss:$0 sm:$0xff] }
 0x535   : > { %10156 = vmatprep.subr.bf16.mxu0 %v10605_v11  ;;  %10177 = vmatpush3.bf16.msra.mxu1 %v10620_v55 }
 0x536   : > { %10178 = vmatprep.subr.bf16.mxu1 %v10621_v61 }
 0x538   : > { %10157 = vmatpush3.bf16.msra.mxu0 %v10606_v44 }
 0x539   : > { %10158 = vmatprep.subr.bf16.mxu0 %v10607_v46  ;;  %10179 = vmatpush3.bf16.msra.mxu1 %v10622_v19 }
 0x53a   : > { %10180 = vmatprep.subr.bf16.mxu1 %v10623_v5 }
 0x53c   : > { %10159 = vmatpush3.bf16.msra.mxu0 %v10608_v52 }
 0x53d   : > { %10160 = vmatprep.subr.bf16.mxu0 %v10609_v40  ;;  %10181 = vmatpush3.bf16.msra.mxu1 %v10624_v60 }
 0x53e   : > { %10182 = vmatprep.subr.bf16.mxu1 %v10625_v23 }
 0x540   : > { %10161 = vmatpush3.bf16.msra.mxu0 %v10610_v54 }
 0x541   : > { %10162 = vmatprep.subr.bf16.mxu0 %v10611_v3  ;;  %10183 = vmatpush3.bf16.msra.mxu1 %v10626_v22 }
 0x542   : > { %10184 = vmatprep.subr.bf16.mxu1 %v10627_v18 }
 0x544   : > { %10163 = vmatpush3.bf16.msra.mxu0 %v10612_v1 }
 0x545   : > { %10164 = vmatprep.subr.bf16.mxu0 %v10613_v47  ;;  %10185 = vmatpush3.bf16.msra.mxu1 %v10628_v17 }
 0x546   : > { %10186 = vmatprep.subr.bf16.mxu1 %v10629_v24 }
 0x548   : > { %10165 = vmatpush3.bf16.msra.mxu0 %v10614_v56 }
 0x549   : > { %10187 = vmatpush3.bf16.msra.mxu1 %v10630_v32 }
 0x56b   : > { %v8397_v53 = vpop.f32.mrf.mxu0 }
 0x56c   : > { %v8438_v15 = vpop.f32.mrf.mxu1  ;;  %v8398_v58 = vadd.f32 %v8397_v53, %v8357_v9 }
 0x56d   : > { %v8399_v33 = vpop.f32.mrf.mxu0 }
 0x56e   : > { %v8440_v13 = vpop.f32.mrf.mxu1  ;;  %v8439_v12 = vadd.f32 %v8438_v15, %v8398_v58  ;;  %v8400_v29 = vadd.f32 %v8399_v33, %v8359_v16 }
 0x56f   : > { %v8401_v4 = vpop.f32.mrf.mxu0 }
 0x570   : > { %v8442_v21 = vpop.f32.mrf.mxu1  ;;  %v8441_v25 = vadd.f32 %v8440_v13, %v8400_v29  ;;  %v8609_v27 = vmax.f32 %v8439_v12, 0.0 }
 0x571   : > { %v8402_v20 = vpop.f32.mrf.mxu0 }
 0x572   : > { %v8443_v50 = vpop.f32.mrf.mxu1  ;;  %v8610_v28 = vmax.f32 %v8441_v25, 0.0  ;;  %v8613_v36 = vpack.c.bf16 %v8609_v27, %v8609_v27 }
 0x574   : > { %v8614_v2 = vpack.c.bf16 %v8610_v28, %v8610_v28 }
 0x576   : > { %8912 = vmatprep.mubr.bf16.mxu0 %v8614_v2 }
 0x577   : > { %8913 = vmatmul.mubr.bf16.vlgmr.msra.gmra.mxu0 %v8613_v36 }
 0x5ab   : > { %v8479_v38 = vpop.f32.mrf.mxu0 }
 0x5ac   : > { %v8520_v41 = vpop.f32.mrf.mxu1  ;;  %v8480_v11 = vadd.f32 %v8479_v38, %v6992_v14 }
 0x5ad   : > { %v8481_v51 = vpop.f32.mrf.mxu0 }
 0x5ae   : > { %v8522_v34 = vpop.f32.mrf.mxu1  ;;  %v8482_v37 = vadd.f32 %v8481_v51, %v6996_v57  ;;  %v8521_v39 = vadd.f32 %v8520_v41, %v8480_v11 }
 0x5af   : > { %v8483_v31 = vpop.f32.mrf.mxu0 }
 0x5b0   : > { %v8524_v26 = vpop.f32.mrf.mxu1  ;;  %v8523_v49 = vadd.f32 %v8522_v34, %v8482_v37 }
 0x5b1   : > { %v8484_v30 = vpop.f32.mrf.mxu0 }
 0x5b2   : > { %v8525_v42 = vpop.f32.mrf.mxu1 }
 0x5eb   : > { %v8561_v59 = vpop.f32.mrf.mxu0 }
 0x5ec   : > { %v8602_v43 = vpop.f32.mrf.mxu1  ;;  %v8562_v44 = vadd.f32 %v8561_v59, %v8521_v39 }
 0x5ed   : > { %v8563_v10 = vpop.f32.mrf.mxu0 }
 0x5ee   : > { %v8604_v46 = vpop.f32.mrf.mxu1  ;;  %v8603_v0 = vadd.f32 %v8602_v43, %v8562_v44  ;;  %v8564_v52 = vadd.f32 %v8563_v10, %v8523_v49 }
 0x5ef   : > { %v8565_v55 = vpop.f32.mrf.mxu0 }
 0x5f0   : > { %v8606_v40 = vpop.f32.mrf.mxu1  ;;  %v8605_v61 = vadd.f32 %v8604_v46, %v8564_v52  ;;  %v8611_v54 = vmax.f32 %v8603_v0, 0.0 }
 0x5f1   : > { %v8566_v19 = vpop.f32.mrf.mxu0 }
 0x5f2   : > { %v8607_v62 = vpop.f32.mrf.mxu1  ;;  %v8612_v3 = vmax.f32 %v8605_v61, 0.0  ;;  %v8615_v35 = vpack.c.bf16 %v8611_v54, %v8611_v54 }
 0x5f4   : > { %v8616_v45 = vpack.c.bf16 %v8612_v3, %v8612_v3 }
 0x5f6   : > { %8952 = vmatprep.mubr.bf16.mxu1 %v8616_v45 }
 0x5f7   : > { %8953 = vmatmul.mubr.bf16.vlgmr.msra.gmra.mxu1 %v8615_v35 }
 0x637   : > { %v10166_v5 = vpop.f32.mrf.mxu0 }
 0x639   : > { %v10167_v1 = vpop.f32.mrf.mxu0 }
 0x63a   : > { %v10168_v60 = vadd.f32 %v10167_v1, %v10166_v5 }
 0x63b   : > { %v10169_v47 = vpop.f32.mrf.mxu0 }
 0x63c   : > { %v8915_v7 = vadd.f32 %v10168_v60, %v10112_v48 }
 0x63d   : > { %v10170_v56 = vpop.f32.mrf.mxu0 }
 0x6b7   : > { %v10188_v63 = vpop.f32.mrf.mxu1 }
 0x6b9   : > { %v10189_v6 = vpop.f32.mrf.mxu1 }
 0x6ba   : > { %v10190_v8 = vadd.f32 %v10189_v6, %v10188_v63 }
 0x6bb   : > { %v10191_v23 = vpop.f32.mrf.mxu1 }
 0x6bc   : > { %v8955_v9 = vadd.f32 %v10190_v8, %v8915_v7 }
 0x6bd   : > { %v10192_v22 = vpop.f32.mrf.mxu1 }
 0x6be   : > { %8960 = vst [vmem:[#allocation3] sm:$0x3] %v8955_v9 }
 0x6bf PF: > { %p10198_p7 = scmp.eq.s32.totalorder %s10718_s25, 1  ;;  %s10671_s29 = smov [#allocation3]  }
 0x6c0   : > { %s8968_s30 = sshll.u32 %s10671_s29, 4  ;;  %s8969_s30 = int_to_ptr.vmem [resolvable:$true] %s8968_s30 }
 0x6c1   : > { %s10631_s8 = scalar_lea.vmem %s8969_s30, 32  ;;  %p10638_p11 = scmp.lt.s32.totalorder %s8969_s30, %s8969_s30 }
 0x6c2   : > { %p10632_p8 = scmp.ne.s32.totalorder %s8969_s30, %s10631_s8  ;;  %p10639_p12 = scmp.lt.s32.totalorder %s10631_s8, %s10631_s8 }
 0x6c4   : > { %p10633_p9 = pnand %p10632_p8, %p10198_p7  ;;  %p10640_p13 = por %p10639_p12, %p10638_p11 }
 0x6c6   : > { %p10634_p10 = pneg %p10633_p9 }
 0x6c8   : > { %p10641_p0 = pnand %p10640_p13, %p10634_p10 }
 0x6ca   : > { %10644 = shalt.err (!%p10641_p0)
}
 0x6cb   : > { %10195 = dma.vmem_to_hbm [thread:$0]  (%p10198_p7), %s8969_s30, 32, %s12771_s7, [#allocation4]  }
 0x6cc   : > { %10660 = dma.done.wait (%p10198_p7), [#allocation4], 32  }
 0x6cd   : > { %10662 = vsyncadd (%p10198_p7), [#allocation4], 4294967264 }
 0x6ce PF: > { %s18_s24 = sadd.s32 1, %s10665_s24  }
 0x6cf   : > { %p15_p1 = scmp.ge.s32.totalorder %s18_s24, 4  }
 0x6d1   :  { %17 = sbr.rel (!%p15_p1) target bundleno = 1 (0x1), region = 86 }
 0x6d6   :  { %8981 = vsyncpa [#allocation4], 1 }
 0x6d7   :  { %8983 = vsyncpa [#allocation4 + $0x1], 1 }

</bundles_post_ra>
